<compile_context>
chip_gen: v5e
topology: v5e:2x2
jax: 0.10.0
libtpu: 0.0.40
codegen_flags: <defaults>
</compile_context>

<pallas_src>
import enum
import math
from dataclasses import dataclass

import jax
import jax.numpy as jnp
from jax.experimental import pallas as pl
from jax.experimental.pallas import tpu as pltpu


class GridFeaturesMemoryFormat(enum.Enum):
    b_x_y_z_c = enum.auto()
    b_c_x_y_z = enum.auto()
    b_zc_x_y = enum.auto()
    b_xc_y_z = enum.auto()
    b_yc_x_z = enum.auto()


# ---------------------------------------------------------------------------
# Budgets / helpers
# ---------------------------------------------------------------------------
_LANE = 128
_MIN_STEP_RAW = 4 * 1024 * 1024   # target raw HBM bytes moved per grid step
_MAX_TY = 16                      # cap the static y-unroll in the yc kernel

_VMEM_PARAMS_CACHE = None


def _vmem_params():
    """(scoped vmem limit, per-step single-buffered block budget) per chip gen.

    Pallas double-buffers each BlockSpec, so the steady-state VMEM use is
    ~2x the per-step budget; we keep 2*budget <= limit/2 for headroom.
    """
    global _VMEM_PARAMS_CACHE
    if _VMEM_PARAMS_CACHE is None:
        cap = None
        try:
            cap = getattr(pltpu.get_tpu_info(), "vmem_capacity_bytes", None)
        except Exception:
            cap = None
        if cap is not None and cap >= 128 * 1024 * 1024:      # v5e / v6e
            _VMEM_PARAMS_CACHE = (64 * 1024 * 1024, 16 * 1024 * 1024)
        else:                                                  # v7x / unknown
            _VMEM_PARAMS_CACHE = (32 * 1024 * 1024, 8 * 1024 * 1024)
    return _VMEM_PARAMS_CACHE


def _round_up(x, m):
    return ((x + m - 1) // m) * m


def _dtype_sublane(itemsize):
    # Minimum sublane tile: 8 (f32), 16 (bf16), 32 (int8 / fp8).
    return max(8, 32 // itemsize)


def _padded2d(rows, cols, itemsize):
    """VMEM footprint of a (rows, cols) tile in the tiled (sublane, 128) layout."""
    sub = _dtype_sublane(itemsize)
    return _round_up(rows, sub) * _round_up(cols, _LANE) * itemsize


def _tile_128_or_full(dim, cap):
    """A tile that is the full extent or a multiple of 128, at most `cap`."""
    if dim <= max(cap, _LANE):
        return dim
    return max(_LANE, (min(cap, dim) // _LANE) * _LANE)


def _snap_to_divisor(tile, dim, unit):
    """Largest multiple of `unit` dividing `dim`, <= tile (if it is >= tile/2)."""
    if tile >= dim:
        return dim
    t = (tile // unit) * unit
    while t >= unit and dim % t:
        t -= unit
    if t >= unit and dim % t == 0 and 2 * t >= tile:
        return t
    return tile


def _snap_batch(tg, g):
    tg = max(1, min(tg, g))
    if tg <= 1 or g % tg == 0:
        return tg
    for cand in range(tg, 0, -1):
        if g % cand == 0:
            return cand if 2 * cand >= tg else tg
    return tg


# ---------------------------------------------------------------------------
# General path: tiled batched transpose of the last two dims
#   (G, M, N) -> (G, N, M)
# ---------------------------------------------------------------------------
def _ensure_multi_step_3d(G, M, N, tg, tm, tn):
    # v7x: 2 TensorCores only get work from "parallel" axes with >= 2 steps.
    steps = pl.cdiv(G, tg) * pl.cdiv(M, tm) * pl.cdiv(N, tn)
    if steps >= 2:
        return tg, tm, tn
    if tg > 1:
        return (tg + 1) // 2, tm, tn
    if M >= 2 * _LANE:
        return tg, _round_up(M // 2, _LANE), tn
    if N >= 2 * _LANE:
        return tg, tm, _round_up(N // 2, _LANE)
    return tg, tm, tn            # genuinely tiny problem; one step is fine


def _choose_transpose_tiles(G, M, N, itemsize):
    _, budget = _vmem_params()

    def step_padded(tg, tm, tn):
        return tg * (_padded2d(tm, tn, itemsize) + _padded2d(tn, tm, itemsize))

    tm = _tile_128_or_full(M, 2048)
    tn = _tile_128_or_full(N, 2048)
    # Shrink the larger tile (keeping multiples of 128 / full) until in budget.
    while step_padded(1, tm, tn) > budget and (tm > _LANE or tn > _LANE):
        if tm >= tn and tm > _LANE:
            tm = _tile_128_or_full(M, max(_LANE, tm // 2))
        else:
            tn = _tile_128_or_full(N, max(_LANE, tn // 2))
    # Prefer even divisors -> identical, unmasked pipeline steps (v5e stores).
    if tm < M:
        tm = _snap_to_divisor(tm, M, _LANE)
    if tn < N:
        tn = _snap_to_divisor(tn, N, _LANE)

    # Batch whole slabs per step based on RAW HBM bytes (not padded VMEM),
    # capped by the padded VMEM footprint.
    tg = 1
    if tm == M and tn == N:
        per_raw = max(2 * M * N * itemsize, 1)
        per_pad = max(step_padded(1, tm, tn), 1)
        tg = max(1, min(G, _MIN_STEP_RAW // per_raw, max(1, budget // per_pad)))
        tg = _snap_batch(tg, G)

    return _ensure_multi_step_3d(G, M, N, tg, tm, tn)


def _transpose_last2_kernel(x_ref, o_ref):
    # x_ref block: (TG, TM, TN); o_ref block: (TG, TN, TM).
    o_ref[...] = jnp.swapaxes(x_ref[...], 1, 2)


def _general_transpose_last2(x3):
    G, M, N = x3.shape
    itemsize = jnp.dtype(x3.dtype).itemsize
    tg, tm, tn = _choose_transpose_tiles(G, M, N, itemsize)
    vmem_limit, _ = _vmem_params()
    return pl.pallas_call(
        _transpose_last2_kernel,
        out_shape=jax.ShapeDtypeStruct((G, N, M), x3.dtype),
        grid=(pl.cdiv(G, tg), pl.cdiv(M, tm), pl.cdiv(N, tn)),
        in_specs=[pl.BlockSpec((tg, tm, tn), lambda g, i, j: (g, i, j))],
        out_specs=pl.BlockSpec((tg, tn, tm), lambda g, i, j: (g, j, i)),
        compiler_params=pltpu.CompilerParams(
            dimension_semantics=("parallel", "parallel", "parallel"),
            vmem_limit_bytes=vmem_limit),
    )(x3)


# ---------------------------------------------------------------------------
# Lane-packed path for channel-minor transposes:
#   (G, M, N) -> (G, N, M)  with N < 128, 128 % N == 0, M % (128/N) == 0.
#
# The HBM slab is viewed (free contiguous reshape) as (G, R, 128) with
# P = 128/N and R = M/P, so both the DMA and the input VMEM block are fully
# lane-dense (no 128/N padding).  The channel de-interleave
#   packed[g, r, p*N + c]  ->  out[g, c, r*P + p]
# is done in-register; the output block (TG, N, TR*P) is lane-dense as well
# (only an 8/N sublane pad).
# ---------------------------------------------------------------------------
def _choose_packed_tiles(G, R, N, itemsize):
    _, budget = _vmem_params()
    P = _LANE // N
    sub = _dtype_sublane(itemsize)
    unit = max(sub, N)          # N | 128 and sub are powers of two -> lcm
    # padded VMEM bytes per packed input row (input block + output block)
    per_row = itemsize * (_LANE + _round_up(N, sub) * P)
    tr = max(unit, (budget // per_row) // unit * unit)
    if tr >= R:
        tr = R
    else:
        tr = _snap_to_divisor(tr, R, unit)

    tg = 1
    if tr == R:
        per_raw = max(2 * R * _LANE * itemsize, 1)
        per_pad = max(per_row * R, 1)
        tg = max(1, min(G, _MIN_STEP_RAW // per_raw, max(1, budget // per_pad)))
        tg = _snap_batch(tg, G)

    # keep >= 2 grid steps so both v7x TensorCores get work
    if pl.cdiv(G, tg) * pl.cdiv(R, tr) < 2:
        if tg > 1:
            tg = (tg + 1) // 2
        elif R >= 2 * unit and tr == R:
            tr = max(unit, (R // 2) // unit * unit)
    return tg, tr


def _packed_transpose_kernel(x_ref, o_ref):
    # x_ref block: (TG, TR, 128) lane-dense packed rows.
    # o_ref block: (TG, N, TR*P) with P = 128 // N.
    tg, tr, lane = x_ref.shape
    n = o_ref.shape[1]
    p = lane // n
    x = x_ref[...]
    x = x.reshape(tg, tr, p, n)            # split lanes: (p major, n minor)
    x = jnp.transpose(x, (0, 3, 1, 2))     # (TG, N, TR, P)  -- de-interleave
    o_ref[...] = x.reshape(tg, n, tr * p)  # merge (TR, P) into the lane dim


def _lane_packed_transpose(x3):
    G, M, N = x3.shape
    itemsize = jnp.dtype(x3.dtype).itemsize
    P = _LANE // N
    R = M // P
    tg, tr = _choose_packed_tiles(G, R, N, itemsize)
    vmem_limit, _ = _vmem_params()
    xp = x3.reshape(G, R, _LANE)           # contiguous -> free HBM-view reshape
    return pl.pallas_call(
        _packed_transpose_kernel,
        out_shape=jax.ShapeDtypeStruct((G, N, M), x3.dtype),
        grid=(pl.cdiv(G, tg), pl.cdiv(R, tr)),
        in_specs=[pl.BlockSpec((tg, tr, _LANE), lambda g, r: (g, r, 0))],
        out_specs=pl.BlockSpec((tg, N, tr * P), lambda g, r: (g, 0, r)),
        compiler_params=pltpu.CompilerParams(
            dimension_semantics=("parallel", "parallel"),
            vmem_limit_bytes=vmem_limit),
    )(xp)


def _batched_transpose_last2(x3):
    """(G, M, N) -> (G, N, M), dispatching to the best kernel for the shape."""
    G, M, N = x3.shape
    if N < _LANE and _LANE % N == 0 and M % (_LANE // N) == 0:
        try:
            return _lane_packed_transpose(x3)
        except Exception:
            # TODO(synk): older Mosaic versions may reject the in-kernel lane
            # split/merge relayouts; fall back to the general (padded) path.
            pass
    return _general_transpose_last2(x3)


# ---------------------------------------------------------------------------
# b_yc_x_z: Y is pulled in front of X.  The grid re-orders Y via the index_map
# and tiles both X and Y; the kernel transposes each (TX*Z, C) slab to
# (C, TX*Z).  Tiling Y (ty) lengthens the contiguous HBM runs of the input DMA
# from Z*C to ty*Z*C elements.
# ---------------------------------------------------------------------------
def _choose_yc_tiles(B, X, Y, Z, C, itemsize):
    _, budget = _vmem_params()
    sub = _dtype_sublane(itemsize)
    # Output lane dim tx*Z must be a multiple of 128, or tx == X (full extent).
    xstep = _LANE // math.gcd(Z, _LANE)

    def blk_bytes(tx, ty):
        in_b = tx * ty * _round_up(Z, sub) * _round_up(C, _LANE) * itemsize
        out_b = ty * _round_up(C, sub) * _round_up(tx * Z, _LANE) * itemsize
        return in_b + out_b

    if X <= xstep or blk_bytes(X, 1) <= budget:
        tx = X
    else:
        tx = xstep
        while tx + xstep <= X and blk_bytes(tx + xstep, 1) <= budget:
            tx += xstep
        tx = _snap_to_divisor(tx, X, xstep)

    # ty: lengthen contiguous HBM runs / batch work per step, bounded by VMEM
    # and a small in-kernel unroll cap.
    ty = 1
    while ty * 2 <= min(Y, _MAX_TY) and blk_bytes(tx, ty * 2) <= budget:
        ty *= 2
    if ty < Y:
        ty = _snap_to_divisor(ty, Y, 1)

    # keep >= 2 grid steps so both v7x TensorCores get work
    if B * pl.cdiv(Y, ty) * pl.cdiv(X, tx) < 2:
        if ty > 1:
            ty = max(1, ty // 2)
        elif tx > xstep:
            tx = max(xstep, (tx // 2) // xstep * xstep)
    return tx, ty


def _yc_transpose_kernel(x_ref, o_ref):
    # x_ref block: (TX, TY, Z, C)  (batch dim squeezed away)
    # o_ref block: (TY, C, TX*Z)
    tx, ty, z, c = x_ref.shape
    # TODO(synk): if Z % 8 != 0 the (TX, Z, C) -> (TX*Z, C) merge is still
    # correct but introduces a hidden VMEM relayout copy.
    for yy in range(ty):                      # ty <= _MAX_TY: bounded unroll
        slab = x_ref[:, yy, :, :].reshape(tx * z, c)
        o_ref[yy] = slab.T


def _to_b_yc_x_z(x5):
    B, X, Y, Z, C = x5.shape
    itemsize = jnp.dtype(x5.dtype).itemsize
    tx, ty = _choose_yc_tiles(B, X, Y, Z, C, itemsize)
    vmem_limit, _ = _vmem_params()
    # TODO(synk): the input block is still lane-sparse when C << 128; a
    # lane-packed variant (as in _lane_packed_transpose) would cut the input
    # DMA/VMEM padding further.
    t = pl.pallas_call(
        _yc_transpose_kernel,
        out_shape=jax.ShapeDtypeStruct((B, Y, C, X * Z), x5.dtype),
        grid=(B, pl.cdiv(Y, ty), pl.cdiv(X, tx)),
        in_specs=[pl.BlockSpec((None, tx, ty, Z, C),
                               lambda b, y, x: (b, x, y, 0, 0))],
        out_specs=pl.BlockSpec((None, ty, C, tx * Z),
                               lambda b, y, x: (b, y, 0, x)),
        compiler_params=pltpu.CompilerParams(
            dimension_semantics=("parallel", "parallel", "parallel"),
            vmem_limit_bytes=vmem_limit),
    )(x5)
    # Contiguous glue reshape: (B, Y, C, X*Z) -> (B, Y*C, X, Z)
    return t.reshape(B, Y * C, X, Z)


# ---------------------------------------------------------------------------
# Conversions from the standard b_x_y_z_c format (glue reshapes are contiguous;
# the permutation happens inside the Pallas kernels above).
# ---------------------------------------------------------------------------
def _to_b_zc_x_y(x5):
    B, X, Y, Z, C = x5.shape
    r = x5.reshape(B, X * Y, Z * C)                  # contiguous
    t = _batched_transpose_last2(r)                  # (B, Z*C, X*Y)
    return t.reshape(B, Z * C, X, Y)


def _to_b_xc_y_z(x5):
    B, X, Y, Z, C = x5.shape
    # Collapse B and X into one slab axis: more grid steps for the two v7x
    # TensorCores and better slab batching.
    r = x5.reshape(B * X, Y * Z, C)                  # contiguous
    t = _batched_transpose_last2(r)                  # (B*X, C, Y*Z)
    return t.reshape(B, X * C, Y, Z)


def _to_b_c_x_y_z(x5):
    B, X, Y, Z, C = x5.shape
    r = x5.reshape(B, X * Y * Z, C)                  # contiguous
    t = _batched_transpose_last2(r)                  # (B, C, X*Y*Z)
    return t.reshape(B, C, X, Y, Z)


_CONVERTERS = {
    GridFeaturesMemoryFormat.b_zc_x_y: _to_b_zc_x_y,
    GridFeaturesMemoryFormat.b_xc_y_z: _to_b_xc_y_z,
    GridFeaturesMemoryFormat.b_yc_x_z: _to_b_yc_x_z,
    GridFeaturesMemoryFormat.b_c_x_y_z: _to_b_c_x_y_z,
}


@dataclass
class GridFeatures:
    batch_features: jax.Array
    memory_format: GridFeaturesMemoryFormat
    grid_shape: tuple           # (X, Y, Z)
    num_channels: int

    def to(self, memory_format: GridFeaturesMemoryFormat) -> "GridFeatures":
        if memory_format == self.memory_format:
            return self
        if self.memory_format != GridFeaturesMemoryFormat.b_x_y_z_c:
            # TODO(synk): reverse conversions (factorized -> b_x_y_z_c) not implemented.
            raise NotImplementedError(
                "Only conversions from b_x_y_z_c are implemented.")
        new_feats = _CONVERTERS[memory_format](self.batch_features)
        return GridFeatures(new_feats, memory_format, self.grid_shape,
                            self.num_channels)


class GridFeatureMemoryFormatConverter:
    """JAX/Pallas port of figconvnet.GridFeatureMemoryFormatConverter."""

    def __init__(self, memory_format: GridFeaturesMemoryFormat) -> None:
        self.memory_format = memory_format

    def __repr__(self):
        return f"GridFeatureMemoryFormatConverter(memory_format={self.memory_format})"

    def __call__(self, grid_features: GridFeatures) -> GridFeatures:
        return grid_features.to(memory_format=self.memory_format)


if __name__ == "__main__":
    # Config 1 exercises the lane-packed (small-C) path; config 2 exercises the
    # general tiled-transpose path (C that does not divide 128 / Z*C >= 128).
    configs = [
        (2, 16, 16, 8, 4),
        (1, 8, 8, 8, 48),
    ]
    key = jax.random.PRNGKey(0)
    for (B, X, Y, Z, C) in configs:
        key, sub = jax.random.split(key)
        x5 = jax.random.normal(sub, (B, X, Y, Z, C), dtype=jnp.float32)
        gf = GridFeatures(x5, GridFeaturesMemoryFormat.b_x_y_z_c, (X, Y, Z), C)

        # Pure-JAX references (exact semantics of the PyTorch permute + flatten(1,2)).
        refs = {
            GridFeaturesMemoryFormat.b_zc_x_y:
                jnp.transpose(x5, (0, 3, 4, 1, 2)).reshape(B, Z * C, X, Y),
            GridFeaturesMemoryFormat.b_xc_y_z:
                jnp.transpose(x5, (0, 1, 4, 2, 3)).reshape(B, X * C, Y, Z),
            GridFeaturesMemoryFormat.b_yc_x_z:
                jnp.transpose(x5, (0, 2, 4, 1, 3)).reshape(B, Y * C, X, Z),
            GridFeaturesMemoryFormat.b_c_x_y_z:
                jnp.transpose(x5, (0, 4, 1, 2, 3)),
        }

        for fmt, ref in refs.items():
            converter = GridFeatureMemoryFormatConverter(fmt)
            out = converter(gf)
            feats = jax.block_until_ready(out.batch_features)
            assert feats.shape == ref.shape, (fmt, feats.shape, ref.shape)
            assert feats.dtype == ref.dtype, (fmt, feats.dtype, ref.dtype)
            assert jnp.array_equal(feats, ref), f"mismatch for {fmt} at {(B, X, Y, Z, C)}"

    print("KERNEL_OK")
</pallas_src>

<mosaic_0001>
module attributes {stable_mosaic.version = 11 : i64} {
  func.func @_packed_transpose_kernel(%arg0: i32, %arg1: i32, %arg2: memref<1x64x128xf32, #tpu.memory_space<vmem>>, %arg3: memref<1x32x256xf32, #tpu.memory_space<vmem>>) attributes {dimension_semantics = [#tpu.dimension_semantics<parallel>, #tpu.dimension_semantics<parallel>], iteration_bounds = array<i64: 2, 1>, scalar_prefetch = 0 : i64, scratch_operands = 0 : i64, tpu.core_type = #tpu.core_type<tc>, window_params = [{transform_indices = @transform_0, window_bounds = array<i64: 1, 64, 128>}, {transform_indices = @transform_1, window_bounds = array<i64: 1, 32, 256>}]} {
    %c0 = arith.constant 0 : index
    %c0_0 = arith.constant 0 : index
    %c0_1 = arith.constant 0 : index
    %0 = vector.load %arg2[%c0, %c0_0, %c0_1] : memref<1x64x128xf32, #tpu.memory_space<vmem>>, vector<1x64x128xf32>
    %1 = vector.shape_cast %0 : vector<1x64x128xf32> to vector<1x64x4x32xf32>
    %2 = tpu.transpose %1, [0, 3, 1, 2] : vector<1x64x4x32xf32> -> vector<1x32x64x4xf32>
    %3 = vector.shape_cast %2 : vector<1x32x64x4xf32> to vector<1x32x256xf32>
    %c0_2 = arith.constant 0 : index
    %c0_3 = arith.constant 0 : index
    %c0_4 = arith.constant 0 : index
    %4 = vector.load %arg3[%c0_2, %c0_3, %c0_4] : memref<1x32x256xf32, #tpu.memory_space<vmem>>, vector<1x32x256xf32>
    tpu.vector_store %arg3[%c0_2, %c0_3, %c0_4], %3 {strides = array<i32>} : memref<1x32x256xf32, #tpu.memory_space<vmem>>, vector<1x32x256xf32>,
    return
  }
  func.func @transform_0(%arg0: i32, %arg1: i32) -> (i32, i32, i32) {
    %c0_i32 = arith.constant 0 : i32
    %c0_i32_0 = arith.constant 0 : i32
    return %arg0, %arg1, %c0_i32 : i32, i32, i32
  }
  func.func @transform_1(%arg0: i32, %arg1: i32) -> (i32, i32, i32) {
    %c0_i32 = arith.constant 0 : i32
    %c0_i32_0 = arith.constant 0 : i32
    return %arg0, %c0_i32, %arg1 : i32, i32, i32
  }
}

module attributes {stable_mosaic.version = 11 : i64} {
  func.func @_transpose_last2_kernel(%arg0: i32, %arg1: i32, %arg2: i32, %arg3: memref<1x256x32xf32, #tpu.memory_space<vmem>>, %arg4: memref<1x32x256xf32, #tpu.memory_space<vmem>>) attributes {dimension_semantics = [#tpu.dimension_semantics<parallel>, #tpu.dimension_semantics<parallel>, #tpu.dimension_semantics<parallel>], iteration_bounds = array<i64: 2, 1, 1>, scalar_prefetch = 0 : i64, scratch_operands = 0 : i64, tpu.core_type = #tpu.core_type<tc>, window_params = [{transform_indices = @transform_0, window_bounds = array<i64: 1, 256, 32>}, {transform_indices = @transform_1, window_bounds = array<i64: 1, 32, 256>}]} {
    %c0 = arith.constant 0 : index
    %c0_0 = arith.constant 0 : index
    %c0_1 = arith.constant 0 : index
    %0 = vector.load %arg3[%c0, %c0_0, %c0_1] : memref<1x256x32xf32, #tpu.memory_space<vmem>>, vector<1x256x32xf32>
    %1 = tpu.transpose %0, [0, 2, 1] : vector<1x256x32xf32> -> vector<1x32x256xf32>
    %c0_2 = arith.constant 0 : index
    %c0_3 = arith.constant 0 : index
    %c0_4 = arith.constant 0 : index
    %2 = vector.load %arg4[%c0_2, %c0_3, %c0_4] : memref<1x32x256xf32, #tpu.memory_space<vmem>>, vector<1x32x256xf32>
    tpu.vector_store %arg4[%c0_2, %c0_3, %c0_4], %1 {strides = array<i32>} : memref<1x32x256xf32, #tpu.memory_space<vmem>>, vector<1x32x256xf32>,
    return
  }
  func.func @transform_0(%arg0: i32, %arg1: i32, %arg2: i32) -> (i32, i32, i32) {
    %c0_i32 = arith.constant 0 : i32
    return %arg0, %arg1, %arg2 : i32, i32, i32
  }
  func.func @transform_1(%arg0: i32, %arg1: i32, %arg2: i32) -> (i32, i32, i32) {
    %c0_i32 = arith.constant 0 : i32
    return %arg0, %arg2, %arg1 : i32, i32, i32
  }
}

</mosaic_0001>

<bundles_post_ra>
// kernel: tpu_custom_call.1
= control target key start
LH: loop header
LB: loop body
LE: loop exit
PB: predicated region body
PF: predicated region fallthrough
CT: control target
= control target key end

     0   :  { %6 = vsyncpa [#allocation3], 0  ;;  %s21055_s0 = inlined_call_operand.hbm [shape: f32[2,64,128], index: 0, kind: input, shape index: {}]   ;;  %s21056_s1 = inlined_call_operand.hbm [shape: f32[2,32,256], index: 1, kind: output, shape index: {}]  }
   0x1   :  { %8 = vsyncpa [#allocation3 + $0x1], 0 }
   0x2   :  { %9 = vsyncpa [#allocation4], 0 }
   0x3   :  { %11 = vsyncpa [#allocation4 + $0x1], 0  ;;  %s11573_s6 = smov 0   ;;  %s11575_s7 = smov 0  }
   0x4   :  { %s11577_s8 = smov 0   ;;  %s11579_s9 = smov 0  }
   0x5   :  { %s11581_s10 = smov 0   ;;  %s11583_s11 = smov 0  }
   0x6 LB: > { %s11294_s12 = sadd.s32 4294967295, %s11525_s11   ;;  %s11295_s13 = sadd.s32 4294967294, %s11525_s11   ;;  %s11525_s11 = sphi %s11583_s11, %s17_s11   ;;  %s11521_s10 = sphi %s11581_s10, %s23536_s10   ;;  %s11517_s9 = sphi %s11579_s9, %s23535_s9   ;;  %s11513_s8 = sphi %s11577_s8, %s23534_s8   ;;  %s11509_s7 = sphi %s11575_s7, %s23533_s7   ;;  %s11505_s6 = sphi %s11573_s6, %s23532_s6  }
   0x7   : > { %s29_s14 = sadd.s32 1, %s11521_s10  ;;  %s38_s15 = sadd.s32 1, %s11513_s8 }
   0x8   : > { %p31_p0 = scmp.ge.s32.totalorder %s29_s14, 2  ;;  %p45_p1 = scmp.ne.s32.totalorder %s11513_s8, %s11509_s7 }
   0x9   : > { %p46_p2 = scmp.eq.s32.totalorder %s11525_s11, 0  ;;  %p51_p3 = scmp.ne.s32.totalorder %s11509_s7, %s11505_s6 }
   0xa   : > { %s23538_s14 = smov (%p31_p0, %s29_s14), 0  ;;  %p52_p5 = scmp.eq.s32.totalorder %s11294_s12, 0 }
   0xb   : > { %p11614_p4 = por %p46_p2, %p45_p1  ;;  %s33_s17 = ssub.s32 %s11521_s10, %s23538_s14 }
   0xc   : > { %p77_p6 = scmp.eq.s32.totalorder %s11294_s12, 1  ;;  %p36_p7 = scmp.eq.s32.totalorder %s33_s17, 0 }
   0xd   : > { %p11620_p8 = por %p52_p5, %p51_p3  ;;  %p83_p10 = scmp.eq.s32.totalorder %s11295_s13, 1 }
   0xe   : > { %p11624_p9 = por %p77_p6, %p45_p1  ;;  %p11297_p12 = scmp.ge.s32.totalorder %s11525_s11, 2 }
   0xf   : > { %s11629_s20 = scalar_select %p36_p7, %s11513_s8, %s38_s15  }
  0x10   : > { %p11631_p11 = por %p83_p10, %p51_p3  ;;  %p11323_p13 = scmp.lt.s32.totalorder %s11525_s11, 2 }
  0x11   : > { %s103_s22 = sand.u32 1, %s11513_s8   ;;  %s11309_s24 = sshll.u32 %s11521_s10, 6 }
  0x12   : > { %s11298_s23 = sshll.u32 %s103_s22, 6  ;;  %s114_s27 = scalar_lea.hbm %s21055_s0, %s11309_s24 }
  0x13   : > { %s107_s28 = scalar_lea.vmem [#allocation2], %s11298_s23  ;;  %s115_s30 = sshll.u32 %s114_s27, 4  ;;  %s116_s30 = int_to_ptr.hbm [resolvable:$true] %s115_s30 }
  0x14   : > { %s117_s29 = sshll.u32 %s107_s28, 4  ;;  %p11316_p0 = pnand %p11323_p13, %p11614_p4  ;;  %s118_s29 = int_to_ptr.vmem [resolvable:$true] %s117_s29 }
  0x15   : > { %p11301_p1 = scmp.ge.s32.totalorder %s11525_s11, 1  ;;  %s104_s2 = scalar_lea.sflag [#allocation3], %s103_s22 }
  0x16   : > { %s11527_s3 = smov 128   ;;  %s11528_s4 = smov 8  }
  0x17   : > { %11318 = dma.hbm_to_vmem [thread:$0]  (!%p11316_p0), %s116_s30, 1024, %s118_s29, %s104_s2, %s11527_s3, %s11527_s3, %s11528_s4  }
  0x18   : > { %p125_p2 = scmp.lt.s32.totalorder %s11525_s11, 3 }
  0x1a   : > { %p126_p3 = pnand %p11301_p1, %p125_p2 }
  0x1c   : > { %129 = sbr.rel (%p126_p3) target bundleno = 1788 (0x6fc), region = 24 }
  0x21   : > { %s11647_s5 = sand.u32 1, %s11509_s7  }
  0x22   : > { %s11302_s12 = sshll.u32 %s11647_s5, 6  ;;  %s132_s13 = scalar_lea.sflag [#allocation3], %s11647_s5 }
  0x23   : > { %s11653_s15 = scalar_lea.vmem [#allocation2], %s11302_s12 }
  0x24   : > { %11496 = dma.done.wait (%p11620_p8), %s132_s13, 1024  }
  0x25   : > { %11498 = vsyncadd (%p11620_p8), %s132_s13, 4294966272  ;;  %v11660_v0 = vld [vmem:[%s11653_s15 + $0x20] sm:$0xff]  ;;  %v11663_v1 = vld [vmem:[%s11653_s15 + $0x10] sm:$0xff]  ;;  %s21627_s16 = smov 96   ;;  %s21567_s17 = smov 64   ;;  %vm246_vm0 = vcmask 1047556  }
  0x26   : > { %v11666_v2 = vld [vmem:[%s11653_s15] sm:$0xff]  ;;  %181 = vrot.lane.b32.xlu2 %v11660_v0, %s21627_s16  ;;  %177 = vrot.lane.b32.xlu1 %v11663_v1, %s21627_s16  ;;  %v162_v3 = vld [vmem:[%s11653_s15 + $0x28] sm:$0xff]  ;;  %s11531_s18 = smov 32   ;;  %v11532_v23 = vmov 1983009808   ;;  %v472_v29 = vrot.slane %v11660_v0, 4 }
  0x27   : > { %173 = vrot.lane.b32.xlu0 %v11666_v2, %s21627_s16  ;;  %v11676_v4 = vld [vmem:[%s11653_s15 + $0x18] sm:$0xff]  ;;  %v11679_v5 = vld [vmem:[%s11653_s15 + $0x8] sm:$0xff]  ;;  %v163_v7 = vld [vmem:[%s11653_s15 + $0x30] sm:$0xff]  ;;  %v251_v24 = vunpack.c.l.s4 %v11532_v23  ;;  %v360_v52 = vrot.slane %v11663_v1, 4  ;;  %v11533_v55 = vmov 1934713408  }
  0x28   : > { %v164_v6 = vld [vmem:[%s11653_s15 + $0x38] sm:$0xff]  ;;  %v275_v56 = vunpack.c.l.s4 %v11533_v55  ;;  %v416_v62 = vrot.slane %v11676_v4, 4  ;;  %s11534_s22 = smov 4   ;;  %s11535_s23 = smov 8   ;;  %vm10902_vm1 = vcmask 31744   ;;  %vm10907_vm2 = vcmask 64512  }
  0x29   : > { %v11741_v28 = vunpack.c.0.s8 %v251_v24  ;;  %s11536_s24 = smov 12   ;;  %s11537_s25 = smov 16   ;;  %vm10912_vm3 = vcmask 97280   ;;  %vm10917_vm4 = vcmask 130048   ;;  %vm10922_vm5 = vcmask 162816  }
  0x2a   : > { %s11538_s26 = smov 20   ;;  %s11539_s27 = smov 24   ;;  %vm10927_vm6 = vcmask 195584   ;;  %vm10932_vm7 = vcmask 228352   ;;  %vm10937_vm8 = vcmask 261120   ;;  %vm10942_vm9 = vcmask 293888  }
  0x2b   : > { %s11540_s28 = smov 28   ;;  %s11541_s29 = smov 36   ;;  %vm21694_vm10 = vcmask 326656   ;;  %vm21673_vm11 = vcmask 359424   ;;  %vm21671_vm12 = vcmask 392192   ;;  %vm21670_vm13 = vcmask 424960  }
  0x2c   : > { %s11542_s30 = smov 40   ;;  %s11543_s2 = smov 44   ;;  %vm21669_vm14 = vcmask 457728   ;;  %vm21672_vm15 = vcmask 490496  }
  0x2d   : > { %s11544_s3 = smov 48   ;;  %s11545_s4 = smov 52  }
  0x2e   : > { %183 = vrot.lane.b32.xlu2 %v162_v3, %s21627_s16  ;;  %179 = vrot.lane.b32.xlu1 %v11676_v4, %s21627_s16  ;;  %s11546_s13 = smov 56  }
  0x2f   : > { %175 = vrot.lane.b32.xlu0 %v11679_v5, %s21627_s16 }
  0x36   : > { %187 = vrot.lane.b32.xlu1 %v164_v6, %s21627_s16  ;;  %197 = vrot.lane.b32.xlu2 %v11666_v2, %s21567_s17 }
  0x37   : > { %185 = vrot.lane.b32.xlu0 %v163_v7, %s21627_s16 }
  0x3e   : > { %201 = vrot.lane.b32.xlu1 %v11663_v1, %s21567_s17  ;;  %203 = vrot.lane.b32.xlu2 %v11676_v4, %s21567_s17 }
  0x3f   : > { %199 = vrot.lane.b32.xlu0 %v11679_v5, %s21567_s17 }
  0x46   : > { %207 = vrot.lane.b32.xlu1 %v162_v3, %s21567_s17  ;;  %209 = vrot.lane.b32.xlu2 %v163_v7, %s21567_s17 }
  0x47   : > { %205 = vrot.lane.b32.xlu0 %v11660_v0, %s21567_s17 }
  0x4e   : > { %221 = vrot.lane.b32.xlu1 %v11666_v2, %s11531_s18  ;;  %223 = vrot.lane.b32.xlu2 %v11679_v5, %s11531_s18 }
  0x4f   : > { %211 = vrot.lane.b32.xlu0 %v164_v6, %s21567_s17 }
  0x56   : > { %227 = vrot.lane.b32.xlu1 %v11676_v4, %s11531_s18  ;;  %229 = vrot.lane.b32.xlu2 %v11660_v0, %s11531_s18 }
  0x57   : > { %225 = vrot.lane.b32.xlu0 %v11663_v1, %s11531_s18 }
  0x5e   : > { %235 = vrot.lane.b32.xlu2 %v164_v6, %s11531_s18  ;;  %233 = vrot.lane.b32.xlu1 %v163_v7, %s11531_s18 }
  0x5f   : > { %231 = vrot.lane.b32.xlu0 %v162_v3, %s11531_s18  ;;  %v11781_v3 = vunpack.c.0.s8 %v275_v56 }
  0x80   : > { %v182_v8 = vpop.permute.xlu2 %181 }
  0x81   : > { %v484_v20 = vrot.slane %v182_v8, 4 }
  0x88   : > { %v11716_v9 = vpop.permute.xlu2 %183 }
  0x90   : > { %v11718_v10 = vpop.permute.xlu2 %197 }
  0x91   : > { %v245_v30 = vrot.slane %v11718_v10, 4 }
  0x93   : > { %v247_v38 = vsel %vm246_vm0, %v245_v30, %v11666_v2 }
  0x94   : > { %v253_v45 = vperm.slane %v247_v38, %v11741_v28 }
  0x96   : > { %v272_v58 = vrot.slane %v253_v45, 4 }
  0x98   : > { %v11720_v11 = vpop.permute.xlu1 %177  ;;  %v11722_v12 = vpop.permute.xlu2 %203 }
  0x99   : > { %v11724_v13 = vpop.permute.xlu0 %173  ;;  %v414_v47 = vrot.slane %v11722_v12, 4  ;;  %v417_v24 = vsel %vm246_vm0, %v11722_v12, %v416_v62 }
  0x9a   : > { %v260_v62 = vrot.slane %v11724_v13, 4 }
  0x9b   : > { %v415_v60 = vsel %vm246_vm0, %v414_v47, %v11676_v4  ;;  %v372_v4 = vrot.slane %v11720_v11, 4 }
  0x9c   : > { %v421_v6 = vperm.slane %v415_v60, %v11741_v28 }
  0x9e   : > { %v440_v12 = vrot.slane %v421_v6, 4 }
  0xa0   : > { %v11726_v14 = vpop.permute.xlu1 %179  ;;  %v11728_v15 = vpop.permute.xlu2 %209 }
  0xa1   : > { %21732 = vst [vmem:[#allocation8_spill] sm:$0xff] %v11728_v15  ;;  %v11730_v16 = vpop.permute.xlu0 %175 }
  0xa8   : > { %v11732_v17 = vpop.permute.xlu1 %187  ;;  %v11734_v18 = vpop.permute.xlu2 %223 }
  0xa9   : > { %21733 = vst [vmem:[#allocation9_spill] sm:$0xff] %v11732_v17  ;;  %v11736_v19 = vpop.permute.xlu0 %185 }
  0xaa   : > { %21734 = vst [vmem:[#allocation10_spill] sm:$0xff] %v11736_v19 }
  0xb0   : > { %v202_v21 = vpop.permute.xlu1 %201  ;;  %v230_v22 = vpop.permute.xlu2 %229 }
  0xb1   : > { %v11738_v25 = vpop.permute.xlu0 %199  ;;  %v482_v26 = vrot.slane %v230_v22, 4  ;;  %v485_v27 = vsel %vm246_vm0, %v230_v22, %v484_v20  ;;  %v358_v57 = vrot.slane %v202_v21, 4  ;;  %v428_v22 = vrot.slane %v11726_v14, 4 }
  0xb2   : > { %v493_v32 = vperm.slane %v485_v27, %v11741_v28 }
  0xb3   : > { %v483_v31 = vsel %vm246_vm0, %v482_v26, %v182_v8  ;;  %v359_v7 = vsel %vm246_vm0, %v358_v57, %v11663_v1 }
  0xb4   : > { %v489_v35 = vperm.slane %v483_v31, %v11741_v28  ;;  %v506_v39 = vrot.slane %v493_v32, 4 }
  0xb6   : > { %v494_v46 = vrot.slane %v489_v35, 4 }
  0xb8   : > { %v11747_v33 = vpop.permute.xlu1 %207 }
  0xb9   : > { %v206_v34 = vpop.permute.xlu0 %205 }
  0xba   : > { %v470_v36 = vrot.slane %v206_v34, 4  ;;  %v473_v37 = vsel %vm246_vm0, %v206_v34, %v472_v29 }
  0xbb   : > { %v481_v40 = vperm.slane %v473_v37, %v11741_v28  ;;  %v425_v37 = vperm.slane %v417_v24, %v11741_v28 }
  0xbc   : > { %v471_v41 = vsel %vm246_vm0, %v470_v36, %v11660_v0  ;;  %v361_v0 = vsel %vm246_vm0, %v202_v21, %v360_v52 }
  0xbd   : > { %v508_v42 = vrot.slane %v481_v40, 4  ;;  %v11757_v43 = vsel %vm246_vm0, %v506_v39, %v481_v40  ;;  %v477_v44 = vperm.slane %v471_v41, %v11741_v28  ;;  %v369_v21 = vperm.slane %v361_v0, %v11741_v28 }
  0xbe   : > { %v452_v0 = vrot.slane %v425_v37, 4 }
  0xbf   : > { %v11763_v48 = vsel %vm246_vm0, %v493_v32, %v508_v42  ;;  %v496_v49 = vrot.slane %v477_v44, 4  ;;  %v11766_v51 = vsel %vm246_vm0, %v494_v46, %v477_v44  ;;  %v365_v32 = vperm.slane %v359_v7, %v11741_v28 }
  0xc0   : > { %v222_v50 = vpop.permute.xlu1 %221  ;;  %v396_v41 = vrot.slane %v369_v21, 4  ;;  %v248_v7 = vrot.slane %v11666_v2, 4 }
  0xc1   : > { %v258_v53 = vrot.slane %v222_v50, 4  ;;  %v11769_v54 = vpop.permute.xlu0 %211  ;;  %v11772_v59 = vsel %vm246_vm0, %v489_v35, %v496_v49  ;;  %v384_v52 = vrot.slane %v365_v32, 4 }
  0xc2   : > { %21735 = vst [vmem:[#allocation11_spill] sm:$0xff] %v11769_v54 }
  0xc3   : > { %v259_v61 = vsel %vm246_vm0, %v258_v53, %v11724_v13 }
  0xc4   : > { %v265_v63 = vperm.slane %v259_v61, %v11741_v28 }
  0xc6   : > { %v273_v8 = vsel %vm246_vm0, %v265_v63, %v272_v58  ;;  %v270_v20 = vrot.slane %v265_v63, 4  ;;  %v261_v63 = vsel %vm246_vm0, %v222_v50, %v260_v62 }
  0xc7   : > { %v281_v23 = vperm.slane %v273_v8, %v11781_v3  ;;  %v269_v8 = vperm.slane %v261_v63, %v11741_v28 }
  0xc8   : > { %v228_v26 = vpop.permute.xlu1 %227  ;;  %v271_v27 = vsel %vm246_vm0, %v270_v20, %v253_v45 }
  0xc9   : > { %v426_v29 = vrot.slane %v228_v26, 4  ;;  %v429_v1 = vsel %vm246_vm0, %v228_v26, %v428_v22  ;;  %v226_v30 = vpop.permute.xlu0 %225  ;;  %758 = vxpose.xlu2.b32.start.end [1/1] (short) (narrow) %v281_v23, 32  ;;  %v277_v31 = vperm.slane %v271_v27, %v11781_v3  ;;  %v249_v22 = vsel %vm246_vm0, %v11718_v10, %v248_v7 }
  0xca   : > { %v437_v34 = vperm.slane %v429_v1, %v11741_v28  ;;  %v370_v35 = vrot.slane %v226_v30, 4  ;;  %v373_v36 = vsel %vm246_vm0, %v226_v30, %v372_v4  ;;  %v257_v4 = vperm.slane %v249_v22, %v11741_v28 }
  0xcb   : > { %v427_v38 = vsel %vm246_vm0, %v426_v29, %v11726_v14  ;;  %v381_v39 = vperm.slane %v373_v36, %v11741_v28  ;;  %694 = vxpose.xlu0.b32.start.end [1/1] (short) (narrow) %v277_v31, 32  ;;  %v294_v40 = vrot.slane %v277_v31, 4  ;;  %v314_v29 = vrot.slane %v11734_v18, 4 }
  0xcc   : > { %v433_v42 = vperm.slane %v427_v38, %v11741_v28  ;;  %v450_v44 = vrot.slane %v437_v34, 4  ;;  %v371_v45 = vsel %vm246_vm0, %v370_v35, %v11720_v11  ;;  %v11834_v20 = vsel %vm246_vm0, %v437_v34, %v452_v0 }
  0xcd   : > { %v394_v46 = vrot.slane %v381_v39, 4  ;;  %v295_v47 = vsel %vm246_vm0, 0.0, %v294_v40  ;;  %v377_v49 = vperm.slane %v371_v45, %v11741_v28  ;;  %v11809_v14 = vsel %vm246_vm0, %v381_v39, %v396_v41 }
  0xce   : > { %726 = vxpose.xlu1.b32.start.end [1/1] (short) (narrow) %v295_v47, 32  ;;  %v438_v53 = vrot.slane %v433_v42, 4  ;;  %v11812_v55 = vsel %vm246_vm0, %v433_v42, %v440_v12  ;;  %v11815_v56 = vsel %vm246_vm0, %v450_v44, %v425_v37  ;;  %v284_v27 = vrot.slane %v257_v4, 4 }
  0xcf   : > { %v382_v57 = vrot.slane %v377_v49, 4  ;;  %v11818_v11 = vsel %vm246_vm0, %v377_v49, %v384_v52  ;;  %v11821_v58 = vsel %vm246_vm0, %v394_v46, %v369_v21  ;;  %v296_v21 = vrot.slane %v281_v23, 4 }
  0xd0   : > { %v11824_v60 = vsel %vm246_vm0, %v438_v53, %v421_v6  ;;  %v282_v6 = vrot.slane %v269_v8, 4  ;;  %v285_v10 = vsel %vm246_vm0, %v269_v8, %v284_v27  ;;  %v315_v1 = vsel %vm246_vm0, %v314_v29, %v11730_v16 }
  0xd1   : > { %v11827_v61 = vsel %vm246_vm0, %v382_v57, %v365_v32  ;;  %v297_v2 = vsel %vm246_vm0, 0.0, %v296_v21  ;;  %v302_v30 = vrot.slane %v11738_v25, 4  ;;  %v293_v23 = vperm.slane %v285_v10, %v11781_v3 }
  0xd2   : > { %v283_v24 = vsel %vm246_vm0, %v282_v6, %v257_v4  ;;  %v321_v31 = vperm.slane %v315_v1, %v11741_v28  ;;  %v316_v47 = vrot.slane %v11730_v16, 4  ;;  %v304_v52 = vrot.slane %v11679_v5, 4  ;;  %v11873_v6 = vpop.permute.xlu2 %235 }
  0xd3   : > { %v289_v13 = vperm.slane %v283_v24, %v11781_v3  ;;  %v303_v32 = vsel %vm246_vm0, %v302_v30, %v11679_v5  ;;  %v300_v34 = vrot.slane %v293_v23, 4  ;;  %21736 = vst [vmem:[#allocation12_spill] sm:$0xff] %v11873_v6  ;;  %v389_v4 = vperm.slane %v11827_v61, %v11781_v3 }
  0xd4   : > { %v326_v35 = vrot.slane %v321_v31, 4  ;;  %v309_v36 = vperm.slane %v303_v32, %v11741_v28  ;;  %v317_v49 = vsel %vm246_vm0, %v11734_v18, %v316_v47  ;;  %v305_v57 = vsel %vm246_vm0, %v11738_v25, %v304_v52 }
  0xd5   : > { %v298_v50 = vrot.slane %v289_v13, 4  ;;  %v301_v12 = vsel %vm246_vm0, 0.0, %v300_v34  ;;  %v325_v53 = vperm.slane %v317_v49, %v11741_v28  ;;  %v313_v63 = vperm.slane %v305_v57, %v11741_v28 }
  0xd6   : > { %v327_v37 = vsel %vm246_vm0, %v326_v35, %v309_v36  ;;  %v328_v39 = vrot.slane %v309_v36, 4  ;;  %v406_v21 = vrot.slane %v389_v4, 4 }
  0xd7   : > { %v299_v26 = vsel %vm246_vm0, 0.0, %v298_v50  ;;  %v333_v38 = vperm.slane %v327_v37, %v11781_v3  ;;  %v338_v62 = vrot.slane %v325_v53, 4  ;;  %v340_v16 = vrot.slane %v313_v63, 4  ;;  %v11879_v50 = vpop.permute.xlu1 %233 }
  0xd8   : > { %v329_v40 = vsel %vm246_vm0, %v321_v31, %v328_v39  ;;  %21737 = vst [vmem:[#allocation13_spill] sm:$0xff] %v11879_v50  ;;  %v407_v29 = vsel %vm246_vm0, 0.0, %v406_v21 }
  0xd9   : > { %v337_v41 = vperm.slane %v329_v40, %v11781_v3  ;;  %v350_v42 = vrot.slane %v333_v38, 4  ;;  %v339_v0 = vsel %vm246_vm0, %v338_v62, %v313_v63  ;;  %v341_v18 = vsel %vm246_vm0, %v325_v53, %v340_v16 }
  0xda   : > { %v345_v7 = vperm.slane %v339_v0, %v11781_v3  ;;  %v349_v5 = vperm.slane %v341_v18, %v11781_v3  ;;  %v393_v40 = vperm.slane %v11818_v11, %v11781_v3  ;;  %v401_v0 = vperm.slane %v11821_v58, %v11781_v3 }
  0xdb   : > { %v352_v44 = vrot.slane %v337_v41, 4  ;;  %v351_v45 = vsel %vm246_vm0, 0.0, %v350_v42 }
  0xdc   : > { %v354_v8 = vrot.slane %v345_v7, 4  ;;  %v356_v24 = vrot.slane %v349_v5, 4 }
  0xdd   : > { %v353_v46 = vsel %vm246_vm0, 0.0, %v352_v44 }
  0xde   : > { %v355_v22 = vsel %vm246_vm0, 0.0, %v354_v8 }
  0xe9   : > { %822 = vxpose.xlu2.b32.start.end [1/1] (short) (narrow) %v289_v13, 32  ;;  %v11877_v13 = vpop.permute.xlu0 %231 }
  0xeb   : > { %790 = vxpose.xlu0.b32.start.end [1/1] (short) (narrow) %v297_v2, 32  ;;  %v357_v2 = vsel %vm246_vm0, 0.0, %v356_v24 }
  0xee   : > { %854 = vxpose.xlu1.b32.start.end [1/1] (short) (narrow) %v299_v26, 32 }
 0x109   : > { %918 = vxpose.xlu2.b32.start.end [1/1] (short) (narrow) %v301_v12, 32 }
 0x10b   : > { %886 = vxpose.xlu0.b32.start.end [1/1] (short) (narrow) %v293_v23, 32 }
 0x10e   : > { %950 = vxpose.xlu1.b32.start.end [1/1] (short) (narrow) %v333_v38, 32 }
 0x129   : > { %1014 = vxpose.xlu2.b32.start.end [1/1] (short) (narrow) %v337_v41, 32 }
 0x12b   : > { %982 = vxpose.xlu0.b32.start.end [1/1] (short) (narrow) %v351_v45, 32  ;;  %v408_v45 = vrot.slane %v393_v40, 4 }
 0x12d   : > { %v409_v52 = vsel %vm246_vm0, 0.0, %v408_v45 }
 0x12e   : > { %1046 = vxpose.xlu1.b32.start.end [1/1] (short) (narrow) %v353_v46, 32 }
 0x149   : > { %1110 = vxpose.xlu2.b32.start.end [1/1] (short) (narrow) %v355_v22, 32 }
 0x14b   : > { %1078 = vxpose.xlu0.b32.start.end [1/1] (short) (narrow) %v345_v7, 32 }
 0x14e   : > { %1142 = vxpose.xlu1.b32.start.end [1/1] (short) (narrow) %v349_v5, 32 }
 0x162   : > { %v774_v25 = vpop.trf.xlu2 }
 0x163   : > { %v2742_v27 = vrot.slane %v774_v25, 4 }
 0x169   : > { %1206 = vxpose.xlu2.b32.start.end [1/1] (short) (narrow) %v389_v4, 32 }
 0x16a   : > { %v775_v26 = vpop.trf.xlu2 }
 0x16b   : > { %1174 = vxpose.xlu0.b32.start.end [1/1] (short) (narrow) %v357_v2, 32  ;;  %v3638_v32 = vrot.slane %v775_v26, 4 }
 0x16e   : > { %1238 = vxpose.xlu1.b32.start.end [1/1] (short) (narrow) %v407_v29, 32 }
 0x16f   : > { %v710_v10 = vpop.trf.xlu0 }
 0x170   : > { %v2743_v1 = vsel %vm246_vm0, %v2742_v27, %v710_v10  ;;  %v2744_v30 = vrot.slane %v710_v10, 4 }
 0x171   : > { %v2749_v7 = vperm.slane %v2743_v1, %v11741_v28 }
 0x172   : > { %v2745_v61 = vsel %vm246_vm0, %v774_v25, %v2744_v30  ;;  %v742_v23 = vpop.trf.xlu1  ;;  %v11885_v31 = vpop.trf.xlu2 }
 0x173   : > { %21738 = vst [vmem:[#allocation14_spill] sm:$0xff] %v11885_v31  ;;  %v2753_v11 = vperm.slane %v2745_v61, %v11741_v28  ;;  %v2756_v63 = vrot.slane %v742_v23, 4  ;;  %v2792_v5 = vrot.slane %v2749_v7, 4 }
 0x175   : > { %v2804_v8 = vrot.slane %v2753_v11, 4 }
 0x177   : > { %v711_v34 = vpop.trf.xlu0 }
 0x178   : > { %v3639_v35 = vsel %vm246_vm0, %v3638_v32, %v711_v34  ;;  %v3640_v36 = vrot.slane %v711_v34, 4 }
 0x179   : > { %v3645_v27 = vperm.slane %v3639_v35, %v11741_v28 }
 0x17a   : > { %v3641_v12 = vsel %vm246_vm0, %v775_v26, %v3640_v36  ;;  %v743_v37 = vpop.trf.xlu1  ;;  %v777_v38 = vpop.trf.xlu2 }
 0x17b   : > { %v5430_v44 = vrot.slane %v777_v38, 4  ;;  %v3649_v29 = vperm.slane %v3641_v12, %v11741_v28  ;;  %v3652_v10 = vrot.slane %v743_v37, 4 }
 0x17d   : > { %v3700_v34 = vrot.slane %v3649_v29, 4 }
 0x17f   : > { %v11889_v39 = vpop.trf.xlu0 }
 0x180   : > { %21739 = vst [vmem:[#allocation15_spill] sm:$0xff] %v11889_v39 }
 0x182   : > { %v11893_v41 = vpop.trf.xlu1  ;;  %v11895_v42 = vpop.trf.xlu2 }
 0x183   : > { %21740 = vst [vmem:[#allocation16_spill] sm:$0xff] %v11893_v41 }
 0x187   : > { %v713_v46 = vpop.trf.xlu0 }
 0x188   : > { %v5431_v47 = vsel %vm246_vm0, %v5430_v44, %v713_v46  ;;  %v5432_v49 = vrot.slane %v713_v46, 4 }
 0x189   : > { %1302 = vxpose.xlu2.b32.start.end [1/1] (short) (narrow) %v409_v52, 32 }
 0x18a   : > { %v5433_v53 = vsel %vm246_vm0, %v777_v38, %v5432_v49  ;;  %v11900_v57 = vpop.trf.xlu1  ;;  %v11902_v62 = vpop.trf.xlu2  ;;  %v3688_v38 = vrot.slane %v3645_v27, 4 }
 0x18b   : > { %1270 = vxpose.xlu0.b32.start.end [1/1] (short) (narrow) %v393_v40, 32 }
 0x18e   : > { %1334 = vxpose.xlu1.b32.start.end [1/1] (short) (narrow) %v401_v0, 32 }
 0x18f   : > { %v806_v16 = vpop.trf.xlu0 }
 0x190   : > { %v2754_v22 = vrot.slane %v806_v16, 4  ;;  %v2757_v18 = vsel %vm246_vm0, %v806_v16, %v2756_v63 }
 0x191   : > { %v2765_v25 = vperm.slane %v2757_v18, %v11741_v28 }
 0x192   : > { %v2755_v4 = vsel %vm246_vm0, %v2754_v22, %v742_v23  ;;  %v870_v24 = vpop.trf.xlu1  ;;  %v11911_v21 = vpop.trf.xlu2 }
 0x193   : > { %21741 = vst [vmem:[#allocation17_spill] sm:$0xff] %v11911_v21  ;;  %v2761_v2 = vperm.slane %v2755_v4, %v11741_v28  ;;  %v2802_v26 = vrot.slane %v2765_v25, 4  ;;  %v11915_v58 = vsel %vm246_vm0, %v2765_v25, %v2804_v8  ;;  %v2780_v16 = vrot.slane %v870_v24, 4 }
 0x194   : > { %v405_v25 = vperm.slane %v11809_v14, %v11781_v3 }
 0x195   : > { %v2790_v1 = vrot.slane %v2761_v2, 4  ;;  %v11920_v30 = vsel %vm246_vm0, %v2761_v2, %v2792_v5  ;;  %v11923_v61 = vsel %vm246_vm0, %v2802_v26, %v2753_v11  ;;  %v5441_v5 = vperm.slane %v5433_v53, %v11741_v28 }
 0x196   : > { %v5437_v26 = vperm.slane %v5431_v47, %v11741_v28 }
 0x197   : > { %v2791_v23 = vsel %vm246_vm0, %v2790_v1, %v2749_v7  ;;  %v807_v32 = vpop.trf.xlu0 }
 0x198   : > { %v3650_v36 = vrot.slane %v807_v32, 4  ;;  %v3653_v40 = vsel %vm246_vm0, %v807_v32, %v3652_v10 }
 0x199   : > { %v3661_v12 = vperm.slane %v3653_v40, %v11741_v28  ;;  %v5480_v40 = vrot.slane %v5437_v26, 4 }
 0x19a   : > { %v3651_v35 = vsel %vm246_vm0, %v3650_v36, %v743_v37  ;;  %v871_v44 = vpop.trf.xlu1  ;;  %v11929_v45 = vpop.trf.xlu2 }
 0x19b   : > { %v3657_v46 = vperm.slane %v3651_v35, %v11741_v28  ;;  %v3698_v49 = vrot.slane %v3661_v12, 4  ;;  %v11933_v52 = vsel %vm246_vm0, %v3661_v12, %v3700_v34  ;;  %v3676_v1 = vrot.slane %v871_v44, 4 }
 0x19c   : > { %v5492_v34 = vrot.slane %v5441_v5, 4  ;;  %v3709_v39 = vperm.slane %v11933_v52, %v11781_v3 }
 0x19d   : > { %v3686_v11 = vrot.slane %v3657_v46, 4  ;;  %v11936_v63 = vsel %vm246_vm0, %v3657_v46, %v3688_v38  ;;  %v11939_v7 = vsel %vm246_vm0, %v3698_v49, %v3649_v29  ;;  %v5444_v29 = vrot.slane %v11900_v57, 4 }
 0x19e   : > { %v412_v38 = vrot.slane %v405_v25, 4 }
 0x19f   : > { %v11942_v37 = vsel %vm246_vm0, %v3686_v11, %v3645_v27  ;;  %v11944_v8 = vpop.trf.xlu0  ;;  %v410_v27 = vrot.slane %v401_v0, 4 }
 0x1a0   : > { %21742 = vst [vmem:[#allocation18_spill] sm:$0xff] %v11944_v8 }
 0x1a1   : > { %v411_v0 = vsel %vm246_vm0, 0.0, %v410_v27 }
 0x1a2   : > { %v11946_v22 = vpop.trf.xlu1  ;;  %v934_v18 = vpop.trf.xlu2 }
 0x1a3   : > { %21743 = vst [vmem:[#allocation19_spill] sm:$0xff] %v11946_v22  ;;  %v2778_v4 = vrot.slane %v934_v18, 4  ;;  %v2781_v2 = vsel %vm246_vm0, %v934_v18, %v2780_v16  ;;  %v2768_v16 = vrot.slane %v11895_v42, 4 }
 0x1a4   : > { %v2789_v46 = vperm.slane %v2781_v2, %v11741_v28 }
 0x1a5   : > { %v2779_v10 = vsel %vm246_vm0, %v2778_v4, %v870_v24 }
 0x1a6   : > { %v2785_v27 = vperm.slane %v2779_v10, %v11741_v28  ;;  %v2809_v10 = vperm.slane %v11923_v61, %v11781_v3 }
 0x1a7   : > { %v809_v32 = vpop.trf.xlu0 }
 0x1a8   : > { %v5442_v36 = vrot.slane %v809_v32, 4  ;;  %v5445_v53 = vsel %vm246_vm0, %v809_v32, %v5444_v29 }
 0x1a9   : > { %1398 = vxpose.xlu2.b32.start.end [1/1] (short) (narrow) %v405_v25, 32  ;;  %v5453_v35 = vperm.slane %v5445_v53, %v11741_v28  ;;  %v413_v25 = vsel %vm246_vm0, 0.0, %v412_v38  ;;  %v11984_v53 = vperm.slane %v2791_v23, %v11781_v3  ;;  %v2801_v23 = vperm.slane %v11920_v30, %v11781_v3 }
 0x1aa   : > { %v5443_v14 = vsel %vm246_vm0, %v5442_v36, %v11900_v57  ;;  %v11959_v47 = vpop.trf.xlu1  ;;  %v935_v12 = vpop.trf.xlu2  ;;  %v2826_v36 = vrot.slane %v2789_v46, 4 }
 0x1ab   : > { %v5449_v24 = vperm.slane %v5443_v14, %v11741_v28  ;;  %1366 = vxpose.xlu0.b32.start.end [1/1] (short) (narrow) %v411_v0, 32  ;;  %v3674_v49 = vrot.slane %v935_v12, 4  ;;  %v3677_v11 = vsel %vm246_vm0, %v935_v12, %v3676_v1  ;;  %v5490_v18 = vrot.slane %v5453_v35, 4 }
 0x1ac   : > { %v11967_v57 = vsel %vm246_vm0, %v5453_v35, %v5492_v34  ;;  %v2813_v1 = vperm.slane %v11915_v58, %v11781_v3  ;;  %v3664_v35 = vrot.slane %v11902_v62, 4 }
 0x1ad   : > { %v5478_v4 = vrot.slane %v5449_v24, 4  ;;  %v11971_v29 = vsel %vm246_vm0, %v5449_v24, %v5480_v40  ;;  %v3675_v32 = vsel %vm246_vm0, %v3674_v49, %v871_v44  ;;  %v11976_v2 = vsel %vm246_vm0, %v5490_v18, %v5441_v5 }
 0x1ae   : > { %1430 = vxpose.xlu1.b32.start.end [1/1] (short) (narrow) %v413_v25, 32  ;;  %v2814_v5 = vrot.slane %v2785_v27, 4  ;;  %v2840_v49 = vrot.slane %v11984_v53, 4  ;;  %v2852_v18 = vrot.slane %v2813_v1, 4 }
 0x1af   : > { %v11981_v34 = vsel %vm246_vm0, %v5478_v4, %v5437_v26  ;;  %v902_v38 = vpop.trf.xlu0 }
 0x1b0   : > { %v2766_v40 = vrot.slane %v902_v38, 4  ;;  %v2769_v44 = vsel %vm246_vm0, %v902_v38, %v2768_v16  ;;  %v2848_v16 = vrot.slane %v2809_v10, 4 }
 0x1b1   : > { %v2777_v14 = vperm.slane %v2769_v44, %v11741_v28 }
 0x1b2   : > { %v2767_v58 = vsel %vm246_vm0, %v2766_v40, %v11895_v42  ;;  %v11993_v26 = vpop.trf.xlu1  ;;  %v11995_v0 = vpop.trf.xlu2  ;;  %v3685_v40 = vperm.slane %v3677_v11, %v11741_v28 }
 0x1b3   : > { %21744 = vst [vmem:[#allocation20_spill] sm:$0xff] %v11995_v0  ;;  %v2773_v61 = vperm.slane %v2767_v58, %v11741_v28  ;;  %v2827_v12 = vsel %vm246_vm0, %v2826_v36, %v2777_v14  ;;  %v2828_v24 = vrot.slane %v2777_v14, 4  ;;  %v2844_v58 = vrot.slane %v2801_v23, 4 }
 0x1b4   : > { %v2833_v25 = vperm.slane %v2827_v12, %v11781_v3  ;;  %v3705_v0 = vperm.slane %v11939_v7, %v11781_v3 }
 0x1b5   : > { %v2815_v42 = vsel %vm246_vm0, %v2814_v5, %v2773_v61  ;;  %v2816_v4 = vrot.slane %v2773_v61, 4  ;;  %v2829_v38 = vsel %vm246_vm0, %v2789_v46, %v2828_v24 }
 0x1b6   : > { %v12007_v30 = vperm.slane %v2815_v42, %v11781_v3  ;;  %v2837_v44 = vperm.slane %v2829_v38, %v11781_v3  ;;  %v2846_v36 = vrot.slane %v2833_v25, 4  ;;  %v2849_v14 = vsel %vm246_vm0, %v2833_v25, %v2848_v16 }
 0x1b7   : > { %v2817_v12 = vsel %vm246_vm0, %v2785_v27, %v2816_v4  ;;  %v6364_v5 = vrot.slane %v2849_v14, 4  ;;  %v903_v61 = vpop.trf.xlu0  ;;  %v3681_v42 = vperm.slane %v3675_v32, %v11741_v28  ;;  %v5468_v16 = vrot.slane %v11959_v47, 4 }
 0x1b8   : > { %v2825_v46 = vperm.slane %v2817_v12, %v11781_v3  ;;  %v12017_v11 = vsel %vm246_vm0, %v12007_v30, %v2840_v49  ;;  %v12020_v24 = vsel %vm246_vm0, %v2846_v36, %v2809_v10  ;;  %v2850_v25 = vrot.slane %v2837_v44, 4 }
 0x1b9   : > { %v2853_v7 = vsel %vm246_vm0, %v2837_v44, %v2852_v18  ;;  %v3722_v38 = vrot.slane %v3685_v40, 4  ;;  %v12035_v32 = vperm.slane %v11942_v37, %v11781_v3  ;;  %v3662_v18 = vrot.slane %v903_v61, 4 }
 0x1ba   : > { %v2842_v27 = vrot.slane %v2825_v46, 4  ;;  %v12026_v4 = vsel %vm246_vm0, %v2825_v46, %v2844_v58  ;;  %v6362_v12 = vrot.slane %v2853_v7, 4  ;;  %v12029_v8 = vsel %vm246_vm0, %v2853_v7, %v6364_v5  ;;  %v12031_v49 = vpop.trf.xlu1  ;;  %v937_v10 = vpop.trf.xlu2 }
 0x1bb   : > { %21745 = vst [vmem:[#allocation21_spill] sm:$0xff] %v12029_v8  ;;  %v12038_v36 = vsel %vm246_vm0, %v2850_v25, %v2813_v1  ;;  %v3665_v44 = vsel %vm246_vm0, %v903_v61, %v3664_v35  ;;  %v3710_v5 = vrot.slane %v3681_v42, 4  ;;  %v3663_v37 = vsel %vm246_vm0, %v3662_v18, %v11902_v62 }
 0x1bc   : > { %v12042_v58 = vsel %vm246_vm0, %v2842_v27, %v2801_v23  ;;  %v12045_v46 = vsel %vm246_vm0, %v6362_v12, %v2849_v14  ;;  %v3673_v7 = vperm.slane %v3665_v44, %v11741_v28  ;;  %v5466_v1 = vrot.slane %v937_v10, 4 }
 0x1bd   : > { %v445_v25 = vperm.slane %v11824_v60, %v11781_v3  ;;  %v3669_v35 = vperm.slane %v3663_v37, %v11741_v28  ;;  %v5469_v14 = vsel %vm246_vm0, %v937_v10, %v5468_v16  ;;  %v3697_v27 = vperm.slane %v11936_v63, %v11781_v3 }
 0x1be   : > { %v3723_v23 = vsel %vm246_vm0, %v3722_v38, %v3673_v7  ;;  %v3724_v61 = vrot.slane %v3673_v7, 4  ;;  %v3744_v12 = vrot.slane %v3705_v0, 4  ;;  %v5467_v62 = vsel %vm246_vm0, %v5466_v1, %v11959_v47 }
 0x1bf   : > { %v3729_v52 = vperm.slane %v3723_v23, %v11781_v3  ;;  %v12060_v44 = vpop.trf.xlu0  ;;  %v3736_v60 = vrot.slane %v12035_v32, 4  ;;  %v3711_v18 = vsel %vm246_vm0, %v3710_v5, %v3669_v35  ;;  %v3712_v37 = vrot.slane %v3669_v35, 4 }
 0x1c0   : > { %21746 = vst [vmem:[#allocation22_spill] sm:$0xff] %v12060_v44  ;;  %v3725_v38 = vsel %vm246_vm0, %v3685_v40, %v3724_v61  ;;  %v12068_v16 = vperm.slane %v3711_v18, %v11781_v3  ;;  %v3748_v23 = vrot.slane %v3709_v39, 4  ;;  %v3740_v5 = vrot.slane %v3697_v27, 4 }
 0x1c1   : > { %v3733_v63 = vperm.slane %v3725_v38, %v11781_v3  ;;  %v3742_v10 = vrot.slane %v3729_v52, 4  ;;  %v12072_v7 = vsel %vm246_vm0, %v3729_v52, %v3744_v12  ;;  %v3713_v44 = vsel %vm246_vm0, %v3681_v42, %v3712_v37 }
 0x1c2   : > { %v12075_v47 = vpop.trf.xlu1  ;;  %v12077_v1 = vpop.trf.xlu2  ;;  %v3721_v35 = vperm.slane %v3713_v44, %v11781_v3  ;;  %v12082_v40 = vsel %vm246_vm0, %v12068_v16, %v3736_v60  ;;  %v462_v52 = vrot.slane %v445_v25, 4  ;;  %v5456_v44 = vrot.slane %v11929_v45, 4 }
 0x1c3   : > { %21747 = vst [vmem:[#allocation23_spill] sm:$0xff] %v12075_v47  ;;  %v12085_v61 = vsel %vm246_vm0, %v3742_v10, %v3705_v0  ;;  %v3746_v18 = vrot.slane %v3733_v63, 4  ;;  %v12088_v12 = vsel %vm246_vm0, %v3733_v63, %v3748_v23  ;;  %v5477_v60 = vperm.slane %v5469_v14, %v11741_v28 }
 0x1c4   : > { %21748 = vst [vmem:[#allocation24_spill] sm:$0xff] %v12088_v12  ;;  %v3738_v42 = vrot.slane %v3721_v35, 4  ;;  %v12091_v37 = vsel %vm246_vm0, %v3721_v35, %v3740_v5  ;;  %v6474_v38 = vrot.slane %v12088_v12, 4  ;;  %v463_v23 = vsel %vm246_vm0, 0.0, %v462_v52 }
 0x1c5   : > { %21749 = vst [vmem:[#allocation25_spill] sm:$0xff] %v12091_v37  ;;  %v12096_v47 = vsel %vm246_vm0, %v3746_v18, %v3709_v39  ;;  %v5473_v5 = vperm.slane %v5467_v62, %v11741_v28  ;;  %v5501_v39 = vperm.slane %v11967_v57, %v11781_v3  ;;  %v5514_v18 = vrot.slane %v5477_v60, 4 }
 0x1c6   : > { %21750 = vst [vmem:[#allocation26_spill] sm:$0xff] %v12096_v47  ;;  %v12100_v0 = vsel %vm246_vm0, %v3738_v42, %v3697_v27  ;;  %v12104_v63 = vsel %vm246_vm0, %v6474_v38, %v12072_v7  ;;  %v12115_v42 = vperm.slane %v11981_v34, %v11781_v3  ;;  %v5497_v52 = vperm.slane %v11976_v2, %v11781_v3 }
 0x1c7   : > { %21751 = vst [vmem:[#allocation27_spill] sm:$0xff] %v12100_v0  ;;  %v905_v10 = vpop.trf.xlu0  ;;  %v5502_v62 = vrot.slane %v5473_v5, 4 }
 0x1c8   : > { %v5454_v35 = vrot.slane %v905_v10, 4  ;;  %v5457_v14 = vsel %vm246_vm0, %v905_v10, %v5456_v44  ;;  %v12124_v44 = vperm.slane %v11812_v55, %v11781_v3  ;;  %v5489_v10 = vperm.slane %v11971_v29, %v11781_v3 }
 0x1c9   : > { %1494 = vxpose.xlu2.b32.start.end [1/1] (short) (narrow) %v463_v23, 32  ;;  %v5465_v57 = vperm.slane %v5457_v14, %v11741_v28  ;;  %v5540_v23 = vrot.slane %v5501_v39, 4  ;;  %v5528_v2 = vrot.slane %v12115_v42, 4  ;;  %v2856_v55 = vrot.slane %v11993_v26, 4 }
 0x1ca   : > { %v12111_v31 = vpop.trf.xlu1  ;;  %v1031_v27 = vpop.trf.xlu2  ;;  %v5455_v38 = vsel %vm246_vm0, %v5454_v35, %v11929_v45  ;;  %v2854_v29 = vrot.slane %v12077_v1, 4  ;;  %v5532_v19 = vrot.slane %v5489_v10, 4 }
 0x1cb   : > { %1462 = vxpose.xlu0.b32.start.end [1/1] (short) (narrow) %v445_v25, 32  ;;  %v5461_v34 = vperm.slane %v5455_v38, %v11741_v28  ;;  %v5515_v41 = vsel %vm246_vm0, %v5514_v18, %v5465_v57  ;;  %v5536_v25 = vrot.slane %v5497_v52, 4  ;;  %v5516_v45 = vrot.slane %v5465_v57, 4 }
 0x1cc   : > { %v5521_v35 = vperm.slane %v5515_v41, %v11781_v3  ;;  %v2855_v15 = vsel %vm246_vm0, %v2854_v29, %v11993_v26 }
 0x1cd   : > { %v5503_v22 = vsel %vm246_vm0, %v5502_v62, %v5461_v34  ;;  %v5504_v21 = vrot.slane %v5461_v34, 4  ;;  %v5517_v18 = vsel %vm246_vm0, %v5477_v60, %v5516_v45 }
 0x1ce   : > { %1526 = vxpose.xlu1.b32.start.end [1/1] (short) (narrow) %v12124_v44, 32  ;;  %v12137_v38 = vperm.slane %v5503_v22, %v11781_v3  ;;  %v5534_v17 = vrot.slane %v5521_v35, 4  ;;  %v5537_v6 = vsel %vm246_vm0, %v5521_v35, %v5536_v25  ;;  %v5525_v41 = vperm.slane %v5517_v18, %v11781_v3 }
 0x1cf   : > { %v998_v14 = vpop.trf.xlu0  ;;  %v5505_v57 = vsel %vm246_vm0, %v5473_v5, %v5504_v21  ;;  %v6700_v54 = vrot.slane %v5537_v6, 4  ;;  %v3752_v21 = vrot.slane %v12031_v49, 4 }
 0x1d0   : > { %v5513_v22 = vperm.slane %v5505_v57, %v11781_v3  ;;  %v12150_v60 = vsel %vm246_vm0, %v12137_v38, %v5528_v2  ;;  %v12153_v25 = vsel %vm246_vm0, %v5534_v17, %v5497_v52  ;;  %v5538_v5 = vrot.slane %v5525_v41, 4 }
 0x1d1   : > { %21753 = vst [vmem:[#allocation29_spill] sm:$0xff] %v12150_v60  ;;  %v5541_v45 = vsel %vm246_vm0, %v5525_v41, %v5540_v23  ;;  %v2857_v17 = vsel %vm246_vm0, %v12077_v1, %v2856_v55  ;;  %v2861_v52 = vperm.slane %v2855_v15, %v11741_v28 }
 0x1d2   : > { %v1062_v62 = vpop.trf.xlu1  ;;  %v12145_v34 = vpop.trf.xlu2  ;;  %21754 = vst [vmem:[#allocation30_spill] sm:$0xff] %v12153_v25  ;;  %v5530_v35 = vrot.slane %v5513_v22, 4  ;;  %v12158_v26 = vsel %vm246_vm0, %v5513_v22, %v5532_v19  ;;  %v6698_v29 = vrot.slane %v5541_v45, 4  ;;  %v12161_v18 = vsel %vm246_vm0, %v5541_v45, %v6700_v54 }
 0x1d3   : > { %21752 = vst [vmem:[#allocation28_spill] sm:$0xff] %v12145_v34  ;;  %v12164_v57 = vsel %vm246_vm0, %v5538_v5, %v5501_v39  ;;  %v2865_v19 = vperm.slane %v2857_v17, %v11741_v28  ;;  %v2868_v22 = vrot.slane %v998_v14, 4  ;;  %v2866_v54 = vrot.slane %v1062_v62, 4 }
 0x1d4   : > { %21755 = vst [vmem:[#allocation31_spill] sm:$0xff] %v12158_v26  ;;  %v12170_v2 = vsel %vm246_vm0, %v5530_v35, %v5489_v10  ;;  %v12173_v23 = vsel %vm246_vm0, %v6698_v29, %v5537_v6  ;;  %v3750_v45 = vrot.slane %v1031_v27, 4  ;;  %v2904_v34 = vrot.slane %v2861_v52, 4 }
 0x1d5   : > { %21756 = vst [vmem:[#allocation32_spill] sm:$0xff] %v12161_v18  ;;  %v2916_v39 = vrot.slane %v2865_v19, 4  ;;  %v3753_v5 = vsel %vm246_vm0, %v1031_v27, %v3752_v21  ;;  %v2867_v1 = vsel %vm246_vm0, %v2866_v54, %v998_v14  ;;  %v2869_v15 = vsel %vm246_vm0, %v1062_v62, %v2868_v22 }
 0x1d6   : > { %21757 = vst [vmem:[#allocation33_spill] sm:$0xff] %v12164_v57  ;;  %v3751_v10 = vsel %vm246_vm0, %v3750_v45, %v12031_v49  ;;  %v3761_v6 = vperm.slane %v3753_v5, %v11741_v28  ;;  %v2873_v29 = vperm.slane %v2867_v1, %v11741_v28  ;;  %v2877_v17 = vperm.slane %v2869_v15, %v11741_v28 }
 0x1d7   : > { %21758 = vst [vmem:[#allocation34_spill] sm:$0xff] %v12170_v2  ;;  %v999_v41 = vpop.trf.xlu0  ;;  %v3757_v18 = vperm.slane %v3751_v10, %v11741_v28 }
 0x1d8   : > { %v3764_v50 = vrot.slane %v999_v41, 4  ;;  %v3812_v27 = vrot.slane %v3761_v6, 4  ;;  %v2902_v14 = vrot.slane %v2873_v29, 4  ;;  %v12187_v62 = vsel %vm246_vm0, %v2873_v29, %v2904_v34 }
 0x1d9   : > { %v2914_v22 = vrot.slane %v2877_v17, 4  ;;  %v12190_v49 = vsel %vm246_vm0, %v2877_v17, %v2916_v39  ;;  %v3800_v54 = vrot.slane %v3757_v18, 4 }
 0x1da   : > { %v1063_v55 = vpop.trf.xlu1  ;;  %v1033_v35 = vpop.trf.xlu2  ;;  %v12194_v5 = vsel %vm246_vm0, %v2902_v14, %v2861_v52  ;;  %v457_v14 = vperm.slane %v11815_v56, %v11781_v3 }
 0x1db   : > { %v3762_v12 = vrot.slane %v1063_v55, 4  ;;  %v3765_v21 = vsel %vm246_vm0, %v1063_v55, %v3764_v50  ;;  %v12197_v1 = vsel %vm246_vm0, %v2914_v22, %v2865_v19  ;;  %v5542_v22 = vrot.slane %v1033_v35, 4 }
 0x1dc   : > { %v3773_v50 = vperm.slane %v3765_v21, %v11741_v28  ;;  %v3734_v21 = vrot.slane %v12068_v16, 4 }
 0x1dd   : > { %v3763_v45 = vsel %vm246_vm0, %v3762_v12, %v999_v41  ;;  %v5544_v12 = vrot.slane %v12111_v31, 4 }
 0x1de   : > { %v3769_v15 = vperm.slane %v3763_v45, %v11741_v28  ;;  %v3810_v39 = vrot.slane %v3773_v50, 4  ;;  %v12207_v29 = vsel %vm246_vm0, %v3773_v50, %v3812_v27  ;;  %v12231_v16 = vsel %vm246_vm0, %v3734_v21, %v12035_v32 }
 0x1df   : > { %v12201_v10 = vpop.trf.xlu0  ;;  %v5545_v27 = vsel %vm246_vm0, %v1033_v35, %v5544_v12  ;;  %v6462_v32 = vrot.slane %v12096_v47, 4 }
 0x1e0   : > { %21759 = vst [vmem:[#allocation35_spill] sm:$0xff] %v12201_v10  ;;  %v3798_v34 = vrot.slane %v3769_v15, 4  ;;  %v12204_v55 = vsel %vm246_vm0, %v3769_v15, %v3800_v54  ;;  %v12218_v17 = vsel %vm246_vm0, %v3810_v39, %v3761_v6  ;;  %v464_v54 = vrot.slane %v12124_v44, 4 }
 0x1e1   : > { %v5543_v15 = vsel %vm246_vm0, %v5542_v22, %v12111_v31  ;;  %v6438_v44 = vrot.slane %v12100_v0, 4  ;;  %v6450_v31 = vrot.slane %v12091_v37, 4 }
 0x1e2   : > { %v12210_v52 = vpop.trf.xlu1  ;;  %v12212_v19 = vpop.trf.xlu2  ;;  %v12215_v41 = vsel %vm246_vm0, %v3798_v34, %v3757_v18  ;;  %v5553_v18 = vperm.slane %v5545_v27, %v11741_v28  ;;  %v5549_v6 = vperm.slane %v5543_v15, %v11741_v28  ;;  %v466_v34 = vrot.slane %v457_v14, 4 }
 0x1e3   : > { %21760 = vst [vmem:[#allocation36_spill] sm:$0xff] %v12210_v52  ;;  %v465_v35 = vsel %vm246_vm0, 0.0, %v464_v54 }
 0x1e4   : > { %21761 = vst [vmem:[#allocation37_spill] sm:$0xff] %v12215_v41  ;;  %v5604_v22 = vrot.slane %v5553_v18, 4  ;;  %v5592_v15 = vrot.slane %v5549_v6, 4  ;;  %v6439_v41 = vsel %vm246_vm0, %v6438_v44, %v12231_v16 }
 0x1e7   : > { %v1001_v45 = vpop.trf.xlu0 }
 0x1e8   : > { %v5556_v50 = vrot.slane %v1001_v45, 4 }
 0x1e9   : > { %1590 = vxpose.xlu2.b32.start.end [1/1] (short) (narrow) %v457_v14, 32  ;;  %v467_v14 = vsel %vm246_vm0, 0.0, %v466_v34  ;;  %v6451_v34 = vsel %vm246_vm0, %v6450_v31, %v12082_v40  ;;  %v5526_v31 = vrot.slane %v12137_v38, 4  ;;  %v6686_v38 = vrot.slane %v12164_v57, 4 }
 0x1ea   : > { %v1065_v56 = vpop.trf.xlu1  ;;  %v12234_v39 = vpop.trf.xlu2 }
 0x1eb   : > { %v5554_v12 = vrot.slane %v1065_v56, 4  ;;  %1558 = vxpose.xlu0.b32.start.end [1/1] (short) (narrow) %v465_v35, 32  ;;  %v5557_v27 = vsel %vm246_vm0, %v1065_v56, %v5556_v50 }
 0x1ec   : > { %v5565_v54 = vperm.slane %v5557_v27, %v11741_v28 }
 0x1ed   : > { %v5555_v21 = vsel %vm246_vm0, %v5554_v12, %v1001_v45 }
 0x1ee   : > { %1622 = vxpose.xlu1.b32.start.end [1/1] (short) (narrow) %v467_v14, 32  ;;  %v5561_v35 = vperm.slane %v5555_v21, %v11741_v28  ;;  %v5602_v10 = vrot.slane %v5565_v54, 4  ;;  %v12247_v37 = vsel %vm246_vm0, %v5565_v54, %v5604_v22  ;;  %v6457_v14 = vperm.slane %v6451_v34, %v11741_v28 }
 0x1ef   : > { %v1094_v52 = vpop.trf.xlu0  ;;  %v6463_v22 = vsel %vm246_vm0, %v6462_v32, %v12085_v61  ;;  %v6481_v21 = vperm.slane %v12104_v63, %v11741_v28  ;;  %v6674_v54 = vrot.slane %v12158_v26, 4  ;;  %v2838_v63 = vrot.slane %v12007_v30, 4 }
 0x1f0   : > { %v2880_v50 = vrot.slane %v1094_v52, 4  ;;  %v5590_v56 = vrot.slane %v5561_v35, 4  ;;  %v12252_v45 = vsel %vm246_vm0, %v5561_v35, %v5592_v15  ;;  %v12255_v12 = vsel %vm246_vm0, %v5602_v10, %v5553_v18 }
 0x1f1   : > { %v6445_v35 = vperm.slane %v6439_v41, %v11741_v28  ;;  %v6469_v32 = vperm.slane %v6463_v22, %v11741_v28  ;;  %v6510_v26 = vrot.slane %v6481_v21, 4  ;;  %v6675_v41 = vsel %vm246_vm0, %v6674_v54, %v12150_v60 }
 0x1f2   : > { %v1158_v27 = vpop.trf.xlu1  ;;  %v12257_v44 = vpop.trf.xlu2  ;;  %v12267_v15 = vsel %vm246_vm0, %v5590_v56, %v5549_v6  ;;  %v12281_v6 = vsel %vm246_vm0, %v5526_v31, %v12115_v42  ;;  %v6681_v42 = vperm.slane %v6675_v41, %v11741_v28  ;;  %v6687_v54 = vsel %vm246_vm0, %v6686_v38, %v12153_v25 }
 0x1f3   : > { %21762 = vst [vmem:[#allocation38_spill] sm:$0xff] %v12257_v44  ;;  %v2878_v10 = vrot.slane %v1158_v27, 4  ;;  %v12270_v18 = vsel %vm246_vm0, %v1158_v27, %v2880_v50  ;;  %v6486_v44 = vrot.slane %v6457_v14, 4  ;;  %v6662_v50 = vrot.slane %v12170_v2, 4 }
 0x1f4   : > { %21763 = vst [vmem:[#allocation39_spill] sm:$0xff] %v12281_v6  ;;  %v12290_v30 = vsel %vm246_vm0, %v6510_v26, %v6469_v32  ;;  %v6338_v27 = vrot.slane %v12026_v4, 4  ;;  %v12305_v26 = vsel %vm246_vm0, %v2838_v63, %v11984_v53  ;;  %v6350_v41 = vrot.slane %v12038_v36, 4 }
 0x1f5   : > { %v12274_v34 = vsel %vm246_vm0, %v2878_v10, %v1094_v52  ;;  %v12287_v56 = vsel %vm246_vm0, %v6486_v44, %v6445_v35  ;;  %21765 = vst [vmem:[#allocation41_spill] sm:$0xff] %v12290_v30  ;;  %v6663_v22 = vsel %vm246_vm0, %v6662_v50, %v12281_v6  ;;  %v6705_v44 = vperm.slane %v12173_v23, %v11741_v28 }
 0x1f6   : > { %21764 = vst [vmem:[#allocation40_spill] sm:$0xff] %v12287_v56  ;;  %v6669_v57 = vperm.slane %v6663_v22, %v11741_v28  ;;  %v6693_v56 = vperm.slane %v6687_v54, %v11741_v28  ;;  %v6710_v2 = vrot.slane %v6681_v42, 4  ;;  %v6326_v38 = vrot.slane %v12042_v58, 4 }
 0x1f7   : > { %v1095_v47 = vpop.trf.xlu0  ;;  %v6734_v22 = vrot.slane %v6705_v44, 4  ;;  %v6339_v23 = vsel %vm246_vm0, %v6338_v27, %v12017_v11  ;;  %v6351_v27 = vsel %vm246_vm0, %v6350_v41, %v12020_v24 }
 0x1f8   : > { %v3776_v52 = vrot.slane %v1095_v47, 4  ;;  %v12319_v53 = vsel %vm246_vm0, %v6710_v2, %v6669_v57  ;;  %v6345_v54 = vperm.slane %v6339_v23, %v11741_v28  ;;  %v6369_v2 = vperm.slane %v12045_v46, %v11741_v28 }
 0x1f9   : > { %21766 = vst [vmem:[#allocation42_spill] sm:$0xff] %v12319_v53  ;;  %v12322_v63 = vsel %vm246_vm0, %v6734_v22, %v6693_v56  ;;  %v6512_v23 = vrot.slane %v6469_v32, 4  ;;  %v6712_v46 = vrot.slane %v6669_v57, 4 }
 0x1fa   : > { %v1159_v31 = vpop.trf.xlu1  ;;  %v12296_v10 = vpop.trf.xlu2  ;;  %21767 = vst [vmem:[#allocation43_spill] sm:$0xff] %v12322_v63  ;;  %v6374_v22 = vrot.slane %v6345_v54, 4 }
 0x1fb   : > { %v3774_v30 = vrot.slane %v1159_v31, 4  ;;  %v12308_v50 = vsel %vm246_vm0, %v1159_v31, %v3776_v52  ;;  %v6327_v31 = vsel %vm246_vm0, %v6326_v38, %v12305_v26  ;;  %v6357_v38 = vperm.slane %v6351_v27, %v11741_v28 }
 0x1fc   : > { %v6513_v0 = vsel %vm246_vm0, %v6481_v21, %v6512_v23  ;;  %v6713_v21 = vsel %vm246_vm0, %v6681_v42, %v6712_v46 }
 0x1fd   : > { %v12313_v6 = vsel %vm246_vm0, %v3774_v30, %v1095_v47  ;;  %v461_v47 = vperm.slane %v11834_v20, %v11781_v3  ;;  %v6333_v30 = vperm.slane %v6327_v31, %v11741_v28  ;;  %v6398_v31 = vrot.slane %v6369_v2, 4 }
 0x1ff   : > { %v12324_v52 = vpop.trf.xlu0  ;;  %v6376_v25 = vrot.slane %v6333_v30, 4  ;;  %v468_v60 = vrot.slane %v461_v47, 4  ;;  %v12342_v20 = vsel %vm246_vm0, %v6374_v22, %v6333_v30  ;;  %v12347_v8 = vsel %vm246_vm0, %v6398_v31, %v6357_v38 }
 0x200   : > { %21768 = vst [vmem:[#allocation44_spill] sm:$0xff] %v12324_v52  ;;  %v6488_v52 = vrot.slane %v6445_v35, 4  ;;  %v12353_v35 = vperm.slane %v6513_v0, %v11781_v3  ;;  %v6400_v30 = vrot.slane %v6357_v38, 4  ;;  %v12362_v0 = vperm.slane %v11766_v51, %v11781_v3 }
 0x201   : > { %21770 = vst [vmem:[#allocation46_spill] sm:$0xff] %v12342_v20  ;;  %v6377_v27 = vsel %vm246_vm0, %v6345_v54, %v6376_v25  ;;  %v469_v20 = vsel %vm246_vm0, 0.0, %v468_v60  ;;  %v2892_v38 = vrot.slane %v12212_v19, 4 }
 0x202   : > { %v12336_v63 = vpop.trf.xlu1  ;;  %v12338_v53 = vpop.trf.xlu2  ;;  %v6489_v41 = vsel %vm246_vm0, %v6457_v14, %v6488_v52  ;;  %v6538_v14 = vrot.slane %v12353_v35, 4  ;;  %v6401_v57 = vsel %vm246_vm0, %v6369_v2, %v6400_v30  ;;  %v6736_v52 = vrot.slane %v6693_v56, 4 }
 0x203   : > { %21769 = vst [vmem:[#allocation45_spill] sm:$0xff] %v12336_v63  ;;  %v12350_v63 = vperm.slane %v6489_v41, %v11781_v3  ;;  %v12371_v60 = vperm.slane %v6377_v27, %v11781_v3  ;;  %v12374_v54 = vperm.slane %v6401_v57, %v11781_v3  ;;  %v2889_v56 = vperm.slane %v12270_v18, %v11741_v28 }
 0x204   : > { %v6737_v51 = vsel %vm246_vm0, %v6705_v44, %v6736_v52  ;;  %v12385_v41 = vperm.slane %v6713_v21, %v11781_v3  ;;  %v2885_v18 = vperm.slane %v12274_v34, %v11741_v28  ;;  %v2913_v30 = vperm.slane %v12187_v62, %v11781_v3 }
 0x205   : > { %v12368_v25 = vsel %vm246_vm0, %v6538_v14, %v12350_v63  ;;  %v12388_v46 = vperm.slane %v6737_v51, %v11781_v3  ;;  %v2925_v57 = vperm.slane %v12190_v49, %v11781_v3 }
 0x206   : > { %21771 = vst [vmem:[#allocation47_spill] sm:$0xff] %v12368_v25  ;;  %v2928_v52 = vrot.slane %v2885_v18, 4 }
 0x207   : > { %v1097_v32 = vpop.trf.xlu0 }
 0x208   : > { %v5568_v22 = vrot.slane %v1097_v32, 4 }
 0x209   : > { %1686 = vxpose.xlu2.b32.start.end [1/1] (short) (narrow) %v469_v20, 32  ;;  %v6426_v20 = vrot.slane %v12374_v54, 4 }
 0x20a   : > { %v1161_v23 = vpop.trf.xlu1  ;;  %v12364_v31 = vpop.trf.xlu2 }
 0x20b   : > { %v5566_v42 = vrot.slane %v1161_v23, 4  ;;  %v12379_v2 = vsel %vm246_vm0, %v1161_v23, %v5568_v22  ;;  %1654 = vxpose.xlu0.b32.start.end [1/1] (short) (narrow) %v461_v47, 32  ;;  %v12398_v44 = vsel %vm246_vm0, %v6426_v20, %v12371_v60  ;;  %v6762_v47 = vrot.slane %v12388_v46, 4 }
 0x20c   : > { %21772 = vst [vmem:[#allocation48_spill] sm:$0xff] %v12398_v44  ;;  %v2940_v22 = vrot.slane %v2889_v56, 4 }
 0x20d   : > { %v12393_v27 = vsel %vm246_vm0, %v5566_v42, %v1097_v32  ;;  %v12408_v21 = vsel %vm246_vm0, %v6762_v47, %v12385_v41  ;;  %v12413_v42 = vperm.slane %v12194_v5, %v11781_v3 }
 0x20e   : > { %1718 = vxpose.xlu1.b32.start.end [1/1] (short) (narrow) %v12362_v0, 32  ;;  %21773 = vst [vmem:[#allocation49_spill] sm:$0xff] %v12408_v21  ;;  %v2964_v21 = vrot.slane %v2925_v57, 4 }
 0x20f   : > { %v1190_v14 = vpop.trf.xlu0  ;;  %21774 = vst [vmem:[#allocation50_spill] sm:$0xff] %v12413_v42 }
 0x210   : > { %v2890_v34 = vrot.slane %v1190_v14, 4  ;;  %v2893_v32 = vsel %vm246_vm0, %v1190_v14, %v2892_v38  ;;  %v12423_v38 = vperm.slane %v12197_v1, %v11781_v3 }
 0x211   : > { %v2901_v23 = vperm.slane %v2893_v32, %v11741_v28  ;;  %v2956_v32 = vrot.slane %v2913_v30, 4 }
 0x212   : > { %v2891_v62 = vsel %vm246_vm0, %v2890_v34, %v12212_v19  ;;  %v12417_v51 = vpop.trf.xlu1  ;;  %v12419_v49 = vpop.trf.xlu2  ;;  %21776 = vst [vmem:[#allocation52_spill] sm:$0xff] %v12423_v38  ;;  %v3781_v19 = vperm.slane %v12313_v6, %v11741_v28  ;;  %v3785_v6 = vperm.slane %v12308_v50, %v11741_v28 }
 0x213   : > { %21775 = vst [vmem:[#allocation51_spill] sm:$0xff] %v12419_v49  ;;  %v2897_v20 = vperm.slane %v2891_v62, %v11741_v28  ;;  %v2938_v47 = vrot.slane %v2901_v23, 4  ;;  %v2941_v14 = vsel %vm246_vm0, %v2901_v23, %v2940_v22  ;;  %v2952_v23 = vrot.slane %v12413_v42, 4 }
 0x214   : > { %v2949_v5 = vperm.slane %v2941_v14, %v11781_v3  ;;  %v2960_v14 = vrot.slane %v12423_v38, 4  ;;  %v3824_v38 = vrot.slane %v3781_v19, 4 }
 0x215   : > { %v2926_v34 = vrot.slane %v2897_v20, 4  ;;  %v2929_v44 = vsel %vm246_vm0, %v2897_v20, %v2928_v52  ;;  %v2939_v25 = vsel %vm246_vm0, %v2938_v47, %v2889_v56  ;;  %v3788_v56 = vrot.slane %v12234_v39, 4 }
 0x216   : > { %v2937_v1 = vperm.slane %v2929_v44, %v11781_v3  ;;  %v12434_v49 = vperm.slane %v2939_v25, %v11781_v3  ;;  %v2962_v62 = vrot.slane %v2949_v5, 4  ;;  %v12437_v22 = vsel %vm246_vm0, %v2949_v5, %v2964_v21 }
 0x217   : > { %21778 = vst [vmem:[#allocation54_spill] sm:$0xff] %v12437_v22  ;;  %v2927_v52 = vsel %vm246_vm0, %v2926_v34, %v2885_v18  ;;  %v1191_v20 = vpop.trf.xlu0 }
 0x218   : > { %21777 = vst [vmem:[#allocation53_spill] sm:$0xff] %v12434_v49  ;;  %v12446_v44 = vperm.slane %v2927_v52, %v11781_v3  ;;  %v2954_v25 = vrot.slane %v2937_v1, 4  ;;  %v12449_v47 = vsel %vm246_vm0, %v2937_v1, %v2956_v32  ;;  %v12453_v21 = vsel %vm246_vm0, %v12434_v49, %v2960_v14 }
 0x219   : > { %21780 = vst [vmem:[#allocation56_spill] sm:$0xff] %v12449_v47  ;;  %v12456_v5 = vsel %vm246_vm0, %v2962_v62, %v2925_v57  ;;  %v3786_v50 = vrot.slane %v1191_v20, 4  ;;  %v3809_v1 = vperm.slane %v12204_v55, %v11781_v3  ;;  %v3836_v14 = vrot.slane %v3785_v6, 4 }
 0x21a   : > { %21779 = vst [vmem:[#allocation55_spill] sm:$0xff] %v12446_v44  ;;  %v12460_v18 = vsel %vm246_vm0, %v12446_v44, %v2952_v23  ;;  %v12463_v34 = vsel %vm246_vm0, %v2954_v25, %v2913_v30  ;;  %v12465_v52 = vpop.trf.xlu1  ;;  %v12467_v32 = vpop.trf.xlu2  ;;  %v6812_v57 = vrot.slane %v12453_v21, 4  ;;  %v3821_v23 = vperm.slane %v12207_v29, %v11781_v3 }
 0x21b   : > { %21781 = vst [vmem:[#allocation57_spill] sm:$0xff] %v12453_v21  ;;  %v3787_v62 = vsel %vm246_vm0, %v3786_v50, %v12234_v39  ;;  %v3789_v42 = vsel %vm246_vm0, %v1191_v20, %v3788_v56  ;;  %v3817_v55 = vperm.slane %v12218_v17, %v11781_v3  ;;  %v3852_v39 = vrot.slane %v3809_v1, 4 }
 0x21c   : > { %21782 = vst [vmem:[#allocation58_spill] sm:$0xff] %v12456_v5  ;;  %v3793_v30 = vperm.slane %v3787_v62, %v11741_v28  ;;  %v12480_v25 = vsel %vm246_vm0, %v12437_v22, %v6812_v57  ;;  %v3860_v62 = vrot.slane %v3821_v23, 4 }
 0x21d   : > { %21783 = vst [vmem:[#allocation59_spill] sm:$0xff] %v12460_v18  ;;  %v3797_v18 = vperm.slane %v3789_v42, %v11741_v28 }
 0x21e   : > { %21784 = vst [vmem:[#allocation60_spill] sm:$0xff] %v12463_v34  ;;  %v3822_v21 = vrot.slane %v3793_v30, 4  ;;  %v3825_v34 = vsel %vm246_vm0, %v3793_v30, %v3824_v38  ;;  %v3856_v38 = vrot.slane %v3817_v55, 4 }
 0x21f   : > { %21785 = vst [vmem:[#allocation61_spill] sm:$0xff] %v12480_v25  ;;  %v3833_v50 = vperm.slane %v3825_v34, %v11781_v3  ;;  %v3834_v29 = vrot.slane %v3797_v18, 4  ;;  %v3837_v20 = vsel %vm246_vm0, %v3797_v18, %v3836_v14  ;;  %v12488_v56 = vpop.trf.xlu0 }
 0x220   : > { %v12491_v57 = vsel %vm246_vm0, %v3822_v21, %v3781_v19  ;;  %v3845_v42 = vperm.slane %v3837_v20, %v11781_v3 }
 0x221   : > { %21786 = vst [vmem:[#allocation62_spill] sm:$0xff] %v12491_v57  ;;  %v3835_v25 = vsel %vm246_vm0, %v3834_v29, %v3785_v6  ;;  %v3850_v17 = vrot.slane %v3833_v50, 4  ;;  %v12496_v5 = vsel %vm246_vm0, %v3833_v50, %v3852_v39  ;;  %v518_v50 = vrot.slane %v12362_v0, 4 }
 0x222   : > { %21787 = vst [vmem:[#allocation63_spill] sm:$0xff] %v12496_v5  ;;  %v3841_v34 = vperm.slane %v3835_v25, %v11781_v3  ;;  %v3858_v30 = vrot.slane %v3845_v42, 4  ;;  %v3861_v18 = vsel %vm246_vm0, %v3845_v42, %v3860_v62  ;;  %v12500_v14 = vpop.trf.xlu1  ;;  %v12502_v44 = vpop.trf.xlu2  ;;  %v505_v62 = vperm.slane %v11772_v59, %v11781_v3 }
 0x223   : > { %21788 = vst [vmem:[#allocation64_spill] sm:$0xff] %v12500_v14  ;;  %v12505_v19 = vsel %vm246_vm0, %v3850_v17, %v3809_v1  ;;  %v6922_v21 = vrot.slane %v3861_v18, 4  ;;  %v5580_v42 = vrot.slane %v12296_v10, 4  ;;  %v5573_v1 = vperm.slane %v12393_v27, %v11741_v28 }
 0x224   : > { %21789 = vst [vmem:[#allocation65_spill] sm:$0xff] %v12505_v19  ;;  %v3854_v20 = vrot.slane %v3841_v34, 4  ;;  %v3857_v6 = vsel %vm246_vm0, %v3841_v34, %v3856_v38  ;;  %v12509_v39 = vsel %vm246_vm0, %v3858_v30, %v3821_v23  ;;  %v5577_v23 = vperm.slane %v12379_v2, %v11741_v28 }
 0x225   : > { %21790 = vst [vmem:[#allocation66_spill] sm:$0xff] %v12509_v39  ;;  %v12513_v25 = vsel %vm246_vm0, %v6922_v21, %v3857_v6  ;;  %v6924_v29 = vrot.slane %v3857_v6, 4  ;;  %v519_v30 = vsel %vm246_vm0, 0.0, %v518_v50  ;;  %v5601_v59 = vperm.slane %v12252_v45, %v11781_v3 }
 0x226   : > { %21791 = vst [vmem:[#allocation67_spill] sm:$0xff] %v12513_v25  ;;  %v12521_v17 = vsel %vm246_vm0, %v3854_v20, %v3817_v55  ;;  %v12533_v21 = vperm.slane %v12255_v12, %v11781_v3  ;;  %v5613_v27 = vperm.slane %v12247_v37, %v11781_v3  ;;  %v520_v55 = vrot.slane %v505_v62, 4 }
 0x227   : > { %21792 = vst [vmem:[#allocation68_spill] sm:$0xff] %v12521_v17  ;;  %v12526_v0 = vsel %vm246_vm0, %v3861_v18, %v6924_v29  ;;  %v1193_v38 = vpop.trf.xlu0  ;;  %v12539_v2 = vperm.slane %v12267_v15, %v11781_v3  ;;  %v5616_v18 = vrot.slane %v5573_v1, 4  ;;  %v5628_v12 = vrot.slane %v5577_v23, 4 }
 0x228   : > { %21793 = vst [vmem:[#allocation69_spill] sm:$0xff] %v12526_v0  ;;  %v5578_v34 = vrot.slane %v1193_v38, 4  ;;  %v5581_v6 = vsel %vm246_vm0, %v1193_v38, %v5580_v42  ;;  %v2980_v29 = vrot.slane %v12417_v51, 4  ;;  %v5652_v25 = vrot.slane %v5613_v27, 4  ;;  %v21978_v22 = vld [vmem:[#allocation62_spill] sm:$0xff] }
 0x229   : > { %21794 = vst [vmem:[#allocation70_spill] sm:$0xff] %v12533_v21  ;;  %1782 = vxpose.xlu2.b32.start.end [1/1] (short) (narrow) %v505_v62, 32  ;;  %v5644_v62 = vrot.slane %v5601_v59, 4  ;;  %v5589_v15 = vperm.slane %v5581_v6, %v11741_v28  ;;  %v521_v19 = vsel %vm246_vm0, 0.0, %v520_v55  ;;  %v5640_v0 = vrot.slane %v12539_v2, 4 }
 0x22a   : > { %21795 = vst [vmem:[#allocation71_spill] sm:$0xff] %v12539_v2  ;;  %v5579_v20 = vsel %vm246_vm0, %v5578_v34, %v12296_v10  ;;  %v12544_v45 = vpop.trf.xlu1  ;;  %v1319_v50 = vpop.trf.xlu2  ;;  %v5648_v10 = vrot.slane %v12533_v21, 4  ;;  %v2968_v34 = vrot.slane %v12338_v53, 4  ;;  %v2978_v2 = vrot.slane %v12502_v44, 4 }
 0x22b   : > { %1750 = vxpose.xlu0.b32.start.end [1/1] (short) (narrow) %v519_v30, 32  ;;  %v5585_v37 = vperm.slane %v5579_v20, %v11741_v28  ;;  %v5626_v17 = vrot.slane %v5589_v15, 4  ;;  %v5629_v20 = vsel %vm246_vm0, %v5589_v15, %v5628_v12  ;;  %v2981_v21 = vsel %vm246_vm0, %v12502_v44, %v2980_v29 }
 0x22c   : > { %v5637_v55 = vperm.slane %v5629_v20, %v11781_v3  ;;  %v13643_v49 = vperm.slane %v21978_v22, %v11781_v3 }
 0x22d   : > { %v5614_v42 = vrot.slane %v5585_v37, 4  ;;  %v5617_v38 = vsel %vm246_vm0, %v5585_v37, %v5616_v18 }
 0x22e   : > { %1814 = vxpose.xlu1.b32.start.end [1/1] (short) (narrow) %v521_v19, 32  ;;  %v5625_v30 = vperm.slane %v5617_v38, %v11781_v3  ;;  %v5627_v19 = vsel %vm246_vm0, %v5626_v17, %v5577_v23  ;;  %v12572_v15 = vsel %vm246_vm0, %v5637_v55, %v5652_v25  ;;  %v3876_v25 = vrot.slane %v12465_v52, 4 }
 0x22f   : > { %v1286_v39 = vpop.trf.xlu0  ;;  %v5615_v6 = vsel %vm246_vm0, %v5614_v42, %v5573_v1  ;;  %v12569_v12 = vperm.slane %v5627_v19, %v11781_v3  ;;  %v5650_v1 = vrot.slane %v5637_v55, 4  ;;  %21799 = vst [vmem:[#allocation75_spill] sm:$0xff] %v12572_v15  ;;  %v2989_v55 = vperm.slane %v2981_v21, %v11741_v28 }
 0x230   : > { %v12562_v18 = vperm.slane %v5615_v6, %v11781_v3  ;;  %v5642_v37 = vrot.slane %v5625_v30, 4  ;;  %v12566_v38 = vsel %vm246_vm0, %v5625_v30, %v5644_v62  ;;  %v2966_v42 = vrot.slane %v1286_v39, 4 }
 0x231   : > { %21797 = vst [vmem:[#allocation73_spill] sm:$0xff] %v12566_v38  ;;  %v12587_v23 = vsel %vm246_vm0, %v12569_v12, %v5648_v10  ;;  %v12590_v62 = vsel %vm246_vm0, %v5650_v1, %v5613_v27  ;;  %v2979_v6 = vsel %vm246_vm0, %v2978_v2, %v12417_v51  ;;  %v2969_v10 = vsel %vm246_vm0, %v1286_v39, %v2968_v34 }
 0x232   : > { %21796 = vst [vmem:[#allocation72_spill] sm:$0xff] %v12562_v18  ;;  %v12574_v20 = vpop.trf.xlu1  ;;  %v12576_v44 = vpop.trf.xlu2  ;;  %v12580_v29 = vsel %vm246_vm0, %v12562_v18, %v5640_v0  ;;  %v12583_v17 = vsel %vm246_vm0, %v5642_v37, %v5601_v59  ;;  %v7148_v30 = vrot.slane %v12587_v23, 4  ;;  %v2985_v0 = vperm.slane %v2979_v6, %v11741_v28 }
 0x233   : > { %21798 = vst [vmem:[#allocation74_spill] sm:$0xff] %v12569_v12  ;;  %v2967_v59 = vsel %vm246_vm0, %v2966_v42, %v12338_v53  ;;  %v2977_v37 = vperm.slane %v2969_v10, %v11741_v28  ;;  %v3864_v51 = vrot.slane %v12364_v31, 4  ;;  %v3026_v6 = vrot.slane %v2989_v55, 4 }
 0x234   : > { %21800 = vst [vmem:[#allocation76_spill] sm:$0xff] %v12580_v29  ;;  %v12603_v27 = vsel %vm246_vm0, %v12572_v15, %v7148_v30  ;;  %v2973_v19 = vperm.slane %v2967_v59, %v11741_v28  ;;  %v3014_v2 = vrot.slane %v2985_v0, 4  ;;  %v3877_v53 = vsel %vm246_vm0, %v1319_v50, %v3876_v25 }
 0x235   : > { %21801 = vst [vmem:[#allocation77_spill] sm:$0xff] %v12583_v17  ;;  %v12613_v34 = vsel %vm246_vm0, %v3026_v6, %v2977_v37  ;;  %v3885_v59 = vperm.slane %v3877_v53, %v11741_v28 }
 0x236   : > { %21802 = vst [vmem:[#allocation78_spill] sm:$0xff] %v12587_v23  ;;  %v3874_v23 = vrot.slane %v1319_v50, 4  ;;  %v3016_v21 = vrot.slane %v2973_v19, 4  ;;  %v12610_v39 = vsel %vm246_vm0, %v3014_v2, %v2973_v19 }
 0x237   : > { %21803 = vst [vmem:[#allocation79_spill] sm:$0xff] %v12590_v62  ;;  %v1287_v1 = vpop.trf.xlu0  ;;  %v3028_v62 = vrot.slane %v2977_v37, 4  ;;  %v3922_v19 = vrot.slane %v3885_v59, 4 }
 0x238   : > { %21804 = vst [vmem:[#allocation80_spill] sm:$0xff] %v12603_v27  ;;  %v3862_v42 = vrot.slane %v1287_v1, 4  ;;  %v3875_v30 = vsel %vm246_vm0, %v3874_v23, %v12465_v52  ;;  %v12621_v29 = vsel %vm246_vm0, %v2985_v0, %v3016_v21  ;;  %v3865_v2 = vsel %vm246_vm0, %v1287_v1, %v3864_v51 }
 0x239   : > { %21805 = vst [vmem:[#allocation81_spill] sm:$0xff] %v12610_v39  ;;  %v12624_v50 = vsel %vm246_vm0, %v2989_v55, %v3028_v62  ;;  %v3881_v25 = vperm.slane %v3875_v30, %v11741_v28  ;;  %v3873_v6 = vperm.slane %v3865_v2, %v11741_v28  ;;  %v513_v55 = vperm.slane %v11757_v43, %v11781_v3 }
 0x23a   : > { %v12618_v10 = vpop.trf.xlu1  ;;  %v1321_v27 = vpop.trf.xlu2  ;;  %v3863_v37 = vsel %vm246_vm0, %v3862_v42, %v12364_v31  ;;  %v5668_v1 = vrot.slane %v12544_v45, 4  ;;  %v538_v2 = vrot.slane %v11877_v13, 4 }
 0x23b   : > { %v3910_v52 = vrot.slane %v3881_v25, 4  ;;  %v3869_v23 = vperm.slane %v3863_v37, %v11741_v28  ;;  %v12640_v21 = vsel %vm246_vm0, %v3922_v19, %v3873_v6  ;;  %v3924_v31 = vrot.slane %v3873_v6, 4 }
 0x23c   : > { %v5669_v43 = vsel %vm246_vm0, %v1321_v27, %v5668_v1  ;;  %v5656_v19 = vrot.slane %v12467_v32, 4  ;;  %v539_v17 = vsel %vm246_vm0, %v538_v2, %v11716_v9  ;;  %v526_v1 = vrot.slane %v11747_v33, 4 }
 0x23d   : > { %v12635_v0 = vsel %vm246_vm0, %v3910_v52, %v3869_v23  ;;  %v3912_v62 = vrot.slane %v3869_v23, 4  ;;  %v12649_v37 = vsel %vm246_vm0, %v3885_v59, %v3924_v31  ;;  %v522_v52 = vrot.slane %v513_v55, 4 }
 0x23e   : > { %v5666_v23 = vrot.slane %v1321_v27, 4  ;;  %v2992_v31 = vrot.slane %v12574_v20, 4 }
 0x23f   : > { %v12632_v53 = vpop.trf.xlu0  ;;  %v12644_v51 = vsel %vm246_vm0, %v3881_v25, %v3912_v62  ;;  %v5677_v62 = vperm.slane %v5669_v43, %v11741_v28  ;;  %v523_v59 = vsel %vm246_vm0, 0.0, %v522_v52 }
 0x240   : > { %21806 = vst [vmem:[#allocation82_spill] sm:$0xff] %v12632_v53  ;;  %v5667_v25 = vsel %vm246_vm0, %v5666_v23, %v12544_v45  ;;  %v12669_v23 = vperm.slane %v539_v17, %v11741_v28 }
 0x241   : > { %v5673_v39 = vperm.slane %v5667_v25, %v11741_v28  ;;  %v5714_v38 = vrot.slane %v5677_v62, 4 }
 0x242   : > { %v12646_v42 = vpop.trf.xlu1  ;;  %v1414_v30 = vpop.trf.xlu2 }
 0x243   : > { %21807 = vst [vmem:[#allocation83_spill] sm:$0xff] %v12646_v42  ;;  %v2990_v27 = vrot.slane %v1414_v30, 4  ;;  %v5702_v2 = vrot.slane %v5673_v39, 4  ;;  %v3888_v42 = vrot.slane %v12618_v10, 4 }
 0x247   : > { %v1289_v6 = vpop.trf.xlu0 }
 0x248   : > { %v5654_v12 = vrot.slane %v1289_v6, 4  ;;  %v5657_v52 = vsel %vm246_vm0, %v1289_v6, %v5656_v19 }
 0x249   : > { %1878 = vxpose.xlu2.b32.start.end [1/1] (short) (narrow) %v523_v59, 32  ;;  %v5665_v25 = vperm.slane %v5657_v52, %v11741_v28  ;;  %v12675_v59 = vperm.slane %v11763_v48, %v11781_v3  ;;  %v12689_v48 = vld [vmem:[%s11653_s15 + $0x28] sm:$0xff] }
 0x24a   : > { %v12663_v15 = vpop.trf.xlu1  ;;  %v1415_v18 = vpop.trf.xlu2  ;;  %v5655_v45 = vsel %vm246_vm0, %v5654_v12, %v12467_v32  ;;  %v2991_v32 = vsel %vm246_vm0, %v2990_v27, %v12574_v20  ;;  %v2993_v12 = vsel %vm246_vm0, %v1414_v30, %v2992_v31  ;;  %v527_v52 = vsel %vm246_vm0, %v526_v1, %v12689_v48 }
 0x24b   : > { %1846 = vxpose.xlu0.b32.start.end [1/1] (short) (narrow) %v513_v55, 32  ;;  %v5661_v43 = vperm.slane %v5655_v45, %v11741_v28  ;;  %v3886_v19 = vrot.slane %v1415_v18, 4  ;;  %v12685_v6 = vsel %vm246_vm0, %v5714_v38, %v5665_v25  ;;  %v5716_v45 = vrot.slane %v5665_v25, 4 }
 0x24c   : > { %v2997_v20 = vperm.slane %v2991_v32, %v11741_v28  ;;  %v3001_v30 = vperm.slane %v2993_v12, %v11741_v28  ;;  %v550_v25 = vrot.slane %v12669_v23, 4  ;;  %v3033_v1 = vperm.slane %v12613_v34, %v11781_v3 }
 0x24d   : > { %v12682_v55 = vsel %vm246_vm0, %v5702_v2, %v5661_v43  ;;  %v5704_v17 = vrot.slane %v5661_v43, 4  ;;  %v12699_v2 = vsel %vm246_vm0, %v5677_v62, %v5716_v45  ;;  %v3887_v43 = vsel %vm246_vm0, %v3886_v19, %v12618_v10 }
 0x24e   : > { %21808 = vst [vmem:[#allocation84_spill] sm:$0xff] %v12682_v55  ;;  %1910 = vxpose.xlu1.b32.start.end [1/1] (short) (narrow) %v12675_v59, 32  ;;  %v12705_v55 = vperm.slane %v527_v52, %v11741_v28  ;;  %v3052_v32 = vrot.slane %v3001_v30, 4  ;;  %v3025_v62 = vperm.slane %v12621_v29, %v11781_v3  ;;  %v3037_v10 = vperm.slane %v12624_v50, %v11781_v3 }
 0x24f   : > { %v1382_v31 = vpop.trf.xlu0  ;;  %v12696_v27 = vsel %vm246_vm0, %v5673_v39, %v5704_v17  ;;  %v3889_v39 = vsel %vm246_vm0, %v1415_v18, %v3888_v42  ;;  %v3040_v52 = vrot.slane %v2997_v20, 4  ;;  %v6540_v18 = vrot.slane %v12350_v63, 4 }
 0x250   : > { %v3004_v38 = vrot.slane %v1382_v31, 4  ;;  %v551_v53 = vsel %vm246_vm0, %v550_v25, %v12705_v55  ;;  %v3072_v42 = vrot.slane %v3033_v1, 4  ;;  %v3068_v50 = vrot.slane %v3025_v62, 4 }
 0x251   : > { %v3076_v14 = vrot.slane %v3037_v10, 4 }
 0x252   : > { %v1446_v12 = vpop.trf.xlu1  ;;  %v12710_v17 = vpop.trf.xlu2 }
 0x253   : > { %21809 = vst [vmem:[#allocation85_spill] sm:$0xff] %v12710_v17  ;;  %v3002_v19 = vrot.slane %v1446_v12, 4  ;;  %v3005_v45 = vsel %vm246_vm0, %v1446_v12, %v3004_v38 }
 0x254   : > { %v3013_v5 = vperm.slane %v3005_v45, %v11741_v28  ;;  %v12727_v45 = vsel %vm246_vm0, %v12353_v35, %v6540_v18 }
 0x255   : > { %v3003_v34 = vsel %vm246_vm0, %v3002_v19, %v1382_v31  ;;  %21810 = vst [vmem:[#allocation86_spill] sm:$0xff] %v12727_v45  ;;  %v3893_v19 = vperm.slane %v3887_v43, %v11741_v28 }
 0x256   : > { %v3009_v17 = vperm.slane %v3003_v34, %v11741_v28  ;;  %v3050_v29 = vrot.slane %v3013_v5, 4  ;;  %v3053_v57 = vsel %vm246_vm0, %v3013_v5, %v3052_v32 }
 0x257   : > { %v3061_v38 = vperm.slane %v3053_v57, %v11781_v3  ;;  %v1383_v12 = vpop.trf.xlu0  ;;  %v12737_v57 = vperm.slane %v12635_v0, %v11781_v3 }
 0x258   : > { %v3038_v31 = vrot.slane %v3009_v17, 4  ;;  %v3041_v25 = vsel %vm246_vm0, %v3009_v17, %v3040_v52  ;;  %v3051_v63 = vsel %vm246_vm0, %v3050_v29, %v3001_v30  ;;  %v3897_v17 = vperm.slane %v3889_v39, %v11741_v28 }
 0x259   : > { %v3049_v34 = vperm.slane %v3041_v25, %v11781_v3  ;;  %v3057_v5 = vperm.slane %v3051_v63, %v11781_v3  ;;  %v3074_v32 = vrot.slane %v3061_v38, 4  ;;  %v3077_v47 = vsel %vm246_vm0, %v3061_v38, %v3076_v14  ;;  %21811 = vst [vmem:[#allocation87_spill] sm:$0xff] %v12737_v57 }
 0x25a   : > { %v12740_v35 = vsel %vm246_vm0, %v3038_v31, %v2997_v20  ;;  %v7258_v18 = vrot.slane %v3077_v47, 4  ;;  %v1447_v30 = vpop.trf.xlu1  ;;  %v1417_v52 = vpop.trf.xlu2  ;;  %v3900_v63 = vrot.slane %v1383_v12, 4  ;;  %v5680_v14 = vrot.slane %v12663_v15, 4 }
 0x25b   : > { %21812 = vst [vmem:[#allocation88_spill] sm:$0xff] %v12740_v35  ;;  %v3066_v43 = vrot.slane %v3049_v34, 4  ;;  %v12744_v29 = vsel %vm246_vm0, %v3049_v34, %v3068_v50  ;;  %v3070_v25 = vrot.slane %v3057_v5, 4  ;;  %v3073_v38 = vsel %vm246_vm0, %v3057_v5, %v3072_v42 }
 0x25c   : > { %21813 = vst [vmem:[#allocation89_spill] sm:$0xff] %v12744_v29  ;;  %v12749_v0 = vsel %vm246_vm0, %v3074_v32, %v3037_v10  ;;  %v3898_v20 = vrot.slane %v1447_v30, 4  ;;  %v3921_v31 = vperm.slane %v12644_v51, %v11781_v3  ;;  %v3936_v50 = vrot.slane %v3893_v19, 4 }
 0x25d   : > { %21814 = vst [vmem:[#allocation90_spill] sm:$0xff] %v12749_v0  ;;  %v12754_v39 = vsel %vm246_vm0, %v3066_v43, %v3025_v62  ;;  %v12757_v45 = vsel %vm246_vm0, %v3070_v25, %v3033_v1  ;;  %v12760_v34 = vsel %vm246_vm0, %v7258_v18, %v3073_v38  ;;  %v7260_v29 = vrot.slane %v3073_v38, 4 }
 0x25e   : > { %21815 = vst [vmem:[#allocation91_spill] sm:$0xff] %v12754_v39  ;;  %v3948_v35 = vrot.slane %v3897_v17, 4  ;;  %v3899_v42 = vsel %vm246_vm0, %v3898_v20, %v1383_v12  ;;  %v3933_v10 = vperm.slane %v12649_v37, %v11781_v3  ;;  %v3901_v5 = vsel %vm246_vm0, %v1447_v30, %v3900_v63 }
 0x25f   : > { %21816 = vst [vmem:[#allocation92_spill] sm:$0xff] %v12757_v45  ;;  %v3905_v51 = vperm.slane %v3899_v42, %v11741_v28  ;;  %v12767_v62 = vpop.trf.xlu0  ;;  %v5678_v32 = vrot.slane %v1417_v52, 4  ;;  %v12770_v1 = vsel %vm246_vm0, %v3077_v47, %v7260_v29  ;;  %v3909_v18 = vperm.slane %v3901_v5, %v11741_v28 }
 0x260   : > { %21817 = vst [vmem:[#allocation93_spill] sm:$0xff] %v12760_v34  ;;  %v5681_v43 = vsel %vm246_vm0, %v1417_v52, %v5680_v14  ;;  %v557_v25 = vperm.slane %v551_v53, %v11781_v3  ;;  %v12777_v12 = vperm.slane %v12640_v21, %v11781_v3  ;;  %v3964_v38 = vrot.slane %v3921_v31, 4 }
 0x261   : > { %21818 = vst [vmem:[#allocation94_spill] sm:$0xff] %v12770_v1  ;;  %v3934_v37 = vrot.slane %v3905_v51, 4  ;;  %v3937_v30 = vsel %vm246_vm0, %v3905_v51, %v3936_v50  ;;  %v5679_v63 = vsel %vm246_vm0, %v5678_v32, %v12663_v15  ;;  %v3946_v29 = vrot.slane %v3909_v18, 4 }
 0x262   : > { %21819 = vst [vmem:[#allocation95_spill] sm:$0xff] %v12777_v12  ;;  %v3945_v47 = vperm.slane %v3937_v30, %v11781_v3  ;;  %v3949_v20 = vsel %vm246_vm0, %v3909_v18, %v3948_v35  ;;  %v12784_v42 = vpop.trf.xlu1  ;;  %v12786_v52 = vpop.trf.xlu2  ;;  %v3960_v53 = vrot.slane %v12737_v57, 4  ;;  %v3972_v21 = vrot.slane %v3933_v10, 4 }
 0x263   : > { %v3935_v14 = vsel %vm246_vm0, %v3934_v37, %v3893_v19  ;;  %v3957_v50 = vperm.slane %v3949_v20, %v11781_v3  ;;  %v3947_v15 = vsel %vm246_vm0, %v3946_v29, %v3897_v17  ;;  %v3968_v35 = vrot.slane %v12777_v12, 4 }
 0x264   : > { %v12792_v5 = vperm.slane %v3935_v14, %v11781_v3  ;;  %v3962_v51 = vrot.slane %v3945_v47, 4  ;;  %v12796_v32 = vsel %vm246_vm0, %v3945_v47, %v3964_v38  ;;  %v12800_v18 = vperm.slane %v3947_v15, %v11781_v3 }
 0x265   : > { %21821 = vst [vmem:[#allocation97_spill] sm:$0xff] %v12796_v32  ;;  %v3970_v30 = vrot.slane %v3957_v50, 4  ;;  %v12803_v1 = vsel %vm246_vm0, %v3957_v50, %v3972_v21  ;;  %v524_v17 = vrot.slane %v12675_v59, 4  ;;  %v574_v21 = vrot.slane %v557_v25, 4 }
 0x266   : > { %21820 = vst [vmem:[#allocation96_spill] sm:$0xff] %v12792_v5  ;;  %v12807_v19 = vsel %vm246_vm0, %v12792_v5, %v3960_v53  ;;  %v12810_v37 = vsel %vm246_vm0, %v3962_v51, %v3921_v31  ;;  %v12815_v38 = vsel %vm246_vm0, %v12800_v18, %v3968_v35  ;;  %v5689_v31 = vperm.slane %v5681_v43, %v11741_v28 }
 0x267   : > { %21822 = vst [vmem:[#allocation98_spill] sm:$0xff] %v12800_v18  ;;  %v12818_v47 = vsel %vm246_vm0, %v3970_v30, %v3933_v10  ;;  %v1385_v29 = vpop.trf.xlu0  ;;  %v7372_v20 = vrot.slane %v12815_v38, 4  ;;  %v525_v50 = vsel %vm246_vm0, 0.0, %v524_v17  ;;  %v5685_v10 = vperm.slane %v5679_v63, %v11741_v28 }
 0x268   : > { %21823 = vst [vmem:[#allocation99_spill] sm:$0xff] %v12803_v1  ;;  %v5692_v14 = vrot.slane %v1385_v29, 4  ;;  %v575_v30 = vsel %vm246_vm0, 0.0, %v574_v21  ;;  %v5713_v43 = vperm.slane %v12696_v27, %v11781_v3  ;;  %v5721_v17 = vperm.slane %v12685_v6, %v11781_v3 }
 0x269   : > { %21824 = vst [vmem:[#allocation100_spill] sm:$0xff] %v12807_v19  ;;  %1974 = vxpose.xlu2.b32.start.end [1/1] (short) (narrow) %v557_v25, 32  ;;  %v12823_v53 = vsel %vm246_vm0, %v12803_v1, %v7372_v20  ;;  %v5740_v20 = vrot.slane %v5689_v31, 4  ;;  %v5728_v57 = vrot.slane %v5685_v10, 4 }
 0x26a   : > { %21825 = vst [vmem:[#allocation101_spill] sm:$0xff] %v12810_v37  ;;  %v1449_v59 = vpop.trf.xlu1  ;;  %v12827_v15 = vpop.trf.xlu2  ;;  %v5756_v27 = vrot.slane %v5713_v43, 4  ;;  %v5760_v39 = vrot.slane %v5721_v17, 4 }
 0x26b   : > { %21826 = vst [vmem:[#allocation102_spill] sm:$0xff] %v12815_v38  ;;  %1942 = vxpose.xlu0.b32.start.end [1/1] (short) (narrow) %v525_v50, 32  ;;  %v5690_v51 = vrot.slane %v1449_v59, 4  ;;  %v5693_v35 = vsel %vm246_vm0, %v1449_v59, %v5692_v14  ;;  %v5725_v50 = vperm.slane %v12699_v2, %v11781_v3 }
 0x26c   : > { %21827 = vst [vmem:[#allocation103_spill] sm:$0xff] %v12818_v47  ;;  %v5701_v25 = vperm.slane %v5693_v35, %v11741_v28 }
 0x26d   : > { %21828 = vst [vmem:[#allocation104_spill] sm:$0xff] %v12823_v53  ;;  %v5691_v12 = vsel %vm246_vm0, %v5690_v51, %v1385_v29  ;;  %v5764_v53 = vrot.slane %v5725_v50, 4 }
 0x26e   : > { %2006 = vxpose.xlu1.b32.start.end [1/1] (short) (narrow) %v575_v30, 32  ;;  %v5697_v14 = vperm.slane %v5691_v12, %v11741_v28  ;;  %v5738_v59 = vrot.slane %v5701_v25, 4  ;;  %v5741_v21 = vsel %vm246_vm0, %v5701_v25, %v5740_v20 }
 0x26f   : > { %v1478_v63 = vpop.trf.xlu0  ;;  %v5749_v2 = vperm.slane %v5741_v21, %v11781_v3 }
 0x270   : > { %v3080_v35 = vrot.slane %v1478_v63, 4  ;;  %v5726_v34 = vrot.slane %v5697_v14, 4  ;;  %v5729_v6 = vsel %vm246_vm0, %v5697_v14, %v5728_v57  ;;  %v5739_v51 = vsel %vm246_vm0, %v5738_v59, %v5689_v31 }
 0x271   : > { %v5737_v29 = vperm.slane %v5729_v6, %v11781_v3  ;;  %v5745_v25 = vperm.slane %v5739_v51, %v11781_v3  ;;  %v5762_v57 = vrot.slane %v5749_v2, 4  ;;  %v5765_v31 = vsel %vm246_vm0, %v5749_v2, %v5764_v53 }
 0x272   : > { %v1542_v30 = vpop.trf.xlu1  ;;  %v12842_v38 = vpop.trf.xlu2  ;;  %v12849_v12 = vsel %vm246_vm0, %v5726_v34, %v5685_v10  ;;  %v7594_v10 = vrot.slane %v5765_v31, 4  ;;  %v552_v53 = vrot.slane %v12705_v55, 4 }
 0x273   : > { %21829 = vst [vmem:[#allocation105_spill] sm:$0xff] %v12842_v38  ;;  %v3078_v20 = vrot.slane %v1542_v30, 4  ;;  %v3081_v38 = vsel %vm246_vm0, %v1542_v30, %v3080_v35  ;;  %v5754_v47 = vrot.slane %v5737_v29, 4  ;;  %v12854_v19 = vsel %vm246_vm0, %v5737_v29, %v5756_v27 }
 0x274   : > { %21830 = vst [vmem:[#allocation106_spill] sm:$0xff] %v12849_v12  ;;  %v5758_v14 = vrot.slane %v5745_v25, 4  ;;  %v5761_v6 = vsel %vm246_vm0, %v5745_v25, %v5760_v39  ;;  %v12862_v34 = vsel %vm246_vm0, %v5762_v57, %v5725_v50  ;;  %v6428_v35 = vrot.slane %v12371_v60, 4 }
 0x275   : > { %21831 = vst [vmem:[#allocation107_spill] sm:$0xff] %v12854_v19  ;;  %v12859_v21 = vsel %vm246_vm0, %v5754_v47, %v5713_v43  ;;  %v7596_v27 = vrot.slane %v5761_v6, 4  ;;  %v3079_v29 = vsel %vm246_vm0, %v3078_v20, %v1478_v63  ;;  %v540_v39 = vrot.slane %v11716_v9, 4 }
 0x276   : > { %21832 = vst [vmem:[#allocation108_spill] sm:$0xff] %v12859_v21  ;;  %v12866_v30 = vsel %vm246_vm0, %v5758_v14, %v5721_v17  ;;  %v12872_v51 = vsel %vm246_vm0, %v7594_v10, %v5761_v6  ;;  %v553_v63 = vsel %vm246_vm0, %v12669_v23, %v552_v53  ;;  %v12885_v9 = vsel %vm246_vm0, %v12374_v54, %v6428_v35 }
 0x277   : > { %v1479_v59 = vpop.trf.xlu0  ;;  %21833 = vst [vmem:[#allocation109_spill] sm:$0xff] %v12862_v34  ;;  %v12877_v50 = vsel %vm246_vm0, %v5765_v31, %v7596_v27  ;;  %v541_v17 = vsel %vm246_vm0, %v11877_v13, %v540_v39  ;;  %v6764_v20 = vrot.slane %v12385_v41, 4  ;;  %v528_v57 = vrot.slane %v12689_v48, 4 }
 0x278   : > { %21834 = vst [vmem:[#allocation110_spill] sm:$0xff] %v12866_v30  ;;  %v3976_v60 = vrot.slane %v1479_v59, 4  ;;  %v12896_v14 = vperm.slane %v541_v17, %v11741_v28  ;;  %v561_v23 = vperm.slane %v553_v63, %v11781_v3  ;;  %v6328_v41 = vrot.slane %v12305_v26, 4 }
 0x279   : > { %21835 = vst [vmem:[#allocation111_spill] sm:$0xff] %v12872_v51  ;;  %v12903_v54 = vsel %vm246_vm0, %v12388_v46, %v6764_v20  ;;  %v529_v6 = vsel %vm246_vm0, %v11747_v33, %v528_v57  ;;  %v6340_v10 = vrot.slane %v12017_v11, 4  ;;  %v6352_v27 = vrot.slane %v12020_v24, 4 }
 0x27a   : > { %v1543_v47 = vpop.trf.xlu1  ;;  %v12874_v43 = vpop.trf.xlu2  ;;  %21837 = vst [vmem:[#allocation113_spill] sm:$0xff] %v12877_v50  ;;  %v562_v48 = vrot.slane %v12896_v14, 4  ;;  %v576_v35 = vrot.slane %v561_v23, 4  ;;  %v12916_v39 = vperm.slane %v529_v6, %v11741_v28  ;;  %v6329_v46 = vsel %vm246_vm0, %v12042_v58, %v6328_v41  ;;  %v21846_v41 = vld [vmem:[#allocation27_spill] sm:$0xff] }
 0x27b   : > { %21836 = vst [vmem:[#allocation112_spill] sm:$0xff] %v12874_v43  ;;  %v3974_v2 = vrot.slane %v1543_v47, 4  ;;  %v12891_v25 = vsel %vm246_vm0, %v1543_v47, %v3976_v60  ;;  %v6452_v33 = vrot.slane %v12082_v40, 4  ;;  %v6464_v53 = vrot.slane %v12085_v61, 4 }
 0x27c   : > { %21838 = vst [vmem:[#allocation114_spill] sm:$0xff] %v12885_v9  ;;  %v6440_v47 = vrot.slane %v12231_v16, 4  ;;  %v577_v60 = vsel %vm246_vm0, 0.0, %v576_v35  ;;  %v563_v11 = vsel %vm246_vm0, %v562_v48, %v12916_v39  ;;  %v6341_v24 = vsel %vm246_vm0, %v12026_v4, %v6340_v10  ;;  %v21843_v4 = vld [vmem:[#allocation21_spill] sm:$0xff]  ;;  %v21848_v48 = vld [vmem:[#allocation26_spill] sm:$0xff] }
 0x27d   : > { %v12888_v55 = vsel %vm246_vm0, %v3974_v2, %v1479_v59  ;;  %21839 = vst [vmem:[#allocation115_spill] sm:$0xff] %v12903_v54  ;;  %v6476_v2 = vrot.slane %v12072_v7, 4  ;;  %v12932_v58 = vperm.slane %v6329_v46, %v11741_v28  ;;  %v12935_v40 = vperm.slane %v6341_v24, %v11741_v28  ;;  %v21853_v9 = vld [vmem:[#allocation30_spill] sm:$0xff] }
 0x27e   : > { %v6353_v61 = vsel %vm246_vm0, %v12038_v36, %v6352_v27  ;;  %v3085_v16 = vperm.slane %v3079_v29, %v11741_v28  ;;  %v3089_v17 = vperm.slane %v3081_v38, %v11741_v28  ;;  %v12946_v7 = vperm.slane %v21843_v4, %v11741_v28  ;;  %v21847_v29 = vld [vmem:[#allocation25_spill] sm:$0xff] }
 0x27f   : > { %v12898_v13 = vpop.trf.xlu0  ;;  %v12942_v63 = vperm.slane %v6353_v61, %v11741_v28  ;;  %v6386_v6 = vrot.slane %v12935_v40, 4  ;;  %v6441_v36 = vsel %vm246_vm0, %v21846_v41, %v6440_v47  ;;  %v6453_v38 = vsel %vm246_vm0, %v21847_v29, %v6452_v33  ;;  %v21849_v27 = vld [vmem:[#allocation29_spill] sm:$0xff]  ;;  %v21850_v41 = vld [vmem:[#allocation24_spill] sm:$0xff] }
 0x280   : > { %v6465_v10 = vsel %vm246_vm0, %v21848_v48, %v6464_v53  ;;  %v12960_v35 = vperm.slane %v563_v11, %v11781_v3  ;;  %v6676_v46 = vrot.slane %v21849_v27, 4  ;;  %v6410_v61 = vrot.slane %v12946_v7, 4  ;;  %v21851_v27 = vld [vmem:[#allocation39_spill] sm:$0xff] }
 0x281   : > { %v6387_v24 = vsel %vm246_vm0, %v6386_v6, %v12932_v58  ;;  %v3128_v47 = vrot.slane %v3085_v16, 4  ;;  %v12968_v4 = vperm.slane %v6441_v36, %v11741_v28  ;;  %v12971_v33 = vperm.slane %v6453_v38, %v11741_v28 }
 0x282   : > { %v12907_v31 = vpop.trf.xlu1  ;;  %v12909_v59 = vpop.trf.xlu2  ;;  %v12975_v53 = vperm.slane %v6387_v24, %v11781_v3  ;;  %v6411_v11 = vsel %vm246_vm0, %v6410_v61, %v12942_v63  ;;  %v6477_v6 = vsel %vm246_vm0, %v21850_v41, %v6476_v2  ;;  %v6664_v50 = vrot.slane %v21851_v27, 4  ;;  %v21852_v61 = vld [vmem:[#allocation31_spill] sm:$0xff] }
 0x283   : > { %21840 = vst [vmem:[#allocation116_spill] sm:$0xff] %v12907_v31  ;;  %v12982_v48 = vperm.slane %v6411_v11, %v11781_v3  ;;  %v12985_v36 = vperm.slane %v6477_v6, %v11741_v28  ;;  %v6498_v38 = vrot.slane %v12971_v33, 4  ;;  %v12991_v21 = vperm.slane %v6465_v10, %v11741_v28 }
 0x284   : > { %21841 = vst [vmem:[#allocation117_spill] sm:$0xff] %v12909_v59  ;;  %v6677_v2 = vsel %vm246_vm0, %v21852_v61, %v6676_v46  ;;  %v6688_v27 = vrot.slane %v21853_v9, 4  ;;  %v21856_v61 = vld [vmem:[#allocation34_spill] sm:$0xff]  ;;  %v3988_v30 = vrot.slane %v12827_v15, 4 }
 0x285   : > { %v6430_v11 = vrot.slane %v12982_v48, 4  ;;  %v6499_v6 = vsel %vm246_vm0, %v6498_v38, %v12968_v4  ;;  %v6522_v54 = vrot.slane %v12985_v36, 4 }
 0x286   : > { %v6505_v46 = vperm.slane %v6499_v6, %v11781_v3 }
 0x287   : > { %v12923_v26 = vpop.trf.xlu0  ;;  %v13021_v9 = vsel %vm246_vm0, %v6430_v11, %v12975_v53  ;;  %v13036_v11 = vperm.slane %v6677_v2, %v11741_v28 }
 0x288   : > { %21842 = vst [vmem:[#allocation118_spill] sm:$0xff] %v12923_v26 }
 0x289   : > { %2070 = vxpose.xlu2.b32.start.end [1/1] (short) (narrow) %v577_v60, 32  ;;  %v3092_v60 = vrot.slane %v12786_v52, 4  ;;  %21857 = vst [vmem:[#allocation26_spill] sm:$0xff] %v13021_v9  ;;  %v21860_v9 = vld [vmem:[#allocation33_spill] sm:$0xff] }
 0x28a   : > { %v12948_v20 = vpop.trf.xlu1  ;;  %v12950_v57 = vpop.trf.xlu2 }
 0x28b   : > { %21844 = vst [vmem:[#allocation21_spill] sm:$0xff] %v12948_v20  ;;  %2038 = vxpose.xlu0.b32.start.end [1/1] (short) (narrow) %v561_v23, 32  ;;  %v3140_v23 = vrot.slane %v3089_v17, 4 }
 0x28c   : > { %21845 = vst [vmem:[#allocation119_spill] sm:$0xff] %v12950_v57 }
 0x28e   : > { %2102 = vxpose.xlu1.b32.start.end [1/1] (short) (narrow) %v12960_v35, 32 }
 0x28f   : > { %v1574_v29 = vpop.trf.xlu0 }
 0x290   : > { %v3090_v51 = vrot.slane %v1574_v29, 4  ;;  %v3093_v24 = vsel %vm246_vm0, %v1574_v29, %v3092_v60 }
 0x291   : > { %v3101_v41 = vperm.slane %v3093_v24, %v11741_v28  ;;  %v6665_v24 = vsel %vm246_vm0, %v21856_v61, %v6664_v50  ;;  %v6523_v50 = vsel %vm246_vm0, %v6522_v54, %v12991_v21  ;;  %v6689_v54 = vsel %vm246_vm0, %v21860_v9, %v6688_v27 }
 0x292   : > { %v3091_v60 = vsel %vm246_vm0, %v3090_v51, %v12786_v52  ;;  %v13003_v29 = vpop.trf.xlu1  ;;  %v13005_v10 = vpop.trf.xlu2  ;;  %v3981_v52 = vperm.slane %v12888_v55, %v11741_v28  ;;  %v3985_v51 = vperm.slane %v12891_v25, %v11741_v28  ;;  %v6544_v55 = vrot.slane %v6505_v46, 4 }
 0x293   : > { %21854 = vst [vmem:[#allocation27_spill] sm:$0xff] %v13003_v29  ;;  %v3097_v38 = vperm.slane %v3091_v60, %v11741_v28  ;;  %v3138_v34 = vrot.slane %v3101_v41, 4  ;;  %v13013_v43 = vsel %vm246_vm0, %v3101_v41, %v3140_v23  ;;  %v6529_v41 = vperm.slane %v6523_v50, %v11781_v3 }
 0x294   : > { %21855 = vst [vmem:[#allocation25_spill] sm:$0xff] %v13005_v10  ;;  %v4024_v19 = vrot.slane %v3981_v52, 4 }
 0x295   : > { %v3126_v6 = vrot.slane %v3097_v38, 4  ;;  %v13026_v60 = vsel %vm246_vm0, %v3097_v38, %v3128_v47  ;;  %v13029_v23 = vsel %vm246_vm0, %v3138_v34, %v3089_v17  ;;  %v6542_v10 = vrot.slane %v6529_v41, 4 }
 0x296   : > { %21858 = vst [vmem:[#allocation29_spill] sm:$0xff] %v13026_v60  ;;  %v4036_v47 = vrot.slane %v3985_v51, 4  ;;  %v13042_v17 = vsel %vm246_vm0, %v6529_v41, %v6544_v55  ;;  %v21865_v41 = vld [vmem:[#allocation32_spill] sm:$0xff] }
 0x297   : > { %v13033_v61 = vsel %vm246_vm0, %v3126_v6, %v3085_v16  ;;  %v1575_v25 = vpop.trf.xlu0  ;;  %21861 = vst [vmem:[#allocation39_spill] sm:$0xff] %v13042_v17  ;;  %v13045_v50 = vsel %vm246_vm0, %v6542_v10, %v6505_v46  ;;  %v13048_v16 = vperm.slane %v6665_v24, %v11741_v28  ;;  %v13062_v55 = vperm.slane %v21865_v41, %v11741_v28 }
 0x298   : > { %21859 = vst [vmem:[#allocation24_spill] sm:$0xff] %v13033_v61  ;;  %v3986_v38 = vrot.slane %v1575_v25, 4  ;;  %v3989_v34 = vsel %vm246_vm0, %v1575_v25, %v3988_v30  ;;  %v13058_v30 = vperm.slane %v6689_v54, %v11741_v28  ;;  %v6722_v46 = vrot.slane %v13036_v11, 4 }
 0x299   : > { %21862 = vst [vmem:[#allocation31_spill] sm:$0xff] %v13045_v50  ;;  %v3997_v6 = vperm.slane %v3989_v34, %v11741_v28  ;;  %v6746_v25 = vrot.slane %v13062_v55, 4  ;;  %v6388_v41 = vrot.slane %v12932_v58, 4 }
 0x29a   : > { %v3987_v2 = vsel %vm246_vm0, %v3986_v38, %v12827_v15  ;;  %v13053_v27 = vpop.trf.xlu1  ;;  %v13055_v9 = vpop.trf.xlu2  ;;  %v6723_v54 = vsel %vm246_vm0, %v6722_v46, %v13048_v16 }
 0x29b   : > { %21863 = vst [vmem:[#allocation30_spill] sm:$0xff] %v13053_v27  ;;  %v3993_v10 = vperm.slane %v3987_v2, %v11741_v28  ;;  %v4034_v24 = vrot.slane %v3997_v6, 4  ;;  %v13067_v15 = vsel %vm246_vm0, %v3997_v6, %v4036_v47  ;;  %v6747_v2 = vsel %vm246_vm0, %v6746_v25, %v13058_v30 }
 0x29c   : > { %21864 = vst [vmem:[#allocation34_spill] sm:$0xff] %v13055_v9  ;;  %v13087_v17 = vperm.slane %v6747_v2, %v11781_v3  ;;  %v6412_v25 = vrot.slane %v12942_v63, 4  ;;  %v578_v2 = vrot.slane %v12960_v35, 4 }
 0x29d   : > { %v4022_v38 = vrot.slane %v3993_v10, 4  ;;  %v13071_v34 = vsel %vm246_vm0, %v3993_v10, %v4024_v19  ;;  %v13077_v50 = vsel %vm246_vm0, %v4034_v24, %v3985_v51  ;;  %v564_v19 = vrot.slane %v12916_v39, 4 }
 0x29e   : > { %21866 = vst [vmem:[#allocation33_spill] sm:$0xff] %v13071_v34  ;;  %v13091_v10 = vperm.slane %v6723_v54, %v11781_v3  ;;  %v6766_v58 = vrot.slane %v13087_v17, 4  ;;  %v6389_v51 = vsel %vm246_vm0, %v12935_v40, %v6388_v41  ;;  %v6413_v41 = vsel %vm246_vm0, %v12946_v7, %v6412_v25 }
 0x29f   : > { %v13082_v47 = vsel %vm246_vm0, %v4022_v38, %v3981_v52  ;;  %v13084_v6 = vpop.trf.xlu0  ;;  %v565_v52 = vsel %vm246_vm0, %v12896_v14, %v564_v19  ;;  %v3116_v38 = vrot.slane %v13003_v29, 4  ;;  %v13117_v19 = vperm.slane %v6413_v41, %v11781_v3 }
 0x2a0   : > { %21867 = vst [vmem:[#allocation32_spill] sm:$0xff] %v13082_v47  ;;  %v13105_v39 = vsel %vm246_vm0, %v6766_v58, %v13091_v10  ;;  %v573_v54 = vperm.slane %v565_v52, %v11781_v3  ;;  %v13125_v35 = vperm.slane %v6389_v51, %v11781_v3  ;;  %v3104_v7 = vrot.slane %v12909_v59, 4  ;;  %v21878_v59 = vld [vmem:[#allocation10_spill] sm:$0xff] }
 0x2a1   : > { %21868 = vst [vmem:[#allocation120_spill] sm:$0xff] %v13084_v6 }
 0x2a2   : > { %v13096_v46 = vpop.trf.xlu1  ;;  %v13100_v24 = vpop.trf.xlu2  ;;  %21871 = vst [vmem:[#allocation123_spill] sm:$0xff] %v13105_v39  ;;  %v580_v63 = vrot.slane %v573_v54, 4  ;;  %v579_v39 = vsel %vm246_vm0, 0.0, %v578_v2  ;;  %v4012_v2 = vrot.slane %v13053_v27, 4 }
 0x2a3   : > { %21869 = vst [vmem:[#allocation121_spill] sm:$0xff] %v13096_v46  ;;  %v3117_v14 = vsel %vm246_vm0, %v13100_v24, %v3116_v38  ;;  %v6434_v38 = vrot.slane %v13117_v19, 4 }
 0x2a4   : > { %21870 = vst [vmem:[#allocation122_spill] sm:$0xff] %v13100_v24  ;;  %v3125_v25 = vperm.slane %v3117_v14, %v11741_v28  ;;  %v581_v41 = vsel %vm246_vm0, 0.0, %v580_v63 }
 0x2a5   : > { %v13138_v51 = vsel %vm246_vm0, %v6434_v38, %v13125_v35 }
 0x2a6   : > { %21877 = vst [vmem:[#allocation127_spill] sm:$0xff] %v13138_v51  ;;  %v6724_v51 = vrot.slane %v13048_v16, 4  ;;  %v4000_v16 = vrot.slane %v12950_v57, 4 }
 0x2a7   : > { %v13110_v40 = vpop.trf.xlu0 }
 0x2a8   : > { %21872 = vst [vmem:[#allocation124_spill] sm:$0xff] %v13110_v40 }
 0x2a9   : > { %2166 = vxpose.xlu2.b32.start.end [1/1] (short) (narrow) %v573_v54, 32  ;;  %v21875_v54 = vld [vmem:[#allocation13_spill] sm:$0xff] }
 0x2aa   : > { %v13119_v58 = vpop.trf.xlu1  ;;  %v13122_v52 = vpop.trf.xlu2  ;;  %v594_v46 = vrot.slane %v21875_v54, 4 }
 0x2ab   : > { %21873 = vst [vmem:[#allocation125_spill] sm:$0xff] %v13119_v58  ;;  %2134 = vxpose.xlu0.b32.start.end [1/1] (short) (narrow) %v579_v39, 32  ;;  %v6432_v58 = vrot.slane %v12975_v53, 4  ;;  %v3162_v39 = vrot.slane %v3125_v25, 4  ;;  %v4013_v27 = vsel %vm246_vm0, %v13122_v52, %v4012_v2  ;;  %v13167_v2 = vsel %vm246_vm0, %v13036_v11, %v6724_v51  ;;  %v11411_v51 = vld [vmem:[%s11653_s15 + $0x30] sm:$0xff] }
 0x2ac   : > { %21874 = vst [vmem:[#allocation126_spill] sm:$0xff] %v13122_v52  ;;  %v595_v29 = vsel %vm246_vm0, %v594_v46, %v21878_v59 }
 0x2ad   : > { %v13147_v53 = vsel %vm246_vm0, %v12982_v48, %v6432_v58  ;;  %v13162_v48 = vperm.slane %v595_v29, %v11741_v28 }
 0x2ae   : > { %2198 = vxpose.xlu1.b32.start.end [1/1] (short) (narrow) %v581_v41, 32  ;;  %21879 = vst [vmem:[#allocation10_spill] sm:$0xff] %v13147_v53  ;;  %v13171_v53 = vperm.slane %v13029_v23, %v11781_v3 }
 0x2af   : > { %v13134_v9 = vpop.trf.xlu0 }
 0x2b0   : > { %21876 = vst [vmem:[#allocation13_spill] sm:$0xff] %v13134_v9  ;;  %v3105_v14 = vsel %vm246_vm0, %v13134_v9, %v3104_v7  ;;  %v13158_v7 = vperm.slane %v13013_v43, %v11781_v3 }
 0x2b1   : > { %v3113_v63 = vperm.slane %v3105_v14, %v11741_v28  ;;  %v21883_v14 = vld [vmem:[#allocation8_spill] sm:$0xff] }
 0x2b2   : > { %v13149_v41 = vpop.trf.xlu1  ;;  %v13153_v38 = vpop.trf.xlu2  ;;  %21882 = vst [vmem:[#allocation130_spill] sm:$0xff] %v13158_v7  ;;  %v582_v34 = vrot.slane %v21883_v14, 4  ;;  %v3188_v29 = vrot.slane %v13158_v7, 4  ;;  %v21890_v7 = vld [vmem:[#allocation12_spill] sm:$0xff] }
 0x2b3   : > { %21880 = vst [vmem:[#allocation128_spill] sm:$0xff] %v13149_v41  ;;  %v3164_v46 = vrot.slane %v3113_v63, 4  ;;  %v3163_v58 = vsel %vm246_vm0, %v3162_v39, %v3113_v63  ;;  %v4021_v41 = vperm.slane %v4013_v27, %v11741_v28  ;;  %v21888_v63 = vld [vmem:[#allocation11_spill] sm:$0xff]  ;;  %v3184_v27 = vrot.slane %v13171_v53, 4 }
 0x2b4   : > { %21881 = vst [vmem:[#allocation129_spill] sm:$0xff] %v13153_v38  ;;  %v13181_v39 = vperm.slane %v3163_v58, %v11781_v3  ;;  %v583_v23 = vsel %vm246_vm0, %v582_v34, %v11411_v51  ;;  %v638_v57 = vrot.slane %v21888_v63, 4  ;;  %v650_v52 = vrot.slane %v21890_v7, 4 }
 0x2b5   : > { %21884 = vst [vmem:[#allocation8_spill] sm:$0xff] %v13171_v53  ;;  %v3165_v43 = vsel %vm246_vm0, %v3125_v25, %v3164_v46  ;;  %v606_v25 = vrot.slane %v13162_v48, 4  ;;  %v589_v61 = vperm.slane %v583_v23, %v11741_v28 }
 0x2b6   : > { %v13177_v38 = vperm.slane %v3165_v43, %v11781_v3  ;;  %21886 = vst [vmem:[#allocation132_spill] sm:$0xff] %v13181_v39  ;;  %v4058_v43 = vrot.slane %v4021_v41, 4  ;;  %v13205_v53 = vsel %vm246_vm0, %v13181_v39, %v3184_v27 }
 0x2b7   : > { %v13183_v11 = vpop.trf.xlu0  ;;  %21893 = vst [vmem:[#allocation135_spill] sm:$0xff] %v13205_v53  ;;  %v607_v27 = vsel %vm246_vm0, %v606_v25, %v589_v61 }
 0x2b8   : > { %21885 = vst [vmem:[#allocation131_spill] sm:$0xff] %v13177_v38  ;;  %v13192_v46 = vsel %vm246_vm0, %v13177_v38, %v3188_v29  ;;  %v4001_v58 = vsel %vm246_vm0, %v13183_v11, %v4000_v16  ;;  %v11412_v38 = vld [vmem:[%s11653_s15 + $0x38] sm:$0xff]  ;;  %v13212_v16 = vperm.slane %v13067_v15, %v11781_v3  ;;  %s21562_s15 = smov 60  }
 0x2b9   : > { %21887 = vst [vmem:[#allocation133_spill] sm:$0xff] %v13183_v11  ;;  %v7706_v47 = vrot.slane %v13192_v46, 4  ;;  %v4009_v29 = vperm.slane %v4001_v58, %v11741_v28  ;;  %v639_v9 = vsel %vm246_vm0, %v638_v57, %v11412_v38  ;;  %v640_v39 = vrot.slane %v11412_v38, 4 }
 0x2ba   : > { %21889 = vst [vmem:[#allocation11_spill] sm:$0xff] %v13192_v46  ;;  %v13198_v60 = vpop.trf.xlu1  ;;  %v13200_v34 = vpop.trf.xlu2  ;;  %v13225_v57 = vperm.slane %v13077_v50, %v11781_v3  ;;  %v613_v50 = vperm.slane %v607_v27, %v11781_v3 }
 0x2bb   : > { %21891 = vst [vmem:[#allocation12_spill] sm:$0xff] %v13198_v60  ;;  %v13216_v46 = vsel %vm246_vm0, %v7706_v47, %v13205_v53  ;;  %v21896_v60 = vld [vmem:[#allocation9_spill] sm:$0xff]  ;;  %v4059_v23 = vsel %vm246_vm0, %v4058_v43, %v4009_v29  ;;  %v4060_v11 = vrot.slane %v4009_v29, 4  ;;  %v645_v47 = vperm.slane %v639_v9, %v11741_v28 }
 0x2bc   : > { %21892 = vst [vmem:[#allocation134_spill] sm:$0xff] %v13200_v34  ;;  %v652_v34 = vrot.slane %v21896_v60, 4  ;;  %v651_v58 = vsel %vm246_vm0, %v650_v52, %v21896_v60  ;;  %v4084_v43 = vrot.slane %v13212_v16, 4  ;;  %v13235_v25 = vperm.slane %v4059_v23, %v11781_v3 }
 0x2bd   : > { %21894 = vst [vmem:[#allocation136_spill] sm:$0xff] %v13212_v16  ;;  %v657_v52 = vperm.slane %v651_v58, %v11741_v28  ;;  %v641_v38 = vsel %vm246_vm0, %v21888_v63, %v640_v39  ;;  %v4080_v9 = vrot.slane %v13225_v57, 4  ;;  %v664_v29 = vrot.slane %v645_v47, 4 }
 0x2be   : > { %21895 = vst [vmem:[#allocation137_spill] sm:$0xff] %v13216_v46  ;;  %v653_v15 = vsel %vm246_vm0, %v21890_v7, %v652_v34  ;;  %v4061_v46 = vsel %vm246_vm0, %v4021_v41, %v4060_v11  ;;  %v630_v39 = vrot.slane %v613_v50, 4  ;;  %v608_v63 = vrot.slane %v589_v61, 4 }
 0x2bf   : > { %21897 = vst [vmem:[#allocation9_spill] sm:$0xff] %v13225_v57  ;;  %v13231_v53 = vpop.trf.xlu0  ;;  %v13238_v60 = vperm.slane %v4061_v46, %v11781_v3  ;;  %v661_v46 = vperm.slane %v653_v15, %v11741_v28  ;;  %v13257_v23 = vsel %vm246_vm0, %v13235_v25, %v4080_v9  ;;  %v662_v27 = vrot.slane %v657_v52, 4 }
 0x2c0   : > { %21898 = vst [vmem:[#allocation138_spill] sm:$0xff] %v13231_v53  ;;  %v649_v58 = vperm.slane %v641_v38, %v11741_v28  ;;  %v631_v9 = vsel %vm246_vm0, 0.0, %v630_v39  ;;  %v665_v57 = vsel %vm246_vm0, %v657_v52, %v664_v29  ;;  %v609_v61 = vsel %vm246_vm0, %v13162_v48, %v608_v63  ;;  %v21909_v52 = vld [vmem:[#allocation17_spill] sm:$0xff]  ;;  %v21910_v39 = vld [vmem:[#allocation19_spill] sm:$0xff] }
 0x2c1   : > { %21899 = vst [vmem:[#allocation139_spill] sm:$0xff] %v13235_v25  ;;  %v13247_v41 = vsel %vm246_vm0, %v13238_v60, %v4084_v43  ;;  %v674_v15 = vrot.slane %v661_v46, 4  ;;  %v4560_v29 = vrot.slane %v21909_v52, 4  ;;  %v13287_v48 = vperm.slane %v665_v57, %v11781_v3  ;;  %v21918_v25 = vld [vmem:[#allocation20_spill] sm:$0xff] }
 0x2c2   : > { %21900 = vst [vmem:[#allocation140_spill] sm:$0xff] %v13238_v60  ;;  %v13249_v7 = vpop.trf.xlu1  ;;  %v13251_v11 = vpop.trf.xlu2  ;;  %v7818_v34 = vrot.slane %v13247_v41, 4  ;;  %v676_v63 = vrot.slane %v649_v58, 4  ;;  %v21917_v60 = vld [vmem:[#allocation18_spill] sm:$0xff]  ;;  %v4570_v24 = vrot.slane %v21918_v25, 4 }
 0x2c3   : > { %21901 = vst [vmem:[#allocation141_spill] sm:$0xff] %v13247_v41  ;;  %v663_v41 = vsel %vm246_vm0, %v662_v27, %v645_v47  ;;  %v675_v38 = vsel %vm246_vm0, %v674_v15, %v649_v58  ;;  %v4572_v27 = vrot.slane %v21910_v39, 4 }
 0x2c4   : > { %21902 = vst [vmem:[#allocation142_spill] sm:$0xff] %v13249_v7  ;;  %v13262_v43 = vsel %vm246_vm0, %v7818_v34, %v13257_v23  ;;  %v584_v7 = vrot.slane %v11411_v51, 4  ;;  %v13282_v47 = vperm.slane %v663_v41, %v11781_v3  ;;  %v677_v6 = vsel %vm246_vm0, %v661_v46, %v676_v63 }
 0x2c5   : > { %21903 = vst [vmem:[#allocation143_spill] sm:$0xff] %v13251_v11  ;;  %v596_v11 = vrot.slane %v21878_v59, 4 }
 0x2c6   : > { %21904 = vst [vmem:[#allocation144_spill] sm:$0xff] %v13257_v23  ;;  %v585_v51 = vsel %vm246_vm0, %v21883_v14, %v584_v7  ;;  %v21912_v14 = vld [vmem:[#allocation16_spill] sm:$0xff]  ;;  %v21916_v23 = vld [vmem:[#allocation22_spill] sm:$0xff]  ;;  %v686_v58 = vrot.slane %v13282_v47, 4 }
 0x2c7   : > { %21905 = vst [vmem:[#allocation145_spill] sm:$0xff] %v13262_v43  ;;  %v13265_v16 = vpop.trf.xlu0  ;;  %v597_v59 = vsel %vm246_vm0, %v21875_v54, %v596_v11  ;;  %v4548_v7 = vrot.slane %v21912_v14, 4  ;;  %v13291_v54 = vperm.slane %v609_v61, %v11781_v3  ;;  %v13294_v11 = vperm.slane %v675_v38, %v11781_v3 }
 0x2c8   : > { %21906 = vst [vmem:[#allocation146_spill] sm:$0xff] %v13265_v16  ;;  %v593_v41 = vperm.slane %v585_v51, %v11741_v28  ;;  %v605_v15 = vperm.slane %v597_v59, %v11741_v28  ;;  %v4558_v57 = vrot.slane %v21916_v23, 4  ;;  %v4546_v61 = vrot.slane %v21917_v60, 4 }
 0x2c9   : > { %2262 = vxpose.xlu2.b32.start.end [1/1] (short) (narrow) %v631_v9, 32  ;;  %21911 = vst [vmem:[#allocation17_spill] sm:$0xff] %v13287_v48  ;;  %v21914_v9 = vld [vmem:[#allocation14_spill] sm:$0xff]  ;;  %v4573_v38 = vsel %vm246_vm0, %v21918_v25, %v4572_v27  ;;  %v4561_v51 = vsel %vm246_vm0, %v21916_v23, %v4560_v29  ;;  %v688_v59 = vrot.slane %v13287_v48, 4  ;;  %v4549_v53 = vsel %vm246_vm0, %v21917_v60, %v4548_v7 }
 0x2ca   : > { %v13277_v34 = vpop.trf.xlu1  ;;  %v13279_v43 = vpop.trf.xlu2  ;;  %21913 = vst [vmem:[#allocation19_spill] sm:$0xff] %v13294_v11  ;;  %v690_v40 = vrot.slane %v13294_v11, 4  ;;  %v620_v20 = vrot.slane %v593_v41, 4  ;;  %v618_v26 = vrot.slane %v605_v15, 4  ;;  %v4581_v29 = vperm.slane %v4573_v38, %v11741_v28  ;;  %v21927_v38 = vld [vmem:[#allocation28_spill] sm:$0xff] }
 0x2cb   : > { %21907 = vst [vmem:[#allocation147_spill] sm:$0xff] %v13277_v34  ;;  %2230 = vxpose.xlu0.b32.start.end [1/1] (short) (narrow) %v613_v50, 32  ;;  %v21915_v34 = vld [vmem:[#allocation15_spill] sm:$0xff]  ;;  %v4569_v60 = vperm.slane %v4561_v51, %v11741_v28  ;;  %v13329_v46 = vsel %vm246_vm0, 0.0, %v686_v58  ;;  %v13335_v63 = vsel %vm246_vm0, 0.0, %v688_v59  ;;  %v4646_v51 = vrot.slane %v21927_v38, 4 }
 0x2cc   : > { %21908 = vst [vmem:[#allocation148_spill] sm:$0xff] %v13279_v43  ;;  %v4534_v43 = vrot.slane %v21914_v9, 4  ;;  %v4536_v50 = vrot.slane %v21915_v34, 4  ;;  %v13345_v58 = vsel %vm246_vm0, 0.0, %v690_v40  ;;  %v621_v59 = vsel %vm246_vm0, %v605_v15, %v620_v20  ;;  %v21929_v11 = vld [vmem:[#allocation36_spill] sm:$0xff] }
 0x2cd   : > { %21922 = vst [vmem:[#allocation22_spill] sm:$0xff] %v13329_v46  ;;  %v632_v48 = vrot.slane %v13291_v54, 4 }
 0x2ce   : > { %2294 = vxpose.xlu1.b32.start.end [1/1] (short) (narrow) %v13291_v54, 32  ;;  %v4535_v27 = vsel %vm246_vm0, %v4534_v43, %v21915_v34  ;;  %v4537_v23 = vsel %vm246_vm0, %v21914_v9, %v4536_v50  ;;  %v4547_v43 = vsel %vm246_vm0, %v4546_v61, %v21912_v14  ;;  %v4557_v34 = vperm.slane %v4549_v53, %v11741_v28  ;;  %v21926_v61 = vld [vmem:[#allocation23_spill] sm:$0xff] }
 0x2cf   : > { %v13308_v16 = vpop.trf.xlu0  ;;  %21923 = vst [vmem:[#allocation18_spill] sm:$0xff] %v13335_v63  ;;  %v13338_v9 = vperm.slane %v677_v6, %v11781_v3  ;;  %v4545_v50 = vperm.slane %v4537_v23, %v11741_v28  ;;  %v4648_v53 = vrot.slane %v21926_v61, 4  ;;  %v4553_v6 = vperm.slane %v4547_v43, %v11741_v28 }
 0x2d0   : > { %21919 = vst [vmem:[#allocation16_spill] sm:$0xff] %v13308_v16  ;;  %v4559_v16 = vsel %vm246_vm0, %v4558_v57, %v21909_v52  ;;  %v4541_v52 = vperm.slane %v4535_v27, %v11741_v28  ;;  %v4571_v57 = vsel %vm246_vm0, %v4570_v24, %v21910_v39  ;;  %v4620_v27 = vrot.slane %v4569_v60, 4  ;;  %v21928_v39 = vld [vmem:[#allocation35_spill] sm:$0xff]  ;;  %v22061_v45 = vld [vmem:[#allocation17_spill] sm:$0xff] }
 0x2d1   : > { %21924 = vst [vmem:[#allocation20_spill] sm:$0xff] %v13338_v9  ;;  %v4565_v14 = vperm.slane %v4559_v16, %v11741_v28  ;;  %v619_v23 = vsel %vm246_vm0, %v618_v26, %v593_v41  ;;  %v4577_v24 = vperm.slane %v4571_v57, %v11741_v28  ;;  %v4660_v40 = vrot.slane %v21928_v39, 4 }
 0x2d2   : > { %v13324_v25 = vpop.trf.xlu1  ;;  %v13326_v7 = vpop.trf.xlu2  ;;  %21925 = vst [vmem:[#allocation149_spill] sm:$0xff] %v13345_v58  ;;  %v4658_v58 = vrot.slane %v21929_v11, 4  ;;  %v4584_v63 = vrot.slane %v4541_v52, 4  ;;  %v4596_v46 = vrot.slane %v4545_v50, 4  ;;  %v692_v20 = vrot.slane %v13338_v9, 4 }
 0x2d3   : > { %21920 = vst [vmem:[#allocation14_spill] sm:$0xff] %v13324_v25  ;;  %v4594_v25 = vrot.slane %v4557_v34, 4  ;;  %v4608_v15 = vrot.slane %v4565_v14, 4  ;;  %v4647_v43 = vsel %vm246_vm0, %v4646_v51, %v21926_v61  ;;  %v4649_v26 = vsel %vm246_vm0, %v21927_v38, %v4648_v53 }
 0x2d4   : > { %21921 = vst [vmem:[#allocation15_spill] sm:$0xff] %v13326_v7  ;;  %v4618_v7 = vrot.slane %v4581_v29, 4  ;;  %v13365_v41 = vperm.slane %v621_v59, %v11781_v3  ;;  %v4582_v57 = vrot.slane %v4553_v6, 4  ;;  %v13374_v9 = vperm.slane %v619_v23, %v11781_v3 }
 0x2d5   : > { %v4595_v61 = vsel %vm246_vm0, %v4594_v25, %v4545_v50  ;;  %v4606_v51 = vrot.slane %v4577_v24, 4  ;;  %v4659_v53 = vsel %vm246_vm0, %v4658_v58, %v21928_v39  ;;  %v4661_v38 = vsel %vm246_vm0, %v21929_v11, %v4660_v40 }
 0x2d6   : > { %v4619_v31 = vsel %vm246_vm0, %v4618_v7, %v4569_v60  ;;  %v4585_v60 = vsel %vm246_vm0, %v4553_v6, %v4584_v63  ;;  %v4653_v7 = vperm.slane %v4647_v43, %v11741_v28  ;;  %v4657_v59 = vperm.slane %v4649_v26, %v11741_v28 }
 0x2d7   : > { %v13356_v16 = vpop.trf.xlu0  ;;  %v4625_v23 = vperm.slane %v4619_v31, %v11781_v3  ;;  %v636_v50 = vrot.slane %v13365_v41, 4  ;;  %v4583_v58 = vsel %vm246_vm0, %v4582_v57, %v4541_v52  ;;  %v4601_v11 = vperm.slane %v4595_v61, %v11781_v3 }
 0x2d8   : > { %21930 = vst [vmem:[#allocation23_spill] sm:$0xff] %v13356_v16  ;;  %v4621_v16 = vsel %vm246_vm0, %v4581_v29, %v4620_v27  ;;  %v4597_v29 = vsel %vm246_vm0, %v4557_v34, %v4596_v46  ;;  %v4609_v27 = vsel %vm246_vm0, %v4577_v24, %v4608_v15  ;;  %v4665_v63 = vperm.slane %v4659_v53, %v11741_v28 }
 0x2d9   : > { %v4629_v25 = vperm.slane %v4621_v16, %v11781_v3  ;;  %v4669_v46 = vperm.slane %v4661_v38, %v11741_v28  ;;  %v13394_v34 = vperm.slane %v4585_v60, %v11781_v3  ;;  %v4605_v6 = vperm.slane %v4597_v29, %v11781_v3 }
 0x2da   : > { %v13369_v12 = vpop.trf.xlu1  ;;  %v13371_v54 = vpop.trf.xlu2  ;;  %v4607_v24 = vsel %vm246_vm0, %v4606_v51, %v4565_v14  ;;  %v634_v39 = vrot.slane %v13374_v9, 4  ;;  %v13402_v40 = vperm.slane %v4609_v27, %v11781_v3  ;;  %v4696_v52 = vrot.slane %v4653_v7, 4 }
 0x2db   : > { %21931 = vst [vmem:[#allocation28_spill] sm:$0xff] %v13369_v12  ;;  %v4708_v16 = vrot.slane %v4657_v59, 4  ;;  %v13405_v15 = vsel %vm246_vm0, 0.0, %v692_v20  ;;  %v13408_v43 = vperm.slane %v4583_v58, %v11781_v3  ;;  %v4638_v26 = vrot.slane %v4625_v23, 4 }
 0x2dc   : > { %21932 = vst [vmem:[#allocation35_spill] sm:$0xff] %v13371_v54  ;;  %v4642_v57 = vrot.slane %v4629_v25, 4  ;;  %v633_v61 = vsel %vm246_vm0, 0.0, %v632_v48  ;;  %v4640_v14 = vrot.slane %v4601_v11, 4  ;;  %v13412_v51 = vperm.slane %v4607_v24, %v11781_v3 }
 0x2dd   : > { %21934 = vst [vmem:[#allocation150_spill] sm:$0xff] %v13405_v15  ;;  %v4694_v53 = vrot.slane %v4665_v63, 4  ;;  %v4706_v38 = vrot.slane %v4669_v46, 4  ;;  %v4636_v20 = vrot.slane %v13394_v34, 4  ;;  %v4644_v27 = vrot.slane %v4605_v6, 4 }
 0x2de   : > { %v635_v58 = vsel %vm246_vm0, 0.0, %v634_v39  ;;  %v13421_v15 = vsel %vm246_vm0, 0.0, %v636_v50  ;;  %v4634_v48 = vrot.slane %v13402_v40, 4  ;;  %v13425_v54 = vsel %vm246_vm0, %v4625_v23, %v4640_v14  ;;  %v21937_v50 = vld [vmem:[#allocation37_spill] sm:$0xff] }
 0x2df   : > { %v13398_v31 = vpop.trf.xlu0  ;;  %v4697_v24 = vsel %vm246_vm0, %v4665_v63, %v4696_v52  ;;  %v13436_v39 = vsel %vm246_vm0, %v4629_v25, %v4644_v27  ;;  %v13440_v12 = vperm.slane %v21937_v50, %v11781_v3  ;;  %v4630_v14 = vrot.slane %v13412_v51, 4 }
 0x2e0   : > { %21933 = vst [vmem:[#allocation36_spill] sm:$0xff] %v13398_v31  ;;  %v4709_v31 = vsel %vm246_vm0, %v4669_v46, %v4708_v16  ;;  %v4695_v63 = vsel %vm246_vm0, %v4694_v53, %v4653_v7  ;;  %v4707_v46 = vsel %vm246_vm0, %v4706_v38, %v4657_v59  ;;  %v6748_v16 = vrot.slane %v13058_v30, 4 }
 0x2e1   : > { %21938 = vst [vmem:[#allocation37_spill] sm:$0xff] %v13440_v12  ;;  %v13451_v25 = vperm.slane %v4709_v31, %v11781_v3  ;;  %v6586_v7 = vrot.slane %v13436_v39, 4  ;;  %v13461_v59 = vsel %vm246_vm0, %v4634_v48, %v13394_v34  ;;  %v13465_v38 = vperm.slane %v4695_v63, %v11781_v3 }
 0x2e2   : > { %v13414_v60 = vpop.trf.xlu1  ;;  %v13416_v29 = vpop.trf.xlu2  ;;  %v13468_v31 = vperm.slane %v4707_v46, %v11781_v3  ;;  %v6749_v30 = vsel %vm246_vm0, %v13062_v55, %v6748_v16  ;;  %v13479_v34 = vperm.slane %v13167_v2, %v11781_v3  ;;  %v6768_v50 = vrot.slane %v13091_v10, 4  ;;  %v21944_v55 = vld [vmem:[#allocation40_spill] sm:$0xff]  ;;  %v21952_v10 = vld [vmem:[#allocation38_spill] sm:$0xff] }
 0x2e3   : > { %21935 = vst [vmem:[#allocation151_spill] sm:$0xff] %v13414_v60  ;;  %v13430_v60 = vsel %vm246_vm0, %v4638_v26, %v4601_v11  ;;  %v13482_v48 = vperm.slane %v6749_v30, %v11781_v3  ;;  %v6500_v63 = vrot.slane %v12968_v4, 4  ;;  %v13490_v16 = vperm.slane %v21944_v55, %v11781_v3  ;;  %v21946_v2 = vld [vmem:[#allocation44_spill] sm:$0xff]  ;;  %v21947_v11 = vld [vmem:[#allocation45_spill] sm:$0xff] }
 0x2e4   : > { %21936 = vst [vmem:[#allocation152_spill] sm:$0xff] %v13416_v29  ;;  %v13433_v29 = vsel %vm246_vm0, %v4642_v57, %v4605_v6  ;;  %v13448_v6 = vperm.slane %v4697_v24, %v11781_v3  ;;  %v6550_v53 = vrot.slane %v13461_v59, 4  ;;  %v4672_v57 = vrot.slane %v21946_v2, 4 }
 0x2e5   : > { %v6574_v26 = vrot.slane %v13433_v29, 4  ;;  %21941 = vst [vmem:[#allocation155_spill] sm:$0xff] %v13465_v38  ;;  %v4670_v30 = vrot.slane %v21947_v11, 4  ;;  %v6770_v23 = vrot.slane %v13482_v48, 4  ;;  %v13498_v4 = vsel %vm246_vm0, %v13087_v17, %v6768_v50 }
 0x2e6   : > { %21939 = vst [vmem:[#allocation153_spill] sm:$0xff] %v13448_v6  ;;  %v13515_v17 = vsel %vm246_vm0, %v13402_v40, %v4636_v20  ;;  %v21995_v12 = vrot.slane %v13448_v6, 4 }
 0x2e7   : > { %v13453_v52 = vpop.trf.xlu0  ;;  %21945 = vst [vmem:[#allocation40_spill] sm:$0xff] %v13490_v16  ;;  %v6575_v55 = vsel %vm246_vm0, %v6574_v26, %v13430_v60  ;;  %v13519_v50 = vsel %vm246_vm0, %v6770_v23, %v13479_v34  ;;  %v4671_v20 = vsel %vm246_vm0, %v4670_v30, %v21946_v2  ;;  %v4673_v23 = vsel %vm246_vm0, %v21947_v11, %v4672_v57 }
 0x2e8   : > { %21940 = vst [vmem:[#allocation154_spill] sm:$0xff] %v13453_v52  ;;  %v4682_v26 = vrot.slane %v12488_v56, 4  ;;  %v6562_v38 = vrot.slane %v13515_v17, 4 }
 0x2e9   : > { %2358 = vxpose.xlu2.b32.start.end [1/1] (short) (narrow) %v13374_v9, 32  ;;  %21948 = vst [vmem:[#allocation44_spill] sm:$0xff] %v13498_v4  ;;  %v6501_v9 = vsel %vm246_vm0, %v12971_v33, %v6500_v63  ;;  %v4684_v4 = vrot.slane %v21952_v10, 4  ;;  %v13538_v63 = vperm.slane %v6575_v55, %v11741_v28 }
 0x2ea   : > { %v13473_v27 = vpop.trf.xlu1  ;;  %v13475_v24 = vpop.trf.xlu2  ;;  %v13557_v55 = vperm.slane %v6501_v9, %v11781_v3  ;;  %v21963_v9 = vrot.slane %v13408_v43, 4 }
 0x2eb   : > { %21942 = vst [vmem:[#allocation156_spill] sm:$0xff] %v13473_v27  ;;  %2326 = vxpose.xlu0.b32.start.end [1/1] (short) (narrow) %v633_v61, 32  ;;  %v21949_v61 = vld [vmem:[#allocation42_spill] sm:$0xff]  ;;  %v21993_v27 = vld [vmem:[#allocation69_spill] sm:$0xff] }
 0x2ec   : > { %21943 = vst [vmem:[#allocation157_spill] sm:$0xff] %v13475_v24  ;;  %v13503_v46 = vperm.slane %v21949_v61, %v11781_v3  ;;  %v13511_v24 = vsel %vm246_vm0, %v4630_v14, %v13408_v43  ;;  %v6524_v61 = vrot.slane %v12991_v21, 4  ;;  %v6536_v21 = vrot.slane %v13490_v16, 4 }
 0x2ed   : > { %21951 = vst [vmem:[#allocation42_spill] sm:$0xff] %v13519_v50  ;;  %v6551_v40 = vsel %vm246_vm0, %v6550_v53, %v13511_v24  ;;  %v21957_v50 = vld [vmem:[#allocation46_spill] sm:$0xff]  ;;  %v4677_v16 = vperm.slane %v4671_v20, %v11741_v28  ;;  %v6624_v20 = vrot.slane %v13538_v63, 4 }
 0x2ee   : > { %21950 = vst [vmem:[#allocation45_spill] sm:$0xff] %v13503_v46  ;;  %2390 = vxpose.xlu1.b32.start.end [1/1] (short) (narrow) %v635_v58, 32  ;;  %v21954_v58 = vld [vmem:[#allocation41_spill] sm:$0xff]  ;;  %v6525_v53 = vsel %vm246_vm0, %v12985_v36, %v6524_v61  ;;  %v6760_v11 = vrot.slane %v13503_v46, 4  ;;  %v13554_v57 = vperm.slane %v6551_v40, %v11741_v28  ;;  %v21961_v36 = vld [vmem:[#allocation43_spill] sm:$0xff]  ;;  %v6587_v46 = vsel %vm246_vm0, %v6586_v7, %v13425_v54 }
 0x2ef   : > { %v13524_v33 = vpop.trf.xlu0  ;;  %v13528_v14 = vperm.slane %v21954_v58, %v11781_v3  ;;  %21956 = vst [vmem:[#allocation158_spill] sm:$0xff] %v13538_v63  ;;  %v13543_v58 = vperm.slane %v21957_v50, %v11781_v3  ;;  %v13560_v50 = vperm.slane %v6525_v53, %v11781_v3  ;;  %v13566_v61 = vperm.slane %v21961_v36, %v11781_v3  ;;  %v21982_v63 = vld [vmem:[#allocation61_spill] sm:$0xff] }
 0x2f0   : > { %21953 = vst [vmem:[#allocation38_spill] sm:$0xff] %v13524_v33  ;;  %v4681_v33 = vperm.slane %v4673_v23, %v11741_v28  ;;  %v4685_v40 = vsel %vm246_vm0, %v12488_v56, %v4684_v4  ;;  %v13576_v53 = vsel %vm246_vm0, %v13412_v51, %v21963_v9  ;;  %v4683_v36 = vsel %vm246_vm0, %v4682_v26, %v21952_v10 }
 0x2f1   : > { %21955 = vst [vmem:[#allocation41_spill] sm:$0xff] %v13528_v14  ;;  %v6546_v23 = vrot.slane %v13560_v50, 4  ;;  %v6424_v7 = vrot.slane %v13543_v58, 4  ;;  %v6563_v56 = vsel %vm246_vm0, %v6562_v38, %v13576_v53  ;;  %v13591_v43 = vsel %vm246_vm0, %v13566_v61, %v6760_v11 }
 0x2f2   : > { %21958 = vst [vmem:[#allocation46_spill] sm:$0xff] %v13543_v58  ;;  %v13548_v2 = vpop.trf.xlu1  ;;  %v13550_v30 = vpop.trf.xlu2  ;;  %v13594_v51 = vperm.slane %v6587_v46, %v11741_v28  ;;  %v6600_v4 = vrot.slane %v13554_v57, 4  ;;  %v4732_v26 = vrot.slane %v4681_v33, 4  ;;  %v13606_v38 = vperm.slane %v12347_v8, %v11781_v3 }
 0x2f3   : > { %21959 = vst [vmem:[#allocation159_spill] sm:$0xff] %v13548_v2  ;;  %v13599_v10 = vsel %vm246_vm0, %v6546_v23, %v13557_v55  ;;  %v6436_v11 = vrot.slane %v13125_v35, 4  ;;  %v4689_v46 = vperm.slane %v4683_v36, %v11741_v28  ;;  %v13652_v36 = vperm.slane %v21982_v63, %v11741_v28  ;;  %v21987_v63 = vld [vmem:[#allocation68_spill] sm:$0xff] }
 0x2f4   : > { %21960 = vst [vmem:[#allocation160_spill] sm:$0xff] %v13550_v30  ;;  %v13584_v30 = vsel %vm246_vm0, %v13528_v14, %v6536_v21  ;;  %v4693_v21 = vperm.slane %v4685_v40, %v11741_v28  ;;  %v13611_v14 = vperm.slane %v6563_v56, %v11741_v28  ;;  %v6625_v23 = vsel %vm246_vm0, %v13594_v51, %v6624_v20  ;;  %v21984_v56 = vld [vmem:[#allocation63_spill] sm:$0xff] }
 0x2f5   : > { %21962 = vst [vmem:[#allocation43_spill] sm:$0xff] %v13566_v61  ;;  %v4720_v61 = vrot.slane %v4677_v16, 4  ;;  %v13618_v40 = vsel %vm246_vm0, %v13606_v38, %v6424_v7  ;;  %v13623_v35 = vsel %vm246_vm0, %v13117_v19, %v6436_v11  ;;  %v13637_v19 = vperm.slane %v6625_v23, %v11781_v3 }
 0x2f6   : > { %21964 = vst [vmem:[#allocation161_spill] sm:$0xff] %v13584_v30  ;;  %v4770_v30 = vrot.slane %v12576_v44, 4  ;;  %v6601_v7 = vsel %vm246_vm0, %v13611_v14, %v6600_v4  ;;  %v4730_v8 = vrot.slane %v4693_v21, 4  ;;  %v22053_v18 = vld [vmem:[#allocation158_spill] sm:$0xff] }
 0x2f7   : > { %21965 = vst [vmem:[#allocation162_spill] sm:$0xff] %v13591_v43  ;;  %v13602_v9 = vpop.trf.xlu0  ;;  %v4721_v4 = vsel %vm246_vm0, %v4689_v46, %v4720_v61  ;;  %v13657_v22 = vperm.slane %v6601_v7, %v11781_v3 }
 0x2f8   : > { %21966 = vst [vmem:[#allocation163_spill] sm:$0xff] %v13599_v10  ;;  %v21969_v10 = vld [vmem:[#allocation51_spill] sm:$0xff]  ;;  %v4731_v61 = vsel %vm246_vm0, %v4730_v8, %v4681_v33  ;;  %v21986_v8 = vld [vmem:[#allocation66_spill] sm:$0xff] }
 0x2f9   : > { %21967 = vst [vmem:[#allocation164_spill] sm:$0xff] %v13602_v9  ;;  %v4760_v43 = vrot.slane %v21969_v10, 4  ;;  %v21975_v9 = vld [vmem:[#allocation64_spill] sm:$0xff] }
 0x2fa   : > { %21968 = vst [vmem:[#allocation165_spill] sm:$0xff] %v13606_v38  ;;  %v13628_v58 = vpop.trf.xlu1  ;;  %v13630_v20 = vpop.trf.xlu2  ;;  %v4772_v2 = vrot.slane %v21975_v9, 4  ;;  %v4733_v38 = vsel %vm246_vm0, %v4693_v21, %v4732_v26 }
 0x2fb   : > { %21970 = vst [vmem:[#allocation51_spill] sm:$0xff] %v13618_v40  ;;  %v21980_v40 = vld [vmem:[#allocation82_spill] sm:$0xff] }
 0x2fc   : > { %21971 = vst [vmem:[#allocation166_spill] sm:$0xff] %v13623_v35  ;;  %v4758_v52 = vrot.slane %v21980_v40, 4  ;;  %v4771_v35 = vsel %vm246_vm0, %v4770_v30, %v21975_v9  ;;  %v4773_v26 = vsel %vm246_vm0, %v12576_v44, %v4772_v2  ;;  %v13669_v30 = vperm.slane %v4721_v4, %v11781_v3 }
 0x2fd   : > { %21972 = vst [vmem:[#allocation167_spill] sm:$0xff] %v13628_v58  ;;  %v4741_v9 = vperm.slane %v4733_v38, %v11781_v3  ;;  %v4777_v7 = vperm.slane %v4771_v35, %v11741_v28  ;;  %v4761_v44 = vsel %vm246_vm0, %v21980_v40, %v4760_v43  ;;  %v6548_v2 = vrot.slane %v13557_v55, 4  ;;  %v21989_v35 = vld [vmem:[#allocation83_spill] sm:$0xff] }
 0x2fe   : > { %21973 = vst [vmem:[#allocation168_spill] sm:$0xff] %v13630_v20  ;;  %v4718_v20 = vrot.slane %v4689_v46, 4  ;;  %v4759_v33 = vsel %vm246_vm0, %v4758_v52, %v21969_v10  ;;  %v21990_v52 = vld [vmem:[#allocation85_spill] sm:$0xff]  ;;  %v4796_v43 = vrot.slane %v12767_v62, 4  ;;  %v4769_v46 = vperm.slane %v4761_v44, %v11741_v28 }
 0x2ff   : > { %21983 = vst [vmem:[#allocation64_spill] sm:$0xff] %v13652_v36  ;;  %v13663_v21 = vpop.trf.xlu0  ;;  %v4784_v36 = vrot.slane %v21989_v35, 4  ;;  %v4782_v10 = vrot.slane %v21990_v52, 4  ;;  %v13691_v55 = vsel %vm246_vm0, %v13560_v50, %v6548_v2  ;;  %v13707_v50 = vsel %vm246_vm0, %v13669_v30, %v21995_v12 }
 0x300   : > { %v4719_v23 = vsel %vm246_vm0, %v4718_v20, %v4677_v16  ;;  %21985 = vst [vmem:[#allocation62_spill] sm:$0xff] %v13669_v30  ;;  %v4737_v16 = vperm.slane %v4731_v61, %v11781_v3  ;;  %v4781_v20 = vperm.slane %v4773_v26, %v11741_v28  ;;  %v4754_v61 = vrot.slane %v4741_v9, 4 }
 0x301   : > { %21991 = vst [vmem:[#allocation61_spill] sm:$0xff] %v13691_v55  ;;  %v13694_v40 = vperm.slane %v4719_v23, %v11781_v3  ;;  %v4765_v26 = vperm.slane %v4759_v33, %v11741_v28  ;;  %v4806_v2 = vrot.slane %v4777_v7, 4  ;;  %v21997_v55 = vrot.slane %v13468_v31, 4 }
 0x302   : > { %v13682_v4 = vpop.trf.xlu1  ;;  %v13684_v38 = vpop.trf.xlu2  ;;  %21996 = vst [vmem:[#allocation69_spill] sm:$0xff] %v13707_v50  ;;  %v4750_v23 = vrot.slane %v4737_v16, 4  ;;  %v21999_v44 = vrot.slane %v13451_v25, 4  ;;  %v4783_v58 = vsel %vm246_vm0, %v4782_v10, %v21989_v35  ;;  %v4785_v12 = vsel %vm246_vm0, %v21990_v52, %v4784_v36 }
 0x303   : > { %21988 = vst [vmem:[#allocation82_spill] sm:$0xff] %v13684_v38  ;;  %v13700_v38 = vperm.slane %v21993_v27, %v11741_v28  ;;  %v13712_v33 = vsel %vm246_vm0, %v4737_v16, %v21997_v55  ;;  %v4794_v30 = vrot.slane %v12784_v42, 4  ;;  %v4797_v6 = vsel %vm246_vm0, %v12784_v42, %v4796_v43 }
 0x304   : > { %21992 = vst [vmem:[#allocation83_spill] sm:$0xff] %v13694_v40  ;;  %v13717_v27 = vsel %vm246_vm0, %v4741_v9, %v21999_v44  ;;  %v13731_v9 = vsel %vm246_vm0, %v4754_v61, %v13451_v25  ;;  %v4808_v55 = vrot.slane %v4765_v26, 4  ;;  %v4820_v44 = vrot.slane %v4769_v46, 4 }
 0x305   : > { %21994 = vst [vmem:[#allocation85_spill] sm:$0xff] %v13700_v38  ;;  %v4818_v38 = vrot.slane %v4781_v20, 4  ;;  %v4807_v52 = vsel %vm246_vm0, %v4806_v2, %v4765_v26  ;;  %v4789_v43 = vperm.slane %v4783_v58, %v11741_v28  ;;  %v4793_v16 = vperm.slane %v4785_v12, %v11741_v28  ;;  %v22003_v2 = vld [vmem:[#allocation73_spill] sm:$0xff]  ;;  %v22004_v58 = vld [vmem:[#allocation72_spill] sm:$0xff] }
 0x306   : > { %21998 = vst [vmem:[#allocation169_spill] sm:$0xff] %v13712_v33  ;;  %v4805_v25 = vperm.slane %v4797_v6, %v11741_v28  ;;  %v13748_v10 = vsel %vm246_vm0, %v4750_v23, %v13468_v31  ;;  %v4809_v36 = vsel %vm246_vm0, %v4777_v7, %v4808_v55  ;;  %v4821_v35 = vsel %vm246_vm0, %v4781_v20, %v4820_v44  ;;  %v22007_v23 = vld [vmem:[#allocation81_spill] sm:$0xff]  ;;  %v22014_v31 = vld [vmem:[#allocation76_spill] sm:$0xff] }
 0x307   : > { %22000 = vst [vmem:[#allocation170_spill] sm:$0xff] %v13717_v27  ;;  %v13726_v11 = vpop.trf.xlu0  ;;  %v4819_v42 = vsel %vm246_vm0, %v4818_v38, %v4769_v46  ;;  %v4795_v46 = vsel %vm246_vm0, %v4794_v30, %v12767_v62  ;;  %v22006_v27 = vld [vmem:[#allocation74_spill] sm:$0xff]  ;;  %v13762_v26 = vperm.slane %v22007_v23, %v11781_v3  ;;  %v4844_v30 = vrot.slane %v4793_v16, 4 }
 0x308   : > { %22001 = vst [vmem:[#allocation171_spill] sm:$0xff] %v13731_v9  ;;  %v13768_v62 = vperm.slane %v4819_v42, %v11781_v3  ;;  %v4801_v12 = vperm.slane %v4795_v46, %v11741_v28  ;;  %v4842_v38 = vrot.slane %v4805_v25, 4  ;;  %v13774_v55 = vperm.slane %v4809_v36, %v11781_v3  ;;  %v22018_v36 = vld [vmem:[#allocation88_spill] sm:$0xff] }
 0x309   : > { %2454 = vxpose.xlu2.b32.start.end [1/1] (short) (narrow) %v13421_v15, 32  ;;  %22002 = vst [vmem:[#allocation172_spill] sm:$0xff] %v13748_v10  ;;  %v13765_v15 = vperm.slane %v4807_v52, %v11781_v3  ;;  %v13777_v44 = vperm.slane %v4821_v35, %v11781_v3  ;;  %v22012_v52 = vld [vmem:[#allocation84_spill] sm:$0xff]  ;;  %v13793_v20 = vperm.slane %v22018_v36, %v11781_v3  ;;  %v6772_v6 = vrot.slane %v13479_v34, 4 }
 0x30a   : > { %v13742_v61 = vpop.trf.xlu1  ;;  %v13744_v40 = vpop.trf.xlu2  ;;  %22008 = vst [vmem:[#allocation72_spill] sm:$0xff] %v13762_v26  ;;  %v13781_v23 = vperm.slane %v22012_v52, %v11781_v3  ;;  %v4864_v52 = vrot.slane %v13768_v62, 4  ;;  %v4830_v7 = vrot.slane %v4801_v12, 4  ;;  %v4843_v9 = vsel %vm246_vm0, %v4842_v38, %v4793_v16 }
 0x30b   : > { %2422 = vxpose.xlu0.b32.start.end [1/1] (short) (narrow) %v13365_v41, 32  ;;  %22009 = vst [vmem:[#allocation74_spill] sm:$0xff] %v13765_v15  ;;  %v4832_v41 = vrot.slane %v4789_v43, 4  ;;  %v4860_v36 = vrot.slane %v13774_v55, 4  ;;  %v4868_v35 = vrot.slane %v13777_v44, 4  ;;  %v22020_v34 = vrot.slane %v13637_v19, 4 }
 0x30c   : > { %22011 = vst [vmem:[#allocation81_spill] sm:$0xff] %v13774_v55 }
 0x30d   : > { %22013 = vst [vmem:[#allocation84_spill] sm:$0xff] %v13781_v23  ;;  %v4833_v33 = vsel %vm246_vm0, %v4801_v12, %v4832_v41  ;;  %v13813_v15 = vsel %vm246_vm0, %v22020_v34, %v13657_v22  ;;  %v22023_v12 = vrot.slane %v13425_v54, 4  ;;  %v4849_v34 = vperm.slane %v4843_v9, %v11781_v3 }
 0x30e   : > { %2486 = vxpose.xlu1.b32.start.end [1/1] (short) (narrow) %v13282_v47, 32  ;;  %v22016_v47 = vld [vmem:[#allocation80_spill] sm:$0xff]  ;;  %22021 = vst [vmem:[#allocation88_spill] sm:$0xff] %v13813_v15  ;;  %v13827_v23 = vperm.slane %v4833_v33, %v11781_v3  ;;  %v22027_v54 = vrot.slane %v13576_v53, 4  ;;  %v22079_v15 = vld [vmem:[#allocation18_spill] sm:$0xff] }
 0x30f   : > { %v13783_v42 = vpop.trf.xlu0  ;;  %v13789_v10 = vperm.slane %v22016_v47, %v11741_v28  ;;  %22019 = vst [vmem:[#allocation80_spill] sm:$0xff] %v13793_v20  ;;  %v4845_v47 = vsel %vm246_vm0, %v4805_v25, %v4844_v30  ;;  %v6589_v41 = vsel %vm246_vm0, %v13436_v39, %v22023_v12  ;;  %v13823_v30 = vsel %vm246_vm0, %v13482_v48, %v6772_v6  ;;  %v22032_v53 = vld [vmem:[#allocation104_spill] sm:$0xff]  ;;  %v22072_v20 = vld [vmem:[#allocation25_spill] sm:$0xff] }
 0x310   : > { %22024 = vst [vmem:[#allocation173_spill] sm:$0xff] %v13823_v30  ;;  %v4853_v16 = vperm.slane %v4845_v47, %v11781_v3  ;;  %v4831_v39 = vsel %vm246_vm0, %v4830_v7, %v4789_v43  ;;  %v13841_v9 = vperm.slane %v6589_v41, %v11741_v28  ;;  %v6552_v25 = vrot.slane %v13511_v24, 4  ;;  %v22046_v24 = vld [vmem:[#allocation120_spill] sm:$0xff]  ;;  %v22075_v30 = vld [vmem:[#allocation33_spill] sm:$0xff] }
 0x311   : > { %22017 = vst [vmem:[#allocation76_spill] sm:$0xff] %v13789_v10  ;;  %v6565_v43 = vsel %vm246_vm0, %v13515_v17, %v22027_v54  ;;  %v22028_v7 = vrot.slane %v13430_v60, 4  ;;  %v13854_v55 = vperm.slane %v4831_v39, %v11781_v3  ;;  %v13858_v41 = vsel %vm246_vm0, %v13827_v23, %v4860_v36 }
 0x312   : > { %v13802_v10 = vpop.trf.xlu1  ;;  %v13804_v46 = vpop.trf.xlu2  ;;  %22025 = vst [vmem:[#allocation174_spill] sm:$0xff] %v13827_v23  ;;  %v4862_v50 = vrot.slane %v4849_v34, 4  ;;  %v4866_v48 = vrot.slane %v4853_v16, 4  ;;  %v13863_v37 = vperm.slane %v22032_v53, %v11741_v28  ;;  %v13866_v60 = vsel %vm246_vm0, %v4849_v34, %v4864_v52  ;;  %v22042_v34 = vld [vmem:[#allocation105_spill] sm:$0xff]  ;;  %v22043_v23 = vld [vmem:[#allocation116_spill] sm:$0xff] }
 0x313   : > { %v6577_v6 = vsel %vm246_vm0, %v13433_v29, %v22028_v7  ;;  %22029 = vst [vmem:[#allocation175_spill] sm:$0xff] %v13854_v55  ;;  %v6598_v54 = vrot.slane %v13611_v14, 4  ;;  %v4872_v36 = vrot.slane %v12898_v13, 4  ;;  %v13875_v39 = vperm.slane %v6565_v43, %v11741_v28  ;;  %v22044_v55 = vld [vmem:[#allocation118_spill] sm:$0xff] }
 0x314   : > { %22030 = vst [vmem:[#allocation176_spill] sm:$0xff] %v13858_v41  ;;  %v13878_v7 = vperm.slane %v6577_v6, %v11741_v28  ;;  %v6634_v53 = vrot.slane %v13841_v9, 4  ;;  %v13883_v52 = vsel %vm246_vm0, %v4853_v16, %v4868_v35  ;;  %v6553_v14 = vsel %vm246_vm0, %v13461_v59, %v6552_v25  ;;  %v22040_v35 = vld [vmem:[#allocation106_spill] sm:$0xff] }
 0x315   : > { %22033 = vst [vmem:[#allocation104_spill] sm:$0xff] %v13863_v37  ;;  %v13891_v43 = vsel %vm246_vm0, %v4862_v50, %v13768_v62  ;;  %v13895_v6 = vsel %vm246_vm0, %v4866_v48, %v13777_v44  ;;  %v7484_v12 = vrot.slane %v13866_v60, 4  ;;  %v13900_v16 = vperm.slane %v22040_v35, %v11781_v3 }
 0x316   : > { %22034 = vst [vmem:[#allocation177_spill] sm:$0xff] %v13866_v60  ;;  %v4884_v41 = vrot.slane %v22042_v34, 4  ;;  %v4870_v59 = vrot.slane %v22043_v23, 4  ;;  %v6599_v25 = vsel %vm246_vm0, %v6598_v54, %v13554_v57  ;;  %v4873_v50 = vsel %vm246_vm0, %v22043_v23, %v4872_v36  ;;  %v22045_v54 = vld [vmem:[#allocation21_spill] sm:$0xff] }
 0x317   : > { %v13838_v33 = vpop.trf.xlu0  ;;  %22037 = vst [vmem:[#allocation180_spill] sm:$0xff] %v13883_v52  ;;  %v13911_v44 = vperm.slane %v6553_v14, %v11741_v28  ;;  %v6610_v48 = vrot.slane %v13875_v39, 4  ;;  %v6635_v35 = vsel %vm246_vm0, %v6634_v53, %v13878_v7  ;;  %v5768_v5 = vrot.slane %v22044_v55, 4 }
 0x318   : > { %22038 = vst [vmem:[#allocation181_spill] sm:$0xff] %v13891_v43  ;;  %v6622_v57 = vrot.slane %v13594_v51, 4  ;;  %v5766_v36 = vrot.slane %v22045_v54, 4  ;;  %v4882_v14 = vrot.slane %v22046_v24, 4  ;;  %v13924_v32 = vperm.slane %v6599_v25, %v11781_v3 }
 0x319   : > { %22039 = vst [vmem:[#allocation182_spill] sm:$0xff] %v13895_v6  ;;  %v13928_v53 = vsel %vm246_vm0, %v13883_v52, %v7484_v12  ;;  %v4871_v37 = vsel %vm246_vm0, %v4870_v59, %v12898_v13  ;;  %v4881_v60 = vperm.slane %v4873_v50, %v11741_v28  ;;  %v13938_v23 = vperm.slane %v6635_v35, %v11781_v3  ;;  %v22052_v13 = vld [vmem:[#allocation112_spill] sm:$0xff] }
 0x31a   : > { %v13868_v17 = vpop.trf.xlu1  ;;  %v13870_v29 = vpop.trf.xlu2  ;;  %22041 = vst [vmem:[#allocation106_spill] sm:$0xff] %v13900_v16  ;;  %v4885_v12 = vsel %vm246_vm0, %v22046_v24, %v4884_v41  ;;  %v5780_v59 = vrot.slane %v22052_v13, 4  ;;  %v5769_v50 = vsel %vm246_vm0, %v22045_v54, %v5768_v5  ;;  %v6652_v52 = vrot.slane %v13657_v22, 4  ;;  %v22060_v54 = vld [vmem:[#allocation122_spill] sm:$0xff] }
 0x31b   : > { %22035 = vst [vmem:[#allocation178_spill] sm:$0xff] %v13868_v17  ;;  %v6623_v35 = vsel %vm246_vm0, %v6622_v57, %v22053_v18  ;;  %v4877_v43 = vperm.slane %v4871_v37, %v11741_v28  ;;  %v5767_v47 = vsel %vm246_vm0, %v5766_v36, %v22044_v55  ;;  %v4883_v41 = vsel %vm246_vm0, %v4882_v14, %v22042_v34  ;;  %v22055_v57 = vld [vmem:[#allocation124_spill] sm:$0xff] }
 0x31c   : > { %22036 = vst [vmem:[#allocation179_spill] sm:$0xff] %v13870_v29  ;;  %v6648_v24 = vrot.slane %v13924_v32, 4  ;;  %v4893_v25 = vperm.slane %v4885_v12, %v11741_v28  ;;  %v6654_v22 = vrot.slane %v13938_v23, 4  ;;  %v5777_v37 = vperm.slane %v5769_v50, %v11741_v28  ;;  %v22107_v29 = vld [vmem:[#allocation128_spill] sm:$0xff] }
 0x31d   : > { %22047 = vst [vmem:[#allocation105_spill] sm:$0xff] %v13924_v32  ;;  %v5778_v16 = vrot.slane %v22055_v57, 4  ;;  %v13969_v34 = vperm.slane %v6623_v35, %v11781_v3  ;;  %v13973_v12 = vperm.slane %v5767_v47, %v11741_v28  ;;  %v13978_v1 = vsel %vm246_vm0, %v13637_v19, %v6652_v52 }
 0x31e   : > { %22048 = vst [vmem:[#allocation116_spill] sm:$0xff] %v13928_v53  ;;  %v6611_v53 = vsel %vm246_vm0, %v6610_v48, %v13911_v44  ;;  %v4932_v48 = vrot.slane %v4881_v60, 4  ;;  %v4920_v18 = vrot.slane %v4877_v43, 4  ;;  %v5781_v50 = vsel %vm246_vm0, %v22055_v57, %v5780_v59 }
 0x31f   : > { %v13908_v62 = vpop.trf.xlu0  ;;  %v13960_v5 = vperm.slane %v6611_v53, %v11781_v3  ;;  %22057 = vst [vmem:[#allocation112_spill] sm:$0xff] %v13969_v34  ;;  %v4889_v53 = vperm.slane %v4883_v41, %v11741_v28  ;;  %v3114_v0 = vrot.slane %v22060_v54, 4  ;;  %v13986_v35 = vsel %vm246_vm0, %v13969_v34, %v6648_v24  ;;  %v22063_v41 = vld [vmem:[#allocation13_spill] sm:$0xff]  ;;  %v22073_v34 = vld [vmem:[#allocation32_spill] sm:$0xff] }
 0x320   : > { %22059 = vst [vmem:[#allocation158_spill] sm:$0xff] %v13978_v1  ;;  %v4930_v47 = vrot.slane %v4893_v25, 4  ;;  %v4933_v14 = vsel %vm246_vm0, %v4893_v25, %v4932_v48  ;;  %v3102_v36 = vrot.slane %v22063_v41, 4  ;;  %v5828_v59 = vrot.slane %v5777_v37, 4  ;;  %v22069_v24 = vld [vmem:[#allocation29_spill] sm:$0xff]  ;;  %v22071_v48 = vld [vmem:[#allocation22_spill] sm:$0xff] }
 0x321   : > { %22062 = vst [vmem:[#allocation124_spill] sm:$0xff] %v13986_v35  ;;  %v13996_v52 = vsel %vm246_vm0, %v6654_v22, %v13960_v5  ;;  %v14004_v57 = vperm.slane %v22069_v24, %v11781_v3  ;;  %v5779_v25 = vsel %vm246_vm0, %v5778_v16, %v22052_v13  ;;  %v5816_v41 = vrot.slane %v13973_v12, 4  ;;  %v22077_v16 = vld [vmem:[#allocation27_spill] sm:$0xff]  ;;  %v22078_v1 = vld [vmem:[#allocation117_spill] sm:$0xff] }
 0x322   : > { %v13933_v6 = vpop.trf.xlu1  ;;  %v13935_v51 = vpop.trf.xlu2  ;;  %22066 = vst [vmem:[#allocation13_spill] sm:$0xff] %v13996_v52  ;;  %v4896_v26 = vrot.slane %v22072_v20, 4  ;;  %v4918_v22 = vrot.slane %v4889_v53, 4  ;;  %v5789_v32 = vperm.slane %v5781_v50, %v11741_v28  ;;  %v14018_v24 = vperm.slane %v22075_v30, %v11781_v3 }
 0x323   : > { %22049 = vst [vmem:[#allocation118_spill] sm:$0xff] %v13933_v6  ;;  %v14021_v35 = vperm.slane %v4933_v14, %v11781_v3  ;;  %v3115_v13 = vsel %vm246_vm0, %v3114_v0, %v22077_v16  ;;  %v4931_v52 = vsel %vm246_vm0, %v4930_v47, %v4881_v60  ;;  %v5785_v50 = vperm.slane %v5779_v25, %v11741_v28  ;;  %v22080_v14 = vld [vmem:[#allocation34_spill] sm:$0xff]  ;;  %v22083_v47 = vld [vmem:[#allocation133_spill] sm:$0xff] }
 0x324   : > { %22050 = vst [vmem:[#allocation21_spill] sm:$0xff] %v13935_v51  ;;  %v22081_v6 = vld [vmem:[#allocation126_spill] sm:$0xff]  ;;  %v5826_v60 = vrot.slane %v5789_v32, 4  ;;  %v3998_v25 = vrot.slane %v22083_v47, 4 }
 0x325   : > { %22070 = vst [vmem:[#allocation29_spill] sm:$0xff] %v14004_v57  ;;  %v4010_v51 = vrot.slane %v22081_v6, 4 }
 0x326   : > { %22076 = vst [vmem:[#allocation25_spill] sm:$0xff] %v14018_v24  ;;  %v5827_v6 = vsel %vm246_vm0, %v5826_v60, %v5777_v37 }
 0x327   : > { %v13966_v55 = vpop.trf.xlu0 }
 0x328   : > { %22056 = vst [vmem:[#allocation120_spill] sm:$0xff] %v13966_v55 }
 0x329   : > { %2550 = vxpose.xlu2.b32.start.end [1/1] (short) (narrow) %v22061_v45, 32  ;;  %v22067_v45 = vld [vmem:[#allocation24_spill] sm:$0xff] }
 0x32a   : > { %v13990_v38 = vpop.trf.xlu1  ;;  %v13992_v19 = vpop.trf.xlu2  ;;  %v14000_v54 = vperm.slane %v22067_v45, %v11781_v3  ;;  %v14014_v45 = vperm.slane %v22073_v34, %v11781_v3  ;;  %v3103_v34 = vsel %vm246_vm0, %v3102_v36, %v22078_v1  ;;  %v22085_v36 = vld [vmem:[#allocation121_spill] sm:$0xff] }
 0x32b   : > { %22064 = vst [vmem:[#allocation122_spill] sm:$0xff] %v13990_v38  ;;  %2518 = vxpose.xlu0.b32.start.end [1/1] (short) (narrow) %v22071_v48, 32  ;;  %v4921_v48 = vsel %vm246_vm0, %v4889_v53, %v4920_v18  ;;  %v4919_v18 = vsel %vm246_vm0, %v4918_v22, %v4877_v43  ;;  %v3121_v53 = vperm.slane %v3115_v13, %v11741_v28  ;;  %v4908_v16 = vrot.slane %v22085_v36, 4 }
 0x32c   : > { %22065 = vst [vmem:[#allocation17_spill] sm:$0xff] %v13992_v19  ;;  %v14041_v1 = vperm.slane %v4921_v48, %v11781_v3  ;;  %v3109_v30 = vperm.slane %v3103_v34, %v11741_v28  ;;  %v5814_v22 = vrot.slane %v5785_v50, 4  ;;  %v14056_v48 = vperm.slane %v4919_v18, %v11781_v3 }
 0x32d   : > { %22068 = vst [vmem:[#allocation24_spill] sm:$0xff] %v14000_v54  ;;  %v5829_v19 = vsel %vm246_vm0, %v5789_v32, %v5828_v59  ;;  %v22089_v54 = vld [vmem:[#allocation30_spill] sm:$0xff]  ;;  %v3150_v38 = vrot.slane %v3121_v53, 4 }
 0x32e   : > { %22074 = vst [vmem:[#allocation22_spill] sm:$0xff] %v14014_v45  ;;  %2582 = vxpose.xlu1.b32.start.end [1/1] (short) (narrow) %v22079_v15, 32  ;;  %v14044_v15 = vperm.slane %v4931_v52, %v11781_v3  ;;  %v5817_v52 = vsel %vm246_vm0, %v5785_v50, %v5816_v41  ;;  %v4011_v34 = vsel %vm246_vm0, %v4010_v51, %v22089_v54  ;;  %v22090_v45 = vld [vmem:[#allocation119_spill] sm:$0xff]  ;;  %v3152_v55 = vrot.slane %v3109_v30, 4 }
 0x32f   : > { %v14035_v0 = vpop.trf.xlu0  ;;  %22084 = vst [vmem:[#allocation33_spill] sm:$0xff] %v14041_v1  ;;  %v3999_v43 = vsel %vm246_vm0, %v3998_v25, %v22090_v45  ;;  %v5815_v32 = vsel %vm246_vm0, %v5814_v22, %v13973_v12  ;;  %v14073_v51 = vperm.slane %v5817_v52, %v11781_v3  ;;  %v14076_v37 = vperm.slane %v5829_v19, %v11781_v3 }
 0x330   : > { %22082 = vst [vmem:[#allocation32_spill] sm:$0xff] %v14035_v0  ;;  %v22091_v0 = vld [vmem:[#allocation129_spill] sm:$0xff]  ;;  %v4017_v59 = vperm.slane %v4011_v34, %v11741_v28  ;;  %v14081_v45 = vperm.slane %v5827_v6, %v11781_v3  ;;  %v4005_v50 = vperm.slane %v3999_v43, %v11741_v28  ;;  %v3151_v12 = vsel %vm246_vm0, %v3150_v38, %v3109_v30  ;;  %v22096_v34 = vld [vmem:[#allocation132_spill] sm:$0xff] }
 0x331   : > { %22088 = vst [vmem:[#allocation18_spill] sm:$0xff] %v14056_v48  ;;  %v4909_v41 = vsel %vm246_vm0, %v22091_v0, %v4908_v16  ;;  %v22094_v16 = vld [vmem:[#allocation138_spill] sm:$0xff]  ;;  %v14093_v52 = vperm.slane %v5815_v32, %v11781_v3  ;;  %v3153_v6 = vsel %vm246_vm0, %v3121_v53, %v3152_v55  ;;  %v3182_v43 = vrot.slane %v22096_v34, 4  ;;  %v22097_v30 = vld [vmem:[#allocation125_spill] sm:$0xff] }
 0x332   : > { %v14051_v13 = vpop.trf.xlu1  ;;  %v14053_v47 = vpop.trf.xlu2  ;;  %22092 = vst [vmem:[#allocation34_spill] sm:$0xff] %v14073_v51  ;;  %v4917_v19 = vperm.slane %v4909_v41, %v11741_v28  ;;  %v4894_v22 = vrot.slane %v22094_v16, 4  ;;  %v14108_v55 = vperm.slane %v3151_v12, %v11781_v3  ;;  %v4048_v53 = vrot.slane %v4005_v50, 4  ;;  %v22104_v12 = vld [vmem:[#allocation131_spill] sm:$0xff] }
 0x333   : > { %22086 = vst [vmem:[#allocation27_spill] sm:$0xff] %v14051_v13  ;;  %v4906_v13 = vrot.slane %v22091_v0, 4  ;;  %v6656_v0 = vrot.slane %v13960_v5, 4 }
 0x334   : > { %22087 = vst [vmem:[#allocation117_spill] sm:$0xff] %v14053_v47  ;;  %v4897_v47 = vsel %vm246_vm0, %v22094_v16, %v4896_v26  ;;  %v14112_v26 = vperm.slane %v3153_v6, %v11781_v3  ;;  %v4954_v16 = vrot.slane %v4917_v19, 4  ;;  %v4895_v5 = vsel %vm246_vm0, %v4894_v22, %v22072_v20  ;;  %v22108_v22 = vld [vmem:[#allocation134_spill] sm:$0xff] }
 0x335   : > { %v4907_v25 = vsel %vm246_vm0, %v4906_v13, %v22085_v36  ;;  %22095 = vst [vmem:[#allocation133_spill] sm:$0xff] %v14093_v52  ;;  %v5804_v36 = vrot.slane %v22097_v30, 4  ;;  %v4046_v13 = vrot.slane %v4017_v59, 4  ;;  %v4905_v38 = vperm.slane %v4897_v47, %v11741_v28 }
 0x336   : > { %22100 = vst [vmem:[#allocation119_spill] sm:$0xff] %v14108_v55  ;;  %v4913_v34 = vperm.slane %v4907_v25, %v11741_v28  ;;  %v14125_v25 = vsel %vm246_vm0, %v13938_v23, %v6656_v0  ;;  %v5802_v47 = vrot.slane %v22108_v22, 4  ;;  %v4049_v54 = vsel %vm246_vm0, %v4017_v59, %v4048_v53  ;;  %v22112_v53 = vld [vmem:[#allocation146_spill] sm:$0xff]  ;;  %v22114_v23 = vld [vmem:[#allocation139_spill] sm:$0xff] }
 0x337   : > { %v14084_v60 = vpop.trf.xlu0  ;;  %22101 = vst [vmem:[#allocation129_spill] sm:$0xff] %v14112_v26  ;;  %v4047_v20 = vsel %vm246_vm0, %v4046_v13, %v4005_v50  ;;  %v4955_v50 = vsel %vm246_vm0, %v4954_v16, %v4905_v38  ;;  %v22109_v13 = vld [vmem:[#allocation130_spill] sm:$0xff]  ;;  %v4078_v6 = vrot.slane %v22114_v23, 4  ;;  %v22117_v23 = vrot.slane %v14004_v57, 4 }
 0x338   : > { %22093 = vst [vmem:[#allocation126_spill] sm:$0xff] %v14084_v60  ;;  %v4942_v52 = vrot.slane %v4913_v34, 4  ;;  %v14146_v59 = vperm.slane %v4047_v20, %v11781_v3  ;;  %v5803_v60 = vsel %vm246_vm0, %v5802_v47, %v22097_v30 }
 0x339   : > { %22105 = vst [vmem:[#allocation132_spill] sm:$0xff] %v14125_v25  ;;  %v14170_v30 = vsel %vm246_vm0, %v14112_v26, %v22117_v23  ;;  %v22120_v25 = vld [vmem:[#allocation12_spill] sm:$0xff] }
 0x33a   : > { %v14102_v41 = vpop.trf.xlu1  ;;  %v14104_v18 = vpop.trf.xlu2  ;;  %22118 = vst [vmem:[#allocation134_spill] sm:$0xff] %v14170_v30 }
 0x33b   : > { %22098 = vst [vmem:[#allocation121_spill] sm:$0xff] %v14102_v41  ;;  %v22102_v41 = vld [vmem:[#allocation8_spill] sm:$0xff] }
 0x33c   : > { %22099 = vst [vmem:[#allocation30_spill] sm:$0xff] %v14104_v18  ;;  %v14120_v32 = vsel %vm246_vm0, %v3182_v43, %v22102_v41  ;;  %v3186_v18 = vrot.slane %v22104_v12, 4  ;;  %v4901_v43 = vperm.slane %v4895_v5, %v11741_v28  ;;  %v5805_v41 = vsel %vm246_vm0, %v22108_v22, %v5804_v36 }
 0x33d   : > { %22103 = vst [vmem:[#allocation138_spill] sm:$0xff] %v14120_v32  ;;  %v4956_v5 = vrot.slane %v4905_v38, 4  ;;  %v5790_v36 = vrot.slane %v22112_v53, 4  ;;  %v14150_v22 = vperm.slane %v4049_v54, %v11781_v3  ;;  %v5813_v16 = vperm.slane %v5805_v41, %v11741_v28  ;;  %v22119_v41 = vld [vmem:[#allocation140_spill] sm:$0xff] }
 0x33e   : > { %v14143_v17 = vsel %vm246_vm0, %v3186_v18, %v22109_v13  ;;  %22111 = vst [vmem:[#allocation8_spill] sm:$0xff] %v14146_v59  ;;  %v4943_v20 = vsel %vm246_vm0, %v4942_v52, %v4901_v43  ;;  %v4944_v13 = vrot.slane %v4901_v43, 4  ;;  %v4961_v38 = vperm.slane %v4955_v50, %v11781_v3 }
 0x33f   : > { %v14135_v12 = vpop.trf.xlu0  ;;  %22110 = vst [vmem:[#allocation125_spill] sm:$0xff] %v14143_v17  ;;  %v22116_v32 = vrot.slane %v22080_v14, 4  ;;  %v4082_v55 = vrot.slane %v22119_v41, 4  ;;  %v4957_v50 = vsel %vm246_vm0, %v4917_v19, %v4956_v5  ;;  %v14186_v47 = vperm.slane %v4943_v20, %v11781_v3  ;;  %v22127_v20 = vld [vmem:[#allocation143_spill] sm:$0xff]  ;;  %v22131_v17 = vld [vmem:[#allocation149_spill] sm:$0xff] }
 0x340   : > { %22113 = vst [vmem:[#allocation131_spill] sm:$0xff] %v14150_v22  ;;  %v4945_v19 = vsel %vm246_vm0, %v4913_v34, %v4944_v13  ;;  %v4974_v5 = vrot.slane %v4961_v38, 4  ;;  %v3190_v30 = vrot.slane %v22127_v20, 4  ;;  %v22130_v13 = vld [vmem:[#allocation142_spill] sm:$0xff] }
 0x341   : > { %v5793_v54 = vsel %vm246_vm0, %v22112_v53, %v22116_v32  ;;  %v5791_v32 = vsel %vm246_vm0, %v5790_v36, %v22080_v14  ;;  %v22121_v53 = vld [vmem:[#allocation9_spill] sm:$0xff]  ;;  %22124 = vst [vmem:[#allocation146_spill] sm:$0xff] %v14186_v47  ;;  %v22125_v14 = vld [vmem:[#allocation136_spill] sm:$0xff] }
 0x342   : > { %v14156_v0 = vpop.trf.xlu1  ;;  %v14158_v18 = vpop.trf.xlu2  ;;  %v14182_v57 = vsel %vm246_vm0, %v4078_v6, %v22121_v53  ;;  %v5801_v41 = vperm.slane %v5793_v54, %v11741_v28  ;;  %v14195_v36 = vsel %vm246_vm0, %v4082_v55, %v22125_v14  ;;  %v4965_v6 = vperm.slane %v4957_v50, %v11781_v3 }
 0x343   : > { %22115 = vst [vmem:[#allocation128_spill] sm:$0xff] %v14156_v0  ;;  %v5809_v0 = vperm.slane %v5803_v60, %v11741_v28  ;;  %v5850_v60 = vrot.slane %v5813_v16, 4  ;;  %v5797_v53 = vperm.slane %v5791_v32, %v11741_v28  ;;  %v22128_v54 = vrot.slane %v14018_v24, 4 }
 0x344   : > { %22122 = vst [vmem:[#allocation130_spill] sm:$0xff] %v14182_v57  ;;  %v14210_v55 = vperm.slane %v4945_v19, %v11781_v3  ;;  %v22133_v50 = vrot.slane %v14056_v48, 4  ;;  %v22135_v14 = vrot.slane %v14044_v15, 4  ;;  %v5852_v34 = vrot.slane %v5801_v41, 4  ;;  %v22146_v19 = vld [vmem:[#allocation20_spill] sm:$0xff] }
 0x345   : > { %22126 = vst [vmem:[#allocation139_spill] sm:$0xff] %v14195_v36  ;;  %v14204_v43 = vsel %vm246_vm0, %v14150_v22, %v22128_v54  ;;  %v5838_v59 = vrot.slane %v5809_v0, 4  ;;  %v14231_v48 = vsel %vm246_vm0, %v4974_v5, %v14044_v15  ;;  %v4978_v22 = vrot.slane %v4965_v6, 4 }
 0x346   : > { %22129 = vst [vmem:[#allocation140_spill] sm:$0xff] %v14204_v43  ;;  %v14216_v32 = vsel %vm246_vm0, %v14186_v47, %v22133_v50  ;;  %v14221_v54 = vsel %vm246_vm0, %v4961_v38, %v22135_v14  ;;  %v5851_v50 = vsel %vm246_vm0, %v5850_v60, %v5801_v41  ;;  %v22140_v43 = vld [vmem:[#allocation19_spill] sm:$0xff]  ;;  %v22141_v38 = vrot.slane %v14021_v35, 4 }
 0x347   : > { %v14191_v52 = vpop.trf.xlu0  ;;  %22132 = vst [vmem:[#allocation12_spill] sm:$0xff] %v14210_v55  ;;  %v5840_v24 = vrot.slane %v5797_v53, 4  ;;  %v5839_v15 = vsel %vm246_vm0, %v5838_v59, %v5797_v53  ;;  %v22143_v41 = vrot.slane %v22107_v29, 4  ;;  %v22144_v60 = vrot.slane %v14041_v1, 4  ;;  %v22150_v59 = vld [vmem:[#allocation14_spill] sm:$0xff] }
 0x348   : > { %22134 = vst [vmem:[#allocation9_spill] sm:$0xff] %v14216_v32  ;;  %v14238_v14 = vsel %vm246_vm0, %v4965_v6, %v22141_v38  ;;  %v5857_v38 = vperm.slane %v5851_v50, %v11781_v3  ;;  %v22152_v5 = vrot.slane %v13643_v49, 4 }
 0x349   : > { %2646 = vxpose.xlu2.b32.start.end [1/1] (short) (narrow) %v22131_v17, 32  ;;  %22136 = vst [vmem:[#allocation136_spill] sm:$0xff] %v14221_v54  ;;  %v3191_v17 = vsel %vm246_vm0, %v3190_v30, %v22107_v29  ;;  %v14254_v6 = vsel %vm246_vm0, %v14210_v55, %v22144_v60  ;;  %v5853_v30 = vsel %vm246_vm0, %v5813_v16, %v5852_v34  ;;  %v22151_v29 = vld [vmem:[#allocation37_spill] sm:$0xff] }
 0x34a   : > { %v14223_v57 = vpop.trf.xlu1  ;;  %v14225_v23 = vpop.trf.xlu2  ;;  %22139 = vst [vmem:[#allocation149_spill] sm:$0xff] %v14231_v48  ;;  %v14262_v53 = vperm.slane %v3191_v17, %v11741_v28  ;;  %v14269_v60 = vsel %vm246_vm0, %v4978_v22, %v14021_v35  ;;  %v5841_v16 = vsel %vm246_vm0, %v5809_v0, %v5840_v24  ;;  %v14273_v34 = vperm.slane %v5839_v15, %v11781_v3  ;;  %v22156_v15 = vld [vmem:[#allocation147_spill] sm:$0xff]  ;;  %v22158_v54 = vld [vmem:[#allocation65_spill] sm:$0xff] }
 0x34b   : > { %22137 = vst [vmem:[#allocation143_spill] sm:$0xff] %v14223_v57  ;;  %2614 = vxpose.xlu0.b32.start.end [1/1] (short) (narrow) %v22140_v43, 32  ;;  %v3193_v43 = vsel %vm246_vm0, %v22127_v20, %v22143_v41  ;;  %v22147_v20 = vld [vmem:[#allocation16_spill] sm:$0xff]  ;;  %v5861_v50 = vperm.slane %v5853_v30, %v11781_v3  ;;  %v3202_v17 = vrot.slane %v22150_v59, 4  ;;  %v14282_v48 = vsel %vm246_vm0, %v22152_v5, %v22151_v29 }
 0x34c   : > { %22138 = vst [vmem:[#allocation142_spill] sm:$0xff] %v14225_v23  ;;  %v3204_v41 = vrot.slane %v22147_v20, 4  ;;  %v22154_v35 = vrot.slane %v22151_v29, 4  ;;  %v5870_v22 = vrot.slane %v5857_v38, 4  ;;  %v14298_v5 = vperm.slane %v5841_v16, %v11781_v3 }
 0x34d   : > { %22142 = vst [vmem:[#allocation19_spill] sm:$0xff] %v14238_v14  ;;  %v3240_v29 = vrot.slane %v14262_v53, 4  ;;  %v22161_v0 = vrot.slane %v14081_v45, 4  ;;  %v22164_v16 = vrot.slane %v21984_v56, 4 }
 0x34e   : > { %22145 = vst [vmem:[#allocation183_spill] sm:$0xff] %v14254_v6  ;;  %2678 = vxpose.xlu1.b32.start.end [1/1] (short) (narrow) %v22146_v19, 32  ;;  %v3201_v19 = vperm.slane %v3193_v43, %v11741_v28  ;;  %v14288_v24 = vsel %vm246_vm0, %v13643_v49, %v22154_v35  ;;  %v3205_v49 = vsel %vm246_vm0, %v22150_v59, %v3204_v41  ;;  %v22160_v35 = vld [vmem:[#allocation148_spill] sm:$0xff]  ;;  %v22163_v6 = vld [vmem:[#allocation23_spill] sm:$0xff]  ;;  %v5874_v41 = vrot.slane %v5861_v50, 4 }
 0x34f   : > { %v14265_v47 = vpop.trf.xlu0  ;;  %22148 = vst [vmem:[#allocation20_spill] sm:$0xff] %v14269_v60  ;;  %v6886_v60 = vrot.slane %v22158_v54, 4  ;;  %v4086_v32 = vrot.slane %v22160_v35, 4  ;;  %v14307_v43 = vsel %vm246_vm0, %v5857_v38, %v22161_v0  ;;  %v4100_v55 = vrot.slane %v22163_v6, 4 }
 0x350   : > { %22149 = vst [vmem:[#allocation16_spill] sm:$0xff] %v14273_v34  ;;  %v14318_v36 = vsel %vm246_vm0, %v22164_v16, %v14288_v24  ;;  %v3252_v26 = vrot.slane %v3201_v19, 4  ;;  %v3203_v38 = vsel %vm246_vm0, %v3202_v17, %v22147_v20  ;;  %v14325_v0 = vsel %vm246_vm0, %v5870_v22, %v14081_v45  ;;  %v22169_v17 = vld [vmem:[#allocation28_spill] sm:$0xff] }
 0x351   : > { %22153 = vst [vmem:[#allocation14_spill] sm:$0xff] %v14282_v48  ;;  %v14312_v1 = vsel %vm246_vm0, %v6886_v60, %v14282_v48  ;;  %v22166_v60 = vrot.slane %v14076_v37, 4  ;;  %v3213_v56 = vperm.slane %v3205_v49, %v11741_v28  ;;  %v22168_v16 = vrot.slane %v22120_v25, 4 }
 0x352   : > { %22155 = vst [vmem:[#allocation37_spill] sm:$0xff] %v14288_v24  ;;  %v14292_v30 = vpop.trf.xlu1  ;;  %v14294_v14 = vpop.trf.xlu2  ;;  %v4087_v45 = vsel %vm246_vm0, %v4086_v32, %v22120_v25  ;;  %v4098_v22 = vrot.slane %v22169_v17, 4  ;;  %v14356_v25 = vsel %vm246_vm0, %v5874_v41, %v14076_v37  ;;  %v22178_v32 = vrot.slane %v22130_v13, 4 }
 0x353   : > { %22157 = vst [vmem:[#allocation147_spill] sm:$0xff] %v14294_v14  ;;  %v14330_v54 = vsel %vm246_vm0, %v5861_v50, %v22166_v60  ;;  %v4089_v59 = vsel %vm246_vm0, %v22160_v35, %v22168_v16  ;;  %v22171_v50 = vrot.slane %v14073_v51, 4  ;;  %v3209_v60 = vperm.slane %v3203_v38, %v11741_v28  ;;  %v22173_v16 = vld [vmem:[#allocation15_spill] sm:$0xff] }
 0x354   : > { %22159 = vst [vmem:[#allocation184_spill] sm:$0xff] %v14298_v5  ;;  %v4101_v35 = vsel %vm246_vm0, %v22169_v17, %v4100_v55  ;;  %v4982_v20 = vrot.slane %v22173_v16, 4  ;;  %v8042_v34 = vrot.slane %v14330_v54, 4  ;;  %v4097_v51 = vperm.slane %v4089_v59, %v11741_v28 }
 0x355   : > { %22162 = vst [vmem:[#allocation148_spill] sm:$0xff] %v14307_v43  ;;  %v14348_v49 = vsel %vm246_vm0, %v14298_v5, %v22171_v50  ;;  %v3250_v48 = vrot.slane %v3213_v56, 4  ;;  %v3253_v50 = vsel %vm246_vm0, %v3213_v56, %v3252_v26  ;;  %v4093_v38 = vperm.slane %v4087_v45, %v11741_v28  ;;  %v22179_v26 = vld [vmem:[#allocation36_spill] sm:$0xff] }
 0x356   : > { %22165 = vst [vmem:[#allocation23_spill] sm:$0xff] %v14325_v0  ;;  %v22177_v17 = vrot.slane %v21986_v8, 4  ;;  %v4099_v41 = vsel %vm246_vm0, %v4098_v22, %v22163_v6  ;;  %v4109_v59 = vperm.slane %v4101_v35, %v11741_v28  ;;  %v4985_v56 = vsel %vm246_vm0, %v22173_v16, %v22178_v32 }
 0x357   : > { %22167 = vst [vmem:[#allocation185_spill] sm:$0xff] %v14330_v54  ;;  %v14342_v24 = vpop.trf.xlu0  ;;  %v4996_v45 = vrot.slane %v22179_v26, 4  ;;  %v3238_v0 = vrot.slane %v3209_v60, 4  ;;  %v4983_v5 = vsel %vm246_vm0, %v4982_v20, %v22130_v13  ;;  %v14387_v6 = vsel %vm246_vm0, %v8042_v34, %v14307_v43  ;;  %v22182_v43 = vld [vmem:[#allocation35_spill] sm:$0xff] }
 0x358   : > { %22170 = vst [vmem:[#allocation28_spill] sm:$0xff] %v14342_v24  ;;  %v14371_v37 = vsel %vm246_vm0, %v22177_v17, %v21987_v63  ;;  %v22180_v17 = vld [vmem:[#allocation151_spill] sm:$0xff]  ;;  %v3241_v22 = vsel %vm246_vm0, %v3209_v60, %v3240_v29  ;;  %v14391_v35 = vperm.slane %v3253_v50, %v11781_v3  ;;  %v4148_v16 = vrot.slane %v4097_v51, 4 }
 0x359   : > { %22172 = vst [vmem:[#allocation186_spill] sm:$0xff] %v14348_v49  ;;  %v4994_v8 = vrot.slane %v22180_v17, 4  ;;  %v3251_v32 = vsel %vm246_vm0, %v3250_v48, %v3201_v19  ;;  %v4136_v63 = vrot.slane %v4093_v38, 4  ;;  %v4105_v54 = vperm.slane %v4099_v41, %v11741_v28  ;;  %v22183_v19 = vld [vmem:[#allocation154_spill] sm:$0xff]  ;;  %v22219_v24 = vld [vmem:[#allocation55_spill] sm:$0xff] }
 0x35a   : > { %22174 = vst [vmem:[#allocation15_spill] sm:$0xff] %v14356_v25  ;;  %v14363_v49 = vpop.trf.xlu1  ;;  %v14365_v55 = vpop.trf.xlu2  ;;  %v4993_v25 = vperm.slane %v4985_v56, %v11741_v28  ;;  %v4146_v13 = vrot.slane %v4109_v59, 4  ;;  %v4989_v20 = vperm.slane %v4983_v5, %v11741_v28  ;;  %v4997_v34 = vsel %vm246_vm0, %v22180_v17, %v4996_v45  ;;  %v22185_v17 = vld [vmem:[#allocation156_spill] sm:$0xff] }
 0x35b   : > { %22175 = vst [vmem:[#allocation187_spill] sm:$0xff] %v14363_v49  ;;  %v3239_v29 = vsel %vm246_vm0, %v3238_v0, %v14262_v53  ;;  %v14403_v60 = vperm.slane %v3241_v22, %v11781_v3  ;;  %v4995_v48 = vsel %vm246_vm0, %v4994_v8, %v22179_v26  ;;  %v5892_v50 = vrot.slane %v22183_v19, 4 }
 0x35c   : > { %22176 = vst [vmem:[#allocation188_spill] sm:$0xff] %v14365_v55  ;;  %v14409_v41 = vperm.slane %v3251_v32, %v11781_v3  ;;  %v4149_v5 = vsel %vm246_vm0, %v4109_v59, %v4148_v16  ;;  %v22184_v56 = vrot.slane %v22156_v15, 4  ;;  %v5890_v53 = vrot.slane %v22185_v17, 4 }
 0x35d   : > { %22181 = vst [vmem:[#allocation36_spill] sm:$0xff] %v14387_v6  ;;  %v5878_v6 = vrot.slane %v22182_v43, 4  ;;  %v4134_v22 = vrot.slane %v4105_v54, 4  ;;  %v4137_v55 = vsel %vm246_vm0, %v4105_v54, %v4136_v63  ;;  %v5044_v8 = vrot.slane %v4993_v25, 4  ;;  %v22197_v63 = vld [vmem:[#allocation38_spill] sm:$0xff] }
 0x35e   : > { %v5881_v45 = vsel %vm246_vm0, %v22182_v43, %v22184_v56  ;;  %v5005_v26 = vperm.slane %v4997_v34, %v11741_v28  ;;  %v4147_v59 = vsel %vm246_vm0, %v4146_v13, %v4097_v51  ;;  %v5032_v16 = vrot.slane %v4989_v20, 4 }
 0x35f   : > { %v14417_v0 = vpop.trf.xlu0  ;;  %v5001_v14 = vperm.slane %v4995_v48, %v11741_v28  ;;  %v5879_v43 = vsel %vm246_vm0, %v5878_v6, %v22156_v15  ;;  %v14430_v56 = vperm.slane %v3239_v29, %v11781_v3  ;;  %v5889_v54 = vperm.slane %v5881_v45, %v11741_v28 }
 0x360   : > { %22186 = vst [vmem:[#allocation151_spill] sm:$0xff] %v14417_v0  ;;  %v5893_v34 = vsel %vm246_vm0, %v22185_v17, %v5892_v50  ;;  %v14438_v51 = vperm.slane %v4137_v55, %v11781_v3  ;;  %v14441_v13 = vperm.slane %v4149_v5, %v11781_v3  ;;  %v5891_v15 = vsel %vm246_vm0, %v5890_v53, %v22183_v19 }
 0x361   : > { %22189 = vst [vmem:[#allocation156_spill] sm:$0xff] %v14430_v56  ;;  %v4135_v6 = vsel %vm246_vm0, %v4134_v22, %v4093_v38  ;;  %v14447_v29 = vperm.slane %v4147_v59, %v11781_v3  ;;  %v5042_v48 = vrot.slane %v5005_v26, 4  ;;  %v5885_v45 = vperm.slane %v5879_v43, %v11741_v28 }
 0x362   : > { %v14421_v49 = vpop.trf.xlu1  ;;  %v14423_v32 = vpop.trf.xlu2  ;;  %v5030_v50 = vrot.slane %v5001_v14, 4  ;;  %v5033_v17 = vsel %vm246_vm0, %v5001_v14, %v5032_v16  ;;  %v5045_v55 = vsel %vm246_vm0, %v5005_v26, %v5044_v8  ;;  %v5940_v19 = vrot.slane %v5889_v54, 4  ;;  %v22195_v8 = vld [vmem:[#allocation150_spill] sm:$0xff] }
 0x363   : > { %22187 = vst [vmem:[#allocation35_spill] sm:$0xff] %v14421_v49  ;;  %v5897_v38 = vperm.slane %v5891_v15, %v11741_v28  ;;  %v14457_v53 = vperm.slane %v4135_v6, %v11781_v3  ;;  %v6612_v59 = vrot.slane %v13911_v44, 4  ;;  %v6636_v14 = vrot.slane %v13878_v7, 4 }
 0x364   : > { %22188 = vst [vmem:[#allocation154_spill] sm:$0xff] %v14423_v32  ;;  %v5901_v32 = vperm.slane %v5893_v34, %v11741_v28  ;;  %v14464_v26 = vperm.slane %v5033_v17, %v11781_v3  ;;  %v5043_v16 = vsel %vm246_vm0, %v5042_v48, %v4993_v25  ;;  %v14468_v43 = vperm.slane %v5045_v55, %v11781_v3  ;;  %v22196_v48 = vld [vmem:[#allocation152_spill] sm:$0xff] }
 0x365   : > { %22190 = vst [vmem:[#allocation189_spill] sm:$0xff] %v14447_v29  ;;  %v5031_v44 = vsel %vm246_vm0, %v5030_v50, %v4989_v20  ;;  %v5928_v5 = vrot.slane %v5885_v45, 4  ;;  %v5926_v17 = vrot.slane %v5897_v38, 4  ;;  %v3228_v55 = vrot.slane %v22196_v48, 4 }
 0x366   : > { %22191 = vst [vmem:[#allocation190_spill] sm:$0xff] %v14457_v53  ;;  %v5938_v7 = vrot.slane %v5901_v32, 4  ;;  %v5941_v25 = vsel %vm246_vm0, %v5901_v32, %v5940_v19  ;;  %v3216_v56 = vrot.slane %v22197_v63, 4  ;;  %v6613_v20 = vsel %vm246_vm0, %v13875_v39, %v6612_v59  ;;  %v22201_v39 = vld [vmem:[#allocation164_spill] sm:$0xff] }
 0x367   : > { %v14476_v22 = vpop.trf.xlu0  ;;  %v6637_v50 = vsel %vm246_vm0, %v13841_v9, %v6636_v14  ;;  %v14499_v0 = vperm.slane %v5941_v25, %v11781_v3  ;;  %v4112_v59 = vrot.slane %v22201_v39, 4  ;;  %v5927_v9 = vsel %vm246_vm0, %v5926_v17, %v5885_v45  ;;  %v22205_v17 = vld [vmem:[#allocation157_spill] sm:$0xff] }
 0x368   : > { %22194 = vst [vmem:[#allocation193_spill] sm:$0xff] %v14476_v22  ;;  %v14492_v22 = vperm.slane %v5031_v44, %v11781_v3  ;;  %v5939_v49 = vsel %vm246_vm0, %v5938_v7, %v5889_v54  ;;  %v6621_v44 = vperm.slane %v6613_v20, %v11781_v3  ;;  %v14512_v54 = vperm.slane %v14318_v36, %v11741_v28 }
 0x369   : > { %v5008_v53 = vrot.slane %v13663_v21, 4  ;;  %v22244_v23 = vrot.slane %v22205_v17, 4 }
 0x36a   : > { %v14470_v34 = vpop.trf.xlu1  ;;  %v14472_v15 = vpop.trf.xlu2  ;;  %22200 = vst [vmem:[#allocation152_spill] sm:$0xff] %v14492_v22  ;;  %v6660_v19 = vrot.slane %v6621_v44, 4 }
 0x36b   : > { %22192 = vst [vmem:[#allocation191_spill] sm:$0xff] %v14470_v34  ;;  %2710 = vxpose.xlu0.b32.start.end [1/1] (short) (narrow) %v22195_v8, 32  ;;  %v14483_v34 = vperm.slane %v5043_v16, %v11781_v3  ;;  %v5929_v16 = vsel %vm246_vm0, %v5897_v38, %v5928_v5  ;;  %v6645_v8 = vperm.slane %v6637_v50, %v11781_v3  ;;  %v22203_v38 = vld [vmem:[#allocation67_spill] sm:$0xff] }
 0x36c   : > { %22193 = vst [vmem:[#allocation192_spill] sm:$0xff] %v14472_v15  ;;  %v22199_v15 = vld [vmem:[#allocation159_spill] sm:$0xff]  ;;  %v14516_v7 = vperm.slane %v22203_v38, %v11741_v28 }
 0x36d   : > { %22198 = vst [vmem:[#allocation150_spill] sm:$0xff] %v14483_v34  ;;  %v3214_v6 = vrot.slane %v22199_v15, 4  ;;  %v3217_v14 = vsel %vm246_vm0, %v22199_v15, %v3216_v56  ;;  %v14520_v56 = vperm.slane %v5929_v16, %v11781_v3  ;;  %v14523_v15 = vperm.slane %v5939_v49, %v11781_v3 }
 0x36e   : > { %22202 = vst [vmem:[#allocation38_spill] sm:$0xff] %v14512_v54  ;;  %v14532_v36 = vperm.slane %v3217_v14, %v11741_v28  ;;  %v6658_v32 = vrot.slane %v6645_v8, 4  ;;  %v14551_v14 = vperm.slane %v14371_v37, %v11741_v28  ;;  %v3229_v16 = vsel %vm246_vm0, %v13783_v42, %v3228_v55 }
 0x36f   : > { %v3215_v5 = vsel %vm246_vm0, %v3214_v6, %v22197_v63  ;;  %22204 = vst [vmem:[#allocation159_spill] sm:$0xff] %v14516_v7  ;;  %v14529_v63 = vperm.slane %v5927_v9, %v11781_v3  ;;  %v22208_v6 = vld [vmem:[#allocation167_spill] sm:$0xff]  ;;  %v14543_v25 = vpop.trf.xlu0  ;;  %v14547_v9 = vperm.slane %v14312_v1, %v11741_v28  ;;  %v5009_v55 = vsel %vm246_vm0, %v13682_v4, %v5008_v53  ;;  %v22222_v53 = vld [vmem:[#allocation52_spill] sm:$0xff] }
 0x370   : > { %v4110_v50 = vrot.slane %v22208_v6, 4  ;;  %v4113_v38 = vsel %vm246_vm0, %v22208_v6, %v4112_v59  ;;  %v14539_v49 = vperm.slane %v3215_v5, %v11741_v28  ;;  %22210 = vst [vmem:[#allocation167_spill] sm:$0xff] %v14543_v25  ;;  %v6934_v59 = vrot.slane %v14512_v54, 4  ;;  %v22213_v25 = vld [vmem:[#allocation160_spill] sm:$0xff] }
 0x371   : > { %22207 = vst [vmem:[#allocation67_spill] sm:$0xff] %v14529_v63  ;;  %v6958_v6 = vrot.slane %v14516_v7, 4  ;;  %v14558_v22 = vperm.slane %v4113_v38, %v11741_v28  ;;  %v3226_v5 = vrot.slane %v13783_v42, 4  ;;  %v14571_v38 = vsel %vm246_vm0, %v6645_v8, %v6660_v19 }
 0x372   : > { %v14526_v20 = vpop.trf.xlu1  ;;  %v14541_v45 = vpop.trf.xlu2  ;;  %22211 = vst [vmem:[#allocation194_spill] sm:$0xff] %v14547_v9  ;;  %v4111_v37 = vsel %vm246_vm0, %v4110_v50, %v22201_v39  ;;  %v3264_v7 = vrot.slane %v14539_v49, 4  ;;  %v14575_v1 = vsel %vm246_vm0, %v6658_v32, %v6621_v44  ;;  %v6935_v39 = vsel %vm246_vm0, %v6934_v59, %v14547_v9 }
 0x373   : > { %22206 = vst [vmem:[#allocation164_spill] sm:$0xff] %v14526_v20  ;;  %v22215_v20 = vld [vmem:[#allocation168_spill] sm:$0xff]  ;;  %v6959_v50 = vsel %vm246_vm0, %v6958_v6, %v14551_v14  ;;  %v14582_v54 = vperm.slane %v4111_v37, %v11741_v28  ;;  %v5006_v42 = vrot.slane %v13682_v4, 4  ;;  %v5904_v32 = vrot.slane %v13726_v11, 4  ;;  %v22218_v37 = vld [vmem:[#allocation50_spill] sm:$0xff] }
 0x374   : > { %22209 = vst [vmem:[#allocation157_spill] sm:$0xff] %v14541_v45  ;;  %v3276_v45 = vrot.slane %v14532_v36, 4  ;;  %v3237_v19 = vperm.slane %v3229_v16, %v11741_v28  ;;  %v14593_v44 = vperm.slane %v6935_v39, %v11781_v3  ;;  %v14596_v59 = vperm.slane %v6959_v50, %v11781_v3  ;;  %v22226_v39 = vld [vmem:[#allocation59_spill] sm:$0xff] }
 0x375   : > { %22212 = vst [vmem:[#allocation195_spill] sm:$0xff] %v14551_v14  ;;  %v3227_v6 = vsel %vm246_vm0, %v3226_v5, %v22196_v48  ;;  %v22220_v63 = vrot.slane %v22219_v24, 4  ;;  %v22227_v14 = vld [vmem:[#allocation56_spill] sm:$0xff]  ;;  %v14617_v9 = vperm.slane %v5009_v55, %v11741_v28 }
 0x376   : > { %22214 = vst [vmem:[#allocation160_spill] sm:$0xff] %v14571_v38  ;;  %v6982_v48 = vrot.slane %v14596_v59, 4  ;;  %v22229_v24 = vld [vmem:[#allocation60_spill] sm:$0xff] }
 0x377   : > { %22216 = vst [vmem:[#allocation168_spill] sm:$0xff] %v14575_v1  ;;  %v14604_v4 = vsel %vm246_vm0, %v22220_v63, %v22218_v37  ;;  %v22223_v1 = vld [vmem:[#allocation53_spill] sm:$0xff]  ;;  %v22230_v63 = vrot.slane %v22229_v24, 4  ;;  %v5902_v37 = vrot.slane %v13742_v61, 4 }
 0x378   : > { %22221 = vst [vmem:[#allocation50_spill] sm:$0xff] %v14604_v4  ;;  %v22224_v38 = vrot.slane %v22223_v1, 4 }
 0x379   : > { %v6775_v5 = vsel %vm246_vm0, %v22230_v63, %v14604_v4  ;;  %v5905_v63 = vsel %vm246_vm0, %v13742_v61, %v5904_v32  ;;  %v22237_v4 = vld [vmem:[#allocation54_spill] sm:$0xff] }
 0x37a   : > { %v14588_v8 = vpop.trf.xlu1  ;;  %v14610_v16 = vsel %vm246_vm0, %v22224_v38, %v22222_v53  ;;  %v5007_v38 = vsel %vm246_vm0, %v5006_v42, %v13663_v21  ;;  %v14630_v53 = vpop.trf.xlu2  ;;  %v14633_v55 = vperm.slane %v6775_v5, %v11741_v28  ;;  %v14646_v21 = vsel %vm246_vm0, %v6982_v48, %v14593_v44  ;;  %v22236_v42 = vld [vmem:[#allocation57_spill] sm:$0xff] }
 0x37b   : > { %22217 = vst [vmem:[#allocation196_spill] sm:$0xff] %v14588_v8  ;;  %v22228_v8 = vrot.slane %v22227_v14, 4  ;;  %v22238_v5 = vrot.slane %v22237_v4, 4  ;;  %v14662_v48 = vperm.slane %v5007_v38, %v11741_v28  ;;  %v3274_v4 = vrot.slane %v3237_v19, 4 }
 0x37c   : > { %22225 = vst [vmem:[#allocation55_spill] sm:$0xff] %v14610_v16  ;;  %v5903_v38 = vsel %vm246_vm0, %v5902_v37, %v13726_v11 }
 0x37d   : > { %v6787_v50 = vsel %vm246_vm0, %v22228_v8, %v22226_v39  ;;  %22231 = vst [vmem:[#allocation52_spill] sm:$0xff] %v14630_v53  ;;  %v22232_v8 = vld [vmem:[#allocation58_spill] sm:$0xff]  ;;  %v14642_v39 = vpop.trf.xlu0  ;;  %v6811_v53 = vsel %vm246_vm0, %v22238_v5, %v22236_v42  ;;  %v14666_v42 = vperm.slane %v5905_v63, %v11741_v28  ;;  %v22241_v5 = vld [vmem:[#allocation165_spill] sm:$0xff]  ;;  %v14688_v37 = vperm.slane %v5903_v38, %v11741_v28 }
 0x37e   : > { %v14625_v1 = vperm.slane %v6787_v50, %v11741_v28  ;;  %v22233_v14 = vrot.slane %v22232_v8, 4  ;;  %v3233_v50 = vperm.slane %v3227_v6, %v11741_v28  ;;  %22234 = vst [vmem:[#allocation53_spill] sm:$0xff] %v14642_v39  ;;  %v3277_v8 = vsel %vm246_vm0, %v3237_v19, %v3276_v45 }
 0x37f   : > { %22235 = vst [vmem:[#allocation197_spill] sm:$0xff] %v14646_v21  ;;  %v14657_v61 = vperm.slane %v6811_v53, %v11741_v28  ;;  %v22239_v21 = vld [vmem:[#allocation82_spill] sm:$0xff]  ;;  %v6422_v39 = vrot.slane %v22241_v5, 4  ;;  %v3275_v5 = vsel %vm246_vm0, %v3274_v4, %v14532_v36  ;;  %v4125_v36 = vsel %vm246_vm0, %v13838_v33, %v22244_v23 }
 0x380   : > { %v6799_v24 = vsel %vm246_vm0, %v22233_v14, %v14610_v16  ;;  %v6822_v32 = vrot.slane %v14625_v1, 4  ;;  %v3285_v16 = vperm.slane %v3277_v8, %v11781_v3  ;;  %v3262_v63 = vrot.slane %v3233_v50, 4 }
 0x381   : > { %v14654_v14 = vperm.slane %v6799_v24, %v11741_v28  ;;  %v6846_v53 = vrot.slane %v14657_v61, 4  ;;  %v3265_v57 = vsel %vm246_vm0, %v3233_v50, %v3264_v7  ;;  %v22242_v50 = vld [vmem:[#allocation46_spill] sm:$0xff]  ;;  %v3281_v7 = vperm.slane %v3275_v5, %v11781_v3 }
 0x382   : > { %v14668_v45 = vpop.trf.xlu1  ;;  %v6823_v24 = vsel %vm246_vm0, %v6822_v32, %v14633_v55  ;;  %v22246_v8 = vrot.slane %v14391_v35, 4  ;;  %v22252_v5 = vld [vmem:[#allocation70_spill] sm:$0xff] }
 0x383   : > { %22240 = vst [vmem:[#allocation57_spill] sm:$0xff] %v14668_v45  ;;  %v6829_v19 = vperm.slane %v6823_v24, %v11781_v3  ;;  %v4122_v45 = vrot.slane %v13838_v33, 4  ;;  %v6847_v32 = vsel %vm246_vm0, %v6846_v53, %v14654_v14  ;;  %v14694_v24 = vsel %vm246_vm0, %v6422_v39, %v22242_v50  ;;  %v14714_v50 = vpop.trf.xlu2 }
 0x384   : > { %v6853_v6 = vperm.slane %v6847_v32, %v11781_v3  ;;  %22243 = vst [vmem:[#allocation54_spill] sm:$0xff] %v14694_v24  ;;  %v3273_v53 = vperm.slane %v3265_v57, %v11781_v3  ;;  %v3263_v32 = vsel %vm246_vm0, %v3262_v63, %v14539_v49  ;;  %v14710_v39 = vsel %vm246_vm0, %v3285_v16, %v22246_v8 }
 0x385   : > { %v6872_v11 = vrot.slane %v6829_v19, 4  ;;  %22247 = vst [vmem:[#allocation165_spill] sm:$0xff] %v14710_v39  ;;  %v4123_v57 = vsel %vm246_vm0, %v4122_v45, %v22205_v17  ;;  %v14716_v33 = vpop.trf.xlu0  ;;  %v22251_v49 = vrot.slane %v22004_v58, 4  ;;  %v22254_v17 = vrot.slane %v22003_v2, 4 }
 0x386   : > { %v6870_v38 = vrot.slane %v6853_v6, 4  ;;  %22248 = vst [vmem:[#allocation46_spill] sm:$0xff] %v14714_v50  ;;  %v3298_v24 = vrot.slane %v3285_v16, 4  ;;  %v22261_v50 = vrot.slane %v14403_v60, 4  ;;  %v22263_v16 = vrot.slane %v14409_v41, 4 }
 0x387   : > { %v14702_v4 = vsel %vm246_vm0, %v6853_v6, %v6872_v11  ;;  %v22250_v6 = vld [vmem:[#allocation71_spill] sm:$0xff]  ;;  %v22253_v11 = vrot.slane %v22006_v27, 4  ;;  %v7123_v45 = vsel %vm246_vm0, %v22254_v17, %v22014_v31  ;;  %v3294_v17 = vrot.slane %v3281_v7, 4 }
 0x388   : > { %22245 = vst [vmem:[#allocation82_spill] sm:$0xff] %v14702_v4  ;;  %v14719_v23 = vsel %vm246_vm0, %v6870_v38, %v6829_v19  ;;  %v14725_v63 = vsel %vm246_vm0, %v22251_v49, %v22250_v6  ;;  %v4133_v19 = vperm.slane %v4125_v36, %v11741_v28  ;;  %v22255_v38 = vld [vmem:[#allocation77_spill] sm:$0xff]  ;;  %v14743_v49 = vperm.slane %v7123_v45, %v11741_v28  ;;  %v22259_v45 = vld [vmem:[#allocation79_spill] sm:$0xff] }
 0x389   : > { %22249 = vst [vmem:[#allocation198_spill] sm:$0xff] %v14719_v23  ;;  %v14731_v8 = vsel %vm246_vm0, %v22253_v11, %v22252_v5  ;;  %v22256_v58 = vrot.slane %v22255_v38, 4  ;;  %v14747_v5 = vperm.slane %v3263_v32, %v11781_v3  ;;  %v4129_v36 = vperm.slane %v4123_v57, %v11741_v28  ;;  %v22267_v38 = vld [vmem:[#allocation75_spill] sm:$0xff] }
 0x38a   : > { %v14753_v23 = vpop.trf.xlu1  ;;  %v22260_v4 = vrot.slane %v22259_v45, 4  ;;  %v3290_v32 = vrot.slane %v3273_v53, 4  ;;  %v14765_v11 = vsel %vm246_vm0, %v3273_v53, %v22261_v50  ;;  %v14770_v57 = vsel %vm246_vm0, %v3281_v7, %v22263_v16 }
 0x38b   : > { %v7111_v6 = vsel %vm246_vm0, %v22256_v58, %v14725_v63  ;;  %22257 = vst [vmem:[#allocation71_spill] sm:$0xff] %v14747_v5  ;;  %v4170_v39 = vrot.slane %v4133_v19, 4  ;;  %v7158_v2 = vrot.slane %v14743_v49, 4  ;;  %v22269_v50 = vrot.slane %v14558_v22, 4 }
 0x38c   : > { %22258 = vst [vmem:[#allocation70_spill] sm:$0xff] %v14753_v23  ;;  %v14756_v58 = vperm.slane %v7111_v6, %v11741_v28  ;;  %v7135_v27 = vsel %vm246_vm0, %v22260_v4, %v14731_v8  ;;  %v14774_v6 = vsel %vm246_vm0, %v3298_v24, %v14391_v35  ;;  %v22266_v23 = vld [vmem:[#allocation78_spill] sm:$0xff]  ;;  %v22268_v4 = vrot.slane %v22267_v38, 4 }
 0x38d   : > { %22262 = vst [vmem:[#allocation199_spill] sm:$0xff] %v14765_v11  ;;  %v4173_v11 = vsel %vm246_vm0, %v4133_v19, %v22269_v50  ;;  %v6984_v35 = vrot.slane %v14593_v44, 4  ;;  %v4158_v24 = vrot.slane %v4129_v36, 4  ;;  %v22270_v16 = vrot.slane %v14582_v54, 4 }
 0x38e   : > { %22264 = vst [vmem:[#allocation200_spill] sm:$0xff] %v14770_v57  ;;  %v7147_v45 = vsel %vm246_vm0, %v22268_v4, %v22266_v23  ;;  %v14793_v23 = vperm.slane %v7135_v27, %v11741_v28  ;;  %v7159_v4 = vsel %vm246_vm0, %v7158_v2, %v14756_v58  ;;  %v5018_v53 = vrot.slane %v13908_v62, 4 }
 0x38f   : > { %22265 = vst [vmem:[#allocation201_spill] sm:$0xff] %v14774_v6  ;;  %v14786_v7 = vperm.slane %v7147_v45, %v11741_v28  ;;  %v4161_v38 = vsel %vm246_vm0, %v4129_v36, %v22270_v16  ;;  %v22271_v19 = vrot.slane %v22213_v25, 4  ;;  %v7165_v44 = vperm.slane %v7159_v4, %v11781_v3  ;;  %v14811_v16 = vpop.trf.xlu2 }
 0x390   : > { %v14806_v36 = vsel %vm246_vm0, %v3290_v32, %v14403_v60  ;;  %v4171_v27 = vsel %vm246_vm0, %v4170_v39, %v14558_v22  ;;  %v4181_v2 = vperm.slane %v4173_v11, %v11781_v3  ;;  %v14815_v5 = vsel %vm246_vm0, %v14596_v59, %v6984_v35 }
 0x391   : > { %v5021_v45 = vsel %vm246_vm0, %v13908_v62, %v22271_v19  ;;  %v7182_v50 = vrot.slane %v14786_v7, 4  ;;  %22272 = vst [vmem:[#allocation78_spill] sm:$0xff] %v14806_v36  ;;  %v14819_v62 = vsel %vm246_vm0, %v3294_v17, %v14409_v41  ;;  %v4169_v32 = vperm.slane %v4161_v38, %v11781_v3  ;;  %v14824_v19 = vpop.trf.xlu0  ;;  %v22276_v17 = vld [vmem:[#allocation178_spill] sm:$0xff] }
 0x392   : > { %22273 = vst [vmem:[#allocation75_spill] sm:$0xff] %v14815_v5  ;;  %v4159_v22 = vsel %vm246_vm0, %v4158_v24, %v14582_v54  ;;  %v5029_v39 = vperm.slane %v5021_v45, %v11741_v28  ;;  %v7208_v11 = vrot.slane %v7165_v44, 4  ;;  %v14832_v41 = vperm.slane %v4171_v27, %v11781_v3  ;;  %v22279_v24 = vld [vmem:[#allocation179_spill] sm:$0xff] }
 0x393   : > { %22274 = vst [vmem:[#allocation202_spill] sm:$0xff] %v14819_v62  ;;  %v7183_v59 = vsel %vm246_vm0, %v7182_v50, %v14793_v23  ;;  %v5019_v60 = vsel %vm246_vm0, %v5018_v53, %v22213_v25  ;;  %v4194_v4 = vrot.slane %v4181_v2, 4  ;;  %v22277_v57 = vrot.slane %v14441_v13, 4  ;;  %v22280_v50 = vld [vmem:[#allocation120_spill] sm:$0xff]  ;;  %v14845_v62 = vpop.trf.xlu1 }
 0x394   : > { %22275 = vst [vmem:[#allocation203_spill] sm:$0xff] %v14832_v41  ;;  %v7189_v38 = vperm.slane %v7183_v59, %v11781_v3  ;;  %v5914_v6 = vrot.slane %v22280_v50, 4  ;;  %v14848_v27 = vperm.slane %v4159_v22, %v11781_v3  ;;  %v22283_v35 = vrot.slane %v22215_v20, 4 }
 0x395   : > { %v14841_v54 = vsel %vm246_vm0, %v4181_v2, %v22277_v57  ;;  %22281 = vst [vmem:[#allocation179_spill] sm:$0xff] %v14845_v62  ;;  %v4186_v57 = vrot.slane %v4169_v32, 4  ;;  %v22285_v2 = vrot.slane %v14438_v51, 4  ;;  %v5025_v36 = vperm.slane %v5019_v60, %v11741_v28 }
 0x396   : > { %22278 = vst [vmem:[#allocation178_spill] sm:$0xff] %v14841_v54  ;;  %v5917_v25 = vsel %vm246_vm0, %v22280_v50, %v22283_v35  ;;  %v14855_v53 = vsel %vm246_vm0, %v7189_v38, %v7208_v11  ;;  %v7206_v59 = vrot.slane %v7189_v38, 4  ;;  %v5066_v5 = vrot.slane %v5029_v39, 4  ;;  %v22289_v11 = vld [vmem:[#allocation21_spill] sm:$0xff] }
 0x397   : > { %22282 = vst [vmem:[#allocation120_spill] sm:$0xff] %v14848_v27  ;;  %v14860_v45 = vsel %vm246_vm0, %v4169_v32, %v22285_v2  ;;  %v22287_v22 = vrot.slane %v14447_v29, 4  ;;  %v3314_v50 = vrot.slane %v22289_v11, 4  ;;  %v5915_v32 = vsel %vm246_vm0, %v5914_v6, %v22215_v20 }
 0x398   : > { %22284 = vst [vmem:[#allocation204_spill] sm:$0xff] %v14855_v53  ;;  %v14872_v38 = vsel %vm246_vm0, %v7206_v59, %v7165_v44  ;;  %v5925_v2 = vperm.slane %v5917_v25, %v11741_v28  ;;  %v22291_v60 = vrot.slane %v13802_v10, 4  ;;  %v14885_v35 = vsel %vm246_vm0, %v4194_v4, %v14441_v13 }
 0x399   : > { %22286 = vst [vmem:[#allocation205_spill] sm:$0xff] %v14860_v45  ;;  %v14867_v62 = vsel %vm246_vm0, %v14832_v41, %v22287_v22  ;;  %v6824_v22 = vrot.slane %v14633_v55, 4  ;;  %v22293_v59 = vrot.slane %v14617_v9, 4  ;;  %v5054_v25 = vrot.slane %v5025_v36, 4 }
 0x39a   : > { %22288 = vst [vmem:[#allocation206_spill] sm:$0xff] %v14867_v62  ;;  %v3317_v29 = vsel %vm246_vm0, %v22289_v11, %v22291_v60  ;;  %v8268_v6 = vrot.slane %v14867_v62, 4  ;;  %v5067_v11 = vsel %vm246_vm0, %v5066_v5, %v14617_v9  ;;  %v14894_v60 = vpop.trf.xlu2  ;;  %v22294_v4 = vrot.slane %v14662_v48, 4 }
 0x39b   : > { %22290 = vst [vmem:[#allocation21_spill] sm:$0xff] %v14872_v38  ;;  %v5069_v20 = vsel %vm246_vm0, %v5029_v39, %v22293_v59  ;;  %v6825_v55 = vsel %vm246_vm0, %v14625_v1, %v6824_v22  ;;  %v5921_v44 = vperm.slane %v5915_v32, %v11741_v28  ;;  %v14904_v39 = vperm.slane %v3317_v29, %v11741_v28  ;;  %v14906_v59 = vpop.trf.xlu0  ;;  %v22297_v29 = vld [vmem:[#allocation118_spill] sm:$0xff] }
 0x39c   : > { %22292 = vst [vmem:[#allocation207_spill] sm:$0xff] %v14885_v35  ;;  %v5057_v53 = vsel %vm246_vm0, %v5025_v36, %v22294_v4  ;;  %v5077_v9 = vperm.slane %v5069_v20, %v11781_v3  ;;  %v5962_v5 = vrot.slane %v5925_v2, 4  ;;  %v3315_v41 = vsel %vm246_vm0, %v3314_v50, %v13802_v10  ;;  %v22299_v50 = vld [vmem:[#allocation32_spill] sm:$0xff] }
 0x39d   : > { %v6848_v1 = vrot.slane %v14654_v14, 4  ;;  %v14914_v22 = vsel %vm246_vm0, %v4186_v57, %v14438_v51  ;;  %v14918_v32 = vperm.slane %v5067_v11, %v11781_v3  ;;  %v14923_v20 = vsel %vm246_vm0, %v14841_v54, %v8268_v6  ;;  %v14929_v51 = vpop.trf.xlu1 }
 0x39e   : > { %22295 = vst [vmem:[#allocation208_spill] sm:$0xff] %v14914_v22  ;;  %v5055_v10 = vsel %vm246_vm0, %v5054_v25, %v14662_v48  ;;  %v5065_v14 = vperm.slane %v5057_v53, %v11781_v3  ;;  %v3302_v13 = vrot.slane %v22299_v50, 4  ;;  %v5950_v57 = vrot.slane %v5921_v44, 4 }
 0x39f   : > { %22296 = vst [vmem:[#allocation209_spill] sm:$0xff] %v14918_v32  ;;  %v3321_v36 = vperm.slane %v3315_v41, %v11741_v28  ;;  %v3362_v11 = vrot.slane %v14904_v39, 4  ;;  %v6849_v4 = vsel %vm246_vm0, %v14657_v61, %v6848_v1  ;;  %v5090_v35 = vrot.slane %v5077_v9, 4 }
 0x3a0   : > { %22298 = vst [vmem:[#allocation118_spill] sm:$0xff] %v14923_v20  ;;  %v22301_v6 = vrot.slane %v14688_v37, 4  ;;  %v5963_v48 = vsel %vm246_vm0, %v5962_v5, %v14666_v42  ;;  %v14941_v53 = vperm.slane %v6849_v4, %v11781_v3  ;;  %v14944_v25 = vperm.slane %v5055_v10, %v11781_v3 }
 0x3a1   : > { %22300 = vst [vmem:[#allocation32_spill] sm:$0xff] %v14929_v51  ;;  %v22303_v41 = vrot.slane %v14483_v34, 4  ;;  %v22305_v61 = vrot.slane %v14468_v43, 4  ;;  %v5082_v5 = vrot.slane %v5065_v14, 4  ;;  %v22307_v4 = vrot.slane %v14666_v42, 4 }
 0x3a2   : > { %v5953_v20 = vsel %vm246_vm0, %v5921_v44, %v22301_v6  ;;  %22302 = vst [vmem:[#allocation210_spill] sm:$0xff] %v14944_v25  ;;  %v14958_v44 = vperm.slane %v6825_v55, %v11781_v3  ;;  %v3303_v6 = vsel %vm246_vm0, %v3302_v13, %v22239_v21  ;;  %v6874_v34 = vrot.slane %v14941_v53, 4 }
 0x3a3   : > { %v14950_v54 = vsel %vm246_vm0, %v14918_v32, %v22303_v41  ;;  %v14955_v1 = vsel %vm246_vm0, %v5077_v9, %v22305_v61  ;;  %v5965_v10 = vsel %vm246_vm0, %v5925_v2, %v22307_v4  ;;  %v22308_v41 = vrot.slane %v14464_v26, 4  ;;  %v22315_v2 = vld [vmem:[#allocation17_spill] sm:$0xff] }
 0x3a4   : > { %22304 = vst [vmem:[#allocation211_spill] sm:$0xff] %v14950_v54  ;;  %v5951_v9 = vsel %vm246_vm0, %v5950_v57, %v14688_v37  ;;  %v5961_v55 = vperm.slane %v5953_v20, %v11781_v3  ;;  %v5969_v61 = vperm.slane %v5963_v48, %v11781_v3  ;;  %v8380_v13 = vrot.slane %v14950_v54, 4  ;;  %v14990_v48 = vpop.trf.xlu0 }
 0x3a5   : > { %22306 = vst [vmem:[#allocation212_spill] sm:$0xff] %v14955_v1  ;;  %v14969_v62 = vsel %vm246_vm0, %v5065_v14, %v22308_v41  ;;  %v22310_v4 = vrot.slane %v22239_v21, 4  ;;  %v14982_v14 = vpop.trf.xlu2  ;;  %v14986_v37 = vsel %vm246_vm0, %v5090_v35, %v14468_v43  ;;  %v5973_v20 = vperm.slane %v5965_v10, %v11781_v3 }
 0x3a6   : > { %22309 = vst [vmem:[#allocation213_spill] sm:$0xff] %v14969_v62  ;;  %v3309_v57 = vperm.slane %v3303_v6, %v11741_v28  ;;  %v14994_v41 = vsel %vm246_vm0, %v6874_v34, %v14958_v44  ;;  %v4210_v43 = vrot.slane %v22315_v2, 4  ;;  %v15004_v35 = vsel %vm246_vm0, %v5082_v5, %v14464_v26  ;;  %v15014_v62 = vpop.trf.xlu1 }
 0x3a7   : > { %v3305_v45 = vsel %vm246_vm0, %v22299_v50, %v22310_v4  ;;  %22311 = vst [vmem:[#allocation214_spill] sm:$0xff] %v14982_v14  ;;  %v14999_v4 = vperm.slane %v5951_v9, %v11781_v3  ;;  %v5978_v10 = vrot.slane %v5961_v55, 4  ;;  %v5982_v6 = vrot.slane %v5969_v61, 4  ;;  %v22318_v50 = vld [vmem:[#allocation122_spill] sm:$0xff] }
 0x3a8   : > { %22312 = vst [vmem:[#allocation215_spill] sm:$0xff] %v14986_v37  ;;  %v3313_v42 = vperm.slane %v3305_v45, %v11741_v28  ;;  %v15010_v21 = vsel %vm246_vm0, %v14955_v1, %v8380_v13  ;;  %v6004_v54 = vrot.slane %v22318_v50, 4  ;;  %v22319_v9 = vld [vmem:[#allocation126_spill] sm:$0xff]  ;;  %v22321_v25 = vrot.slane %v14520_v56, 4 }
 0x3a9   : > { %22313 = vst [vmem:[#allocation216_spill] sm:$0xff] %v14994_v41  ;;  %v4198_v32 = vrot.slane %v22319_v9, 4  ;;  %v22323_v5 = vrot.slane %v14499_v0, 4  ;;  %v3350_v34 = vrot.slane %v3321_v36, 4  ;;  %v3352_v37 = vrot.slane %v3309_v57, 4 }
 0x3aa   : > { %22314 = vst [vmem:[#allocation217_spill] sm:$0xff] %v14999_v4  ;;  %v15019_v26 = vsel %vm246_vm0, %v5961_v55, %v22321_v25  ;;  %v4211_v22 = vsel %vm246_vm0, %v4210_v43, %v22276_v17  ;;  %v15036_v25 = vsel %vm246_vm0, %v5978_v10, %v14520_v56  ;;  %v15040_v55 = vsel %vm246_vm0, %v5982_v6, %v14523_v15  ;;  %v22331_v43 = vld [vmem:[#allocation117_spill] sm:$0xff] }
 0x3ab   : > { %22316 = vst [vmem:[#allocation17_spill] sm:$0xff] %v15004_v35  ;;  %v15024_v45 = vsel %vm246_vm0, %v5973_v20, %v22323_v5  ;;  %v5986_v35 = vrot.slane %v5973_v20, 4  ;;  %v3364_v5 = vrot.slane %v3313_v42, 4  ;;  %v22329_v13 = vrot.slane %v22276_v17, 4 }
 0x3ac   : > { %22317 = vst [vmem:[#allocation218_spill] sm:$0xff] %v15010_v21  ;;  %v22325_v21 = vrot.slane %v14523_v15, 4  ;;  %v4199_v20 = vsel %vm246_vm0, %v4198_v32, %v13744_v40  ;;  %v5106_v10 = vrot.slane %v22331_v43, 4  ;;  %v3351_v15 = vsel %vm246_vm0, %v3350_v34, %v3309_v57 }
 0x3ad   : > { %22320 = vst [vmem:[#allocation122_spill] sm:$0xff] %v15014_v62  ;;  %v4213_v4 = vsel %vm246_vm0, %v22315_v2, %v22329_v13  ;;  %v3353_v6 = vsel %vm246_vm0, %v3321_v36, %v3352_v37  ;;  %v3363_v17 = vsel %vm246_vm0, %v3362_v11, %v3313_v42  ;;  %v4217_v2 = vperm.slane %v4211_v22, %v11741_v28  ;;  %v15075_v42 = vpop.trf.xlu0 }
 0x3ae   : > { %22322 = vst [vmem:[#allocation126_spill] sm:$0xff] %v15019_v26  ;;  %v15030_v1 = vsel %vm246_vm0, %v5969_v61, %v22325_v21  ;;  %v22330_v21 = vrot.slane %v13744_v40, 4  ;;  %v15060_v13 = vsel %vm246_vm0, %v5986_v35, %v14499_v0  ;;  %v4221_v40 = vperm.slane %v4213_v4, %v11741_v28 }
 0x3af   : > { %22324 = vst [vmem:[#allocation219_spill] sm:$0xff] %v15024_v45  ;;  %v3365_v57 = vsel %vm246_vm0, %v14904_v39, %v3364_v5  ;;  %v4205_v36 = vperm.slane %v4199_v20, %v11741_v28  ;;  %v22334_v22 = vrot.slane %v22297_v29, 4  ;;  %v15078_v37 = vperm.slane %v3351_v15, %v11781_v3  ;;  %v22338_v5 = vld [vmem:[#allocation27_spill] sm:$0xff]  ;;  %v22341_v45 = vld [vmem:[#allocation30_spill] sm:$0xff] }
 0x3b0   : > { %22326 = vst [vmem:[#allocation220_spill] sm:$0xff] %v15030_v1  ;;  %v4201_v56 = vsel %vm246_vm0, %v22319_v9, %v22330_v21  ;;  %v5094_v9 = vrot.slane %v14135_v12, 4  ;;  %v15065_v21 = vpop.trf.xlu2  ;;  %v15081_v4 = vperm.slane %v3353_v6, %v11781_v3  ;;  %v15084_v35 = vperm.slane %v3363_v17, %v11781_v3 }
 0x3b1   : > { %22327 = vst [vmem:[#allocation221_spill] sm:$0xff] %v15036_v25  ;;  %v4209_v11 = vperm.slane %v4201_v56, %v11741_v28  ;;  %v5109_v0 = vsel %vm246_vm0, %v22331_v43, %v22334_v22  ;;  %v5107_v39 = vsel %vm246_vm0, %v5106_v10, %v22297_v29  ;;  %v3328_v20 = vrot.slane %v22338_v5, 4  ;;  %v15100_v29 = vpop.trf.xlu1 }
 0x3b2   : > { %22328 = vst [vmem:[#allocation222_spill] sm:$0xff] %v15040_v55  ;;  %v4246_v56 = vrot.slane %v4217_v2, 4  ;;  %v22339_v43 = vrot.slane %v13804_v46, 4  ;;  %v15095_v22 = vperm.slane %v3365_v57, %v11781_v3  ;;  %v4258_v6 = vrot.slane %v4221_v40, 4 }
 0x3b3   : > { %22332 = vst [vmem:[#allocation117_spill] sm:$0xff] %v15060_v13  ;;  %v5117_v17 = vperm.slane %v5109_v0, %v11741_v28  ;;  %v5095_v32 = vsel %vm246_vm0, %v5094_v9, %v13804_v46  ;;  %v4248_v10 = vrot.slane %v4205_v36, 4  ;;  %v4260_v61 = vrot.slane %v4209_v11, 4  ;;  %v22342_v13 = vld [vmem:[#allocation121_spill] sm:$0xff] }
 0x3b4   : > { %22333 = vst [vmem:[#allocation223_spill] sm:$0xff] %v15065_v21  ;;  %v5097_v15 = vsel %vm246_vm0, %v14135_v12, %v22339_v43  ;;  %v5113_v34 = vperm.slane %v5107_v39, %v11741_v28  ;;  %v6002_v1 = vrot.slane %v22341_v45, 4  ;;  %v4247_v0 = vsel %vm246_vm0, %v4246_v56, %v4205_v36  ;;  %v22356_v39 = vld [vmem:[#allocation143_spill] sm:$0xff]  ;;  %v22381_v21 = vld [vmem:[#allocation193_spill] sm:$0xff] }
 0x3b5   : > { %22335 = vst [vmem:[#allocation224_spill] sm:$0xff] %v15075_v42  ;;  %v5105_v43 = vperm.slane %v5097_v15, %v11741_v28  ;;  %v5101_v46 = vperm.slane %v5095_v32, %v11741_v28  ;;  %v6005_v9 = vsel %vm246_vm0, %v22341_v45, %v6004_v54  ;;  %v5990_v55 = vrot.slane %v14191_v52, 4 }
 0x3b6   : > { %22336 = vst [vmem:[#allocation225_spill] sm:$0xff] %v15078_v37  ;;  %v4259_v25 = vsel %vm246_vm0, %v4258_v6, %v4209_v11  ;;  %v5154_v12 = vrot.slane %v5117_v17, 4  ;;  %v4249_v57 = vsel %vm246_vm0, %v4217_v2, %v4248_v10  ;;  %v4261_v15 = vsel %vm246_vm0, %v4221_v40, %v4260_v61  ;;  %v15136_v40 = vpop.trf.xlu0 }
 0x3b7   : > { %22337 = vst [vmem:[#allocation226_spill] sm:$0xff] %v15081_v4  ;;  %v5142_v26 = vrot.slane %v5113_v34, 4  ;;  %v6003_v32 = vsel %vm246_vm0, %v6002_v1, %v22318_v50  ;;  %v15121_v36 = vperm.slane %v4247_v0, %v11781_v3  ;;  %v5156_v54 = vrot.slane %v5105_v43, 4 }
 0x3b8   : > { %22340 = vst [vmem:[#allocation27_spill] sm:$0xff] %v15100_v29  ;;  %v6013_v45 = vperm.slane %v6005_v9, %v11741_v28  ;;  %v22344_v56 = vrot.slane %v22279_v24, 4  ;;  %v15128_v6 = vpop.trf.xlu2  ;;  %v15131_v2 = vperm.slane %v4259_v25, %v11781_v3  ;;  %v5144_v61 = vrot.slane %v5101_v46, 4 }
 0x3b9   : > { %22343 = vst [vmem:[#allocation30_spill] sm:$0xff] %v15121_v36  ;;  %v5991_v1 = vsel %vm246_vm0, %v5990_v55, %v22279_v24  ;;  %v3326_v50 = vrot.slane %v14158_v18, 4  ;;  %v15139_v10 = vperm.slane %v4249_v57, %v11781_v3  ;;  %v15142_v0 = vperm.slane %v4261_v15, %v11781_v3  ;;  %v15154_v27 = vpop.trf.xlu1 }
 0x3ba   : > { %v5993_v11 = vsel %vm246_vm0, %v14191_v52, %v22344_v56  ;;  %22345 = vst [vmem:[#allocation121_spill] sm:$0xff] %v15128_v6  ;;  %v5155_v52 = vsel %vm246_vm0, %v5154_v12, %v5105_v43  ;;  %v6009_v9 = vperm.slane %v6003_v32, %v11741_v28  ;;  %v5143_v25 = vsel %vm246_vm0, %v5142_v26, %v5101_v46  ;;  %v22353_v12 = vld [vmem:[#allocation142_spill] sm:$0xff] }
 0x3bb   : > { %22346 = vst [vmem:[#allocation227_spill] sm:$0xff] %v15136_v40  ;;  %v6001_v56 = vperm.slane %v5993_v11, %v11741_v28  ;;  %v3329_v24 = vsel %vm246_vm0, %v14158_v18, %v3328_v20  ;;  %v3340_v55 = vrot.slane %v14265_v47, 4  ;;  %v5157_v57 = vsel %vm246_vm0, %v5117_v17, %v5156_v54  ;;  %v22351_v17 = vld [vmem:[#allocation128_spill] sm:$0xff]  ;;  %v22352_v11 = vld [vmem:[#allocation161_spill] sm:$0xff] }
 0x3bc   : > { %22347 = vst [vmem:[#allocation228_spill] sm:$0xff] %v15139_v10  ;;  %v6050_v37 = vrot.slane %v6013_v45, 4  ;;  %v5997_v15 = vperm.slane %v5991_v1, %v11741_v28  ;;  %v5145_v26 = vsel %vm246_vm0, %v5113_v34, %v5144_v61  ;;  %v3327_v43 = vsel %vm246_vm0, %v3326_v50, %v22338_v5 }
 0x3bd   : > { %22348 = vst [vmem:[#allocation229_spill] sm:$0xff] %v15154_v27  ;;  %v3338_v18 = vrot.slane %v14292_v30, 4  ;;  %v15162_v20 = vperm.slane %v5143_v25, %v11781_v3  ;;  %v15165_v46 = vperm.slane %v5155_v52, %v11781_v3  ;;  %v5120_v32 = vrot.slane %v22351_v17, 4 }
 0x3be   : > { %v3337_v54 = vperm.slane %v3329_v24, %v11741_v28  ;;  %v15172_v34 = vperm.slane %v5157_v57, %v11781_v3  ;;  %v6038_v5 = vrot.slane %v6009_v9, 4  ;;  %v6052_v61 = vrot.slane %v6001_v56, 4 }
 0x3bf   : > { %22349 = vst [vmem:[#allocation230_spill] sm:$0xff] %v15162_v20  ;;  %v3341_v1 = vsel %vm246_vm0, %v14292_v30, %v3340_v55  ;;  %v15177_v50 = vperm.slane %v5145_v26, %v11781_v3  ;;  %v6040_v52 = vrot.slane %v5997_v15, 4  ;;  %v6051_v25 = vsel %vm246_vm0, %v6050_v37, %v6001_v56 }
 0x3c0   : > { %22350 = vst [vmem:[#allocation231_spill] sm:$0xff] %v15165_v46  ;;  %9916 = vrot.lane.b32.xlu1 %v22352_v11, %s11534_s22  ;;  %v3333_v24 = vperm.slane %v3327_v43, %v11741_v28  ;;  %v3339_v57 = vsel %vm246_vm0, %v3338_v18, %v14265_v47  ;;  %v4222_v36 = vrot.slane %v22353_v12, 4  ;;  %v3388_v55 = vrot.slane %v3337_v54, 4  ;;  %v15189_v27 = vpop.trf.xlu2  ;;  %v15197_v47 = vpop.trf.xlu0 }
 0x3c1   : > { %v3349_v26 = vperm.slane %v3341_v1, %v11741_v28  ;;  %22354 = vst [vmem:[#allocation128_spill] sm:$0xff] %v15189_v27  ;;  %v6039_v56 = vsel %vm246_vm0, %v6038_v5, %v5997_v15  ;;  %v6053_v43 = vsel %vm246_vm0, %v6013_v45, %v6052_v61  ;;  %v15195_v11 = vperm.slane %v6051_v25, %v11781_v3  ;;  %v22357_v15 = vld [vmem:[#allocation28_spill] sm:$0xff]  ;;  %v22358_v45 = vld [vmem:[#allocation147_spill] sm:$0xff] }
 0x3c2   : > { %22355 = vst [vmem:[#allocation161_spill] sm:$0xff] %v15197_v47  ;;  %v6041_v41 = vsel %vm246_vm0, %v6009_v9, %v6040_v52  ;;  %v3376_v30 = vrot.slane %v3333_v24, 4  ;;  %v3345_v1 = vperm.slane %v3339_v57, %v11741_v28  ;;  %v4223_v37 = vsel %vm246_vm0, %v4222_v36, %v22342_v13  ;;  %v15214_v52 = vpop.trf.xlu1  ;;  %v22361_v57 = vld [vmem:[#allocation162_spill] sm:$0xff] }
 0x3c3   : > { %v4236_v5 = vrot.slane %v22357_v15, 4  ;;  %v5118_v61 = vrot.slane %v22358_v45, 4  ;;  %v15208_v25 = vperm.slane %v6039_v56, %v11781_v3  ;;  %v15211_v29 = vperm.slane %v6053_v43, %v11781_v3  ;;  %22360 = vst [vmem:[#allocation143_spill] sm:$0xff] %v15214_v52  ;;  %v22364_v43 = vld [vmem:[#allocation187_spill] sm:$0xff] }
 0x3c4   : > { %v3386_v18 = vrot.slane %v3349_v26, 4  ;;  %v3389_v9 = vsel %vm246_vm0, %v3349_v26, %v3388_v55  ;;  %v15219_v36 = vperm.slane %v6041_v41, %v11781_v3  ;;  %v22363_v27 = vrot.slane %v22342_v13, 4  ;;  %v22365_v41 = vld [vmem:[#allocation51_spill] sm:$0xff] }
 0x3c5   : > { %22359 = vst [vmem:[#allocation142_spill] sm:$0xff] %v15208_v25  ;;  %v4234_v38 = vrot.slane %v22364_v43, 4  ;;  %v3374_v62 = vrot.slane %v3345_v1, 4  ;;  %v3377_v55 = vsel %vm246_vm0, %v3345_v1, %v3376_v30  ;;  %v15229_v26 = vperm.slane %v4223_v37, %v11741_v28  ;;  %v22373_v37 = vld [vmem:[#allocation47_spill] sm:$0xff] }
 0x3c6   : > { %22362 = vst [vmem:[#allocation28_spill] sm:$0xff] %v15219_v36  ;;  %v4225_v56 = vsel %vm246_vm0, %v22353_v12, %v22363_v27  ;;  %v3397_v20 = vperm.slane %v3389_v9, %v11781_v3  ;;  %v4237_v13 = vsel %vm246_vm0, %v22364_v43, %v4236_v5  ;;  %v5119_v27 = vsel %vm246_vm0, %v5118_v61, %v22351_v17  ;;  %v22366_v12 = vld [vmem:[#allocation151_spill] sm:$0xff] }
 0x3c7   : > { %v5132_v52 = vrot.slane %v22366_v12, 4  ;;  %v3387_v1 = vsel %vm246_vm0, %v3386_v18, %v3337_v54  ;;  %v15247_v9 = vperm.slane %v3377_v55, %v11781_v3  ;;  %v4235_v5 = vsel %vm246_vm0, %v4234_v38, %v22357_v15  ;;  %v22371_v38 = vld [vmem:[#allocation35_spill] sm:$0xff] }
 0x3c8   : > { %9920 = vrot.lane.b32.xlu1 %v22361_v57, %s11534_s22  ;;  %v5121_v57 = vsel %vm246_vm0, %v22358_v45, %v5120_v32  ;;  %v4233_v32 = vperm.slane %v4225_v56, %v11741_v28  ;;  %v3375_v61 = vsel %vm246_vm0, %v3374_v62, %v3333_v24  ;;  %v4272_v43 = vrot.slane %v15229_v26, 4  ;;  %v15258_v18 = vpop.trf.xlu2  ;;  %v15269_v24 = vpop.trf.xlu0 }
 0x3c9   : > { %22367 = vst [vmem:[#allocation147_spill] sm:$0xff] %v15247_v9  ;;  %v5129_v17 = vperm.slane %v5121_v57, %v11741_v28  ;;  %v15256_v54 = vperm.slane %v5119_v27, %v11741_v28  ;;  %v3393_v56 = vperm.slane %v3387_v1, %v11781_v3  ;;  %v22369_v55 = vrot.slane %v15095_v22, 4  ;;  %v22374_v1 = vld [vmem:[#allocation14_spill] sm:$0xff] }
 0x3ca   : > { %9914 = vrot.lane.b32.xlu2 %v22365_v41, %s11534_s22  ;;  %v4245_v41 = vperm.slane %v4237_v13, %v11741_v28  ;;  %22368 = vst [vmem:[#allocation162_spill] sm:$0xff] %v15258_v18  ;;  %v5130_v15 = vrot.slane %v22371_v38, 4  ;;  %v5133_v62 = vsel %vm246_vm0, %v22371_v38, %v5132_v52  ;;  %v3410_v57 = vrot.slane %v3397_v20, 4  ;;  %v15288_v45 = vpop.trf.xlu1 }
 0x3cb   : > { %v15264_v30 = vsel %vm246_vm0, %v3397_v20, %v22369_v55  ;;  %22372 = vst [vmem:[#allocation51_spill] sm:$0xff] %v15269_v24  ;;  %v4284_v13 = vrot.slane %v4233_v32, 4  ;;  %v4241_v27 = vperm.slane %v4235_v5, %v11741_v28  ;;  %v15276_v55 = vperm.slane %v3375_v61, %v11781_v3  ;;  %v22378_v20 = vld [vmem:[#allocation37_spill] sm:$0xff]  ;;  %v22380_v61 = vld [vmem:[#allocation48_spill] sm:$0xff] }
 0x3cc   : > { %22370 = vst [vmem:[#allocation187_spill] sm:$0xff] %v15264_v30  ;;  %v22376_v25 = vrot.slane %v15081_v4, 4  ;;  %v5180_v38 = vrot.slane %v5129_v17, 4  ;;  %v4282_v24 = vrot.slane %v4245_v41, 4  ;;  %v5168_v6 = vrot.slane %v15256_v54, 4 }
 0x3cd   : > { %22375 = vst [vmem:[#allocation151_spill] sm:$0xff] %v15276_v55  ;;  %v3406_v47 = vrot.slane %v3393_v56, 4  ;;  %v6028_v18 = vrot.slane %v22381_v21, 4  ;;  %v22382_v5 = vrot.slane %v15084_v35, 4  ;;  %v22386_v42 = vrot.slane %v22356_v39, 4 }
 0x3ce   : > { %v15282_v52 = vsel %vm246_vm0, %v15247_v9, %v22376_v25  ;;  %22379 = vst [vmem:[#allocation47_spill] sm:$0xff] %v15288_v45  ;;  %v5131_v25 = vsel %vm246_vm0, %v5130_v15, %v22366_v12  ;;  %v4273_v9 = vsel %vm246_vm0, %v4241_v27, %v4272_v43  ;;  %v4285_v12 = vsel %vm246_vm0, %v4245_v41, %v4284_v13  ;;  %v22385_v15 = vld [vmem:[#allocation188_spill] sm:$0xff]  ;;  %v22389_v41 = vld [vmem:[#allocation191_spill] sm:$0xff] }
 0x3cf   : > { %22377 = vst [vmem:[#allocation35_spill] sm:$0xff] %v15282_v52  ;;  %v15299_v40 = vsel %vm246_vm0, %v3393_v56, %v22382_v5  ;;  %v6014_v51 = vrot.slane %v22385_v15, 4  ;;  %v4283_v14 = vsel %vm246_vm0, %v4282_v24, %v4233_v32  ;;  %v5137_v56 = vperm.slane %v5131_v25, %v11741_v28 }
 0x3d0   : > { %9932 = vrot.lane.b32.xlu1 %v22373_v37, %s11535_s23  ;;  %v5141_v37 = vperm.slane %v5133_v62, %v11741_v28  ;;  %22383 = vst [vmem:[#allocation14_spill] sm:$0xff] %v15299_v40  ;;  %v15303_v62 = vsel %vm246_vm0, %v3410_v57, %v15095_v22  ;;  %v6017_v22 = vsel %vm246_vm0, %v22385_v15, %v22386_v42  ;;  %v15316_v57 = vpop.trf.xlu2  ;;  %v8604_v43 = vrot.slane %v15299_v40, 4  ;;  %v15340_v24 = vpop.trf.xlu0 }
 0x3d1   : > { %22384 = vst [vmem:[#allocation37_spill] sm:$0xff] %v15303_v62  ;;  %v15320_v4 = vsel %vm246_vm0, %v3406_v47, %v15084_v35  ;;  %v6026_v13 = vrot.slane %v22389_v41, 4  ;;  %v6029_v32 = vsel %vm246_vm0, %v22389_v41, %v6028_v18  ;;  %v15330_v42 = vperm.slane %v4273_v9, %v11781_v3  ;;  %v22391_v35 = vld [vmem:[#allocation49_spill] sm:$0xff] }
 0x3d2   : > { %9930 = vrot.lane.b32.xlu2 %v22380_v61, %s11535_s23  ;;  %v4270_v61 = vrot.slane %v4241_v27, 4  ;;  %v5178_v5 = vrot.slane %v5141_v37, 4  ;;  %22387 = vst [vmem:[#allocation48_spill] sm:$0xff] %v15316_v57  ;;  %v4293_v25 = vperm.slane %v4285_v12, %v11781_v3  ;;  %v4289_v47 = vperm.slane %v4283_v14, %v11781_v3 }
 0x3d3   : > { %22388 = vst [vmem:[#allocation193_spill] sm:$0xff] %v15320_v4  ;;  %v5181_v15 = vsel %vm246_vm0, %v5141_v37, %v5180_v38  ;;  %v6015_v18 = vsel %vm246_vm0, %v6014_v51, %v22356_v39  ;;  %v6025_v41 = vperm.slane %v6017_v22, %v11741_v28  ;;  %v5166_v9 = vrot.slane %v5137_v56, 4 }
 0x3d4   : > { %v4271_v27 = vsel %vm246_vm0, %v4270_v61, %v15229_v26  ;;  %22390 = vst [vmem:[#allocation188_spill] sm:$0xff] %v15330_v42  ;;  %v5179_v61 = vsel %vm246_vm0, %v5178_v5, %v5129_v17  ;;  %v6037_v12 = vperm.slane %v6029_v32, %v11741_v28  ;;  %v15349_v14 = vsel %vm246_vm0, %v15264_v30, %v8604_v43  ;;  %v15365_v32 = vpop.trf.xlu1 }
 0x3d5   : > { %22392 = vst [vmem:[#allocation191_spill] sm:$0xff] %v15340_v24  ;;  %v15352_v51 = vperm.slane %v4271_v27, %v11781_v3  ;;  %v5169_v39 = vsel %vm246_vm0, %v5137_v56, %v5168_v6  ;;  %v6027_v38 = vsel %vm246_vm0, %v6026_v13, %v22381_v21  ;;  %v22396_v37 = vrot.slane %v15139_v10, 4 }
 0x3d6   : > { %22394 = vst [vmem:[#allocation49_spill] sm:$0xff] %v15349_v14  ;;  %v4306_v5 = vrot.slane %v4293_v25, 4  ;;  %v5189_v22 = vperm.slane %v5181_v15, %v11781_v3  ;;  %v6021_v43 = vperm.slane %v6015_v18, %v11741_v28  ;;  %v22399_v27 = vrot.slane %v15131_v2, 4 }
 0x3d7   : > { %v15361_v17 = vsel %vm246_vm0, %v15330_v42, %v22396_v37  ;;  %22398 = vst [vmem:[#allocation233_spill] sm:$0xff] %v15365_v32  ;;  %v22401_v21 = vrot.slane %v15142_v0, 4  ;;  %v15378_v13 = vperm.slane %v5179_v61, %v11781_v3  ;;  %v5167_v15 = vsel %vm246_vm0, %v5166_v9, %v15256_v54  ;;  %v22405_v9 = vld [vmem:[#allocation86_spill] sm:$0xff]  ;;  %v22500_v32 = vld [vmem:[#allocation68_spill] sm:$0xff] }
 0x3d8   : > { %9936 = vrot.lane.b32.xlu1 %v22391_v35, %s11535_s23  ;;  %v22393_v35 = vld [vmem:[#allocation88_spill] sm:$0xff]  ;;  %22397 = vst [vmem:[#allocation232_spill] sm:$0xff] %v15361_v17  ;;  %v15370_v6 = vsel %vm246_vm0, %v4289_v47, %v22399_v27  ;;  %v5177_v18 = vperm.slane %v5169_v39, %v11781_v3  ;;  %v6033_v37 = vperm.slane %v6027_v38, %v11741_v28  ;;  %v6074_v26 = vrot.slane %v6037_v12, 4  ;;  %v15394_v39 = vpop.trf.xlu2  ;;  %v22416_v17 = vld [vmem:[#allocation154_spill] sm:$0xff] }
 0x3d9   : > { %22395 = vst [vmem:[#allocation88_spill] sm:$0xff] %v15352_v51  ;;  %v15375_v56 = vsel %vm246_vm0, %v4293_v25, %v22401_v21  ;;  %v4302_v14 = vrot.slane %v4289_v47, 4  ;;  %v15389_v61 = vsel %vm246_vm0, %v4306_v5, %v15142_v0  ;;  %v5202_v10 = vrot.slane %v5189_v22, 4 }
 0x3da   : > { %9934 = vrot.lane.b32.xlu2 %v22393_v35, %s11535_s23  ;;  %22400 = vst [vmem:[#allocation234_spill] sm:$0xff] %v15370_v6  ;;  %v6076_v35 = vrot.slane %v6025_v41, 4  ;;  %v6064_v54 = vrot.slane %v6021_v43, 4  ;;  %v15398_v47 = vperm.slane %v5167_v15, %v11781_v3  ;;  %v22408_v27 = vrot.slane %v15165_v46, 4  ;;  %v22412_v15 = vld [vmem:[#allocation114_spill] sm:$0xff] }
 0x3db   : > { %22402 = vst [vmem:[#allocation235_spill] sm:$0xff] %v15375_v56  ;;  %v5194_v25 = vrot.slane %v5177_v18, 4  ;;  %v22410_v45 = vrot.slane %v15177_v50, 4  ;;  %v6062_v21 = vrot.slane %v6033_v37, 4  ;;  %v6075_v38 = vsel %vm246_vm0, %v6074_v26, %v6025_v41 }
 0x3dc   : > { %22403 = vst [vmem:[#allocation236_spill] sm:$0xff] %v15378_v13  ;;  %v15404_v0 = vsel %vm246_vm0, %v15378_v13, %v22408_v27  ;;  %v6077_v5 = vsel %vm246_vm0, %v6037_v12, %v6076_v35  ;;  %v15417_v46 = vsel %vm246_vm0, %v4302_v14, %v15131_v2  ;;  %v22414_v12 = vrot.slane %v15172_v34, 4  ;;  %v22427_v13 = vld [vmem:[#allocation157_spill] sm:$0xff] }
 0x3dd   : > { %22404 = vst [vmem:[#allocation237_spill] sm:$0xff] %v15389_v61  ;;  %v15430_v41 = vsel %vm246_vm0, %v5202_v10, %v15172_v34  ;;  %v8828_v26 = vrot.slane %v15404_v0, 4  ;;  %v6065_v2 = vsel %vm246_vm0, %v6033_v37, %v6064_v54  ;;  %v6085_v14 = vperm.slane %v6077_v5, %v11781_v3  ;;  %v15446_v54 = vpop.trf.xlu1  ;;  %v22426_v10 = vld [vmem:[#allocation192_spill] sm:$0xff] }
 0x3de   : > { %22406 = vst [vmem:[#allocation86_spill] sm:$0xff] %v15394_v39  ;;  %v15423_v35 = vsel %vm246_vm0, %v5189_v22, %v22414_v12  ;;  %v6081_v22 = vperm.slane %v6075_v38, %v11781_v3  ;;  %v22419_v12 = vld [vmem:[#allocation164_spill] sm:$0xff]  ;;  %v15441_v61 = vsel %vm246_vm0, %v5194_v25, %v15177_v50  ;;  %v6063_v37 = vsel %vm246_vm0, %v6062_v21, %v6021_v43  ;;  %v22423_v38 = vld [vmem:[#allocation167_spill] sm:$0xff]  ;;  %v22434_v43 = vld [vmem:[#allocation158_spill] sm:$0xff] }
 0x3df   : > { %22407 = vst [vmem:[#allocation238_spill] sm:$0xff] %v15398_v47  ;;  %v3416_v27 = vrot.slane %v22423_v38, 4  ;;  %v15456_v50 = vsel %vm246_vm0, %v15423_v35, %v8828_v26  ;;  %v6098_v25 = vrot.slane %v6085_v14, 4  ;;  %v22428_v21 = vld [vmem:[#allocation115_spill] sm:$0xff]  ;;  %v15463_v5 = vperm.slane %v6063_v37, %v11781_v3 }
 0x3e0   : > { %9948 = vrot.lane.b32.xlu1 %v22405_v9, %s11536_s24  ;;  %22409 = vst [vmem:[#allocation239_spill] sm:$0xff] %v15404_v0  ;;  %v15410_v9 = vsel %vm246_vm0, %v5177_v18, %v22410_v45  ;;  %v15426_v18 = vpop.trf.xlu0  ;;  %v3414_v45 = vrot.slane %v22419_v12, 4  ;;  %v22424_v0 = vld [vmem:[#allocation194_spill] sm:$0xff]  ;;  %v22438_v56 = vrot.slane %v15219_v36, 4  ;;  %v22481_v55 = vrot.slane %v22014_v31, 4 }
 0x3e1   : > { %22411 = vst [vmem:[#allocation240_spill] sm:$0xff] %v15410_v9  ;;  %v6936_v9 = vrot.slane %v22424_v0, 4  ;;  %v22432_v0 = vld [vmem:[#allocation53_spill] sm:$0xff] }
 0x3e2   : > { %9946 = vrot.lane.b32.xlu2 %v22412_v15, %s11536_s24  ;;  %22413 = vst [vmem:[#allocation114_spill] sm:$0xff] %v15417_v46  ;;  %v15450_v15 = vperm.slane %v6065_v2, %v11781_v3  ;;  %v22430_v2 = vrot.slane %v15195_v11, 4  ;;  %v3415_v26 = vsel %vm246_vm0, %v3414_v45, %v22423_v38  ;;  %v22437_v46 = vld [vmem:[#allocation195_spill] sm:$0xff]  ;;  %v6094_v38 = vrot.slane %v6081_v22, 4 }
 0x3e3   : > { %22415 = vst [vmem:[#allocation241_spill] sm:$0xff] %v15423_v35  ;;  %v15476_v35 = vpop.trf.xlu2  ;;  %v6960_v47 = vrot.slane %v22437_v46, 4 }
 0x3e4   : > { %22417 = vst [vmem:[#allocation154_spill] sm:$0xff] %v15426_v18  ;;  %v15487_v45 = vsel %vm246_vm0, %v15450_v15, %v22438_v56 }
 0x3e5   : > { %22418 = vst [vmem:[#allocation242_spill] sm:$0xff] %v15430_v41  ;;  %v15468_v41 = vsel %vm246_vm0, %v6081_v22, %v22430_v2  ;;  %v7184_v2 = vrot.slane %v14793_v23, 4  ;;  %v3417_v23 = vsel %vm246_vm0, %v22419_v12, %v3416_v27  ;;  %v15505_v22 = vperm.slane %v3415_v26, %v11741_v28 }
 0x3e6   : > { %22420 = vst [vmem:[#allocation164_spill] sm:$0xff] %v15441_v61  ;;  %v4312_v61 = vrot.slane %v22432_v0, 4  ;;  %v8940_v56 = vrot.slane %v15468_v41, 4  ;;  %v15519_v26 = vsel %vm246_vm0, %v6094_v38, %v15195_v11 }
 0x3e7   : > { %22421 = vst [vmem:[#allocation243_spill] sm:$0xff] %v15446_v54 }
 0x3e8   : > { %22422 = vst [vmem:[#allocation244_spill] sm:$0xff] %v15450_v15  ;;  %9952 = vrot.lane.b32.xlu1 %v22428_v21, %s11536_s24  ;;  %v22436_v21 = vld [vmem:[#allocation38_spill] sm:$0xff]  ;;  %v7136_v15 = vrot.slane %v14731_v8, 4  ;;  %v22469_v8 = vld [vmem:[#allocation57_spill] sm:$0xff] }
 0x3e9   : > { %22425 = vst [vmem:[#allocation167_spill] sm:$0xff] %v15456_v50  ;;  %v22433_v50 = vld [vmem:[#allocation196_spill] sm:$0xff]  ;;  %v6937_v37 = vsel %vm246_vm0, %v22436_v21, %v6936_v9  ;;  %v15496_v9 = vsel %vm246_vm0, %v6098_v25, %v15211_v29  ;;  %v22443_v21 = vld [vmem:[#allocation159_spill] sm:$0xff]  ;;  %v7160_v25 = vrot.slane %v14756_v58, 4  ;;  %v15530_v58 = vpop.trf.xlu1  ;;  %v5206_v62 = vrot.slane %v22469_v8, 4 }
 0x3ea   : > { %22429 = vst [vmem:[#allocation194_spill] sm:$0xff] %v15463_v5  ;;  %v4310_v34 = vrot.slane %v22433_v50, 4  ;;  %9950 = vrot.lane.b32.xlu2 %v22434_v43, %s11536_s24  ;;  %v22440_v43 = vrot.slane %v15211_v29, 4  ;;  %v6945_v46 = vperm.slane %v6937_v37, %v11781_v3  ;;  %v6961_v42 = vsel %vm246_vm0, %v22443_v21, %v6960_v47  ;;  %v22453_v37 = vld [vmem:[#allocation153_spill] sm:$0xff]  ;;  %v22466_v5 = vld [vmem:[#allocation60_spill] sm:$0xff] }
 0x3eb   : > { %22431 = vst [vmem:[#allocation192_spill] sm:$0xff] %v15468_v41  ;;  %v6969_v29 = vperm.slane %v6961_v42, %v11781_v3  ;;  %v7185_v47 = vsel %vm246_vm0, %v14786_v7, %v7184_v2  ;;  %v22447_v7 = vld [vmem:[#allocation13_spill] sm:$0xff]  ;;  %v22454_v42 = vld [vmem:[#allocation62_spill] sm:$0xff]  ;;  %v6876_v41 = vrot.slane %v14958_v44, 4  ;;  %v22472_v44 = vld [vmem:[#allocation31_spill] sm:$0xff] }
 0x3ec   : > { %22435 = vst [vmem:[#allocation157_spill] sm:$0xff] %v15476_v35  ;;  %v15492_v6 = vsel %vm246_vm0, %v6085_v14, %v22440_v43  ;;  %v4313_v14 = vsel %vm246_vm0, %v22433_v50, %v4312_v61  ;;  %v15509_v43 = vpop.trf.xlu0  ;;  %v4311_v27 = vsel %vm246_vm0, %v4310_v34, %v22432_v0  ;;  %v6988_v12 = vrot.slane %v6945_v46, 4  ;;  %v22485_v35 = vld [vmem:[#allocation170_spill] sm:$0xff] }
 0x3ed   : > { %22439 = vst [vmem:[#allocation115_spill] sm:$0xff] %v15487_v45  ;;  %v15523_v61 = vperm.slane %v3417_v23, %v11741_v28  ;;  %v6986_v50 = vrot.slane %v6969_v29, 4  ;;  %v15528_v0 = vperm.slane %v4313_v14, %v11741_v28  ;;  %v15535_v11 = vperm.slane %v7185_v47, %v11781_v3  ;;  %v22448_v23 = vld [vmem:[#allocation124_spill] sm:$0xff] }
 0x3ee   : > { %22441 = vst [vmem:[#allocation53_spill] sm:$0xff] %v15492_v6  ;;  %v15539_v38 = vperm.slane %v4311_v27, %v11741_v28  ;;  %v15544_v21 = vsel %vm246_vm0, %v6969_v29, %v6988_v12  ;;  %v15552_v47 = vsel %vm246_vm0, %v15492_v6, %v8940_v56  ;;  %v22450_v27 = vld [vmem:[#allocation26_spill] sm:$0xff]  ;;  %v22451_v12 = vld [vmem:[#allocation52_spill] sm:$0xff]  ;;  %v22455_v34 = vrot.slane %v22454_v42, 4 }
 0x3ef   : > { %22442 = vst [vmem:[#allocation196_spill] sm:$0xff] %v15496_v9  ;;  %v15547_v14 = vsel %vm246_vm0, %v6986_v50, %v6945_v46  ;;  %v22452_v46 = vld [vmem:[#allocation55_spill] sm:$0xff] }
 0x3f0   : > { %22444 = vst [vmem:[#allocation158_spill] sm:$0xff] %v15509_v43  ;;  %9966 = vrot.lane.b32.xlu1 %v22447_v7, %s11537_s25  ;;  %v6800_v50 = vrot.slane %v22452_v46, 4  ;;  %v15566_v56 = vsel %vm246_vm0, %v22455_v34, %v22453_v37  ;;  %v5208_v7 = vrot.slane %v14716_v33, 4  ;;  %v22457_v46 = vld [vmem:[#allocation155_spill] sm:$0xff]  ;;  %v22460_v37 = vld [vmem:[#allocation50_spill] sm:$0xff]  ;;  %v22499_v43 = vld [vmem:[#allocation132_spill] sm:$0xff] }
 0x3f1   : > { %22445 = vst [vmem:[#allocation38_spill] sm:$0xff] %v15519_v26  ;;  %9918 = vrot.lane.b32.xlu0 %v22448_v23, %s11534_s22  ;;  %v7161_v23 = vsel %vm246_vm0, %v14743_v49, %v7160_v25  ;;  %v7210_v25 = vrot.slane %v15535_v11, 4  ;;  %v22458_v29 = vrot.slane %v22457_v46, 4  ;;  %v22459_v9 = vld [vmem:[#allocation83_spill] sm:$0xff]  ;;  %v6776_v34 = vrot.slane %v22460_v37, 4 }
 0x3f2   : > { %22446 = vst [vmem:[#allocation195_spill] sm:$0xff] %v15530_v58  ;;  %9962 = vrot.lane.b32.xlu2 %v22450_v27, %s11537_s25  ;;  %v15570_v27 = vpop.trf.xlu2  ;;  %v15573_v49 = vperm.slane %v7161_v23, %v11781_v3  ;;  %v22461_v26 = vld [vmem:[#allocation59_spill] sm:$0xff]  ;;  %v6998_v23 = vrot.slane %v15566_v56, 4  ;;  %v22486_v58 = vrot.slane %v22485_v35, 4  ;;  %v5209_v31 = vsel %vm246_vm0, %v22469_v8, %v5208_v7 }
 0x3f3   : > { %22449 = vst [vmem:[#allocation159_spill] sm:$0xff] %v15552_v47  ;;  %v15581_v42 = vsel %vm246_vm0, %v22459_v9, %v22458_v29  ;;  %v22462_v45 = vrot.slane %v22461_v26, 4  ;;  %v22463_v47 = vld [vmem:[#allocation56_spill] sm:$0xff]  ;;  %v6777_v37 = vsel %vm246_vm0, %v22466_v5, %v6776_v34  ;;  %v22467_v26 = vld [vmem:[#allocation58_spill] sm:$0xff]  ;;  %v22473_v34 = vld [vmem:[#allocation69_spill] sm:$0xff]  ;;  %v15743_v18 = vperm.slane %v5209_v31, %v11741_v28 }
 0x3f4   : > { %22456 = vst [vmem:[#allocation13_spill] sm:$0xff] %v15570_v27  ;;  %v15592_v2 = vsel %vm246_vm0, %v7210_v25, %v15573_v49  ;;  %v15597_v29 = vpop.trf.xlu0  ;;  %v6801_v6 = vsel %vm246_vm0, %v22467_v26, %v6800_v50  ;;  %v22470_v25 = vld [vmem:[#allocation39_spill] sm:$0xff]  ;;  %v15615_v5 = vperm.slane %v6777_v37, %v11741_v28  ;;  %v22474_v26 = vrot.slane %v22473_v34, 4  ;;  %v15632_v37 = vpop.trf.xlu1  ;;  %v22482_v27 = vld [vmem:[#allocation73_spill] sm:$0xff] }
 0x3f5   : > { %v6789_v51 = vsel %vm246_vm0, %v22463_v47, %v22462_v45  ;;  %22464 = vst [vmem:[#allocation124_spill] sm:$0xff] %v15592_v2  ;;  %v22468_v45 = vld [vmem:[#allocation64_spill] sm:$0xff]  ;;  %v15618_v50 = vperm.slane %v6801_v6, %v11741_v28  ;;  %v22477_v6 = vld [vmem:[#allocation123_spill] sm:$0xff] }
 0x3f6   : > { %v15595_v36 = vperm.slane %v6789_v51, %v11741_v28  ;;  %22465 = vst [vmem:[#allocation26_spill] sm:$0xff] %v15597_v29  ;;  %v6858_v47 = vrot.slane %v22468_v45, 4  ;;  %v22471_v51 = vrot.slane %v22459_v9, 4  ;;  %v15629_v9 = vsel %vm246_vm0, %v14941_v53, %v6876_v41  ;;  %v22483_v41 = vld [vmem:[#allocation79_spill] sm:$0xff] }
 0x3f7   : > { %22475 = vst [vmem:[#allocation52_spill] sm:$0xff] %v15629_v9  ;;  %v7125_v53 = vsel %vm246_vm0, %v22482_v27, %v22481_v55  ;;  %v22507_v9 = vld [vmem:[#allocation70_spill] sm:$0xff] }
 0x3f8   : > { %9980 = vrot.lane.b32.xlu1 %v22470_v25, %s11538_s26  ;;  %v15612_v4 = vsel %vm246_vm0, %v22471_v51, %v22457_v46  ;;  %v7011_v25 = vsel %vm246_vm0, %v22474_v26, %v15581_v42  ;;  %v6834_v52 = vrot.slane %v15595_v36, 4  ;;  %v7112_v46 = vrot.slane %v14725_v63, 4  ;;  %22476 = vst [vmem:[#allocation55_spill] sm:$0xff] %v15632_v37  ;;  %v22478_v51 = vld [vmem:[#allocation172_spill] sm:$0xff] }
 0x3f9   : > { %9964 = vrot.lane.b32.xlu0 %v22472_v44, %s11537_s25  ;;  %v22479_v44 = vld [vmem:[#allocation171_spill] sm:$0xff]  ;;  %v6859_v26 = vsel %vm246_vm0, %v6858_v47, %v15618_v50  ;;  %v7137_v63 = vsel %vm246_vm0, %v22483_v41, %v7136_v15  ;;  %v6999_v37 = vsel %vm246_vm0, %v6998_v23, %v15612_v4  ;;  %v22487_v47 = vld [vmem:[#allocation76_spill] sm:$0xff]  ;;  %v15662_v15 = vperm.slane %v7011_v25, %v11741_v28 }
 0x3fa   : > { %9968 = vrot.lane.b32.xlu2 %v22477_v6, %s11537_s25  ;;  %v22480_v30 = vrot.slane %v22479_v44, 4  ;;  %v22484_v6 = vld [vmem:[#allocation169_spill] sm:$0xff]  ;;  %v7194_v39 = vrot.slane %v22487_v47, 4  ;;  %v15659_v55 = vpop.trf.xlu2  ;;  %v15668_v23 = vperm.slane %v6859_v26, %v11781_v3  ;;  %v15675_v54 = vperm.slane %v7125_v53, %v11741_v28 }
 0x3fb   : > { %v7035_v29 = vsel %vm246_vm0, %v22486_v58, %v22484_v6  ;;  %22488 = vst [vmem:[#allocation153_spill] sm:$0xff] %v15659_v55  ;;  %v5207_v58 = vsel %vm246_vm0, %v5206_v62, %v14716_v33  ;;  %v15678_v7 = vperm.slane %v7137_v63, %v11741_v28  ;;  %v15681_v8 = vperm.slane %v6999_v37, %v11741_v28  ;;  %v22491_v63 = vld [vmem:[#allocation65_spill] sm:$0xff] }
 0x3fc   : > { %v7023_v40 = vsel %vm246_vm0, %v22480_v30, %v22478_v51  ;;  %v6835_v30 = vsel %vm246_vm0, %v6834_v52, %v15615_v5  ;;  %v22489_v52 = vld [vmem:[#allocation77_spill] sm:$0xff]  ;;  %v15684_v25 = vperm.slane %v7035_v29, %v11741_v28  ;;  %v6878_v26 = vrot.slane %v15668_v23, 4  ;;  %v22492_v29 = vld [vmem:[#allocation127_spill] sm:$0xff] }
 0x3fd   : > { %v15665_v27 = vperm.slane %v6835_v30, %v11781_v3  ;;  %v7113_v41 = vsel %vm246_vm0, %v22489_v52, %v7112_v46  ;;  %v7170_v33 = vrot.slane %v15675_v54, 4  ;;  %v7195_v62 = vsel %vm246_vm0, %v7194_v39, %v15678_v7 }
 0x3fe   : > { %v15688_v30 = vperm.slane %v7113_v41, %v11741_v28  ;;  %v7212_v46 = vrot.slane %v15573_v49, 4  ;;  %v22490_v53 = vrot.slane %v22374_v1, 4  ;;  %v15701_v52 = vperm.slane %v7023_v40, %v11741_v28  ;;  %v15711_v1 = vpop.trf.xlu0  ;;  %v22495_v49 = vld [vmem:[#allocation10_spill] sm:$0xff] }
 0x3ff   : > { %v7046_v41 = vrot.slane %v15662_v15, 4  ;;  %v15706_v55 = vsel %vm246_vm0, %v6878_v26, %v15665_v27  ;;  %v15709_v39 = vperm.slane %v7195_v62, %v11781_v3  ;;  %22494 = vst [vmem:[#allocation155_spill] sm:$0xff] %v15711_v1  ;;  %v22497_v26 = vrot.slane %v22378_v20, 4 }
 0x400   : > { %v6889_v37 = vsel %vm246_vm0, %v22491_v63, %v22490_v53  ;;  %9994 = vrot.lane.b32.xlu1 %v22492_v29, %s11539_s27  ;;  %22493 = vst [vmem:[#allocation62_spill] sm:$0xff] %v15706_v55  ;;  %v7171_v53 = vsel %vm246_vm0, %v7170_v33, %v15688_v30  ;;  %v15719_v40 = vsel %vm246_vm0, %v15535_v11, %v7212_v46  ;;  %v22498_v29 = vld [vmem:[#allocation63_spill] sm:$0xff]  ;;  %v22501_v11 = vrot.slane %v22500_v32, 4  ;;  %v22502_v46 = vld [vmem:[#allocation66_spill] sm:$0xff] }
 0x401   : > { %9978 = vrot.lane.b32.xlu0 %v22495_v49, %s11538_s26  ;;  %22496 = vst [vmem:[#allocation83_spill] sm:$0xff] %v15719_v40  ;;  %v6897_v63 = vperm.slane %v6889_v37, %v11741_v28  ;;  %v6901_v62 = vsel %vm246_vm0, %v22498_v29, %v22497_v26  ;;  %v15729_v1 = vperm.slane %v7171_v53, %v11781_v3  ;;  %v7214_v49 = vrot.slane %v15709_v39, 4  ;;  %v22503_v29 = vld [vmem:[#allocation85_spill] sm:$0xff]  ;;  %v15745_v40 = vpop.trf.xlu1 }
 0x402   : > { %9982 = vrot.lane.b32.xlu2 %v22499_v43, %s11538_s26  ;;  %v6909_v33 = vperm.slane %v6901_v62, %v11741_v28  ;;  %v6913_v37 = vsel %vm246_vm0, %v22502_v46, %v22501_v11  ;;  %v6104_v20 = vrot.slane %v14824_v19, 4  ;;  %v7070_v57 = vrot.slane %v15684_v25, 4  ;;  %22504 = vst [vmem:[#allocation50_spill] sm:$0xff] %v15745_v40  ;;  %v15760_v55 = vpop.trf.xlu2 }
 0x403   : > { %v6921_v26 = vperm.slane %v6913_v37, %v11741_v28  ;;  %v6970_v43 = vrot.slane %v22503_v29, 4  ;;  %v3426_v53 = vrot.slane %v14906_v59, 4  ;;  %v15749_v32 = vsel %vm246_vm0, %v7214_v49, %v15729_v1  ;;  %22508 = vst [vmem:[#allocation56_spill] sm:$0xff] %v15760_v55  ;;  %v22509_v55 = vld [vmem:[#allocation46_spill] sm:$0xff] }
 0x404   : > { %22505 = vst [vmem:[#allocation59_spill] sm:$0xff] %v15749_v32  ;;  %v6946_v62 = vrot.slane %v6909_v33, 4  ;;  %v22506_v11 = vrot.slane %v22416_v17, 4  ;;  %v15756_v37 = vperm.slane %v5207_v58, %v11741_v28  ;;  %v6102_v24 = vrot.slane %v22507_v9, 4 }
 0x405   : > { %v6971_v31 = vsel %vm246_vm0, %v6970_v43, %v6921_v26  ;;  %v7047_v49 = vsel %vm246_vm0, %v7046_v41, %v15681_v8  ;;  %v7071_v58 = vsel %vm246_vm0, %v7070_v57, %v15701_v52  ;;  %v6880_v43 = vrot.slane %v15665_v27, 4  ;;  %v22511_v27 = vld [vmem:[#allocation44_spill] sm:$0xff] }
 0x406   : > { %v3429_v46 = vsel %vm246_vm0, %v14906_v59, %v22506_v11  ;;  %v6947_v32 = vsel %vm246_vm0, %v6946_v62, %v6897_v63  ;;  %v6977_v2 = vperm.slane %v6971_v31, %v11781_v3  ;;  %v6105_v59 = vsel %vm246_vm0, %v22507_v9, %v6104_v20  ;;  %v22510_v62 = vld [vmem:[#allocation42_spill] sm:$0xff] }
 0x407   : > { %v6953_v11 = vperm.slane %v6947_v32, %v11781_v3  ;;  %v3427_v40 = vsel %vm246_vm0, %v3426_v53, %v22416_v17  ;;  %v3437_v41 = vperm.slane %v3429_v46, %v11741_v28  ;;  %v6103_v57 = vsel %vm246_vm0, %v6102_v24, %v14824_v19  ;;  %v22512_v53 = vld [vmem:[#allocation163_spill] sm:$0xff]  ;;  %v15801_v24 = vpop.trf.xlu0 }
 0x408   : > { %10000 = vrot.lane.b32.xlu1 %v22510_v62, %s11539_s27  ;;  %v6990_v31 = vrot.slane %v6977_v2, 4  ;;  %v15787_v17 = vperm.slane %v6105_v59, %v11741_v28  ;;  %v15792_v46 = vperm.slane %v7047_v49, %v11781_v3  ;;  %v15795_v62 = vperm.slane %v7071_v58, %v11781_v3  ;;  %22513 = vst [vmem:[#allocation60_spill] sm:$0xff] %v15801_v24 }
 0x409   : > { %9984 = vrot.lane.b32.xlu0 %v22511_v27, %s11538_s26  ;;  %v3433_v19 = vperm.slane %v3427_v40, %v11741_v28  ;;  %v15805_v59 = vsel %vm246_vm0, %v15668_v23, %v6880_v43  ;;  %v6948_v27 = vrot.slane %v6897_v63, 4  ;;  %v6972_v32 = vrot.slane %v6921_v26, 4  ;;  %v15811_v58 = vpop.trf.xlu1 }
 0x40a   : > { %9996 = vrot.lane.b32.xlu2 %v22512_v53, %s11539_s27  ;;  %v15798_v9 = vsel %vm246_vm0, %v6990_v31, %v6953_v11  ;;  %v3474_v53 = vrot.slane %v3437_v41, 4  ;;  %v4322_v49 = vrot.slane %v14990_v48, 4  ;;  %v15809_v20 = vperm.slane %v6103_v57, %v11741_v28  ;;  %22514 = vst [vmem:[#allocation58_spill] sm:$0xff] %v15811_v58 }
 0x40b   : > { %v6992_v31 = vrot.slane %v6953_v11, 4  ;;  %v6949_v44 = vsel %vm246_vm0, %v6909_v33, %v6948_v27  ;;  %v6973_v40 = vsel %vm246_vm0, %v22503_v29, %v6972_v32  ;;  %v7216_v24 = vrot.slane %v15729_v1, 4  ;;  %v15843_v32 = vpop.trf.xlu2 }
 0x40c   : > { %v6836_v23 = vrot.slane %v15615_v5, 4  ;;  %v22515_v63 = vrot.slane %v15523_v61, 4  ;;  %v22516_v43 = vrot.slane %v22426_v10, 4  ;;  %v7072_v11 = vrot.slane %v15701_v52, 4  ;;  %v22520_v52 = vld [vmem:[#allocation160_spill] sm:$0xff]  ;;  %22521 = vst [vmem:[#allocation39_spill] sm:$0xff] %v15843_v32 }
 0x40d   : > { %v15827_v33 = vperm.slane %v6973_v40, %v11781_v3  ;;  %v3462_v27 = vrot.slane %v3433_v19, 4  ;;  %v15830_v29 = vsel %vm246_vm0, %v6977_v2, %v6992_v31  ;;  %v15834_v5 = vsel %vm246_vm0, %v15709_v39, %v7216_v24  ;;  %v22522_v40 = vld [vmem:[#allocation168_spill] sm:$0xff] }
 0x40e   : > { %v3477_v26 = vsel %vm246_vm0, %v3437_v41, %v22515_v63  ;;  %v4325_v57 = vsel %vm246_vm0, %v14990_v48, %v22516_v43  ;;  %22517 = vst [vmem:[#allocation64_spill] sm:$0xff] %v15830_v29  ;;  %v6837_v1 = vsel %vm246_vm0, %v15595_v36, %v6836_v23  ;;  %v22519_v41 = vrot.slane %v15505_v22, 4 }
 0x40f   : > { %22518 = vst [vmem:[#allocation57_spill] sm:$0xff] %v15834_v5  ;;  %v7094_v2 = vrot.slane %v15795_v62, 4  ;;  %v7048_v31 = vrot.slane %v15681_v8, 4  ;;  %v15848_v39 = vperm.slane %v6949_v44, %v11781_v3  ;;  %v3475_v36 = vsel %vm246_vm0, %v3474_v53, %v15523_v61  ;;  %v22523_v61 = vld [vmem:[#allocation166_spill] sm:$0xff]  ;;  %v22537_v5 = vld [vmem:[#allocation173_spill] sm:$0xff] }
 0x410   : > { %v3465_v48 = vsel %vm246_vm0, %v3433_v19, %v22519_v41  ;;  %10014 = vrot.lane.b32.xlu1 %v22520_v52, %s11540_s28  ;;  %v4323_v24 = vsel %vm246_vm0, %v4322_v49, %v22426_v10  ;;  %v4333_v19 = vperm.slane %v4325_v57, %v11741_v28  ;;  %v6994_v23 = vrot.slane %v15827_v33, 4 }
 0x411   : > { %9998 = vrot.lane.b32.xlu0 %v22522_v40, %s11539_s27  ;;  %v15859_v63 = vperm.slane %v3477_v26, %v11781_v3  ;;  %v3463_v10 = vsel %vm246_vm0, %v3462_v27, %v15505_v22  ;;  %v15869_v53 = vperm.slane %v3465_v48, %v11781_v3  ;;  %v7073_v49 = vsel %vm246_vm0, %v15684_v25, %v7072_v11  ;;  %v15885_v48 = vpop.trf.xlu0  ;;  %v22529_v27 = vld [vmem:[#allocation224_spill] sm:$0xff] }
 0x412   : > { %10010 = vrot.lane.b32.xlu2 %v22523_v61, %s11540_s28  ;;  %v6860_v26 = vrot.slane %v15618_v50, 4  ;;  %v15875_v57 = vperm.slane %v3475_v36, %v11781_v3  ;;  %v4329_v41 = vperm.slane %v4323_v24, %v11741_v28  ;;  %v7049_v52 = vsel %vm246_vm0, %v15662_v15, %v7048_v31  ;;  %22525 = vst [vmem:[#allocation69_spill] sm:$0xff] %v15885_v48  ;;  %v22527_v31 = vld [vmem:[#allocation179_spill] sm:$0xff]  ;;  %v15897_v24 = vpop.trf.xlu1 }
 0x413   : > { %22524 = vst [vmem:[#allocation31_spill] sm:$0xff] %v15869_v53  ;;  %v15882_v40 = vsel %vm246_vm0, %v6994_v23, %v15848_v39  ;;  %v4370_v22 = vrot.slane %v4333_v19, 4  ;;  %v15889_v50 = vsel %vm246_vm0, %v7094_v2, %v15792_v46  ;;  %v6845_v25 = vperm.slane %v6837_v1, %v11781_v3 }
 0x414   : > { %v15893_v11 = vperm.slane %v3463_v10, %v11781_v3  ;;  %v3452_v36 = vrot.slane %v22527_v31, 4  ;;  %22528 = vst [vmem:[#allocation172_spill] sm:$0xff] %v15897_v24  ;;  %v15900_v23 = vperm.slane %v7073_v49, %v11781_v3  ;;  %v5218_v8 = vrot.slane %v22529_v27, 4  ;;  %v22531_v49 = vld [vmem:[#allocation197_spill] sm:$0xff] }
 0x415   : > { %v15905_v2 = vperm.slane %v7049_v52, %v11781_v3  ;;  %v6861_v1 = vsel %vm246_vm0, %v22468_v45, %v6860_v26  ;;  %v4358_v15 = vrot.slane %v4329_v41, 4  ;;  %v22530_v43 = vrot.slane %v22427_v13, 4  ;;  %v22534_v24 = vld [vmem:[#allocation61_spill] sm:$0xff] }
 0x416   : > { %22526 = vst [vmem:[#allocation123_spill] sm:$0xff] %v15893_v11  ;;  %v7096_v61 = vrot.slane %v15792_v46, 4  ;;  %v22532_v32 = vrot.slane %v15539_v38, 4  ;;  %v4371_v45 = vsel %vm246_vm0, %v4370_v22, %v15528_v0  ;;  %v22533_v26 = vrot.slane %v15528_v0, 4  ;;  %v22536_v46 = vld [vmem:[#allocation32_spill] sm:$0xff]  ;;  %v22539_v22 = vld [vmem:[#allocation227_spill] sm:$0xff] }
 0x417   : > { %v5221_v44 = vsel %vm246_vm0, %v22529_v27, %v22530_v43  ;;  %v6884_v43 = vrot.slane %v6845_v25, 4  ;;  %v5219_v0 = vsel %vm246_vm0, %v5218_v8, %v22427_v13  ;;  %v4359_v58 = vsel %vm246_vm0, %v4358_v15, %v15539_v38 }
 0x418   : > { %10028 = vrot.lane.b32.xlu1 %v22531_v49, %s11531_s18  ;;  %v4361_v52 = vsel %vm246_vm0, %v4329_v41, %v22532_v32  ;;  %v4373_v10 = vsel %vm246_vm0, %v4333_v19, %v22533_v26  ;;  %v15932_v32 = vpop.trf.xlu2  ;;  %v7098_v41 = vrot.slane %v15900_v23, 4  ;;  %v5229_v19 = vperm.slane %v5221_v44, %v11741_v28  ;;  %v22542_v44 = vld [vmem:[#allocation223_spill] sm:$0xff] }
 0x419   : > { %10012 = vrot.lane.b32.xlu0 %v22534_v24, %s11540_s28  ;;  %22538 = vst [vmem:[#allocation73_spill] sm:$0xff] %v15932_v32  ;;  %v6114_v24 = vrot.slane %v22539_v22, 4  ;;  %v6869_v26 = vperm.slane %v6861_v1, %v11781_v3  ;;  %v15943_v27 = vperm.slane %v4361_v52, %v11781_v3  ;;  %v15949_v48 = vperm.slane %v4373_v10, %v11781_v3 }
 0x41a   : > { %10016 = vrot.lane.b32.xlu2 %v22537_v5, %s11540_s28  ;;  %v15946_v5 = vperm.slane %v4371_v45, %v11781_v3  ;;  %v22541_v13 = vrot.slane %v22451_v12, 4  ;;  %v3453_v1 = vsel %vm246_vm0, %v22542_v44, %v3452_v36  ;;  %v5225_v15 = vperm.slane %v5219_v0, %v11741_v28  ;;  %v22544_v45 = vld [vmem:[#allocation41_spill] sm:$0xff] }
 0x41b   : > { %22540 = vst [vmem:[#allocation79_spill] sm:$0xff] %v15943_v27  ;;  %v15958_v32 = vsel %vm246_vm0, %v6869_v26, %v6884_v43  ;;  %v6882_v38 = vrot.slane %v6869_v26, 4  ;;  %v3450_v52 = vrot.slane %v22542_v44, 4  ;;  %v15964_v10 = vsel %vm246_vm0, %v15795_v62, %v7096_v61  ;;  %v15972_v43 = vpop.trf.xlu0  ;;  %v15982_v61 = vpop.trf.xlu1  ;;  %v22550_v44 = vld [vmem:[#allocation161_spill] sm:$0xff] }
 0x41c   : > { %v6117_v8 = vsel %vm246_vm0, %v22539_v22, %v22541_v13  ;;  %22543 = vst [vmem:[#allocation169_spill] sm:$0xff] %v15958_v32  ;;  %v6534_v49 = vrot.slane %v22544_v45, 4  ;;  %v15968_v29 = vperm.slane %v4359_v58, %v11781_v3  ;;  %v5266_v22 = vrot.slane %v5229_v19, 4  ;;  %v22549_v58 = vld [vmem:[#allocation82_spill] sm:$0xff] }
 0x41d   : > { %v6115_v36 = vsel %vm246_vm0, %v6114_v24, %v22451_v12  ;;  %22546 = vst [vmem:[#allocation76_spill] sm:$0xff] %v15972_v43  ;;  %v15975_v26 = vsel %vm246_vm0, %v6882_v38, %v6845_v25  ;;  %v6125_v13 = vperm.slane %v6117_v8, %v11741_v28  ;;  %v15980_v62 = vperm.slane %v3453_v1, %v11741_v28  ;;  %v22552_v45 = vld [vmem:[#allocation198_spill] sm:$0xff]  ;;  %v22555_v43 = vld [vmem:[#allocation40_spill] sm:$0xff] }
 0x41e   : > { %22545 = vst [vmem:[#allocation170_spill] sm:$0xff] %v15968_v29  ;;  %v15988_v12 = vsel %vm246_vm0, %v7098_v41, %v15905_v2  ;;  %v3438_v38 = vrot.slane %v22550_v44, 4  ;;  %v22551_v8 = vrot.slane %v22509_v55, 4  ;;  %v5254_v0 = vrot.slane %v5225_v15, 4  ;;  %v22562_v29 = vld [vmem:[#allocation122_spill] sm:$0xff] }
 0x41f   : > { %22547 = vst [vmem:[#allocation77_spill] sm:$0xff] %v15975_v26  ;;  %v3451_v25 = vsel %vm246_vm0, %v3450_v52, %v22527_v31  ;;  %v22557_v52 = vld [vmem:[#allocation121_spill] sm:$0xff] }
 0x420   : > { %22548 = vst [vmem:[#allocation65_spill] sm:$0xff] %v15982_v61  ;;  %10042 = vrot.lane.b32.xlu1 %v22549_v58, %s11541_s29  ;;  %v3441_v1 = vsel %vm246_vm0, %v22550_v44, %v22551_v8  ;;  %v22553_v58 = vrot.slane %v15743_v18, 4  ;;  %v6121_v61 = vperm.slane %v6115_v36, %v11741_v28  ;;  %v22554_v44 = vrot.slane %v15756_v37, 4 }
 0x421   : > { %10026 = vrot.lane.b32.xlu0 %v22552_v45, %s11531_s18  ;;  %v5267_v45 = vsel %vm246_vm0, %v5266_v22, %v15743_v18  ;;  %v6162_v36 = vrot.slane %v6125_v13, 4  ;;  %v3449_v31 = vperm.slane %v3441_v1, %v11741_v28  ;;  %v3439_v18 = vsel %vm246_vm0, %v3438_v38, %v22509_v55  ;;  %v22560_v22 = vld [vmem:[#allocation43_spill] sm:$0xff] }
 0x422   : > { %v5269_v41 = vsel %vm246_vm0, %v5229_v19, %v22553_v58  ;;  %10030 = vrot.lane.b32.xlu2 %v15889_v50, %s11531_s18  ;;  %v5257_v8 = vsel %vm246_vm0, %v5225_v15, %v22554_v44  ;;  %v16015_v19 = vsel %vm246_vm0, %v6534_v49, %v22555_v43  ;;  %v3498_v58 = vrot.slane %v15980_v62, 4 }
 0x423   : > { %22556 = vst [vmem:[#allocation127_spill] sm:$0xff] %v16015_v19  ;;  %v4346_v50 = vrot.slane %v22557_v52, 4  ;;  %v16023_v24 = vperm.slane %v5269_v41, %v11781_v3  ;;  %v3457_v15 = vperm.slane %v3451_v25, %v11741_v28  ;;  %v6758_v49 = vrot.slane %v22560_v22, 4 }
 0x424   : > { %v16020_v26 = vpop.permute.xlu2 %9914  ;;  %v5255_v43 = vsel %vm246_vm0, %v5254_v0, %v15756_v37  ;;  %v16032_v44 = vperm.slane %v5257_v8, %v11781_v3  ;;  %v6150_v1 = vrot.slane %v6121_v61, 4  ;;  %v5244_v19 = vrot.slane %v22562_v29, 4 }
 0x425   : > { %22558 = vst [vmem:[#allocation10_spill] sm:$0xff] %v16020_v26  ;;  %v16036_v26 = vperm.slane %v5267_v45, %v11781_v3  ;;  %v22564_v41 = vrot.slane %v15809_v20, 4  ;;  %v22565_v55 = vrot.slane %v15787_v17, 4  ;;  %v22566_v22 = vrot.slane %v22536_v46, 4 }
 0x426   : > { %22559 = vst [vmem:[#allocation63_spill] sm:$0xff] %v16023_v24  ;;  %v6163_v0 = vsel %vm246_vm0, %v6162_v36, %v15787_v17  ;;  %v3445_v8 = vperm.slane %v3439_v18, %v11741_v28  ;;  %v3499_v45 = vsel %vm246_vm0, %v3498_v58, %v3449_v31  ;;  %v4347_v32 = vsel %vm246_vm0, %v4346_v50, %v22536_v46  ;;  %v22570_v17 = vld [vmem:[#allocation21_spill] sm:$0xff] }
 0x427   : > { %22561 = vst [vmem:[#allocation132_spill] sm:$0xff] %v16032_v44  ;;  %v6153_v25 = vsel %vm246_vm0, %v6121_v61, %v22564_v41  ;;  %v6165_v38 = vsel %vm246_vm0, %v6125_v13, %v22565_v55  ;;  %v4349_v37 = vsel %vm246_vm0, %v22557_v52, %v22566_v22  ;;  %v22567_v61 = vld [vmem:[#allocation204_spill] sm:$0xff]  ;;  %v16057_v13 = vperm.slane %v5255_v43, %v11781_v3  ;;  %v16060_v52 = vpop.trf.xlu0  ;;  %v22571_v36 = vld [vmem:[#allocation45_spill] sm:$0xff]  ;;  %v16079_v22 = vpop.trf.xlu1 }
 0x428   : > { %22563 = vst [vmem:[#allocation68_spill] sm:$0xff] %v16036_v26  ;;  %10048 = vrot.lane.b32.xlu1 %v22567_v61, %s11541_s29  ;;  %v3486_v55 = vrot.slane %v3457_v15, 4  ;;  %v16066_v58 = vsel %vm246_vm0, %v6758_v49, %v22571_v36  ;;  %v6151_v46 = vsel %vm246_vm0, %v6150_v1, %v15809_v20  ;;  %v16071_v50 = vperm.slane %v6153_v25, %v11781_v3  ;;  %v22576_v61 = vld [vmem:[#allocation75_spill] sm:$0xff]  ;;  %v22578_v36 = vld [vmem:[#allocation128_spill] sm:$0xff] }
 0x429   : > { %22568 = vst [vmem:[#allocation66_spill] sm:$0xff] %v16057_v13  ;;  %10032 = vrot.lane.b32.xlu0 %v22570_v17, %s11531_s18  ;;  %v16074_v18 = vperm.slane %v6165_v38, %v11781_v3  ;;  %v16077_v43 = vperm.slane %v4349_v37, %v11741_v28  ;;  %v16084_v49 = vperm.slane %v6163_v0, %v11781_v3  ;;  %v3500_v17 = vrot.slane %v3449_v31, 4 }
 0x42a   : > { %22569 = vst [vmem:[#allocation85_spill] sm:$0xff] %v16060_v52  ;;  %10044 = vrot.lane.b32.xlu2 %v22576_v61, %s11541_s29  ;;  %v3505_v20 = vperm.slane %v3499_v45, %v11781_v3  ;;  %v16088_v1 = vperm.slane %v4347_v32, %v11741_v28  ;;  %v3488_v37 = vrot.slane %v3445_v8, 4  ;;  %v5242_v41 = vrot.slane %v22578_v36, 4  ;;  %v22581_v45 = vld [vmem:[#allocation27_spill] sm:$0xff]  ;;  %v22582_v52 = vld [vmem:[#allocation112_spill] sm:$0xff] }
 0x42b   : > { %22572 = vst [vmem:[#allocation70_spill] sm:$0xff] %v16066_v58  ;;  %v16097_v0 = vperm.slane %v6151_v46, %v11781_v3  ;;  %v3487_v31 = vsel %vm246_vm0, %v3486_v55, %v3445_v8  ;;  %v4394_v38 = vrot.slane %v16077_v43, 4  ;;  %v6646_v24 = vrot.slane %v22582_v52, 4 }
 0x42c   : > { %22573 = vst [vmem:[#allocation46_spill] sm:$0xff] %v16071_v50  ;;  %v16093_v58 = vpop.permute.xlu2 %9930  ;;  %v3501_v61 = vsel %vm246_vm0, %v15980_v62, %v3500_v17  ;;  %v22583_v46 = vrot.slane %v15875_v57, 4  ;;  %v4382_v8 = vrot.slane %v16088_v1, 4  ;;  %v3489_v55 = vsel %vm246_vm0, %v3457_v15, %v3488_v37 }
 0x42d   : > { %22574 = vst [vmem:[#allocation42_spill] sm:$0xff] %v16074_v18  ;;  %v16116_v32 = vperm.slane %v3487_v31, %v11781_v3  ;;  %v5243_v52 = vsel %vm246_vm0, %v5242_v41, %v22562_v29  ;;  %v5245_v25 = vsel %vm246_vm0, %v22578_v36, %v5244_v19  ;;  %v7172_v15 = vrot.slane %v15688_v30, 4  ;;  %v22587_v36 = vld [vmem:[#allocation216_spill] sm:$0xff]  ;;  %v22589_v31 = vld [vmem:[#allocation105_spill] sm:$0xff]  ;;  %v22592_v30 = vld [vmem:[#allocation51_spill] sm:$0xff] }
 0x42e   : > { %22575 = vst [vmem:[#allocation44_spill] sm:$0xff] %v16079_v22  ;;  %v16111_v13 = vsel %vm246_vm0, %v3505_v20, %v22583_v46  ;;  %v7196_v37 = vrot.slane %v15678_v7, 4  ;;  %v3509_v29 = vperm.slane %v3501_v61, %v11781_v3  ;;  %v3518_v41 = vrot.slane %v3505_v20, 4 }
 0x42f   : > { %22577 = vst [vmem:[#allocation163_spill] sm:$0xff] %v16084_v49  ;;  %v16138_v62 = vsel %vm246_vm0, %v6646_v24, %v22589_v31  ;;  %v4334_v46 = vrot.slane %v22592_v30, 4  ;;  %v16145_v7 = vperm.slane %v5243_v52, %v11741_v28  ;;  %v16148_v20 = vperm.slane %v5245_v25, %v11741_v28  ;;  %v16150_v61 = vpop.trf.xlu0 }
 0x430   : > { %22579 = vst [vmem:[#allocation160_spill] sm:$0xff] %v16093_v58  ;;  %10062 = vrot.lane.b32.xlu1 %v15988_v12, %s11542_s30  ;;  %v22594_v19 = vrot.slane %v14811_v16, 4  ;;  %v7024_v26 = vrot.slane %v22478_v51, 4  ;;  %v22597_v25 = vrot.slane %v22484_v6, 4  ;;  %v16181_v51 = vsel %vm246_vm0, %v3518_v41, %v15875_v57 }
 0x431   : > { %22580 = vst [vmem:[#allocation168_spill] sm:$0xff] %v16097_v0  ;;  %10046 = vrot.lane.b32.xlu0 %v15964_v10, %s11541_s29  ;;  %v16141_v10 = vperm.slane %v3489_v55, %v11781_v3  ;;  %v22596_v55 = vrot.slane %v15581_v42, 4  ;;  %v22598_v42 = vrot.slane %v15893_v11, 4  ;;  %v22628_v11 = vld [vmem:[#allocation89_spill] sm:$0xff] }
 0x432   : > { %22584 = vst [vmem:[#allocation166_spill] sm:$0xff] %v16111_v13  ;;  %10058 = vrot.lane.b32.xlu2 %v22587_v36, %s11542_s30  ;;  %v16134_v12 = vpop.permute.xlu1 %9916  ;;  %v4337_v24 = vsel %vm246_vm0, %v22592_v30, %v22594_v19  ;;  %v7037_v22 = vsel %vm246_vm0, %v22485_v35, %v22597_v25  ;;  %v7173_v36 = vsel %vm246_vm0, %v15675_v54, %v7172_v15  ;;  %v6996_v30 = vrot.slane %v15848_v39, 4 }
 0x433   : > { %22585 = vst [vmem:[#allocation179_spill] sm:$0xff] %v16116_v32  ;;  %v7013_v52 = vsel %vm246_vm0, %v22473_v34, %v22596_v55  ;;  %v7197_v19 = vsel %vm246_vm0, %v22487_v47, %v7196_v37  ;;  %v16177_v34 = vsel %vm246_vm0, %v16116_v32, %v22598_v42  ;;  %v7181_v35 = vperm.slane %v7173_v36, %v11781_v3  ;;  %v22604_v55 = vld [vmem:[#allocation171_spill] sm:$0xff] }
 0x434   : > { %22588 = vst [vmem:[#allocation224_spill] sm:$0xff] %v16134_v12  ;;  %v16157_v31 = vpop.permute.xlu2 %9934  ;;  %v7205_v6 = vperm.slane %v7197_v19, %v11781_v3  ;;  %v3522_v54 = vrot.slane %v3509_v29, 4  ;;  %v4335_v47 = vsel %vm246_vm0, %v4334_v46, %v14811_v16  ;;  %v4345_v39 = vperm.slane %v4337_v24, %v11741_v28 }
 0x435   : > { %22590 = vst [vmem:[#allocation197_spill] sm:$0xff] %v16138_v62  ;;  %v16190_v15 = vsel %vm246_vm0, %v15827_v33, %v6996_v30  ;;  %v16195_v57 = vperm.slane %v7013_v52, %v11741_v28  ;;  %v16198_v37 = vperm.slane %v7037_v22, %v11741_v28  ;;  %v7220_v41 = vrot.slane %v7181_v35, 4 }
 0x436   : > { %22591 = vst [vmem:[#allocation61_spill] sm:$0xff] %v16141_v10  ;;  %v7218_v36 = vrot.slane %v7205_v6, 4  ;;  %v22601_v16 = vrot.slane %v15859_v63, 4  ;;  %v7025_v22 = vsel %vm246_vm0, %v22604_v55, %v7024_v26  ;;  %v4341_v25 = vperm.slane %v4335_v47, %v11741_v28  ;;  %v22609_v47 = vld [vmem:[#allocation162_spill] sm:$0xff] }
 0x437   : > { %22593 = vst [vmem:[#allocation32_spill] sm:$0xff] %v16150_v61  ;;  %v16221_v30 = vsel %vm246_vm0, %v7205_v6, %v7220_v41  ;;  %v4395_v26 = vsel %vm246_vm0, %v4394_v38, %v4345_v39  ;;  %v4396_v42 = vrot.slane %v4345_v39, 4  ;;  %v7058_v41 = vrot.slane %v16195_v57, 4 }
 0x438   : > { %22595 = vst [vmem:[#allocation173_spill] sm:$0xff] %v16157_v31  ;;  %10076 = vrot.lane.b32.xlu1 %v15544_v21, %s11543_s2  ;;  %v16203_v46 = vsel %vm246_vm0, %v3509_v29, %v22601_v16  ;;  %v22603_v21 = vrot.slane %v15612_v4, 4  ;;  %v22605_v29 = vld [vmem:[#allocation124_spill] sm:$0xff]  ;;  %v16224_v4 = vsel %vm246_vm0, %v7218_v36, %v7181_v35  ;;  %v6138_v16 = vrot.slane %v22609_v47, 4 }
 0x439   : > { %22599 = vst [vmem:[#allocation227_spill] sm:$0xff] %v16177_v34  ;;  %10060 = vrot.lane.b32.xlu0 %v15547_v14, %s11542_s30  ;;  %v22607_v14 = vrot.slane %v15869_v53, 4  ;;  %v16242_v35 = vperm.slane %v7025_v22, %v11741_v28  ;;  %v7082_v36 = vrot.slane %v16198_v37, 4  ;;  %v16249_v38 = vsel %vm246_vm0, %v3522_v54, %v15859_v63 }
 0x43a   : > { %22600 = vst [vmem:[#allocation223_spill] sm:$0xff] %v16181_v51  ;;  %v7001_v24 = vsel %vm246_vm0, %v15566_v56, %v22603_v21  ;;  %10064 = vrot.lane.b32.xlu2 %v22605_v29, %s11542_s30  ;;  %v16218_v19 = vpop.permute.xlu1 %9920  ;;  %v16252_v29 = vpop.trf.xlu0  ;;  %v4383_v22 = vsel %vm246_vm0, %v4382_v8, %v4341_v25  ;;  %v16259_v52 = vperm.slane %v4395_v26, %v11781_v3  ;;  %v22613_v33 = vrot.slane %v22581_v45, 4  ;;  %v22615_v51 = vld [vmem:[#allocation62_spill] sm:$0xff] }
 0x43b   : > { %22602 = vst [vmem:[#allocation41_spill] sm:$0xff] %v16203_v46  ;;  %v16230_v56 = vsel %vm246_vm0, %v16141_v10, %v22607_v14  ;;  %v16239_v6 = vperm.slane %v7001_v24, %v11741_v28  ;;  %v7100_v24 = vrot.slane %v15905_v2, 4  ;;  %v4384_v14 = vrot.slane %v4341_v25, 4  ;;  %v22625_v2 = vld [vmem:[#allocation93_spill] sm:$0xff]  ;;  %v22700_v25 = vld [vmem:[#allocation182_spill] sm:$0xff] }
 0x43c   : > { %22606 = vst [vmem:[#allocation82_spill] sm:$0xff] %v16218_v19  ;;  %v16236_v21 = vpop.permute.xlu2 %9946  ;;  %v6141_v63 = vsel %vm246_vm0, %v22609_v47, %v22613_v33  ;;  %v4397_v39 = vsel %vm246_vm0, %v16077_v43, %v4396_v42  ;;  %v16272_v8 = vsel %vm246_vm0, %v6138_v16, %v22581_v45  ;;  %v7083_v43 = vsel %vm246_vm0, %v7082_v36, %v16242_v35  ;;  %v22617_v47 = vld [vmem:[#allocation191_spill] sm:$0xff]  ;;  %v22618_v16 = vld [vmem:[#allocation52_spill] sm:$0xff] }
 0x43d   : > { %22608 = vst [vmem:[#allocation161_spill] sm:$0xff] %v16230_v56  ;;  %v7059_v33 = vsel %vm246_vm0, %v7058_v41, %v16239_v6  ;;  %v16282_v42 = vperm.slane %v4383_v22, %v11781_v3  ;;  %v5230_v54 = vrot.slane %v22617_v47, 4  ;;  %v16286_v45 = vperm.slane %v6141_v63, %v11741_v28 }
 0x43e   : > { %22610 = vst [vmem:[#allocation198_spill] sm:$0xff] %v16236_v21  ;;  %v4385_v41 = vsel %vm246_vm0, %v16088_v1, %v4384_v14  ;;  %v16295_v26 = vperm.slane %v4397_v39, %v11781_v3  ;;  %v4414_v36 = vrot.slane %v16259_v52, 4  ;;  %v22619_v22 = vrot.slane %v15946_v5, 4  ;;  %v22622_v39 = vld [vmem:[#allocation72_spill] sm:$0xff] }
 0x43f   : > { %22611 = vst [vmem:[#allocation40_spill] sm:$0xff] %v16249_v38  ;;  %v16311_v1 = vperm.slane %v7083_v43, %v11781_v3  ;;  %v22624_v14 = vld [vmem:[#allocation80_spill] sm:$0xff]  ;;  %v7265_v32 = vperm.slane %v22625_v2, %v11741_v28  ;;  %v22629_v46 = vrot.slane %v22628_v11, 4  ;;  %v22631_v43 = vld [vmem:[#allocation90_spill] sm:$0xff]  ;;  %v22701_v18 = vrot.slane %v22700_v25, 4 }
 0x440   : > { %22612 = vst [vmem:[#allocation121_spill] sm:$0xff] %v16252_v29  ;;  %10090 = vrot.lane.b32.xlu1 %v22615_v51, %s11544_s3  ;;  %v7101_v51 = vsel %vm246_vm0, %v15900_v23, %v7100_v24  ;;  %v16302_v63 = vsel %vm246_vm0, %v16259_v52, %v22619_v22  ;;  %v16308_v23 = vperm.slane %v7059_v33, %v11781_v3  ;;  %v22623_v24 = vrot.slane %v22622_v39, 4  ;;  %v22627_v22 = vld [vmem:[#allocation91_spill] sm:$0xff]  ;;  %v22630_v38 = vld [vmem:[#allocation92_spill] sm:$0xff]  ;;  %v22696_v29 = vld [vmem:[#allocation109_spill] sm:$0xff] }
 0x441   : > { %22616 = vst [vmem:[#allocation43_spill] sm:$0xff] %v16282_v42  ;;  %10074 = vrot.lane.b32.xlu0 %v22618_v16, %s11543_s2  ;;  %v22632_v56 = vrot.slane %v22631_v43, 4  ;;  %v7294_v21 = vrot.slane %v7265_v32, 4  ;;  %v22697_v61 = vrot.slane %v22696_v29, 4 }
 0x442   : > { %22620 = vst [vmem:[#allocation122_spill] sm:$0xff] %v16302_v63  ;;  %10078 = vrot.lane.b32.xlu2 %v7101_v51, %s11543_s2  ;;  %v16305_v16 = vpop.permute.xlu1 %9932  ;;  %v3065_v55 = vsel %vm246_vm0, %v22624_v14, %v22623_v24  ;;  %v7222_v51 = vrot.slane %v22627_v22, 4  ;;  %v22633_v24 = vrot.slane %v22624_v14, 4  ;;  %v16346_v14 = vpop.trf.xlu0 }
 0x443   : > { %22621 = vst [vmem:[#allocation204_spill] sm:$0xff] %v16305_v16  ;;  %v7235_v33 = vsel %vm246_vm0, %v22629_v46, %v3065_v55  ;;  %v7236_v13 = vrot.slane %v3065_v55, 4  ;;  %v7247_v34 = vsel %vm246_vm0, %v22632_v56, %v22630_v38  ;;  %v22634_v55 = vrot.slane %v22630_v38, 4 }
 0x444   : > { %v16319_v52 = vpop.permute.xlu2 %9950  ;;  %v3063_v10 = vsel %vm246_vm0, %v22633_v24, %v22622_v39  ;;  %v7241_v2 = vperm.slane %v7235_v33, %v11741_v28  ;;  %v7253_v53 = vperm.slane %v7247_v34, %v11741_v28  ;;  %22635 = vst [vmem:[#allocation45_spill] sm:$0xff] %v16346_v14 }
 0x445   : > { %22626 = vst [vmem:[#allocation21_spill] sm:$0xff] %v16319_v52  ;;  %v7223_v52 = vsel %vm246_vm0, %v7222_v51, %v3063_v10  ;;  %v7224_v16 = vrot.slane %v3063_v10, 4  ;;  %v16338_v46 = vsel %vm246_vm0, %v22628_v11, %v7236_v13  ;;  %v16344_v56 = vsel %vm246_vm0, %v22631_v43, %v22634_v55  ;;  %v22637_v11 = vld [vmem:[#allocation59_spill] sm:$0xff] }
 0x446   : > { %v7229_v39 = vperm.slane %v7223_v52, %v11741_v28  ;;  %v7270_v33 = vrot.slane %v7241_v2, 4  ;;  %v7295_v34 = vsel %vm246_vm0, %v7294_v21, %v7253_v53  ;;  %v7296_v24 = vrot.slane %v7253_v53, 4  ;;  %v22638_v53 = vld [vmem:[#allocation83_spill] sm:$0xff] }
 0x447   : > { %v16351_v10 = vperm.slane %v4385_v41, %v11781_v3  ;;  %v7084_v13 = vrot.slane %v16242_v35, 4  ;;  %v16357_v38 = vperm.slane %v7295_v34, %v11781_v3  ;;  %v16361_v51 = vsel %vm246_vm0, %v22627_v22, %v7224_v16  ;;  %v22640_v22 = vld [vmem:[#allocation102_spill] sm:$0xff]  ;;  %v22641_v34 = vld [vmem:[#allocation99_spill] sm:$0xff] }
 0x448   : > { %10096 = vrot.lane.b32.xlu1 %v22637_v11, %s11544_s3  ;;  %v5231_v52 = vsel %vm246_vm0, %v5230_v54, %v14894_v60  ;;  %v7271_v21 = vsel %vm246_vm0, %v7270_v33, %v7229_v39  ;;  %v7272_v41 = vrot.slane %v7229_v39, 4  ;;  %v7297_v43 = vsel %vm246_vm0, %v7265_v32, %v7296_v24  ;;  %v22643_v24 = vld [vmem:[#allocation95_spill] sm:$0xff] }
 0x449   : > { %22636 = vst [vmem:[#allocation75_spill] sm:$0xff] %v16351_v10  ;;  %10080 = vrot.lane.b32.xlu0 %v22638_v53, %s11543_s2  ;;  %v7104_v55 = vrot.slane %v16308_v23, 4  ;;  %v16375_v16 = vperm.slane %v7271_v21, %v11781_v3  ;;  %v7318_v54 = vrot.slane %v16357_v38, 4  ;;  %v22642_v11 = vrot.slane %v22641_v34, 4  ;;  %v22647_v34 = vld [vmem:[#allocation100_spill] sm:$0xff] }
 0x44a   : > { %10092 = vrot.lane.b32.xlu2 %v15798_v9, %s11544_s3  ;;  %v16371_v35 = vpop.permute.xlu1 %9936  ;;  %v7102_v39 = vrot.slane %v16311_v1, 4  ;;  %v7060_v32 = vrot.slane %v16239_v6, 4  ;;  %v22644_v9 = vld [vmem:[#allocation98_spill] sm:$0xff]  ;;  %v7273_v21 = vsel %vm246_vm0, %v7241_v2, %v7272_v41  ;;  %v7085_v19 = vsel %vm246_vm0, %v16198_v37, %v7084_v13 }
 0x44b   : > { %22639 = vst [vmem:[#allocation128_spill] sm:$0xff] %v16371_v35  ;;  %v7371_v33 = vsel %vm246_vm0, %v22642_v11, %v22640_v22  ;;  %v22645_v53 = vrot.slane %v22644_v9, 4  ;;  %v16397_v22 = vsel %vm246_vm0, %v7318_v54, %v16375_v16  ;;  %v22648_v11 = vld [vmem:[#allocation97_spill] sm:$0xff]  ;;  %v22650_v9 = vld [vmem:[#allocation103_spill] sm:$0xff]  ;;  %v22652_v37 = vrot.slane %v14894_v60, 4 }
 0x44c   : > { %v16391_v35 = vpop.permute.xlu2 %9962  ;;  %v22649_v6 = vrot.slane %v22648_v11, 4  ;;  %v16415_v54 = vperm.slane %v16272_v8, %v11741_v28  ;;  %v7377_v60 = vperm.slane %v7371_v33, %v11741_v28  ;;  %v7105_v8 = vsel %vm246_vm0, %v16311_v1, %v7104_v55 }
 0x44d   : > { %v16388_v14 = vsel %vm246_vm0, %v22645_v53, %v22643_v24  ;;  %22646 = vst [vmem:[#allocation27_spill] sm:$0xff] %v16391_v35  ;;  %v22651_v24 = vrot.slane %v22650_v9, 4  ;;  %v5233_v13 = vsel %vm246_vm0, %v22617_v47, %v22652_v37  ;;  %v4418_v35 = vrot.slane %v16295_v26, 4 }
 0x44e   : > { %v7347_v58 = vsel %vm246_vm0, %v22649_v6, %v22647_v34  ;;  %v16419_v6 = vsel %vm246_vm0, %v4414_v36, %v15946_v5  ;;  %v16430_v47 = vperm.slane %v5231_v52, %v11741_v28  ;;  %v16435_v37 = vperm.slane %v7085_v19, %v11781_v3  ;;  %v22656_v5 = vld [vmem:[#allocation87_spill] sm:$0xff]  ;;  %v22657_v36 = vld [vmem:[#allocation96_spill] sm:$0xff]  ;;  %v22659_v19 = vld [vmem:[#allocation101_spill] sm:$0xff] }
 0x44f   : > { %v7359_v53 = vsel %vm246_vm0, %v22651_v24, %v16388_v14  ;;  %22653 = vst [vmem:[#allocation112_spill] sm:$0xff] %v16419_v6  ;;  %v22654_v24 = vrot.slane %v15949_v48, 4  ;;  %v22658_v2 = vrot.slane %v22657_v36, 4  ;;  %v7103_v52 = vsel %vm246_vm0, %v7102_v39, %v16308_v23 }
 0x450   : > { %10110 = vrot.lane.b32.xlu1 %v7105_v8, %s11545_s4  ;;  %v7061_v1 = vsel %vm246_vm0, %v16195_v57, %v7060_v32  ;;  %v22660_v55 = vrot.slane %v22659_v19, 4  ;;  %v16460_v8 = vpop.trf.xlu0  ;;  %v7353_v57 = vperm.slane %v7347_v58, %v11741_v28  ;;  %v16467_v39 = vsel %vm246_vm0, %v4418_v35, %v15949_v48 }
 0x451   : > { %v16426_v41 = vsel %vm246_vm0, %v16295_v26, %v22654_v24  ;;  %v16441_v42 = vsel %vm246_vm0, %v22658_v2, %v22656_v5  ;;  %v22661_v24 = vrot.slane %v15943_v27, 4  ;;  %22663 = vst [vmem:[#allocation51_spill] sm:$0xff] %v16460_v8  ;;  %10094 = vrot.lane.b32.xlu0 %v7103_v52, %s11544_s3  ;;  %v16476_v52 = vperm.slane %v5233_v13, %v11741_v28  ;;  %v22667_v5 = vld [vmem:[#allocation74_spill] sm:$0xff]  ;;  %v22668_v26 = vld [vmem:[#allocation175_spill] sm:$0xff] }
 0x452   : > { %22655 = vst [vmem:[#allocation216_spill] sm:$0xff] %v16426_v41  ;;  %v7335_v33 = vsel %vm246_vm0, %v22660_v55, %v16441_v42  ;;  %10106 = vrot.lane.b32.xlu2 %v15805_v59, %s11545_s4  ;;  %v16472_v36 = vpop.permute.xlu1 %9948  ;;  %v7365_v55 = vperm.slane %v7359_v53, %v11741_v28  ;;  %v7106_v58 = vrot.slane %v16435_v37, 4  ;;  %v7382_v48 = vrot.slane %v7353_v57, 4 }
 0x453   : > { %v16457_v2 = vsel %vm246_vm0, %v16351_v10, %v22661_v24  ;;  %v7341_v23 = vperm.slane %v7335_v33, %v11741_v28  ;;  %22664 = vst [vmem:[#allocation171_spill] sm:$0xff] %v16467_v39  ;;  %v7406_v24 = vrot.slane %v7377_v60, 4  ;;  %v16479_v33 = vperm.slane %v7061_v1, %v11781_v3  ;;  %v22671_v1 = vld [vmem:[#allocation81_spill] sm:$0xff] }
 0x454   : > { %22662 = vst [vmem:[#allocation105_spill] sm:$0xff] %v16457_v2  ;;  %v16482_v35 = vpop.permute.xlu2 %9968  ;;  %v22669_v32 = vrot.slane %v22668_v26, 4  ;;  %v16492_v6 = vperm.slane %v7273_v21, %v11781_v3  ;;  %v16495_v13 = vperm.slane %v7297_v43, %v11781_v3  ;;  %v22672_v2 = vld [vmem:[#allocation174_spill] sm:$0xff]  ;;  %v7408_v12 = vrot.slane %v7365_v55, 4 }
 0x455   : > { %22665 = vst [vmem:[#allocation124_spill] sm:$0xff] %v16472_v36  ;;  %v7407_v53 = vsel %vm246_vm0, %v7406_v24, %v7365_v55  ;;  %v22673_v10 = vrot.slane %v22672_v2, 4  ;;  %v7383_v8 = vsel %vm246_vm0, %v7382_v48, %v7341_v23  ;;  %v7384_v36 = vrot.slane %v7341_v23, 4 }
 0x456   : > { %22666 = vst [vmem:[#allocation162_spill] sm:$0xff] %v16482_v35  ;;  %v16488_v59 = vsel %vm246_vm0, %v22669_v32, %v22667_v5  ;;  %v7413_v35 = vperm.slane %v7407_v53, %v11781_v3  ;;  %v7320_v32 = vrot.slane %v16375_v16, 4  ;;  %v7389_v24 = vperm.slane %v7383_v8, %v11781_v3 }
 0x457   : > { %22670 = vst [vmem:[#allocation62_spill] sm:$0xff] %v16488_v59  ;;  %v16501_v27 = vsel %vm246_vm0, %v22673_v10, %v22671_v1  ;;  %v7322_v21 = vrot.slane %v16495_v13, 4  ;;  %v22675_v43 = vrot.slane %v22667_v5, 4  ;;  %v22677_v10 = vld [vmem:[#allocation177_spill] sm:$0xff]  ;;  %v22678_v1 = vld [vmem:[#allocation180_spill] sm:$0xff]  ;;  %v7409_v23 = vsel %vm246_vm0, %v7377_v60, %v7408_v12 }
 0x458   : > { %22674 = vst [vmem:[#allocation191_spill] sm:$0xff] %v16501_v27  ;;  %v22679_v31 = vrot.slane %v22678_v1, 4  ;;  %v7430_v53 = vrot.slane %v7413_v35, 4  ;;  %v16520_v16 = vsel %vm246_vm0, %v16357_v38, %v7320_v32  ;;  %10124 = vrot.lane.b32.xlu1 %v15882_v40, %s11546_s13  ;;  %v7432_v8 = vrot.slane %v7389_v24, 4  ;;  %v22681_v32 = vld [vmem:[#allocation84_spill] sm:$0xff]  ;;  %v22685_v12 = vld [vmem:[#allocation57_spill] sm:$0xff] }
 0x459   : > { %v16512_v2 = vsel %vm246_vm0, %v22668_v26, %v22675_v43  ;;  %v16526_v5 = vsel %vm246_vm0, %v7322_v21, %v16492_v6  ;;  %v7385_v26 = vsel %vm246_vm0, %v7353_v57, %v7384_v36  ;;  %v7446_v55 = vrot.slane %v16501_v27, 4  ;;  %v22682_v43 = vld [vmem:[#allocation106_spill] sm:$0xff]  ;;  %v22687_v36 = vld [vmem:[#allocation176_spill] sm:$0xff] }
 0x45a   : > { %22676 = vst [vmem:[#allocation52_spill] sm:$0xff] %v16512_v2  ;;  %v7483_v48 = vsel %vm246_vm0, %v22679_v31, %v22677_v10  ;;  %v22680_v31 = vld [vmem:[#allocation64_spill] sm:$0xff]  ;;  %v16534_v38 = vsel %vm246_vm0, %v7430_v53, %v7389_v24  ;;  %v22683_v40 = vrot.slane %v22682_v43, 4  ;;  %v22684_v21 = vrot.slane %v22681_v32, 4  ;;  %10112 = vrot.lane.b32.xlu2 %v22685_v12, %s11545_s4  ;;  %v16550_v60 = vpop.permute.xlu1 %9952 }
 0x45b   : > { %10108 = vrot.lane.b32.xlu0 %v22680_v31, %s11545_s4  ;;  %22686 = vst [vmem:[#allocation72_spill] sm:$0xff] %v16550_v60  ;;  %v22688_v24 = vrot.slane %v22687_v36, 4  ;;  %v16557_v53 = vsel %vm246_vm0, %v7413_v35, %v7432_v8  ;;  %v22689_v31 = vld [vmem:[#allocation108_spill] sm:$0xff]  ;;  %v16570_v60 = vpop.trf.xlu0  ;;  %v22695_v8 = vld [vmem:[#allocation110_spill] sm:$0xff]  ;;  %v22702_v36 = vld [vmem:[#allocation111_spill] sm:$0xff]  ;;  %v7447_v0 = vsel %vm246_vm0, %v7446_v55, %v16488_v59  ;;  %v22728_v39 = vrot.slane %v16032_v44, 4 }
 0x45c   : > { %v16540_v10 = vsel %vm246_vm0, %v22683_v40, %v22681_v32  ;;  %v16546_v57 = vsel %vm246_vm0, %v22682_v43, %v22684_v21  ;;  %v7558_v40 = vrot.slane %v22689_v31, 4  ;;  %v22690_v32 = vld [vmem:[#allocation107_spill] sm:$0xff]  ;;  %v22692_v21 = vrot.slane %v16145_v7, 4  ;;  %22693 = vst [vmem:[#allocation80_spill] sm:$0xff] %v16570_v60  ;;  %v16580_v27 = vpop.permute.xlu2 %9982 }
 0x45d   : > { %v7459_v1 = vsel %vm246_vm0, %v22688_v24, %v16512_v2  ;;  %v22691_v62 = vrot.slane %v22690_v32, 4  ;;  %v16573_v24 = vperm.slane %v7483_v48, %v11741_v28  ;;  %v7583_v50 = vsel %vm246_vm0, %v22697_v61, %v22695_v8  ;;  %22698 = vst [vmem:[#allocation91_spill] sm:$0xff] %v16580_v27 }
 0x45e   : > { %v16568_v12 = vsel %vm246_vm0, %v22692_v21, %v16430_v47  ;;  %v7559_v60 = vsel %vm246_vm0, %v7558_v40, %v16540_v10  ;;  %v7589_v48 = vperm.slane %v7583_v50, %v11741_v28  ;;  %v16594_v61 = vperm.slane %v7459_v1, %v11741_v28 }
 0x45f   : > { %v7571_v43 = vsel %vm246_vm0, %v22691_v62, %v16546_v57  ;;  %22694 = vst [vmem:[#allocation93_spill] sm:$0xff] %v16573_v24  ;;  %v22699_v62 = vld [vmem:[#allocation181_spill] sm:$0xff]  ;;  %v7565_v27 = vperm.slane %v7559_v60, %v11741_v28  ;;  %v16600_v40 = vperm.slane %v7385_v26, %v11781_v3  ;;  %v16603_v50 = vperm.slane %v7409_v23, %v11781_v3 }
 0x460   : > { %v7577_v35 = vperm.slane %v7571_v43, %v11741_v28  ;;  %v7471_v21 = vsel %vm246_vm0, %v22701_v18, %v22699_v62  ;;  %v7601_v43 = vperm.slane %v22702_v36, %v11741_v28  ;;  %v7107_v18 = vsel %vm246_vm0, %v7106_v58, %v16479_v33  ;;  %v22703_v60 = vld [vmem:[#allocation169_spill] sm:$0xff] }
 0x461   : > { %v16606_v36 = vperm.slane %v7471_v21, %v11741_v28  ;;  %v7518_v55 = vrot.slane %v16573_v24, 4  ;;  %v7632_v62 = vrot.slane %v7589_v48, 4  ;;  %10138 = vrot.lane.b32.xlu1 %v22703_v60, %s21562_s15  ;;  %v16613_v58 = vperm.slane %v7447_v0, %v11741_v28  ;;  %v22704_v21 = vld [vmem:[#allocation77_spill] sm:$0xff] }
 0x462   : > { %v7606_v2 = vrot.slane %v7577_v35, 4  ;;  %v7630_v25 = vrot.slane %v7601_v43, 4  ;;  %v7434_v59 = vrot.slane %v16603_v50, 4  ;;  %v7494_v17 = vrot.slane %v16594_v61, 4  ;;  %10126 = vrot.lane.b32.xlu2 %v7107_v18, %s11546_s13  ;;  %v16625_v0 = vpop.permute.xlu1 %9966 }
 0x463   : > { %10122 = vrot.lane.b32.xlu0 %v22704_v21, %s11546_s13  ;;  %v7608_v49 = vrot.slane %v7565_v27, 4  ;;  %v7633_v24 = vsel %vm246_vm0, %v7601_v43, %v7632_v62  ;;  %v5280_v60 = vrot.slane %v16430_v47, 4  ;;  %22705 = vst [vmem:[#allocation89_spill] sm:$0xff] %v16625_v0  ;;  %v16633_v21 = vpop.permute.xlu0 %9918  ;;  %v7324_v43 = vrot.slane %v16492_v6, 4 }
 0x464   : > { %v7607_v1 = vsel %vm246_vm0, %v7606_v2, %v7565_v27  ;;  %v7631_v23 = vsel %vm246_vm0, %v7630_v25, %v7589_v48  ;;  %v7360_v25 = vrot.slane %v16388_v14, 4  ;;  %v7641_v48 = vperm.slane %v7633_v24, %v11781_v3  ;;  %22706 = vst [vmem:[#allocation92_spill] sm:$0xff] %v16633_v21 }
 0x465   : > { %v7613_v26 = vperm.slane %v7607_v1, %v11781_v3  ;;  %v7637_v2 = vperm.slane %v7631_v23, %v11781_v3  ;;  %v16631_v1 = vsel %vm246_vm0, %v7434_v59, %v16600_v40  ;;  %v7519_v27 = vsel %vm246_vm0, %v7518_v55, %v16606_v36  ;;  %v16640_v23 = vpop.permute.xlu2 %9996 }
 0x466   : > { %v7609_v47 = vsel %vm246_vm0, %v7577_v35, %v7608_v49  ;;  %22707 = vst [vmem:[#allocation90_spill] sm:$0xff] %v16640_v23  ;;  %v7658_v24 = vrot.slane %v7641_v48, 4  ;;  %v7495_v59 = vsel %vm246_vm0, %v7494_v17, %v16613_v58  ;;  %v16650_v55 = vperm.slane %v16338_v46, %v11741_v28 }
 0x467   : > { %v7654_v62 = vrot.slane %v7637_v2, 4  ;;  %v7617_v14 = vperm.slane %v7609_v47, %v11781_v3  ;;  %v7656_v0 = vrot.slane %v7613_v26, 4  ;;  %v16654_v49 = vperm.slane %v16344_v56, %v11741_v28 }
 0x468   : > { %v16657_v6 = vperm.slane %v7519_v27, %v11781_v3  ;;  %v16667_v17 = vsel %vm246_vm0, %v16495_v13, %v7324_v43  ;;  %v7336_v46 = vrot.slane %v16441_v42, 4  ;;  %v7361_v27 = vsel %vm246_vm0, %v22650_v9, %v7360_v25 }
 0x469   : > { %v16646_v21 = vsel %vm246_vm0, %v7654_v62, %v7613_v26  ;;  %v16660_v35 = vsel %vm246_vm0, %v7658_v24, %v7617_v14  ;;  %v16663_v47 = vsel %vm246_vm0, %v7637_v2, %v7656_v0  ;;  %v22708_v26 = vrot.slane %v22647_v34, 4  ;;  %10144 = vrot.lane.b32.xlu1 %v16221_v30, %s21562_s15  ;;  %v22710_v0 = vld [vmem:[#allocation94_spill] sm:$0xff] }
 0x46a   : > { %v16678_v62 = vperm.slane %v16361_v51, %v11741_v28  ;;  %v16683_v13 = vperm.slane %v7495_v59, %v11781_v3  ;;  %v16689_v34 = vperm.slane %v7361_v27, %v11741_v28  ;;  %v7337_v51 = vsel %vm246_vm0, %v22659_v19, %v7336_v46  ;;  %10140 = vrot.lane.b32.xlu2 %v16190_v15, %s21562_s15  ;;  %v16703_v43 = vpop.permute.xlu1 %9980 }
 0x46b   : > { %v7349_v56 = vsel %vm246_vm0, %v22648_v11, %v22708_v26  ;;  %v22709_v11 = vld [vmem:[#allocation104_spill] sm:$0xff]  ;;  %10128 = vrot.lane.b32.xlu0 %v16224_v4, %s11546_s13  ;;  %v7436_v9 = vrot.slane %v16600_v40, 4  ;;  %v7660_v30 = vrot.slane %v7617_v14, 4  ;;  %v16699_v25 = vperm.slane %v22710_v0, %v11741_v28  ;;  %22711 = vst [vmem:[#allocation59_spill] sm:$0xff] %v16703_v43  ;;  %v16712_v40 = vpop.permute.xlu0 %9964 }
 0x46c   : > { %v16686_v42 = vperm.slane %v7349_v56, %v11741_v28  ;;  %v7418_v2 = vrot.slane %v22709_v11, 4  ;;  %v7542_v24 = vrot.slane %v16657_v6, 4  ;;  %v16707_v59 = vperm.slane %v7337_v51, %v11741_v28  ;;  %22712 = vst [vmem:[#allocation83_spill] sm:$0xff] %v16712_v40 }
 0x46d   : > { %v16719_v15 = vsel %vm246_vm0, %v16603_v50, %v7436_v9  ;;  %v16722_v46 = vsel %vm246_vm0, %v7641_v48, %v7660_v30  ;;  %v7282_v26 = vrot.slane %v16650_v55, 4  ;;  %v16725_v56 = vpop.permute.xlu2 %10010  ;;  %v7108_v27 = vrot.slane %v16479_v33, 4 }
 0x46e   : > { %v7394_v4 = vrot.slane %v16686_v42, 4  ;;  %v7419_v19 = vsel %vm246_vm0, %v7418_v2, %v16689_v34  ;;  %22713 = vst [vmem:[#allocation102_spill] sm:$0xff] %v16725_v56  ;;  %v7560_v2 = vrot.slane %v16540_v10, 4  ;;  %v7306_v0 = vrot.slane %v16699_v25, 4 }
 0x46f   : > { %v16715_v14 = vperm.slane %v7419_v19, %v11781_v3  ;;  %v7572_v19 = vrot.slane %v16546_v57, 4  ;;  %v7283_v9 = vsel %vm246_vm0, %v7282_v26, %v16678_v62  ;;  %v5281_v30 = vsel %vm246_vm0, %v16145_v7, %v5280_v60 }
 0x470   : > { %v7395_v51 = vsel %vm246_vm0, %v7394_v4, %v16707_v59  ;;  %v22714_v33 = vrot.slane %v16148_v20, 4  ;;  %v7289_v4 = vperm.slane %v7283_v9, %v11781_v3  ;;  %v7307_v57 = vsel %vm246_vm0, %v7306_v0, %v16654_v49 }
 0x471   : > { %v7401_v50 = vperm.slane %v7395_v51, %v11781_v3  ;;  %v7438_v48 = vrot.slane %v16715_v14, 4  ;;  %v5292_v51 = vrot.slane %v16476_v52, 4  ;;  %v7543_v18 = vsel %vm246_vm0, %v7542_v24, %v16683_v13 }
 0x472   : > { %v5291_v10 = vsel %vm246_vm0, %v22714_v33, %v16476_v52  ;;  %v7313_v7 = vperm.slane %v7307_v57, %v11781_v3  ;;  %v22715_v60 = vrot.slane %v16426_v41, 4  ;;  %v16761_v9 = vperm.slane %v16568_v12, %v11781_v3  ;;  %10158 = vrot.lane.b32.xlu1 %v7543_v18, %s21567_s17  ;;  %10154 = vrot.lane.b32.xlu2 %v16397_v22, %s21567_s17 }
 0x473   : > { %v16750_v26 = vsel %vm246_vm0, %v7438_v48, %v7401_v50  ;;  %v7109_v52 = vsel %vm246_vm0, %v16435_v37, %v7108_v27  ;;  %v7328_v24 = vrot.slane %v7289_v4, 4  ;;  %v7561_v48 = vsel %vm246_vm0, %v22689_v31, %v7560_v2 }
 0x474   : > { %v16757_v33 = vsel %vm246_vm0, %v22715_v60, %v16302_v63  ;;  %22717 = vst [vmem:[#allocation95_spill] sm:$0xff] %v16761_v9  ;;  %10142 = vrot.lane.b32.xlu0 %v7109_v52, %s21562_s15  ;;  %v7326_v0 = vrot.slane %v7313_v7, 4  ;;  %v7573_v57 = vsel %vm246_vm0, %v22690_v32, %v7572_v19  ;;  %v22718_v60 = vrot.slane %v22695_v8, 4  ;;  %v16782_v52 = vpop.permute.xlu1 %9994  ;;  %v16789_v8 = vpop.permute.xlu0 %9978  ;;  %s21576_s15 = smov 68  }
 0x475   : > { %22716 = vst [vmem:[#allocation99_spill] sm:$0xff] %v16757_v33  ;;  %v16776_v18 = vperm.slane %v5281_v30, %v11781_v3  ;;  %v5297_v37 = vperm.slane %v5291_v10, %v11781_v3  ;;  %v16785_v31 = vsel %vm246_vm0, %v7313_v7, %v7328_v24  ;;  %v5293_v32 = vsel %vm246_vm0, %v16148_v20, %v5292_v51  ;;  %v16802_v10 = vpop.permute.xlu2 %10016  ;;  %v22723_v20 = vld [vmem:[#allocation113_spill] sm:$0xff] }
 0x476   : > { %v7585_v12 = vsel %vm246_vm0, %v22696_v29, %v22718_v60  ;;  %22720 = vst [vmem:[#allocation100_spill] sm:$0xff] %v16782_v52  ;;  %v16792_v29 = vsel %vm246_vm0, %v7326_v0, %v7289_v4  ;;  %v16795_v2 = vperm.slane %v7561_v48, %v11741_v28  ;;  %v16798_v19 = vperm.slane %v7573_v57, %v11741_v28  ;;  %v22724_v4 = vld [vmem:[#allocation154_spill] sm:$0xff]  ;;  %v22727_v60 = vld [vmem:[#allocation47_spill] sm:$0xff] }
 0x477   : > { %22719 = vst [vmem:[#allocation98_spill] sm:$0xff] %v16776_v18  ;;  %v6186_v30 = vrot.slane %v16286_v45, 4  ;;  %v16805_v7 = vperm.slane %v7585_v12, %v11741_v28  ;;  %v16809_v51 = vperm.slane %v22723_v20, %v11741_v28  ;;  %v6126_v24 = vrot.slane %v22724_v4, 4  ;;  %v22725_v0 = vld [vmem:[#allocation214_spill] sm:$0xff] }
 0x478   : > { %22721 = vst [vmem:[#allocation97_spill] sm:$0xff] %v16789_v8  ;;  %v22726_v48 = vrot.slane %v22725_v0, 4  ;;  %v7618_v27 = vrot.slane %v16798_v19, 4  ;;  %v16819_v41 = vperm.slane %v5293_v32, %v11781_v3  ;;  %v5310_v12 = vrot.slane %v5297_v37, 4 }
 0x479   : > { %22722 = vst [vmem:[#allocation103_spill] sm:$0xff] %v16802_v10  ;;  %v7642_v63 = vrot.slane %v16809_v51, 4  ;;  %v7440_v9 = vrot.slane %v7401_v50, 4  ;;  %v16827_v33 = vsel %vm246_vm0, %v16776_v18, %v22728_v39  ;;  %v22731_v10 = vld [vmem:[#allocation68_spill] sm:$0xff] }
 0x47a   : > { %v6129_v57 = vsel %vm246_vm0, %v22724_v4, %v22726_v48  ;;  %22729 = vst [vmem:[#allocation87_spill] sm:$0xff] %v16827_v33  ;;  %v22730_v4 = vld [vmem:[#allocation48_spill] sm:$0xff]  ;;  %v7619_v22 = vsel %vm246_vm0, %v7618_v27, %v16795_v2  ;;  %v22732_v32 = vrot.slane %v22731_v10, 4  ;;  %10172 = vrot.lane.b32.xlu1 %v16557_v53, %s21576_s15  ;;  %v6127_v27 = vsel %vm246_vm0, %v6126_v24, %v22725_v0 }
 0x47b   : > { %v7625_v50 = vperm.slane %v7619_v22, %v11781_v3  ;;  %v7643_v39 = vsel %vm246_vm0, %v7642_v63, %v16805_v7  ;;  %v16844_v20 = vsel %vm246_vm0, %v16715_v14, %v7440_v9  ;;  %v16849_v48 = vperm.slane %v6129_v57, %v11741_v28  ;;  %10160 = vrot.lane.b32.xlu2 %v16646_v21, %s21567_s17 }
 0x47c   : > { %v16835_v56 = vsel %vm246_vm0, %v5297_v37, %v22732_v32  ;;  %v22734_v37 = vld [vmem:[#allocation233_spill] sm:$0xff]  ;;  %10156 = vrot.lane.b32.xlu0 %v16534_v38, %s21567_s17  ;;  %v7649_v53 = vperm.slane %v7643_v39, %v11781_v3  ;;  %v16857_v63 = vsel %vm246_vm0, %v5310_v12, %v22731_v10  ;;  %v5314_v14 = vrot.slane %v16819_v41, 4  ;;  %v16862_v9 = vpop.permute.xlu1 %10000  ;;  %v16865_v0 = vpop.permute.xlu0 %9984  ;;  %v22738_v12 = vld [vmem:[#allocation63_spill] sm:$0xff]  ;;  %s21584_s17 = smov 72  }
 0x47d   : > { %22733 = vst [vmem:[#allocation96_spill] sm:$0xff] %v16835_v56  ;;  %v7664_v22 = vrot.slane %v7625_v50, 4  ;;  %v7284_v24 = vrot.slane %v16678_v62, 4  ;;  %v7308_v38 = vrot.slane %v16654_v49, 4  ;;  %v7396_v39 = vrot.slane %v16707_v59, 4  ;;  %v16877_v18 = vpop.permute.xlu2 %10030 }
 0x47e   : > { %22735 = vst [vmem:[#allocation101_spill] sm:$0xff] %v16857_v63  ;;  %v7662_v57 = vrot.slane %v7649_v53, 4  ;;  %v7420_v10 = vrot.slane %v16689_v34, 4  ;;  %v22739_v32 = vrot.slane %v22738_v12, 4  ;;  %v7544_v59 = vrot.slane %v16683_v13, 4  ;;  %v22774_v63 = vld [vmem:[#allocation42_spill] sm:$0xff] }
 0x47f   : > { %22736 = vst [vmem:[#allocation74_spill] sm:$0xff] %v16862_v9  ;;  %v16880_v62 = vsel %vm246_vm0, %v7649_v53, %v7664_v22  ;;  %v7285_v49 = vsel %vm246_vm0, %v16650_v55, %v7284_v24  ;;  %v7520_v21 = vrot.slane %v16606_v36, 4  ;;  %v7397_v55 = vsel %vm246_vm0, %v16686_v42, %v7396_v39 }
 0x480   : > { %22737 = vst [vmem:[#allocation175_spill] sm:$0xff] %v16865_v0  ;;  %v16874_v33 = vsel %vm246_vm0, %v16819_v41, %v22739_v32  ;;  %v16886_v34 = vsel %vm246_vm0, %v7662_v57, %v7625_v50  ;;  %v7293_v44 = vperm.slane %v7285_v49, %v11781_v3  ;;  %v7309_v41 = vsel %vm246_vm0, %v16699_v25, %v7308_v38 }
 0x481   : > { %22740 = vst [vmem:[#allocation81_spill] sm:$0xff] %v16874_v33  ;;  %v6187_v32 = vsel %vm246_vm0, %v6186_v30, %v16849_v48  ;;  %v7317_v53 = vperm.slane %v7309_v41, %v11781_v3  ;;  %v7405_v13 = vperm.slane %v7397_v55, %v11781_v3  ;;  %v7421_v50 = vsel %vm246_vm0, %v22709_v11, %v7420_v10 }
 0x482   : > { %22741 = vst [vmem:[#allocation174_spill] sm:$0xff] %v16877_v18  ;;  %v7620_v22 = vrot.slane %v16795_v2, 4  ;;  %v7644_v24 = vrot.slane %v16805_v7, 4  ;;  %10186 = vrot.lane.b32.xlu1 %v16526_v5, %s21584_s17  ;;  %v7496_v36 = vrot.slane %v16613_v58, 4  ;;  %v7429_v30 = vperm.slane %v7421_v50, %v11781_v3  ;;  %v22745_v50 = vld [vmem:[#allocation158_spill] sm:$0xff] }
 0x483   : > { %v7330_v25 = vrot.slane %v7317_v53, 4  ;;  %v7332_v57 = vrot.slane %v7293_v44, 4  ;;  %v7545_v42 = vsel %vm246_vm0, %v16657_v6, %v7544_v59  ;;  %v7444_v11 = vrot.slane %v7405_v13, 4 }
 0x484   : > { %10170 = vrot.lane.b32.xlu0 %v16520_v16, %s21576_s15  ;;  %v7621_v2 = vsel %vm246_vm0, %v16798_v19, %v7620_v22  ;;  %v7645_v7 = vsel %vm246_vm0, %v16809_v51, %v7644_v24  ;;  %v6133_v5 = vperm.slane %v6127_v27, %v11741_v28  ;;  %10174 = vrot.lane.b32.xlu2 %v7545_v42, %s21576_s15  ;;  %v16916_v58 = vpop.permute.xlu1 %10014  ;;  %v7442_v16 = vrot.slane %v7429_v30, 4  ;;  %v16923_v10 = vpop.permute.xlu0 %9998  ;;  %v22746_v24 = vld [vmem:[#allocation93_spill] sm:$0xff]  ;;  %v22749_v42 = vld [vmem:[#allocation243_spill] sm:$0xff] }
 0x485   : > { %22742 = vst [vmem:[#allocation177_spill] sm:$0xff] %v16916_v58  ;;  %v16919_v38 = vsel %vm246_vm0, %v7330_v25, %v7293_v44  ;;  %v7629_v39 = vperm.slane %v7621_v2, %v11781_v3  ;;  %v6188_v6 = vrot.slane %v16849_v48, 4  ;;  %v16926_v19 = vsel %vm246_vm0, %v7429_v30, %v7444_v11  ;;  %v16933_v59 = vpop.permute.xlu2 %10044 }
 0x486   : > { %22743 = vst [vmem:[#allocation180_spill] sm:$0xff] %v16923_v10  ;;  %v7653_v51 = vperm.slane %v7645_v7, %v11781_v3  ;;  %v16930_v27 = vsel %vm246_vm0, %v7317_v53, %v7332_v57  ;;  %v6193_v49 = vperm.slane %v6187_v32, %v11781_v3  ;;  %v7497_v44 = vsel %vm246_vm0, %v16594_v61, %v7496_v36 }
 0x487   : > { %22744 = vst [vmem:[#allocation64_spill] sm:$0xff] %v16933_v59  ;;  %v16938_v41 = vsel %vm246_vm0, %v7442_v16, %v7405_v13  ;;  %v7668_v48 = vrot.slane %v7629_v39, 4  ;;  %v9274_v55 = vrot.slane %v16874_v33, 4  ;;  %v3540_v22 = vrot.slane %v22745_v50, 4 }
 0x488   : > { %v7521_v25 = vsel %vm246_vm0, %v22746_v24, %v7520_v21  ;;  %v7666_v53 = vrot.slane %v7653_v51, 4  ;;  %v16946_v32 = vsel %vm246_vm0, %v5314_v14, %v22738_v12  ;;  %v22748_v30 = vrot.slane %v16415_v54, 4  ;;  %v22750_v12 = vld [vmem:[#allocation163_spill] sm:$0xff]  ;;  %v22767_v14 = vld [vmem:[#allocation86_spill] sm:$0xff] }
 0x489   : > { %22747 = vst [vmem:[#allocation84_spill] sm:$0xff] %v16946_v32  ;;  %v6176_v36 = vrot.slane %v6133_v5, 4  ;;  %v16952_v13 = vsel %vm246_vm0, %v7653_v51, %v7668_v48  ;;  %v6189_v57 = vsel %vm246_vm0, %v16286_v45, %v6188_v6  ;;  %v3538_v11 = vrot.slane %v22749_v42, 4 }
 0x48a   : > { %v6175_v61 = vsel %vm246_vm0, %v22748_v30, %v6133_v5  ;;  %v7505_v21 = vperm.slane %v7497_v44, %v11781_v3  ;;  %v16959_v2 = vsel %vm246_vm0, %v7666_v53, %v7629_v39  ;;  %v22751_v7 = vrot.slane %v22750_v12, 4  ;;  %v22753_v5 = vld [vmem:[#allocation229_spill] sm:$0xff]  ;;  %10192 = vrot.lane.b32.xlu1 %v16660_v35, %s21584_s17 }
 0x48b   : > { %v22754_v51 = vrot.slane %v22730_v4, 4  ;;  %v7529_v45 = vperm.slane %v7521_v25, %v11781_v3  ;;  %v16975_v39 = vperm.slane %v6175_v61, %v11781_v3  ;;  %v6206_v6 = vrot.slane %v6193_v49, 4  ;;  %v22759_v61 = vld [vmem:[#allocation52_spill] sm:$0xff] }
 0x48c   : > { %v16965_v16 = vsel %vm246_vm0, %v6193_v49, %v22751_v7  ;;  %v3541_v44 = vsel %vm246_vm0, %v22749_v42, %v3540_v22  ;;  %v22756_v24 = vrot.slane %v22753_v5, 4  ;;  %10176 = vrot.lane.b32.xlu0 %v16663_v47, %s21576_s15  ;;  %v16988_v35 = vsel %vm246_vm0, %v9274_v55, %v16835_v56  ;;  %10188 = vrot.lane.b32.xlu2 %v16631_v1, %s21584_s17  ;;  %v16997_v22 = vpop.permute.xlu1 %10028  ;;  %v17003_v55 = vpop.permute.xlu0 %10012  ;;  %s21596_s15 = smov 76  }
 0x48d   : > { %22752 = vst [vmem:[#allocation106_spill] sm:$0xff] %v16965_v16  ;;  %v3527_v48 = vsel %vm246_vm0, %v22754_v51, %v22753_v5  ;;  %v6177_v49 = vsel %vm246_vm0, %v16415_v54, %v6176_v36  ;;  %v16993_v25 = vperm.slane %v6189_v57, %v11781_v3  ;;  %v3539_v47 = vsel %vm246_vm0, %v3538_v11, %v22745_v50  ;;  %v17008_v5 = vpop.permute.xlu2 %10058  ;;  %v22763_v50 = vld [vmem:[#allocation168_spill] sm:$0xff] }
 0x48e   : > { %22755 = vst [vmem:[#allocation57_spill] sm:$0xff] %v16975_v39  ;;  %v3529_v53 = vsel %vm246_vm0, %v22730_v4, %v22756_v24  ;;  %v7460_v42 = vrot.slane %v22759_v61, 4  ;;  %v7548_v7 = vrot.slane %v7505_v21, 4  ;;  %v3549_v54 = vperm.slane %v3541_v44, %v11741_v28  ;;  %v22769_v24 = vld [vmem:[#allocation62_spill] sm:$0xff] }
 0x48f   : > { %22757 = vst [vmem:[#allocation108_spill] sm:$0xff] %v16988_v35  ;;  %v3533_v36 = vperm.slane %v3527_v48, %v11741_v28  ;;  %v3537_v57 = vperm.slane %v3529_v53, %v11741_v28  ;;  %v7546_v1 = vrot.slane %v7529_v45, 4  ;;  %v17011_v51 = vperm.slane %v6177_v49, %v11781_v3  ;;  %v22768_v49 = vld [vmem:[#allocation116_spill] sm:$0xff] }
 0x490   : > { %22758 = vst [vmem:[#allocation107_spill] sm:$0xff] %v16997_v22  ;;  %v22764_v11 = vrot.slane %v22763_v50, 4  ;;  %v17022_v44 = vsel %vm246_vm0, %v6206_v6, %v22750_v12  ;;  %v6210_v48 = vrot.slane %v16993_v25, 4  ;;  %v3545_v53 = vperm.slane %v3539_v47, %v11741_v28  ;;  %v22771_v50 = vld [vmem:[#allocation181_spill] sm:$0xff]  ;;  %v22773_v6 = vld [vmem:[#allocation182_spill] sm:$0xff] }
 0x491   : > { %22760 = vst [vmem:[#allocation110_spill] sm:$0xff] %v17003_v55  ;;  %v4422_v4 = vrot.slane %v22767_v14, 4  ;;  %v17029_v30 = vperm.slane %v22768_v49, %v11741_v28  ;;  %v7448_v33 = vrot.slane %v22769_v24, 4  ;;  %v7549_v56 = vsel %vm246_vm0, %v7529_v45, %v7548_v7  ;;  %v22841_v55 = vld [vmem:[#allocation145_spill] sm:$0xff] }
 0x492   : > { %22761 = vst [vmem:[#allocation109_spill] sm:$0xff] %v17008_v5  ;;  %v17018_v61 = vsel %vm246_vm0, %v16975_v39, %v22764_v11  ;;  %v22770_v11 = vld [vmem:[#allocation176_spill] sm:$0xff]  ;;  %v22772_v12 = vrot.slane %v22771_v50, 4  ;;  %v3586_v35 = vrot.slane %v3549_v54, 4  ;;  %v3576_v47 = vrot.slane %v3533_v36, 4  ;;  %10206 = vrot.lane.b32.xlu1 %v7549_v56, %s21596_s15  ;;  %v22777_v50 = vld [vmem:[#allocation26_spill] sm:$0xff] }
 0x493   : > { %22762 = vst [vmem:[#allocation111_spill] sm:$0xff] %v17011_v51  ;;  %v7461_v39 = vsel %vm246_vm0, %v22770_v11, %v7460_v42  ;;  %v3588_v32 = vrot.slane %v3537_v57, 4  ;;  %v7547_v49 = vsel %vm246_vm0, %v7546_v1, %v7505_v21  ;;  %v22775_v24 = vrot.slane %v22774_v63, 4 }
 0x494   : > { %22765 = vst [vmem:[#allocation169_spill] sm:$0xff] %v17018_v61  ;;  %v7473_v16 = vsel %vm246_vm0, %v22773_v6, %v22772_v12  ;;  %v4436_v11 = vrot.slane %v22777_v50, 4  ;;  %10190 = vrot.lane.b32.xlu0 %v7547_v49, %s21584_s17  ;;  %v22778_v12 = vld [vmem:[#allocation143_spill] sm:$0xff]  ;;  %10202 = vrot.lane.b32.xlu2 %v16667_v17, %s21596_s15  ;;  %v17057_v21 = vpop.permute.xlu1 %10042  ;;  %v3574_v7 = vrot.slane %v3545_v53, 4  ;;  %v22785_v49 = vld [vmem:[#allocation46_spill] sm:$0xff]  ;;  %s21606_s17 = smov 80   ;;  %v7825_v23 = vperm.slane %v22841_v55, %v11741_v28 }
 0x495   : > { %22766 = vst [vmem:[#allocation77_spill] sm:$0xff] %v17022_v44  ;;  %v17045_v45 = vsel %vm246_vm0, %v16993_v25, %v22775_v24  ;;  %v22779_v6 = vrot.slane %v22778_v12, 4  ;;  %v17060_v25 = vperm.slane %v7461_v39, %v11741_v28  ;;  %v17063_v1 = vperm.slane %v7473_v16, %v11741_v28  ;;  %v22783_v61 = vld [vmem:[#allocation195_spill] sm:$0xff]  ;;  %v17077_v59 = vpop.permute.xlu2 %10064  ;;  %v22843_v55 = vld [vmem:[#allocation50_spill] sm:$0xff] }
 0x496   : > { %22776 = vst [vmem:[#allocation104_spill] sm:$0xff] %v17045_v45  ;;  %v7530_v24 = vrot.slane %v17029_v30, 4  ;;  %v4423_v42 = vsel %vm246_vm0, %v4422_v4, %v22778_v12  ;;  %v3577_v44 = vsel %vm246_vm0, %v3545_v53, %v3576_v47  ;;  %v3587_v39 = vsel %vm246_vm0, %v3586_v35, %v3537_v57  ;;  %v22788_v53 = vld [vmem:[#allocation157_spill] sm:$0xff] }
 0x497   : > { %v4425_v56 = vsel %vm246_vm0, %v22767_v14, %v22779_v6  ;;  %22780 = vst [vmem:[#allocation94_spill] sm:$0xff] %v17057_v21  ;;  %v17069_v14 = vpop.permute.xlu0 %10026  ;;  %v22782_v6 = vld [vmem:[#allocation191_spill] sm:$0xff]  ;;  %v3589_v16 = vsel %vm246_vm0, %v3549_v54, %v3588_v32  ;;  %v4434_v5 = vrot.slane %v22783_v61, 4  ;;  %v22786_v21 = vrot.slane %v22785_v49, 4  ;;  %v22803_v49 = vld [vmem:[#allocation134_spill] sm:$0xff] }
 0x498   : > { %22781 = vst [vmem:[#allocation113_spill] sm:$0xff] %v17069_v14  ;;  %v7449_v17 = vsel %vm246_vm0, %v22782_v6, %v7448_v33  ;;  %v4437_v12 = vsel %vm246_vm0, %v22783_v61, %v4436_v11  ;;  %v4433_v33 = vperm.slane %v4425_v56, %v11741_v28  ;;  %v5318_v47 = vrot.slane %v22788_v53, 4 }
 0x499   : > { %22784 = vst [vmem:[#allocation154_spill] sm:$0xff] %v17077_v59  ;;  %v17083_v4 = vsel %vm246_vm0, %v17011_v51, %v22786_v21  ;;  %v17090_v35 = vperm.slane %v4423_v42, %v11741_v28  ;;  %v17093_v32 = vperm.slane %v7449_v17, %v11741_v28  ;;  %v7506_v54 = vrot.slane %v17060_v25, 4 }
 0x49a   : > { %22787 = vst [vmem:[#allocation214_spill] sm:$0xff] %v17083_v4  ;;  %v7531_v57 = vsel %vm246_vm0, %v7530_v24, %v17063_v1  ;;  %v3575_v21 = vsel %vm246_vm0, %v3574_v7, %v3533_v36  ;;  %v17100_v6 = vperm.slane %v3577_v44, %v11781_v3  ;;  %v17103_v61 = vperm.slane %v3587_v39, %v11781_v3 }
 0x49b   : > { %v17106_v11 = vperm.slane %v3589_v16, %v11781_v3  ;;  %v17110_v42 = vsel %vm246_vm0, %v6210_v48, %v22774_v63  ;;  %v4435_v24 = vsel %vm246_vm0, %v4434_v5, %v22777_v50  ;;  %v4445_v36 = vperm.slane %v4437_v12, %v11741_v28  ;;  %10220 = vrot.lane.b32.xlu1 %v16750_v26, %s21606_s17  ;;  %v22800_v12 = vld [vmem:[#allocation129_spill] sm:$0xff] }
 0x49c   : > { %22789 = vst [vmem:[#allocation47_spill] sm:$0xff] %v17100_v6  ;;  %v4484_v44 = vrot.slane %v4433_v33, 4  ;;  %v5319_v7 = vsel %vm246_vm0, %v5318_v47, %v22727_v60  ;;  %v22793_v17 = vrot.slane %v22727_v60, 4  ;;  %10204 = vrot.lane.b32.xlu0 %v16719_v15, %s21596_s15  ;;  %v17127_v5 = vperm.slane %v7531_v57, %v11781_v3  ;;  %10208 = vrot.lane.b32.xlu2 %v16722_v46, %s21596_s15  ;;  %v17136_v60 = vpop.permute.xlu1 %10048  ;;  %v22797_v57 = vld [vmem:[#allocation155_spill] sm:$0xff]  ;;  %v22799_v15 = vld [vmem:[#allocation29_spill] sm:$0xff]  ;;  %s21611_s15 = smov 84  }
 0x49d   : > { %22790 = vst [vmem:[#allocation48_spill] sm:$0xff] %v17103_v61  ;;  %v17131_v50 = vperm.slane %v3575_v21, %v11781_v3  ;;  %v4472_v26 = vrot.slane %v17090_v35, 4  ;;  %v7507_v39 = vsel %vm246_vm0, %v7506_v54, %v17093_v32  ;;  %v5332_v21 = vrot.slane %v22797_v57, 4  ;;  %v17153_v54 = vpop.permute.xlu2 %10078 }
 0x49e   : > { %22791 = vst [vmem:[#allocation68_spill] sm:$0xff] %v17106_v11  ;;  %v5321_v63 = vsel %vm246_vm0, %v22788_v53, %v22793_v17  ;;  %v4441_v53 = vperm.slane %v4435_v24, %v11741_v28  ;;  %v4482_v17 = vrot.slane %v4445_v36, 4  ;;  %v17148_v46 = vperm.slane %v5319_v7, %v11741_v28  ;;  %v22802_v7 = vld [vmem:[#allocation13_spill] sm:$0xff] }
 0x49f   : > { %22792 = vst [vmem:[#allocation233_spill] sm:$0xff] %v17110_v42  ;;  %v17144_v47 = vpop.permute.xlu0 %10032  ;;  %v17151_v56 = vperm.slane %v5321_v63, %v11741_v28  ;;  %v4485_v48 = vsel %vm246_vm0, %v4445_v36, %v4484_v44  ;;  %v17157_v16 = vperm.slane %v7507_v39, %v11781_v3  ;;  %v7550_v24 = vrot.slane %v17127_v5, 4  ;;  %v22804_v36 = vld [vmem:[#allocation24_spill] sm:$0xff]  ;;  %v22805_v44 = vld [vmem:[#allocation119_spill] sm:$0xff] }
 0x4a0   : > { %22794 = vst [vmem:[#allocation63_spill] sm:$0xff] %v17131_v50  ;;  %v22801_v45 = vrot.slane %v22800_v12, 4  ;;  %v6214_v4 = vrot.slane %v22802_v7, 4  ;;  %v7532_v63 = vrot.slane %v17063_v1, 4  ;;  %v7682_v61 = vrot.slane %v22803_v49, 4  ;;  %v22809_v12 = vld [vmem:[#allocation125_spill] sm:$0xff] }
 0x4a1   : > { %22795 = vst [vmem:[#allocation158_spill] sm:$0xff] %v17136_v60  ;;  %v22806_v39 = vrot.slane %v22805_v44, 4  ;;  %v22810_v59 = vrot.slane %v22809_v12, 4  ;;  %v22811_v60 = vld [vmem:[#allocation137_spill] sm:$0xff]  ;;  %v22829_v50 = vld [vmem:[#allocation34_spill] sm:$0xff] }
 0x4a2   : > { %22796 = vst [vmem:[#allocation93_spill] sm:$0xff] %v17144_v47  ;;  %v17164_v42 = vsel %vm246_vm0, %v22801_v45, %v22799_v15  ;;  %v22808_v15 = vld [vmem:[#allocation138_spill] sm:$0xff]  ;;  %v17188_v18 = vperm.slane %v22811_v60, %v11741_v28  ;;  %v4470_v47 = vrot.slane %v4441_v53, 4  ;;  %v7533_v22 = vsel %vm246_vm0, %v17029_v30, %v7532_v63 }
 0x4a3   : > { %22798 = vst [vmem:[#allocation243_spill] sm:$0xff] %v17153_v54  ;;  %v7670_v51 = vrot.slane %v17164_v42, 4  ;;  %v17174_v6 = vsel %vm246_vm0, %v22806_v39, %v22804_v36  ;;  %v22807_v54 = vrot.slane %v22804_v36, 4  ;;  %v7695_v1 = vsel %vm246_vm0, %v22810_v59, %v22808_v15  ;;  %10234 = vrot.lane.b32.xlu1 %v16785_v31, %s21611_s15 }
 0x4a4   : > { %10218 = vrot.lane.b32.xlu0 %v16792_v29, %s21606_s17  ;;  %v7551_v59 = vsel %vm246_vm0, %v7550_v24, %v17157_v16  ;;  %v4473_v39 = vsel %vm246_vm0, %v4441_v53, %v4472_v26  ;;  %v17216_v24 = vpop.permute.xlu1 %10062  ;;  %v17227_v53 = vperm.slane %v4485_v48, %v11781_v3  ;;  %v4471_v30 = vsel %vm246_vm0, %v4470_v47, %v17090_v35 }
 0x4a5   : > { %v17180_v45 = vsel %vm246_vm0, %v22805_v44, %v22807_v54  ;;  %v7671_v36 = vsel %vm246_vm0, %v7670_v51, %v17174_v6  ;;  %v17197_v44 = vperm.slane %v7695_v1, %v11741_v28  ;;  %v7742_v51 = vrot.slane %v17188_v18, 4  ;;  %v22812_v1 = vld [vmem:[#allocation55_spill] sm:$0xff]  ;;  %10222 = vrot.lane.b32.xlu2 %v7551_v59, %s21606_s17  ;;  %22813 = vst [vmem:[#allocation163_spill] sm:$0xff] %v17216_v24 }
 0x4a6   : > { %v7683_v54 = vsel %vm246_vm0, %v7682_v61, %v17180_v45  ;;  %v17204_v60 = vperm.slane %v7671_v36, %v11741_v28  ;;  %v4483_v61 = vsel %vm246_vm0, %v4482_v17, %v4433_v33  ;;  %v5330_v14 = vrot.slane %v22812_v1, 4  ;;  %22815 = vst [vmem:[#allocation52_spill] sm:$0xff] %v17227_v53  ;;  %v22833_v53 = vld [vmem:[#allocation22_spill] sm:$0xff] }
 0x4a7   : > { %v17207_v31 = vperm.slane %v7683_v54, %v11741_v28  ;;  %v5333_v29 = vsel %vm246_vm0, %v22812_v1, %v5332_v21  ;;  %v17218_v36 = vpop.permute.xlu0 %10046  ;;  %v7508_v54 = vrot.slane %v17093_v32, 4  ;;  %v7743_v33 = vsel %vm246_vm0, %v7742_v51, %v17197_v44  ;;  %v17234_v1 = vpop.permute.xlu2 %10092 }
 0x4a8   : > { %22814 = vst [vmem:[#allocation229_spill] sm:$0xff] %v17218_v36  ;;  %v5380_v21 = vrot.slane %v17151_v56, 4  ;;  %v22816_v17 = vrot.slane %v22734_v37, 4  ;;  %v17237_v32 = vperm.slane %v7743_v33, %v11781_v3  ;;  %v17242_v63 = vperm.slane %v4473_v39, %v11781_v3 }
 0x4a9   : > { %v7718_v26 = vrot.slane %v17207_v31, 4  ;;  %22817 = vst [vmem:[#allocation86_spill] sm:$0xff] %v17234_v1  ;;  %v17245_v48 = vperm.slane %v4483_v61, %v11781_v3  ;;  %v5341_v24 = vperm.slane %v5333_v29, %v11741_v28  ;;  %v5331_v47 = vsel %vm246_vm0, %v5330_v14, %v22797_v57  ;;  %v22835_v1 = vld [vmem:[#allocation8_spill] sm:$0xff] }
 0x4aa   : > { %v6217_v59 = vsel %vm246_vm0, %v22802_v7, %v22816_v17  ;;  %22818 = vst [vmem:[#allocation116_spill] sm:$0xff] %v17242_v63  ;;  %v17251_v7 = vperm.slane %v7533_v22, %v11781_v3  ;;  %v7766_v17 = vrot.slane %v17237_v32, 4  ;;  %v5368_v39 = vrot.slane %v17148_v46, 4 }
 0x4ab   : > { %22819 = vst [vmem:[#allocation62_spill] sm:$0xff] %v17245_v48  ;;  %v7719_v51 = vsel %vm246_vm0, %v7718_v26, %v17204_v60  ;;  %v7509_v61 = vsel %vm246_vm0, %v17060_v25, %v7508_v54  ;;  %v5381_v22 = vsel %vm246_vm0, %v5341_v24, %v5380_v21  ;;  %v6215_v26 = vsel %vm246_vm0, %v6214_v4, %v22734_v37  ;;  %v22827_v25 = vld [vmem:[#allocation140_spill] sm:$0xff] }
 0x4ac   : > { %v17254_v33 = vperm.slane %v7719_v51, %v11781_v3  ;;  %10240 = vrot.lane.b32.xlu1 %v16880_v62, %s21611_s15  ;;  %v17274_v14 = vperm.slane %v4471_v30, %v11781_v3  ;;  %v17279_v54 = vperm.slane %v6217_v59, %v11741_v28  ;;  %10224 = vrot.lane.b32.xlu0 %v16886_v34, %s21606_s17  ;;  %v5378_v62 = vrot.slane %v5341_v24, 4  ;;  %v17288_v4 = vpop.permute.xlu1 %10076  ;;  %v22825_v24 = vld [vmem:[#allocation131_spill] sm:$0xff]  ;;  %s11553_s17 = smov 88  }
 0x4ad   : > { %v17284_v37 = vperm.slane %v5331_v47, %v11741_v28  ;;  %10236 = vrot.lane.b32.xlu2 %v16844_v20, %s21611_s15  ;;  %22821 = vst [vmem:[#allocation181_spill] sm:$0xff] %v17288_v4  ;;  %v17291_v21 = vperm.slane %v7509_v61, %v11781_v3  ;;  %v7554_v30 = vrot.slane %v17251_v7, 4  ;;  %v17295_v59 = vperm.slane %v5381_v22, %v11781_v3  ;;  %v22824_v47 = vld [vmem:[#allocation25_spill] sm:$0xff]  ;;  %v22830_v22 = vld [vmem:[#allocation184_spill] sm:$0xff] }
 0x4ae   : > { %v17271_v51 = vsel %vm246_vm0, %v7766_v17, %v17254_v33  ;;  %22820 = vst [vmem:[#allocation176_spill] sm:$0xff] %v17274_v14  ;;  %v17298_v17 = vperm.slane %v6215_v26, %v11741_v28  ;;  %v22826_v35 = vrot.slane %v22825_v24, 4  ;;  %v7794_v29 = vrot.slane %v22827_v25, 4 }
 0x4af   : > { %22822 = vst [vmem:[#allocation182_spill] sm:$0xff] %v17295_v59  ;;  %v17300_v34 = vpop.permute.xlu0 %10060  ;;  %v17309_v61 = vpop.permute.xlu2 %10106  ;;  %v7552_v57 = vrot.slane %v17157_v16, 4  ;;  %v22831_v48 = vrot.slane %v22830_v22, 4  ;;  %v22834_v63 = vrot.slane %v22833_v53, 4  ;;  %v22838_v22 = vld [vmem:[#allocation139_spill] sm:$0xff]  ;;  %v7555_v58 = vsel %vm246_vm0, %v7554_v30, %v17291_v21 }
 0x4b0   : > { %22823 = vst [vmem:[#allocation42_spill] sm:$0xff] %v17300_v34  ;;  %v17306_v20 = vsel %vm246_vm0, %v22826_v35, %v22824_v47  ;;  %v22839_v4 = vrot.slane %v22838_v22, 4  ;;  %v17356_v10 = vsel %vm246_vm0, %v17284_v37, %v5368_v39 }
 0x4b1   : > { %22828 = vst [vmem:[#allocation26_spill] sm:$0xff] %v17309_v61  ;;  %v17316_v26 = vsel %vm246_vm0, %v22831_v48, %v22829_v50  ;;  %v17322_v24 = vsel %vm246_vm0, %v22835_v1, %v22834_v63  ;;  %v7782_v35 = vrot.slane %v17306_v20, 4  ;;  %v22836_v61 = vrot.slane %v22835_v1, 4  ;;  %v22837_v48 = vld [vmem:[#allocation130_spill] sm:$0xff]  ;;  %v22840_v63 = vld [vmem:[#allocation60_spill] sm:$0xff] }
 0x4b2   : > { %22832 = vst [vmem:[#allocation143_spill] sm:$0xff] %v17316_v26  ;;  %v7795_v50 = vsel %vm246_vm0, %v7794_v29, %v17322_v24  ;;  %v7807_v34 = vsel %vm246_vm0, %v22839_v4, %v22837_v48  ;;  %v6228_v36 = vrot.slane %v22840_v63, 4  ;;  %v7553_v30 = vsel %vm246_vm0, %v17127_v5, %v7552_v57  ;;  %v22845_v5 = vld [vmem:[#allocation133_spill] sm:$0xff]  ;;  %v22846_v57 = vld [vmem:[#allocation16_spill] sm:$0xff] }
 0x4b3   : > { %v17330_v16 = vsel %vm246_vm0, %v22836_v61, %v22833_v53  ;;  %v7801_v1 = vperm.slane %v7795_v50, %v11741_v28  ;;  %v8006_v53 = vrot.slane %v17316_v26, 4  ;;  %v7813_v29 = vperm.slane %v7807_v34, %v11741_v28  ;;  %v22858_v26 = vld [vmem:[#allocation12_spill] sm:$0xff] }
 0x4b4   : > { %v7783_v47 = vsel %vm246_vm0, %v7782_v35, %v17330_v16  ;;  %10254 = vrot.lane.b32.xlu1 %v7555_v58, %s11553_s17  ;;  %v22842_v35 = vld [vmem:[#allocation186_spill] sm:$0xff]  ;;  %v17360_v34 = vsel %vm246_vm0, %v5378_v62, %v17151_v56  ;;  %10238 = vrot.lane.b32.xlu0 %v7553_v30, %s21611_s15  ;;  %v7854_v4 = vrot.slane %v7825_v23, 4  ;;  %v17366_v58 = vpop.permute.xlu1 %10090  ;;  %v22847_v52 = vrot.slane %v22846_v57, 4  ;;  %v22851_v62 = vld [vmem:[#allocation23_spill] sm:$0xff]  ;;  %s21625_s15 = smov 92  }
 0x4b5   : > { %v7789_v61 = vperm.slane %v7783_v47, %v11741_v28  ;;  %v8018_v9 = vrot.slane %v22842_v35, 4  ;;  %v7830_v50 = vrot.slane %v7801_v1, 4  ;;  %v6226_v47 = vrot.slane %v22843_v55, 4  ;;  %10250 = vrot.lane.b32.xlu2 %v16919_v38, %s11553_s17  ;;  %22844 = vst [vmem:[#allocation191_spill] sm:$0xff] %v17366_v58  ;;  %v22852_v30 = vld [vmem:[#allocation15_spill] sm:$0xff] }
 0x4b6   : > { %v17372_v39 = vsel %vm246_vm0, %v22847_v52, %v22845_v5  ;;  %v22849_v11 = vrot.slane %v22845_v5, 4  ;;  %v22853_v0 = vrot.slane %v22852_v30, 4  ;;  %v22855_v52 = vld [vmem:[#allocation36_spill] sm:$0xff]  ;;  %v7855_v5 = vsel %vm246_vm0, %v7854_v4, %v7813_v29 }
 0x4b7   : > { %22848 = vst [vmem:[#allocation195_spill] sm:$0xff] %v17372_v39  ;;  %v7831_v38 = vsel %vm246_vm0, %v7830_v50, %v7789_v61  ;;  %v17385_v58 = vpop.permute.xlu0 %10074  ;;  %v8007_v8 = vsel %vm246_vm0, %v8006_v53, %v17372_v39  ;;  %v17391_v40 = vperm.slane %v22855_v52, %v11741_v28  ;;  %v7861_v53 = vperm.slane %v7855_v5, %v11781_v3 }
 0x4b8   : > { %v17378_v56 = vsel %vm246_vm0, %v22846_v57, %v22849_v11  ;;  %v8031_v43 = vsel %vm246_vm0, %v22853_v0, %v22851_v62  ;;  %22854 = vst [vmem:[#allocation155_spill] sm:$0xff] %v17385_v58  ;;  %v7768_v11 = vrot.slane %v17254_v33, 4  ;;  %v17397_v57 = vsel %vm246_vm0, %v22843_v55, %v6228_v36  ;;  %v17399_v0 = vpop.permute.xlu2 %10112 }
 0x4b9   : > { %22850 = vst [vmem:[#allocation157_spill] sm:$0xff] %v17378_v56  ;;  %v8019_v50 = vsel %vm246_vm0, %v8018_v9, %v17378_v56  ;;  %v7837_v58 = vperm.slane %v7831_v38, %v11781_v3  ;;  %v17407_v52 = vsel %vm246_vm0, %v6226_v47, %v22840_v63  ;;  %v7672_v4 = vrot.slane %v17174_v6, 4  ;;  %v22857_v9 = vld [vmem:[#allocation33_spill] sm:$0xff] }
 0x4ba   : > { %22856 = vst [vmem:[#allocation29_spill] sm:$0xff] %v17399_v0  ;;  %v7684_v33 = vrot.slane %v17180_v45, 4  ;;  %v17412_v36 = vperm.slane %v8031_v43, %v11741_v28  ;;  %v17415_v55 = vperm.slane %v8007_v8, %v11741_v28  ;;  %v7878_v0 = vrot.slane %v7861_v53, 4 }
 0x4bb   : > { %v22859_v38 = vrot.slane %v22858_v26, 4  ;;  %v17425_v63 = vsel %vm246_vm0, %v17237_v32, %v7768_v11  ;;  %v17428_v6 = vperm.slane %v8019_v50, %v11741_v28  ;;  %v8078_v43 = vrot.slane %v17391_v40, 4  ;;  %v22860_v26 = vld [vmem:[#allocation9_spill] sm:$0xff] }
 0x4bc   : > { %v7832_v45 = vrot.slane %v7789_v61, 4  ;;  %v7856_v47 = vrot.slane %v7813_v29, 4  ;;  %10268 = vrot.lane.b32.xlu1 %v16926_v19, %s21625_s15  ;;  %v17434_v8 = vsel %vm246_vm0, %v7878_v0, %v7837_v58  ;;  %v7880_v11 = vrot.slane %v7837_v58, 4  ;;  %10252 = vrot.lane.b32.xlu0 %v16938_v41, %s11553_s17  ;;  %v22863_v29 = vld [vmem:[#allocation20_spill] sm:$0xff]  ;;  %v17449_v62 = vpop.permute.xlu1 %10096  ;;  %v22866_v58 = vld [vmem:[#allocation19_spill] sm:$0xff] }
 0x4bd   : > { %v17421_v5 = vsel %vm246_vm0, %v22859_v38, %v22857_v9  ;;  %v22861_v9 = vld [vmem:[#allocation183_spill] sm:$0xff]  ;;  %v7744_v50 = vrot.slane %v17197_v44, 4  ;;  %v7918_v30 = vrot.slane %v22863_v29, 4  ;;  %10256 = vrot.lane.b32.xlu2 %v16959_v2, %s11553_s17  ;;  %22864 = vst [vmem:[#allocation129_spill] sm:$0xff] %v17449_v62  ;;  %v22867_v35 = vrot.slane %v22866_v58, 4  ;;  %v22870_v62 = vld [vmem:[#allocation18_spill] sm:$0xff] }
 0x4be   : > { %v22862_v38 = vrot.slane %v22861_v9, 4  ;;  %v7894_v61 = vrot.slane %v17421_v5, 4  ;;  %v7833_v19 = vsel %vm246_vm0, %v7801_v1, %v7832_v45  ;;  %v7857_v0 = vsel %vm246_vm0, %v7825_v23, %v7856_v47 }
 0x4bf   : > { %v17456_v41 = vperm.slane %v7833_v19, %v11781_v3  ;;  %v17459_v39 = vperm.slane %v7857_v0, %v11781_v3  ;;  %v17462_v1 = vsel %vm246_vm0, %v7861_v53, %v7880_v11  ;;  %v17464_v23 = vpop.permute.xlu0 %10080  ;;  %v8054_v2 = vrot.slane %v17428_v6, 4  ;;  %v22871_v0 = vld [vmem:[#allocation146_spill] sm:$0xff] }
 0x4c0   : > { %v7907_v32 = vsel %vm246_vm0, %v22862_v38, %v22860_v26  ;;  %v22865_v38 = vld [vmem:[#allocation136_spill] sm:$0xff]  ;;  %22868 = vst [vmem:[#allocation13_spill] sm:$0xff] %v17464_v23  ;;  %v8079_v45 = vsel %vm246_vm0, %v8078_v43, %v17412_v36  ;;  %v7720_v47 = vrot.slane %v17204_v60, 4  ;;  %v17472_v19 = vpop.permute.xlu2 %10126  ;;  %v22872_v56 = vrot.slane %v22871_v0, 4 }
 0x4c1   : > { %v7931_v44 = vsel %vm246_vm0, %v22867_v35, %v22865_v38  ;;  %v7745_v35 = vsel %vm246_vm0, %v17188_v18, %v7744_v50  ;;  %22869 = vst [vmem:[#allocation134_spill] sm:$0xff] %v17472_v19  ;;  %v17481_v11 = vperm.slane %v7907_v32, %v11741_v28  ;;  %v7882_v23 = vrot.slane %v17459_v39, 4 }
 0x4c2   : > { %v17478_v53 = vsel %vm246_vm0, %v22872_v56, %v22870_v62  ;;  %v7753_v43 = vperm.slane %v7745_v35, %v11781_v3  ;;  %v7556_v60 = vrot.slane %v17291_v21, 4  ;;  %v17489_v50 = vperm.slane %v7931_v44, %v11741_v28  ;;  %v22873_v62 = vld [vmem:[#allocation149_spill] sm:$0xff] }
 0x4c3   : > { %v7895_v18 = vsel %vm246_vm0, %v7894_v61, %v17478_v53  ;;  %v7721_v0 = vsel %vm246_vm0, %v17207_v31, %v7720_v47  ;;  %v17494_v56 = vperm.slane %v8079_v45, %v11781_v3  ;;  %v7919_v32 = vsel %vm246_vm0, %v7918_v30, %v22873_v62 }
 0x4c4   : > { %v17500_v35 = vsel %vm246_vm0, %v7882_v23, %v17456_v41  ;;  %v7729_v21 = vperm.slane %v7721_v0, %v11781_v3  ;;  %v7770_v19 = vrot.slane %v7753_v43, 4  ;;  %v7673_v61 = vsel %vm246_vm0, %v17164_v42, %v7672_v4  ;;  %10282 = vrot.lane.b32.xlu1 %v17271_v51, %s21627_s16  ;;  %10266 = vrot.lane.b32.xlu0 %v16930_v27, %s21625_s15  ;;  %v17537_v27 = vpop.permute.xlu1 %10110 }
 0x4c5   : > { %v7685_v44 = vsel %vm246_vm0, %v22803_v49, %v7684_v33  ;;  %v22874_v31 = vrot.slane %v22808_v15, 4  ;;  %v8055_v30 = vsel %vm246_vm0, %v8054_v2, %v17415_v55  ;;  %v17516_v23 = vperm.slane %v7895_v18, %v11741_v28  ;;  %v22876_v2 = vld [vmem:[#allocation135_spill] sm:$0xff] }
 0x4c6   : > { %v7942_v47 = vrot.slane %v17481_v11, 4  ;;  %v7772_v42 = vrot.slane %v7729_v21, 4  ;;  %v7557_v49 = vsel %vm246_vm0, %v17251_v7, %v7556_v60  ;;  %v17524_v15 = vperm.slane %v7919_v32, %v11741_v28  ;;  %v22878_v18 = vld [vmem:[#allocation11_spill] sm:$0xff]  ;;  %v22880_v32 = vld [vmem:[#allocation153_spill] sm:$0xff] }
 0x4c7   : > { %v7697_v45 = vsel %vm246_vm0, %v22809_v12, %v22874_v31  ;;  %v7966_v12 = vrot.slane %v17489_v50, 4  ;;  %v17528_v51 = vsel %vm246_vm0, %v7770_v19, %v7729_v21  ;;  %v17532_v4 = vperm.slane %v17356_v10, %v11781_v3  ;;  %10270 = vrot.lane.b32.xlu2 %v7557_v49, %s21625_s15 }
 0x4c8   : > { %v6237_v33 = vperm.slane %v17397_v57, %v11741_v28  ;;  %v17540_v7 = vsel %vm246_vm0, %v7753_v43, %v7772_v42  ;;  %v22877_v60 = vrot.slane %v22876_v2, 4  ;;  %v22879_v0 = vrot.slane %v17284_v37, 4  ;;  %v17551_v57 = vpop.permute.xlu0 %10094 }
 0x4c9   : > { %22875 = vst [vmem:[#allocation24_spill] sm:$0xff] %v17532_v4  ;;  %v17554_v31 = vperm.slane %v8055_v30, %v11781_v3  ;;  %v8102_v43 = vrot.slane %v17494_v56, 4  ;;  %v6233_v49 = vperm.slane %v17407_v52, %v11741_v28  ;;  %v6264_v2 = vrot.slane %v17298_v17, 4 }
 0x4ca   : > { %v7709_v19 = vsel %vm246_vm0, %v22878_v18, %v22877_v60  ;;  %v5367_v10 = vsel %vm246_vm0, %v22879_v0, %v17148_v46  ;;  %v17561_v60 = vpop.permute.xlu2 %10140  ;;  %v7943_v46 = vsel %vm246_vm0, %v7942_v47, %v17516_v23  ;;  %v17567_v37 = vperm.slane %v17360_v34, %v11781_v3 }
 0x4cb   : > { %22881 = vst [vmem:[#allocation119_spill] sm:$0xff] %v17561_v60  ;;  %v7967_v18 = vsel %vm246_vm0, %v7966_v12, %v17524_v15  ;;  %v17573_v0 = vperm.slane %v7685_v44, %v11741_v28  ;;  %v17576_v52 = vperm.slane %v5367_v10, %v11781_v3  ;;  %v6274_v21 = vrot.slane %v6237_v33, 4  ;;  %v22895_v60 = vld [vmem:[#allocation141_spill] sm:$0xff] }
 0x4cc   : > { %22882 = vst [vmem:[#allocation138_spill] sm:$0xff] %v17567_v37  ;;  %v22884_v47 = vrot.slane %v17279_v54, 4  ;;  %v8103_v34 = vsel %vm246_vm0, %v8102_v43, %v17554_v31  ;;  %v7949_v30 = vperm.slane %v7943_v46, %v11781_v3  ;;  %v7884_v12 = vrot.slane %v17456_v41, 4  ;;  %10272 = vrot.lane.b32.xlu0 %v16952_v13, %s21625_s15  ;;  %v22890_v37 = vld [vmem:[#allocation58_spill] sm:$0xff]  ;;  %s21629_s15 = smov 100  }
 0x4cd   : > { %22883 = vst [vmem:[#allocation125_spill] sm:$0xff] %v17576_v52  ;;  %v17587_v44 = vperm.slane %v7673_v61, %v11741_v28  ;;  %v6262_v59 = vrot.slane %v6233_v49, 4  ;;  %v6265_v10 = vsel %vm246_vm0, %v6233_v49, %v6264_v2  ;;  %10288 = vrot.lane.b32.xlu1 %v8103_v34, %s21627_s16  ;;  %v7784_v42 = vrot.slane %v17330_v16, 4  ;;  %v22885_v49 = vld [vmem:[#allocation69_spill] sm:$0xff] }
 0x4ce   : > { %v6277_v14 = vsel %vm246_vm0, %v6237_v33, %v22884_v47  ;;  %v7973_v4 = vperm.slane %v7967_v18, %v11781_v3  ;;  %v17597_v33 = vsel %vm246_vm0, %v17459_v39, %v7884_v12  ;;  %v17600_v41 = vperm.slane %v7697_v45, %v11741_v28  ;;  %v17613_v39 = vpop.permute.xlu1 %10124 }
 0x4cf   : > { %v17603_v61 = vperm.slane %v7709_v19, %v11741_v28  ;;  %v7730_v43 = vrot.slane %v17573_v0, 4  ;;  %v3552_v2 = vrot.slane %v22885_v49, 4  ;;  %v6275_v46 = vsel %vm246_vm0, %v6274_v21, %v17279_v54  ;;  %10284 = vrot.lane.b32.xlu2 %v17434_v8, %s21627_s16 }
 0x4d0   : > { %v7796_v45 = vrot.slane %v17322_v24, 4  ;;  %v17616_v19 = vpop.permute.xlu0 %10108  ;;  %v7992_v47 = vrot.slane %v7949_v30, 4  ;;  %v17623_v54 = vperm.slane %v6265_v10, %v11781_v3  ;;  %v17626_v21 = vperm.slane %v6277_v14, %v11781_v3 }
 0x4d1   : > { %v7731_v34 = vsel %vm246_vm0, %v7730_v43, %v17587_v44  ;;  %v7754_v12 = vrot.slane %v17603_v61, 4  ;;  %v7990_v18 = vrot.slane %v7973_v4, 4  ;;  %v6263_v24 = vsel %vm246_vm0, %v6262_v59, %v17298_v17 }
 0x4d2   : > { %22887 = vst [vmem:[#allocation137_spill] sm:$0xff] %v17623_v54  ;;  %v17628_v8 = vpop.permute.xlu2 %10154  ;;  %v3550_v13 = vrot.slane %v22890_v37, 4  ;;  %v7785_v16 = vsel %vm246_vm0, %v17306_v20, %v7784_v42  ;;  %v17638_v10 = vperm.slane %v6275_v46, %v11781_v3  ;;  %v3553_v14 = vsel %vm246_vm0, %v22890_v37, %v3552_v2  ;;  %v22893_v42 = vld [vmem:[#allocation144_spill] sm:$0xff] }
 0x4d3   : > { %22888 = vst [vmem:[#allocation55_spill] sm:$0xff] %v17626_v21  ;;  %v7755_v43 = vsel %vm246_vm0, %v7754_v12, %v17600_v41  ;;  %v17643_v52 = vperm.slane %v7731_v34, %v11781_v3  ;;  %v7993_v59 = vsel %vm246_vm0, %v7973_v4, %v7992_v47  ;;  %v7797_v17 = vsel %vm246_vm0, %v22827_v25, %v7796_v45  ;;  %v22917_v47 = vld [vmem:[#allocation65_spill] sm:$0xff] }
 0x4d4   : > { %22889 = vst [vmem:[#allocation25_spill] sm:$0xff] %v17628_v8  ;;  %v7761_v8 = vperm.slane %v7755_v43, %v11781_v3  ;;  %v22892_v12 = vrot.slane %v22837_v48, 4  ;;  %v22894_v46 = vrot.slane %v22893_v42, 4  ;;  %v7991_v2 = vsel %vm246_vm0, %v7990_v18, %v7949_v30  ;;  %v22900_v42 = vld [vmem:[#allocation76_spill] sm:$0xff]  ;;  %v22919_v30 = vld [vmem:[#allocation195_spill] sm:$0xff] }
 0x4d5   : > { %22891 = vst [vmem:[#allocation131_spill] sm:$0xff] %v17638_v10  ;;  %10302 = vrot.lane.b32.xlu1 %v7993_v59, %s21629_s15  ;;  %v17660_v4 = vperm.slane %v7785_v16, %v11741_v28  ;;  %v17663_v25 = vperm.slane %v7797_v17, %v11741_v28  ;;  %v3551_v48 = vsel %vm246_vm0, %v3550_v13, %v22885_v49  ;;  %v7968_v18 = vrot.slane %v17524_v15, 4  ;;  %v22923_v10 = vld [vmem:[#allocation15_spill] sm:$0xff] }
 0x4d6   : > { %v7809_v20 = vsel %vm246_vm0, %v22838_v22, %v22892_v12  ;;  %v7821_v37 = vsel %vm246_vm0, %v22895_v60, %v22894_v46  ;;  %v7774_v34 = vrot.slane %v7761_v8, 4  ;;  %10286 = vrot.lane.b32.xlu0 %v7991_v2, %s21627_s16  ;;  %v8104_v22 = vrot.slane %v17554_v31, 4  ;;  %v17678_v16 = vpop.permute.xlu1 %10138  ;;  %s21639_s16 = smov 104  }
 0x4d7   : > { %v17670_v60 = vperm.slane %v7809_v20, %v11741_v28  ;;  %v17673_v45 = vperm.slane %v7821_v37, %v11741_v28  ;;  %10298 = vrot.lane.b32.xlu2 %v17425_v63, %s21629_s15  ;;  %22896 = vst [vmem:[#allocation140_spill] sm:$0xff] %v17678_v16  ;;  %v7842_v31 = vrot.slane %v17663_v25, 4  ;;  %v17687_v13 = vperm.slane %v6263_v24, %v11781_v3  ;;  %v23045_v16 = vld [vmem:[#allocation209_spill] sm:$0xff] }
 0x4d8   : > { %v17683_v49 = vsel %vm246_vm0, %v7774_v34, %v17643_v52  ;;  %v17690_v43 = vpop.permute.xlu0 %10122  ;;  %v7944_v59 = vrot.slane %v17516_v23, 4  ;;  %v17696_v15 = vperm.slane %v3551_v48, %v11741_v28  ;;  %v17699_v12 = vperm.slane %v3553_v14, %v11741_v28 }
 0x4d9   : > { %22897 = vst [vmem:[#allocation34_spill] sm:$0xff] %v17687_v13  ;;  %v7866_v63 = vrot.slane %v17673_v45, 4  ;;  %v7843_v24 = vsel %vm246_vm0, %v7842_v31, %v17660_v4  ;;  %v4448_v46 = vrot.slane %v22900_v42, 4  ;;  %v8105_v23 = vsel %vm246_vm0, %v17494_v56, %v8104_v22 }
 0x4da   : > { %22898 = vst [vmem:[#allocation184_spill] sm:$0xff] %v17696_v15  ;;  %v17701_v20 = vpop.permute.xlu2 %10160  ;;  %v7849_v37 = vperm.slane %v7843_v24, %v11781_v3  ;;  %v7969_v34 = vsel %vm246_vm0, %v17489_v50, %v7968_v18  ;;  %v22901_v14 = vrot.slane %v22865_v38, 4  ;;  %v7732_v17 = vrot.slane %v17587_v44, 4 }
 0x4db   : > { %22899 = vst [vmem:[#allocation22_spill] sm:$0xff] %v17701_v20  ;;  %v7867_v2 = vsel %vm246_vm0, %v7866_v63, %v17670_v60  ;;  %v7945_v56 = vsel %vm246_vm0, %v17481_v11, %v7944_v59  ;;  %v7756_v24 = vrot.slane %v17600_v41, 4  ;;  %v7776_v63 = vrot.slane %v17643_v52, 4 }
 0x4dc   : > { %v7933_v48 = vsel %vm246_vm0, %v22866_v58, %v22901_v14  ;;  %v7873_v31 = vperm.slane %v7867_v2, %v11781_v3  ;;  %v7888_v22 = vrot.slane %v7849_v37, 4  ;;  %v8056_v38 = vrot.slane %v17415_v55, 4 }
 0x4dd   : > { %10316 = vrot.lane.b32.xlu1 %v17500_v35, %s21639_s16  ;;  %v7896_v58 = vrot.slane %v17478_v53, 4  ;;  %v7733_v44 = vsel %vm246_vm0, %v17573_v0, %v7732_v17  ;;  %v17732_v11 = vperm.slane %v7969_v34, %v11781_v3  ;;  %v8080_v52 = vrot.slane %v17412_v36, 4 }
 0x4de   : > { %v7886_v50 = vrot.slane %v7873_v31, 4  ;;  %10300 = vrot.lane.b32.xlu0 %v17462_v1, %s21629_s15  ;;  %v17736_v41 = vsel %vm246_vm0, %v7873_v31, %v7888_v22  ;;  %v7757_v55 = vsel %vm246_vm0, %v17603_v61, %v7756_v24  ;;  %v17741_v53 = vpop.permute.xlu1 %10144  ;;  %v7741_v1 = vperm.slane %v7733_v44, %v11781_v3 }
 0x4df   : > { %10304 = vrot.lane.b32.xlu2 %v8105_v23, %s21629_s15  ;;  %22902 = vst [vmem:[#allocation8_spill] sm:$0xff] %v17741_v53  ;;  %v7765_v0 = vperm.slane %v7757_v55, %v11781_v3  ;;  %v17749_v18 = vsel %vm246_vm0, %v7761_v8, %v7776_v63  ;;  %v22903_v61 = vrot.slane %v22860_v26, 4  ;;  %v8057_v8 = vsel %vm246_vm0, %v17428_v6, %v8056_v38  ;;  %v22906_v63 = vld [vmem:[#allocation172_spill] sm:$0xff]  ;;  %s21651_s15 = smov 108  }
 0x4e0   : > { %v17744_v35 = vsel %vm246_vm0, %v7886_v50, %v7849_v37  ;;  %v17753_v17 = vpop.permute.xlu0 %10128  ;;  %v17760_v37 = vperm.slane %v7933_v48, %v11741_v28  ;;  %v22905_v34 = vrot.slane %v22873_v62, 4  ;;  %v7844_v22 = vrot.slane %v17660_v4, 4 }
 0x4e1   : > { %v7909_v23 = vsel %vm246_vm0, %v22861_v9, %v22903_v61  ;;  %v7778_v31 = vrot.slane %v7765_v0, 4  ;;  %v17773_v9 = vperm.slane %v7945_v56, %v11781_v3  ;;  %v7994_v48 = vrot.slane %v17732_v11, 4 }
 0x4e2   : > { %v17762_v2 = vpop.permute.xlu2 %10174  ;;  %v7921_v14 = vsel %vm246_vm0, %v22863_v29, %v22905_v34  ;;  %v8081_v24 = vsel %vm246_vm0, %v17391_v40, %v8080_v52  ;;  %v4449_v6 = vsel %vm246_vm0, %v22906_v63, %v4448_v46  ;;  %v7897_v62 = vsel %vm246_vm0, %v17421_v5, %v7896_v58 }
 0x4e3   : > { %22904 = vst [vmem:[#allocation130_spill] sm:$0xff] %v17762_v2  ;;  %v17783_v29 = vperm.slane %v7909_v23, %v11741_v28  ;;  %v17786_v4 = vsel %vm246_vm0, %v7778_v31, %v7741_v1  ;;  %v8065_v56 = vperm.slane %v8057_v8, %v11781_v3  ;;  %v17790_v38 = vperm.slane %v7921_v14, %v11741_v28  ;;  %v22909_v23 = vld [vmem:[#allocation157_spill] sm:$0xff] }
 0x4e4   : > { %v7845_v40 = vsel %vm246_vm0, %v17663_v25, %v7844_v22  ;;  %v7868_v50 = vrot.slane %v17670_v60, 4  ;;  %v8089_v5 = vperm.slane %v8081_v24, %v11781_v3  ;;  %v7978_v46 = vrot.slane %v17760_v37, 4  ;;  %v22912_v22 = vld [vmem:[#allocation148_spill] sm:$0xff] }
 0x4e5   : > { %10330 = vrot.lane.b32.xlu1 %v17540_v7, %s21651_s15  ;;  %v7853_v58 = vperm.slane %v7845_v40, %v11781_v3  ;;  %v7780_v44 = vrot.slane %v7741_v1, 4  ;;  %v4446_v61 = vrot.slane %v22906_v63, 4  ;;  %v7995_v25 = vsel %vm246_vm0, %v7994_v48, %v17773_v9 }
 0x4e6   : > { %10314 = vrot.lane.b32.xlu0 %v17528_v51, %s21639_s16  ;;  %v7869_v7 = vsel %vm246_vm0, %v17673_v45, %v7868_v50  ;;  %v17809_v60 = vperm.slane %v4449_v6, %v11741_v28  ;;  %v8020_v8 = vrot.slane %v22909_v23, 4  ;;  %v17813_v1 = vpop.permute.xlu1 %10158  ;;  %v17816_v34 = vperm.slane %v7897_v62, %v11741_v28  ;;  %v22914_v45 = vld [vmem:[#allocation185_spill] sm:$0xff] }
 0x4e7   : > { %10318 = vrot.lane.b32.xlu2 %v7995_v25, %s21639_s16  ;;  %22910 = vst [vmem:[#allocation60_spill] sm:$0xff] %v17813_v1  ;;  %v7877_v51 = vperm.slane %v7869_v7, %v11781_v3  ;;  %v8108_v31 = vrot.slane %v8065_v56, 4  ;;  %v22913_v48 = vrot.slane %v22912_v22, 4  ;;  %v17826_v63 = vsel %vm246_vm0, %v7765_v0, %v7780_v44  ;;  %v22916_v23 = vld [vmem:[#allocation85_spill] sm:$0xff]  ;;  %v22918_v44 = vld [vmem:[#allocation32_spill] sm:$0xff] }
 0x4e8   : > { %22908 = vst [vmem:[#allocation139_spill] sm:$0xff] %v17809_v60  ;;  %v17819_v14 = vpop.permute.xlu0 %10142  ;;  %v7892_v6 = vrot.slane %v7853_v58, 4  ;;  %v8106_v50 = vrot.slane %v8089_v5, 4  ;;  %v7954_v62 = vrot.slane %v17783_v29, 4  ;;  %v7979_v25 = vsel %vm246_vm0, %v7978_v46, %v17790_v38  ;;  %v22959_v60 = vld [vmem:[#allocation72_spill] sm:$0xff] }
 0x4e9   : > { %22911 = vst [vmem:[#allocation145_spill] sm:$0xff] %v17819_v14  ;;  %v8045_v24 = vsel %vm246_vm0, %v22914_v45, %v22913_v48  ;;  %v7890_v7 = vrot.slane %v7877_v51, 4  ;;  %v5344_v36 = vrot.slane %v22916_v23, 4  ;;  %v4447_v22 = vsel %vm246_vm0, %v4446_v61, %v22900_v42  ;;  %v22920_v42 = vld [vmem:[#allocation186_spill] sm:$0xff]  ;;  %v23043_v14 = vld [vmem:[#allocation221_spill] sm:$0xff] }
 0x4ea   : > { %v17828_v40 = vpop.permute.xlu2 %10188  ;;  %v5342_v48 = vrot.slane %v22917_v47, 4  ;;  %v17838_v0 = vsel %vm246_vm0, %v7877_v51, %v7892_v6  ;;  %v6240_v45 = vrot.slane %v22918_v44, 4  ;;  %v8008_v55 = vrot.slane %v22919_v30, 4  ;;  %v22921_v51 = vld [vmem:[#allocation23_spill] sm:$0xff]  ;;  %v22924_v30 = vld [vmem:[#allocation121_spill] sm:$0xff] }
 0x4eb   : > { %22915 = vst [vmem:[#allocation50_spill] sm:$0xff] %v17828_v40  ;;  %v17843_v26 = vperm.slane %v8045_v24, %v11741_v28  ;;  %v17846_v46 = vsel %vm246_vm0, %v7890_v7, %v7853_v58  ;;  %v8109_v59 = vsel %vm246_vm0, %v8089_v5, %v8108_v31  ;;  %v17850_v13 = vperm.slane %v7979_v25, %v11781_v3  ;;  %v22927_v7 = vld [vmem:[#allocation44_spill] sm:$0xff]  ;;  %v23018_v40 = vld [vmem:[#allocation210_spill] sm:$0xff] }
 0x4ec   : > { %v8021_v61 = vsel %vm246_vm0, %v22920_v42, %v8020_v8  ;;  %v22922_v6 = vrot.slane %v22921_v51, 4  ;;  %v3562_v21 = vrot.slane %v22924_v30, 4  ;;  %v22925_v24 = vrot.slane %v22880_v32, 4 }
 0x4ed   : > { %10336 = vrot.lane.b32.xlu1 %v8109_v59, %s21651_s15  ;;  %v8107_v5 = vsel %vm246_vm0, %v8106_v50, %v8065_v56  ;;  %v7955_v31 = vsel %vm246_vm0, %v7954_v62, %v17816_v34  ;;  %v17868_v8 = vperm.slane %v4447_v22, %v11741_v28  ;;  %v5345_v25 = vsel %vm246_vm0, %v22917_v47, %v5344_v36 }
 0x4ee   : > { %v8033_v54 = vsel %vm246_vm0, %v22923_v10, %v22922_v6  ;;  %v3565_v58 = vsel %vm246_vm0, %v22924_v30, %v22925_v24  ;;  %v5343_v10 = vsel %vm246_vm0, %v5342_v48, %v22916_v23  ;;  %v6238_v42 = vrot.slane %v22927_v7, 4  ;;  %10320 = vrot.lane.b32.xlu0 %v8107_v5, %s21639_s16  ;;  %v17880_v56 = vpop.permute.xlu1 %10172  ;;  %s21657_s16 = smov 112  }
 0x4ef   : > { %22926 = vst [vmem:[#allocation133_spill] sm:$0xff] %v17868_v8  ;;  %v6241_v59 = vsel %vm246_vm0, %v22927_v7, %v6240_v45  ;;  %10332 = vrot.lane.b32.xlu2 %v17597_v33, %s21651_s15  ;;  %v17883_v50 = vperm.slane %v8021_v61, %v11741_v28  ;;  %v17886_v62 = vperm.slane %v8033_v54, %v11741_v28  ;;  %v8090_v47 = vrot.slane %v17843_v26, 4  ;;  %v22930_v33 = vld [vmem:[#allocation143_spill] sm:$0xff]  ;;  %v22937_v7 = vld [vmem:[#allocation92_spill] sm:$0xff] }
 0x4f0   : > { %22928 = vst [vmem:[#allocation16_spill] sm:$0xff] %v17880_v56  ;;  %v3573_v36 = vperm.slane %v3565_v58, %v11741_v28  ;;  %v17890_v23 = vpop.permute.xlu0 %10156  ;;  %v17893_v22 = vperm.slane %v7955_v31, %v11781_v3  ;;  %v7998_v48 = vrot.slane %v17850_v13, 4  ;;  %v8009_v45 = vsel %vm246_vm0, %v22930_v33, %v8008_v55 }
 0x4f1   : > { %22929 = vst [vmem:[#allocation36_spill] sm:$0xff] %v17890_v23  ;;  %v3563_v61 = vsel %vm246_vm0, %v3562_v21, %v22880_v32  ;;  %v17901_v54 = vperm.slane %v5343_v10, %v11741_v28  ;;  %v17904_v51 = vperm.slane %v5345_v25, %v11741_v28  ;;  %v7996_v30 = vrot.slane %v17773_v9, 4  ;;  %v23036_v23 = vld [vmem:[#allocation165_spill] sm:$0xff] }
 0x4f2   : > { %v17906_v6 = vpop.permute.xlu2 %10202  ;;  %v17912_v55 = vperm.slane %v6241_v59, %v11741_v28  ;;  %v6239_v32 = vsel %vm246_vm0, %v6238_v42, %v22918_v44  ;;  %v17917_v21 = vperm.slane %v8009_v45, %v11741_v28  ;;  %v8066_v5 = vrot.slane %v17883_v50, 4  ;;  %v22938_v59 = vld [vmem:[#allocation197_spill] sm:$0xff] }
 0x4f3   : > { %22931 = vst [vmem:[#allocation33_spill] sm:$0xff] %v17901_v54  ;;  %v8091_v31 = vsel %vm246_vm0, %v8090_v47, %v17886_v62  ;;  %v17923_v9 = vperm.slane %v3563_v61, %v11741_v28  ;;  %v22936_v10 = vrot.slane %v17699_v12, 4  ;;  %v10905_v33 = vsel %vm10902_vm1, %v22938_v59, %v22937_v7  ;;  %v22942_v45 = vld [vmem:[#allocation173_spill] sm:$0xff]  ;;  %v22947_v59 = vld [vmem:[#allocation224_spill] sm:$0xff]  ;;  %v22948_v47 = vld [vmem:[#allocation127_spill] sm:$0xff] }
 0x4f4   : > { %22932 = vst [vmem:[#allocation12_spill] sm:$0xff] %v17904_v51  ;;  %v7999_v44 = vsel %vm246_vm0, %v7998_v48, %v17893_v22  ;;  %v7997_v61 = vsel %vm246_vm0, %v17732_v11, %v7996_v30  ;;  %v17940_v24 = vperm.slane %v6239_v32, %v11741_v28  ;;  %v17944_v48 = vperm.slane %v8091_v31, %v11781_v3  ;;  %v22945_v31 = vld [vmem:[#allocation10_spill] sm:$0xff]  ;;  %v22953_v51 = vld [vmem:[#allocation204_spill] sm:$0xff] }
 0x4f5   : > { %22933 = vst [vmem:[#allocation9_spill] sm:$0xff] %v17906_v6  ;;  %v3613_v25 = vsel %vm246_vm0, %v3573_v36, %v22936_v10  ;;  %10350 = vrot.lane.b32.xlu1 %v7999_v44, %s21657_s16  ;;  %v3610_v10 = vrot.slane %v3573_v36, 4  ;;  %v10910_v44 = vsel %vm10907_vm2, %v10905_v33, %v22942_v45  ;;  %v8067_v36 = vsel %vm246_vm0, %v8066_v5, %v17917_v21  ;;  %v22950_v45 = vld [vmem:[#allocation160_spill] sm:$0xff]  ;;  %v22951_v5 = vld [vmem:[#allocation82_spill] sm:$0xff] }
 0x4f6   : > { %22934 = vst [vmem:[#allocation183_spill] sm:$0xff] %v17912_v55  ;;  %10334 = vrot.lane.b32.xlu0 %v7997_v61, %s21651_s15  ;;  %v17947_v7 = vperm.slane %v3613_v25, %v11781_v3  ;;  %v17954_v11 = vpop.permute.xlu1 %10186  ;;  %v22944_v30 = vrot.slane %v17696_v15, 4  ;;  %v22946_v25 = vld [vmem:[#allocation54_spill] sm:$0xff]  ;;  %v10904_v33 = vsel %vm10902_vm1, %v22948_v47, %v22947_v59  ;;  %v22956_v47 = vld [vmem:[#allocation21_spill] sm:$0xff]  ;;  %v17984_v52 = vperm.slane %v8067_v36, %v11781_v3  ;;  %s21663_s15 = smov 116  }
 0x4f7   : > { %22935 = vst [vmem:[#allocation20_spill] sm:$0xff] %v17923_v9  ;;  %10346 = vrot.lane.b32.xlu2 %v17683_v49, %s21657_s16  ;;  %v10903_v61 = vsel %vm10902_vm1, %v22946_v25, %v22945_v31  ;;  %v22952_v55 = vld [vmem:[#allocation70_spill] sm:$0xff]  ;;  %v22955_v31 = vld [vmem:[#allocation128_spill] sm:$0xff]  ;;  %v10915_v59 = vsel %vm10912_vm3, %v10910_v44, %v22956_v47  ;;  %v22960_v44 = vld [vmem:[#allocation27_spill] sm:$0xff]  ;;  %v23037_v20 = vrot.slane %v23036_v23, 4  ;;  %v8454_v53 = vrot.slane %v23043_v14, 4 }
 0x4f8   : > { %22940 = vst [vmem:[#allocation136_spill] sm:$0xff] %v17940_v24  ;;  %v3601_v32 = vsel %vm246_vm0, %v17923_v9, %v22944_v30  ;;  %v17968_v49 = vpop.permute.xlu0 %10170  ;;  %v10908_v58 = vsel %vm10907_vm2, %v10903_v61, %v22950_v45  ;;  %v10906_v42 = vsel %vm10902_vm1, %v22952_v55, %v22951_v5  ;;  %v10909_v30 = vsel %vm10907_vm2, %v10904_v33, %v22953_v51  ;;  %v22957_v45 = vld [vmem:[#allocation198_spill] sm:$0xff]  ;;  %v22958_v33 = vld [vmem:[#allocation124_spill] sm:$0xff]  ;;  %v22961_v47 = vld [vmem:[#allocation83_spill] sm:$0xff] }
 0x4f9   : > { %22941 = vst [vmem:[#allocation19_spill] sm:$0xff] %v17947_v7  ;;  %v10911_v25 = vsel %vm10907_vm2, %v10906_v42, %v22955_v31  ;;  %v8110_v61 = vrot.slane %v17944_v48, 4  ;;  %v3611_v55 = vsel %vm246_vm0, %v3610_v10, %v17699_v12  ;;  %v10913_v51 = vsel %vm10912_vm3, %v10908_v58, %v22957_v45  ;;  %v22962_v10 = vld [vmem:[#allocation97_spill] sm:$0xff]  ;;  %v22978_v12 = vld [vmem:[#allocation190_spill] sm:$0xff]  ;;  %v22980_v31 = vld [vmem:[#allocation120_spill] sm:$0xff] }
 0x4fa   : > { %22943 = vst [vmem:[#allocation18_spill] sm:$0xff] %v17954_v11  ;;  %v17977_v54 = vpop.permute.xlu2 %10208  ;;  %v10914_v5 = vsel %vm10912_vm3, %v10909_v30, %v22958_v33  ;;  %v10916_v42 = vsel %vm10912_vm3, %v10911_v25, %v22959_v60  ;;  %v10918_v36 = vsel %vm10917_vm4, %v10913_v51, %v22960_v44  ;;  %v22963_v45 = vld [vmem:[#allocation89_spill] sm:$0xff]  ;;  %v8092_v60 = vrot.slane %v17886_v62, 4  ;;  %v22966_v33 = vld [vmem:[#allocation162_spill] sm:$0xff] }
 0x4fb   : > { %22949 = vst [vmem:[#allocation146_spill] sm:$0xff] %v17968_v49  ;;  %v10919_v8 = vsel %vm10917_vm4, %v10914_v5, %v22961_v47  ;;  %v10923_v58 = vsel %vm10922_vm5, %v10918_v36, %v22962_v10  ;;  %v10920_v30 = vsel %vm10917_vm4, %v10915_v59, %v22963_v45  ;;  %v18009_v25 = vperm.slane %v3601_v32, %v11781_v3  ;;  %v22968_v32 = vld [vmem:[#allocation175_spill] sm:$0xff]  ;;  %v22983_v24 = vld [vmem:[#allocation110_spill] sm:$0xff]  ;;  %v23023_v11 = vld [vmem:[#allocation229_spill] sm:$0xff] }
 0x4fc   : > { %22954 = vst [vmem:[#allocation149_spill] sm:$0xff] %v17977_v54  ;;  %v18012_v51 = vperm.slane %v3611_v55, %v11781_v3  ;;  %v10921_v5 = vsel %vm10917_vm4, %v10916_v42, %v22966_v33  ;;  %v8111_v59 = vsel %vm246_vm0, %v8110_v61, %v17984_v52  ;;  %v22970_v42 = vld [vmem:[#allocation68_spill] sm:$0xff]  ;;  %v22974_v45 = vld [vmem:[#allocation91_spill] sm:$0xff]  ;;  %v22979_v44 = vrot.slane %v22978_v12, 4  ;;  %v23014_v54 = vld [vmem:[#allocation201_spill] sm:$0xff] }
 0x4fd   : > { %10364 = vrot.lane.b32.xlu1 %v17736_v41, %s21663_s15  ;;  %22964 = vst [vmem:[#allocation135_spill] sm:$0xff] %v18009_v25  ;;  %v22967_v41 = vld [vmem:[#allocation59_spill] sm:$0xff]  ;;  %v10926_v36 = vsel %vm10922_vm5, %v10921_v5, %v22968_v32  ;;  %v22971_v47 = vrot.slane %v22970_v42, 4  ;;  %v22973_v61 = vld [vmem:[#allocation100_spill] sm:$0xff]  ;;  %v8068_v32 = vrot.slane %v17917_v21, 4  ;;  %v23015_v6 = vrot.slane %v23014_v54, 4 }
 0x4fe   : > { %22965 = vst [vmem:[#allocation11_spill] sm:$0xff] %v18012_v51  ;;  %10348 = vrot.lane.b32.xlu0 %v17744_v35, %s21657_s16  ;;  %v10924_v62 = vsel %vm10922_vm5, %v10919_v8, %v22967_v41  ;;  %v18026_v55 = vpop.permute.xlu1 %10192  ;;  %v10928_v10 = vsel %vm10927_vm6, %v10923_v58, %v22973_v61  ;;  %v10925_v8 = vsel %vm10922_vm5, %v10920_v30, %v22974_v45  ;;  %v22976_v5 = vld [vmem:[#allocation180_spill] sm:$0xff]  ;;  %v22981_v61 = vld [vmem:[#allocation74_spill] sm:$0xff]  ;;  %v23034_v49 = vld [vmem:[#allocation181_spill] sm:$0xff] }
 0x4ff   : > { %10352 = vrot.lane.b32.xlu2 %v8111_v59, %s21657_s16  ;;  %22969 = vst [vmem:[#allocation153_spill] sm:$0xff] %v18026_v55  ;;  %v18032_v35 = vsel %vm246_vm0, %v17947_v7, %v22971_v47  ;;  %v10930_v59 = vsel %vm10927_vm6, %v10925_v8, %v22976_v5  ;;  %v8093_v47 = vsel %vm246_vm0, %v17843_v26, %v8092_v60  ;;  %v22982_v45 = vld [vmem:[#allocation90_spill] sm:$0xff]  ;;  %v8000_v5 = vrot.slane %v17893_v22, 4  ;;  %s11560_s16 = smov 120   ;;  %v23052_v14 = vld [vmem:[#allocation117_spill] sm:$0xff] }
 0x500   : > { %22972 = vst [vmem:[#allocation69_spill] sm:$0xff] %v18032_v35  ;;  %v18038_v33 = vpop.permute.xlu0 %10176  ;;  %v18051_v58 = vsel %vm246_vm0, %v22980_v31, %v22979_v44  ;;  %v10931_v30 = vsel %vm10927_vm6, %v10926_v36, %v22981_v61  ;;  %v10929_v8 = vsel %vm10927_vm6, %v10924_v62, %v22982_v45  ;;  %v22984_v26 = vld [vmem:[#allocation102_spill] sm:$0xff]  ;;  %v7956_v7 = vrot.slane %v17816_v34, 4  ;;  %v22985_v44 = vld [vmem:[#allocation177_spill] sm:$0xff]  ;;  %v22986_v61 = vld [vmem:[#allocation208_spill] sm:$0xff] }
 0x501   : > { %22975 = vst [vmem:[#allocation58_spill] sm:$0xff] %v18038_v33  ;;  %v10934_v21 = vsel %vm10932_vm7, %v10929_v8, %v22983_v24  ;;  %v10933_v60 = vsel %vm10932_vm7, %v10928_v10, %v22984_v26  ;;  %v10935_v42 = vsel %vm10932_vm7, %v10930_v59, %v22985_v44  ;;  %v18066_v36 = vperm.slane %v8093_v47, %v11781_v3  ;;  %v22987_v62 = vld [vmem:[#allocation205_spill] sm:$0xff]  ;;  %v22989_v24 = vld [vmem:[#allocation103_spill] sm:$0xff] }
 0x502   : > { %v18042_v41 = vpop.permute.xlu2 %10222  ;;  %v8230_v51 = vrot.slane %v22986_v61, 4  ;;  %v22988_v22 = vrot.slane %v22987_v62, 4  ;;  %v10936_v8 = vsel %vm10932_vm7, %v10931_v30, %v22989_v24  ;;  %v8069_v34 = vsel %vm246_vm0, %v17883_v50, %v8068_v32  ;;  %v22991_v26 = vld [vmem:[#allocation107_spill] sm:$0xff] }
 0x503   : > { %22977 = vst [vmem:[#allocation144_spill] sm:$0xff] %v18042_v41  ;;  %v7980_v10 = vrot.slane %v17790_v38, 4  ;;  %v22990_v59 = vrot.slane %v22980_v31, 4  ;;  %v10939_v44 = vsel %vm10937_vm8, %v10934_v21, %v22991_v26  ;;  %v22993_v38 = vld [vmem:[#allocation93_spill] sm:$0xff]  ;;  %v22994_v31 = vld [vmem:[#allocation174_spill] sm:$0xff]  ;;  %v7957_v21 = vsel %vm246_vm0, %v17783_v29, %v7956_v7  ;;  %v22998_v29 = vld [vmem:[#allocation64_spill] sm:$0xff] }
 0x504   : > { %v8243_v45 = vsel %vm246_vm0, %v22988_v22, %v18051_v58  ;;  %v22992_v22 = vld [vmem:[#allocation113_spill] sm:$0xff]  ;;  %v10941_v50 = vsel %vm10937_vm8, %v10936_v8, %v22993_v38  ;;  %v8112_v24 = vrot.slane %v17984_v52, 4  ;;  %v22997_v8 = vld [vmem:[#allocation94_spill] sm:$0xff]  ;;  %v10944_v7 = vsel %vm10942_vm9, %v10939_v44, %v22998_v29  ;;  %v23000_v26 = vld [vmem:[#allocation199_spill] sm:$0xff] }
 0x505   : > { %10378 = vrot.lane.b32.xlu1 %v17786_v4, %s11560_s16  ;;  %v18084_v47 = vsel %vm246_vm0, %v22990_v59, %v22978_v12  ;;  %v10938_v30 = vsel %vm10937_vm8, %v10933_v60, %v22992_v22  ;;  %v8001_v4 = vsel %vm246_vm0, %v17850_v13, %v8000_v5  ;;  %v10940_v12 = vsel %vm10937_vm8, %v10935_v42, %v22994_v31  ;;  %v23003_v31 = vld [vmem:[#allocation178_spill] sm:$0xff]  ;;  %v23007_v44 = vld [vmem:[#allocation71_spill] sm:$0xff] }
 0x506   : > { %10362 = vrot.lane.b32.xlu0 %v17749_v18, %s21663_s15  ;;  %v18099_v32 = vpop.permute.xlu1 %10206  ;;  %v18104_v60 = vperm.slane %v8243_v45, %v11741_v28  ;;  %v18109_v13 = vperm.slane %v8069_v34, %v11781_v3  ;;  %v8114_v5 = vrot.slane %v18066_v36, 4  ;;  %v8231_v42 = vsel %vm246_vm0, %v8230_v51, %v18084_v47  ;;  %v23002_v51 = vld [vmem:[#allocation206_spill] sm:$0xff] }
 0x507   : > { %10366 = vrot.lane.b32.xlu2 %v8001_v4, %s21663_s15  ;;  %22995 = vst [vmem:[#allocation141_spill] sm:$0xff] %v18099_v32  ;;  %v10943_v59 = vsel %vm10942_vm9, %v10938_v30, %v22997_v8  ;;  %v7981_v34 = vsel %vm246_vm0, %v17760_v37, %v7980_v10  ;;  %v8130_v22 = vrot.slane %v23000_v26, 4  ;;  %v23001_v4 = vld [vmem:[#allocation158_spill] sm:$0xff]  ;;  %v7965_v38 = vperm.slane %v7957_v21, %v11781_v3  ;;  %v23005_v8 = vld [vmem:[#allocation156_spill] sm:$0xff]  ;;  %v23009_v37 = vld [vmem:[#allocation203_spill] sm:$0xff] }
 0x508   : > { %v18106_v18 = vpop.permute.xlu0 %10190  ;;  %v10946_v52 = vsel %vm10942_vm9, %v10941_v50, %v23001_v4  ;;  %v23004_v25 = vrot.slane %v23003_v31, 4  ;;  %v23006_v35 = vrot.slane %v23005_v8, 4  ;;  %v23010_v10 = vrot.slane %v23009_v37, 4  ;;  %v23011_v4 = vld [vmem:[#allocation78_spill] sm:$0xff]  ;;  %v23021_v32 = vld [vmem:[#allocation207_spill] sm:$0xff] }
 0x509   : > { %22996 = vst [vmem:[#allocation76_spill] sm:$0xff] %v18106_v18  ;;  %v18144_v50 = vperm.slane %v8231_v42, %v11741_v28  ;;  %v8278_v21 = vrot.slane %v18104_v60, 4  ;;  %v8118_v31 = vrot.slane %v23011_v4, 4  ;;  %v23012_v37 = vrot.slane %v23007_v44, 4 }
 0x50a   : > { %v18119_v45 = vpop.permute.xlu2 %10236  ;;  %v8267_v30 = vsel %vm246_vm0, %v23004_v25, %v23002_v51  ;;  %v18135_v29 = vsel %vm246_vm0, %v23007_v44, %v23006_v35  ;;  %v8115_v25 = vsel %vm246_vm0, %v8114_v5, %v18109_v13  ;;  %v8113_v35 = vsel %vm246_vm0, %v17944_v48, %v8112_v24  ;;  %v23013_v5 = vld [vmem:[#allocation202_spill] sm:$0xff]  ;;  %v23016_v24 = vld [vmem:[#allocation152_spill] sm:$0xff] }
 0x50b   : > { %22999 = vst [vmem:[#allocation172_spill] sm:$0xff] %v18119_v45  ;;  %v23008_v45 = vld [vmem:[#allocation189_spill] sm:$0xff]  ;;  %v7989_v51 = vperm.slane %v7981_v34, %v11781_v3  ;;  %v18161_v42 = vperm.slane %v8267_v30, %v11741_v28  ;;  %v8143_v48 = vsel %vm246_vm0, %v23015_v6, %v23013_v5  ;;  %v23017_v34 = vrot.slane %v23016_v24, 4 }
 0x50c   : > { %v18141_v41 = vsel %vm246_vm0, %v23010_v10, %v23008_v45  ;;  %v18157_v45 = vsel %vm246_vm0, %v23012_v37, %v23005_v8  ;;  %v8131_v10 = vsel %vm246_vm0, %v8130_v22, %v18135_v29  ;;  %v23019_v8 = vld [vmem:[#allocation109_spill] sm:$0xff]  ;;  %v23020_v37 = vld [vmem:[#allocation154_spill] sm:$0xff]  ;;  %v8004_v22 = vrot.slane %v7965_v38, 4 }
 0x50d   : > { %10384 = vrot.lane.b32.xlu1 %v8115_v25, %s11560_s16  ;;  %v18173_v44 = vsel %vm246_vm0, %v23018_v40, %v23017_v34  ;;  %v10948_v25 = vsel %vm21694_vm10, %v10943_v59, %v23019_v8  ;;  %v18179_v30 = vsel %vm21694_vm10, %v10946_v52, %v23020_v37  ;;  %v23022_v55 = vrot.slane %v23021_v32, 4  ;;  %v23024_v34 = vld [vmem:[#allocation42_spill] sm:$0xff]  ;;  %v23028_v37 = vld [vmem:[#allocation213_spill] sm:$0xff] }
 0x50e   : > { %10368 = vrot.lane.b32.xlu0 %v8113_v35, %s21663_s15  ;;  %v10945_v56 = vsel %vm10942_vm9, %v10940_v12, %v23023_v11  ;;  %v10949_v18 = vsel %vm21694_vm10, %v10944_v7, %v23024_v34  ;;  %v18192_v59 = vpop.permute.xlu1 %10220  ;;  %v8279_v52 = vsel %vm246_vm0, %v8278_v21, %v18144_v50  ;;  %v8119_v35 = vsel %vm246_vm0, %v8118_v31, %v18157_v45  ;;  %v23027_v12 = vld [vmem:[#allocation17_spill] sm:$0xff]  ;;  %s11561_s15 = smov 124  }
 0x50f   : > { %v8255_v6 = vsel %vm246_vm0, %v23022_v55, %v18141_v41  ;;  %10380 = vrot.lane.b32.xlu2 %v17846_v46, %s11560_s16  ;;  %23025 = vst [vmem:[#allocation157_spill] sm:$0xff] %v18192_v59  ;;  %v8137_v55 = vperm.slane %v8131_v10, %v11741_v28  ;;  %v18202_v11 = vperm.slane %v8143_v48, %v11741_v28  ;;  %v8342_v7 = vrot.slane %v23027_v12, 4 }
 0x510   : > { %v18198_v8 = vpop.permute.xlu0 %10204  ;;  %v23029_v46 = vrot.slane %v23028_v37, 4  ;;  %v8002_v21 = vrot.slane %v7989_v51, 4  ;;  %v18212_v33 = vperm.slane %v8255_v6, %v11741_v28  ;;  %v8302_v31 = vrot.slane %v18161_v42, 4  ;;  %v23035_v6 = vld [vmem:[#allocation200_spill] sm:$0xff] }
 0x511   : > { %23026 = vst [vmem:[#allocation148_spill] sm:$0xff] %v18198_v8  ;;  %v23031_v10 = vrot.slane %v23018_v40, 4  ;;  %v23033_v8 = vld [vmem:[#allocation163_spill] sm:$0xff]  ;;  %v8155_v1 = vsel %vm246_vm0, %v23037_v20, %v23035_v6  ;;  %v18235_v40 = vperm.slane %v8279_v52, %v11781_v3  ;;  %v23042_v20 = vld [vmem:[#allocation217_spill] sm:$0xff]  ;;  %v23046_v12 = vrot.slane %v23045_v16, 4 }
 0x512   : > { %v8355_v34 = vsel %vm246_vm0, %v23029_v46, %v18173_v44  ;;  %v18209_v59 = vpop.permute.xlu2 %10250  ;;  %v18223_v2 = vsel %vm21694_vm10, %v10945_v56, %v23033_v8  ;;  %v18227_v46 = vsel %vm21673_vm11, %v10949_v18, %v23034_v49  ;;  %v23039_v8 = vld [vmem:[#allocation126_spill] sm:$0xff]  ;;  %v8192_v49 = vrot.slane %v18202_v11, 4 }
 0x513   : > { %23030 = vst [vmem:[#allocation185_spill] sm:$0xff] %v18209_v59  ;;  %v18219_v48 = vsel %vm246_vm0, %v23031_v10, %v23016_v24  ;;  %v8005_v59 = vsel %vm246_vm0, %v7989_v51, %v8004_v22  ;;  %v8125_v24 = vperm.slane %v8119_v35, %v11741_v28  ;;  %v18239_v56 = vperm.slane %v8355_v34, %v11741_v28  ;;  %v23040_v22 = vld [vmem:[#allocation67_spill] sm:$0xff] }
 0x514   : > { %23032 = vst [vmem:[#allocation85_spill] sm:$0xff] %v18219_v48  ;;  %v8466_v10 = vrot.slane %v23039_v8, 4  ;;  %v8166_v18 = vrot.slane %v8137_v55, 4  ;;  %v8343_v51 = vsel %vm246_vm0, %v8342_v7, %v18219_v48  ;;  %v23041_v9 = vrot.slane %v23040_v22, 4  ;;  %v23044_v7 = vld [vmem:[#allocation150_spill] sm:$0xff]  ;;  %v23047_v8 = vld [vmem:[#allocation211_spill] sm:$0xff] }
 0x515   : > { %23038 = vst [vmem:[#allocation65_spill] sm:$0xff] %v18235_v40  ;;  %10398 = vrot.lane.b32.xlu1 %v8005_v59, %s11561_s15  ;;  %v8003_v52 = vsel %vm246_vm0, %v8002_v21, %v7965_v38  ;;  %v8303_v35 = vsel %vm246_vm0, %v8302_v31, %v18212_v33  ;;  %v8161_v34 = vperm.slane %v8155_v1, %v11741_v28  ;;  %v23048_v48 = vld [vmem:[#allocation212_spill] sm:$0xff]  ;;  %v23050_v21 = vrot.slane %v23042_v20, 4  ;;  %v23051_v31 = vld [vmem:[#allocation222_spill] sm:$0xff] }
 0x516   : > { %v18249_v15 = vsel %vm246_vm0, %v23042_v20, %v23041_v9  ;;  %10382 = vrot.lane.b32.xlu0 %v8003_v52, %s11560_s16  ;;  %v18262_v9 = vsel %vm246_vm0, %v23046_v12, %v23044_v7  ;;  %v23049_v59 = vrot.slane %v23048_v48, 4  ;;  %v23053_v52 = vrot.slane %v23052_v14, 4  ;;  %v18280_v16 = vpop.permute.xlu1 %10234  ;;  %v23055_v20 = vld [vmem:[#allocation155_spill] sm:$0xff] }
 0x517   : > { %v18272_v1 = vsel %vm246_vm0, %v23050_v21, %v23040_v22  ;;  %10394 = vrot.lane.b32.xlu2 %v17826_v63, %s11561_s15  ;;  %23054 = vst [vmem:[#allocation32_spill] sm:$0xff] %v18280_v16  ;;  %v8168_v12 = vrot.slane %v8125_v24, 4  ;;  %v18283_v48 = vperm.slane %v8343_v51, %v11741_v28  ;;  %v8467_v22 = vsel %vm246_vm0, %v8466_v10, %v18249_v15 }
 0x518   : > { %v8379_v38 = vsel %vm246_vm0, %v23049_v59, %v23047_v8  ;;  %v8479_v37 = vsel %vm246_vm0, %v23053_v52, %v23051_v31  ;;  %v8390_v8 = vrot.slane %v18239_v56, 4  ;;  %v10953_v7 = vsel %vm21673_vm11, %v10948_v25, %v23055_v20  ;;  %v18290_v59 = vpop.permute.xlu0 %10218  ;;  %v23064_v31 = vld [vmem:[#allocation219_spill] sm:$0xff] }
 0x519   : > { %23056 = vst [vmem:[#allocation195_spill] sm:$0xff] %v18290_v59  ;;  %v8328_v21 = vrot.slane %v18235_v40, 4  ;;  %v8193_v63 = vsel %vm246_vm0, %v8161_v34, %v8192_v49  ;;  %v8167_v52 = vsel %vm246_vm0, %v8166_v18, %v8125_v24  ;;  %v8116_v51 = vrot.slane %v18109_v13, 4  ;;  %v23059_v49 = vld [vmem:[#allocation215_spill] sm:$0xff] }
 0x51a   : > { %v18295_v16 = vpop.permute.xlu2 %10256  ;;  %v18299_v14 = vperm.slane %v8379_v38, %v11741_v28  ;;  %v8455_v10 = vsel %vm246_vm0, %v8454_v53, %v18272_v1  ;;  %v18304_v25 = vperm.slane %v8479_v37, %v11741_v28  ;;  %v18307_v20 = vperm.slane %v8303_v35, %v11781_v3  ;;  %v23062_v35 = vld [vmem:[#allocation191_spill] sm:$0xff] }
 0x51b   : > { %23057 = vst [vmem:[#allocation186_spill] sm:$0xff] %v18295_v16  ;;  %v8190_v40 = vrot.slane %v8161_v34, 4  ;;  %v23060_v24 = vrot.slane %v23059_v49, 4  ;;  %v8473_v13 = vperm.slane %v8467_v22, %v11741_v28  ;;  %v8169_v38 = vsel %vm246_vm0, %v8137_v55, %v8168_v12  ;;  %v23063_v22 = vld [vmem:[#allocation220_spill] sm:$0xff] }
 0x51c   : > { %23058 = vst [vmem:[#allocation23_spill] sm:$0xff] %v18307_v20  ;;  %v18316_v16 = vperm.slane %v8193_v63, %v11781_v3  ;;  %v18319_v53 = vperm.slane %v8167_v52, %v11781_v3  ;;  %v8391_v37 = vsel %vm246_vm0, %v8390_v8, %v18283_v48  ;;  %v10958_v34 = vsel %vm21671_vm12, %v10953_v7, %v23062_v35 }
 0x51d   : > { %v8367_v18 = vsel %vm246_vm0, %v23060_v24, %v18262_v9  ;;  %v8329_v59 = vsel %vm246_vm0, %v18307_v20, %v8328_v21  ;;  %v8461_v24 = vperm.slane %v8455_v10, %v11741_v28  ;;  %v23065_v55 = vrot.slane %v23064_v31, 4 }
 0x51e   : > { %23061 = vst [vmem:[#allocation15_spill] sm:$0xff] %v18319_v53  ;;  %10412 = vrot.lane.b32.xlu1 %v8329_v59, %s11534_s22  ;;  %v8117_v63 = vsel %vm246_vm0, %v18066_v36, %v8116_v51  ;;  %v8373_v8 = vperm.slane %v8367_v18, %v11741_v28  ;;  %v8414_v52 = vrot.slane %v18299_v14, 4  ;;  %v8528_v7 = vrot.slane %v18304_v25, 4  ;;  %10396 = vrot.lane.b32.xlu0 %v17838_v0, %s11561_s15  ;;  %v18349_v36 = vpop.permute.xlu1 %10240 }
 0x51f   : > { %v8491_v12 = vsel %vm246_vm0, %v23065_v55, %v23063_v22  ;;  %v18341_v21 = vperm.slane %v8169_v38, %v11781_v3  ;;  %v8191_v10 = vsel %vm246_vm0, %v8190_v40, %v18202_v11  ;;  %v18346_v59 = vperm.slane %v8391_v37, %v11781_v3  ;;  %10400 = vrot.lane.b32.xlu2 %v8117_v63, %s11561_s15  ;;  %v23067_v55 = vld [vmem:[#allocation243_spill] sm:$0xff]  ;;  %v23068_v40 = vld [vmem:[#allocation86_spill] sm:$0xff] }
 0x520   : > { %v8502_v35 = vrot.slane %v8473_v13, 4  ;;  %23066 = vst [vmem:[#allocation121_spill] sm:$0xff] %v18349_v36  ;;  %v8218_v51 = vrot.slane %v18316_v16, 4  ;;  %v8216_v18 = vrot.slane %v18319_v53, 4  ;;  %v8497_v0 = vperm.slane %v8491_v12, %v11741_v28  ;;  %v18361_v63 = vpop.permute.xlu0 %10224  ;;  %v23071_v22 = vld [vmem:[#allocation26_spill] sm:$0xff] }
 0x521   : > { %v8304_v38 = vrot.slane %v18212_v33, 4  ;;  %v10955_v11 = vsel %vm21673_vm11, %v18223_v2, %v23067_v55  ;;  %v10959_v37 = vsel %vm21671_vm12, %v18227_v46, %v23068_v40  ;;  %v8504_v20 = vrot.slane %v8461_v24, 4  ;;  %v23070_v2 = vld [vmem:[#allocation13_spill] sm:$0xff] }
 0x522   : > { %v18363_v36 = vpop.permute.xlu2 %10270  ;;  %v18366_v53 = vperm.slane %v8191_v10, %v11781_v3  ;;  %v8415_v12 = vsel %vm246_vm0, %v8414_v52, %v8373_v8  ;;  %v8529_v33 = vsel %vm246_vm0, %v8497_v0, %v8528_v7  ;;  %v8280_v31 = vrot.slane %v18144_v50, 4 }
 0x523   : > { %23069 = vst [vmem:[#allocation44_spill] sm:$0xff] %v18363_v36  ;;  %v10956_v55 = vsel %vm21673_vm11, %v18179_v30, %v23070_v2  ;;  %v10963_v46 = vsel %vm21670_vm13, %v10958_v34, %v23071_v22  ;;  %v8440_v40 = vrot.slane %v18346_v59, 4  ;;  %v8503_v36 = vsel %vm246_vm0, %v8502_v35, %v8461_v24  ;;  %v23073_v2 = vld [vmem:[#allocation118_spill] sm:$0xff] }
 0x524   : > { %v10960_v10 = vsel %vm21671_vm12, %v10955_v11, %v17551_v57  ;;  %v8219_v52 = vsel %vm246_vm0, %v8218_v51, %v18341_v21  ;;  %v8217_v50 = vsel %vm246_vm0, %v18366_v53, %v8216_v18  ;;  %v8305_v7 = vsel %vm246_vm0, %v18161_v42, %v8304_v38 }
 0x525   : > { %v18387_v30 = vperm.slane %v8415_v12, %v11781_v3  ;;  %v8505_v34 = vsel %vm246_vm0, %v8473_v13, %v8504_v20  ;;  %v18391_v22 = vperm.slane %v8529_v33, %v11781_v3  ;;  %v8526_v24 = vrot.slane %v8497_v0, 4 }
 0x526   : > { %10426 = vrot.lane.b32.xlu1 %v8219_v52, %s11535_s23  ;;  %v18395_v57 = vperm.slane %v8503_v36, %v11781_v3  ;;  %v8281_v35 = vsel %vm246_vm0, %v18104_v60, %v8280_v31  ;;  %v8392_v51 = vrot.slane %v18283_v48, 4  ;;  %v8416_v42 = vrot.slane %v8373_v8, 4  ;;  %10410 = vrot.lane.b32.xlu0 %v8217_v50, %s11534_s22  ;;  %v23072_v36 = vld [vmem:[#allocation129_spill] sm:$0xff]  ;;  %v18416_v48 = vpop.permute.xlu1 %10254 }
 0x527   : > { %v8256_v18 = vrot.slane %v18141_v41, 4  ;;  %v8441_v20 = vsel %vm246_vm0, %v18387_v30, %v8440_v40  ;;  %v18405_v13 = vperm.slane %v8305_v7, %v11781_v3  ;;  %v8244_v0 = vrot.slane %v18051_v58, 4  ;;  %v23074_v50 = vld [vmem:[#allocation29_spill] sm:$0xff]  ;;  %v23075_v7 = vld [vmem:[#allocation134_spill] sm:$0xff] }
 0x528   : > { %v10961_v38 = vsel %vm21671_vm12, %v10956_v55, %v23072_v36  ;;  %v10965_v60 = vsel %vm21670_vm13, %v10960_v10, %v17537_v27  ;;  %v10964_v31 = vsel %vm21670_vm13, %v10959_v37, %v17616_v19  ;;  %v8132_v41 = vrot.slane %v18135_v29, 4  ;;  %10414 = vrot.lane.b32.xlu2 %v8441_v20, %s11534_s22  ;;  %v18418_v8 = vpop.permute.xlu0 %10238 }
 0x529   : > { %v18421_v11 = vperm.slane %v8505_v34, %v11781_v3  ;;  %v8554_v58 = vrot.slane %v18391_v22, 4  ;;  %v8527_v12 = vsel %vm246_vm0, %v8526_v24, %v18304_v25  ;;  %v18427_v27 = vperm.slane %v8281_v35, %v11781_v3 }
 0x52a   : > { %v18429_v19 = vpop.permute.xlu2 %10284  ;;  %v8552_v29 = vrot.slane %v18395_v57, 4  ;;  %v8393_v37 = vsel %vm246_vm0, %v18239_v56, %v8392_v51  ;;  %v8417_v33 = vsel %vm246_vm0, %v18299_v14, %v8416_v42  ;;  %v18438_v55 = vperm.slane %v23073_v2, %v11741_v28 }
 0x52b   : > { %v8330_v40 = vrot.slane %v18405_v13, 4  ;;  %v8232_v25 = vrot.slane %v18084_v47, 4  ;;  %v8245_v10 = vsel %vm246_vm0, %v22987_v62, %v8244_v0  ;;  %v8257_v52 = vsel %vm246_vm0, %v23021_v32, %v8256_v18 }
 0x52c   : > { %v18448_v56 = vsel %vm21669_vm14, %v10964_v31, %v17613_v39  ;;  %v10966_v14 = vsel %vm21670_vm13, %v10961_v38, %v23074_v50  ;;  %v18454_v34 = vsel %vm21669_vm14, %v10965_v60, %v23075_v7  ;;  %v18457_v24 = vperm.slane %v8527_v12, %v11781_v3  ;;  %v23079_v50 = vld [vmem:[#allocation85_spill] sm:$0xff] }
 0x52d   : > { %v18461_v62 = vsel %vm21669_vm14, %v10963_v46, %v17690_v43  ;;  %v8555_v47 = vsel %vm246_vm0, %v8554_v58, %v18421_v11  ;;  %v8401_v39 = vperm.slane %v8393_v37, %v11781_v3  ;;  %v8425_v32 = vperm.slane %v8417_v33, %v11781_v3 }
 0x52e   : > { %10432 = vrot.lane.b32.xlu1 %v8555_v47, %s11535_s23  ;;  %v8553_v35 = vsel %vm246_vm0, %v18457_v24, %v8552_v29  ;;  %v18471_v51 = vperm.slane %v8245_v10, %v11741_v28  ;;  %v18474_v42 = vperm.slane %v8257_v52, %v11741_v28  ;;  %v8314_v43 = vrot.slane %v18438_v55, 4  ;;  %v18486_v36 = vpop.permute.xlu1 %10268  ;;  %v23078_v52 = vld [vmem:[#allocation218_spill] sm:$0xff] }
 0x52f   : > { %v8120_v46 = vrot.slane %v18157_v45, 4  ;;  %10416 = vrot.lane.b32.xlu0 %v8553_v35, %s11534_s22  ;;  %v8331_v18 = vsel %vm246_vm0, %v8330_v40, %v18427_v27  ;;  %v8233_v20 = vsel %vm246_vm0, %v22986_v61, %v8232_v25  ;;  %v8133_v0 = vsel %vm246_vm0, %v23000_v26, %v8132_v41  ;;  %v23077_v25 = vld [vmem:[#allocation213_spill] sm:$0xff]  ;;  %s23332_s22 = smov 64  }
 0x530   : > { %10428 = vrot.lane.b32.xlu2 %v8331_v18, %s11535_s23  ;;  %v8220_v38 = vrot.slane %v18341_v21, 4  ;;  %v8144_v60 = vrot.slane %v23013_v5, 4  ;;  %v23076_v45 = vrot.slane %v23035_v6, 4  ;;  %v8356_v58 = vrot.slane %v18173_v44, 4  ;;  %v18498_v41 = vpop.permute.xlu0 %10252 }
 0x531   : > { %v10971_v61 = vsel %vm21669_vm14, %v10966_v14, %v17753_v17  ;;  %v8368_v26 = vrot.slane %v18262_v9, 4  ;;  %v8444_v12 = vrot.slane %v8401_v39, 4  ;;  %v8442_v29 = vrot.slane %v8425_v32, 4 }
 0x532   : > { %v8157_v31 = vsel %vm246_vm0, %v23036_v23, %v23076_v45  ;;  %v18500_v21 = vpop.permute.xlu2 %10298  ;;  %v18503_v5 = vperm.slane %v8233_v20, %v11741_v28  ;;  %v8290_v6 = vrot.slane %v18471_v51, 4  ;;  %v8315_v23 = vsel %vm246_vm0, %v8314_v43, %v18474_v42  ;;  %v23082_v45 = vld [vmem:[#allocation220_spill] sm:$0xff] }
 0x533   : > { %v18509_v44 = vperm.slane %v8133_v0, %v11741_v28  ;;  %v8456_v17 = vrot.slane %v18272_v1, 4  ;;  %v8468_v9 = vrot.slane %v18249_v15, 4  ;;  %v8121_v37 = vsel %vm246_vm0, %v23011_v4, %v8120_v46 }
 0x534   : > { %v18516_v33 = vperm.slane %v8157_v31, %v11741_v28  ;;  %v8221_v2 = vsel %vm246_vm0, %v18316_v16, %v8220_v38  ;;  %v8145_v40 = vsel %vm246_vm0, %v23014_v54, %v8144_v60  ;;  %v8357_v10 = vsel %vm246_vm0, %v23077_v25, %v8356_v58  ;;  %v23081_v38 = vld [vmem:[#allocation222_spill] sm:$0xff]  ;;  %v23084_v58 = vld [vmem:[#allocation219_spill] sm:$0xff] }
 0x535   : > { %v18526_v1 = vperm.slane %v23078_v52, %v11741_v28  ;;  %v8445_v15 = vsel %vm246_vm0, %v8425_v32, %v8444_v12  ;;  %v18530_v4 = vperm.slane %v8315_v23, %v11781_v3  ;;  %v8344_v14 = vrot.slane %v23079_v50, 4  ;;  %v23087_v50 = vld [vmem:[#allocation8_spill] sm:$0xff] }
 0x536   : > { %v8369_v16 = vsel %vm246_vm0, %v23059_v49, %v8368_v26  ;;  %10446 = vrot.lane.b32.xlu1 %v8445_v15, %s11536_s24  ;;  %v8443_v54 = vsel %vm246_vm0, %v8442_v29, %v8401_v39  ;;  %v8291_v7 = vsel %vm246_vm0, %v8290_v6, %v18503_v5  ;;  %v18540_v47 = vperm.slane %v8121_v37, %v11741_v28  ;;  %v23080_v39 = vld [vmem:[#allocation126_spill] sm:$0xff]  ;;  %v18554_v18 = vpop.permute.xlu1 %10282 }
 0x537   : > { %v8178_v32 = vrot.slane %v18509_v44, 4  ;;  %vm21693_vm14 = vcmask 523264   ;;  %10430 = vrot.lane.b32.xlu0 %v8443_v54, %s11535_s23  ;;  %v18545_v35 = vperm.slane %v8145_v40, %v11741_v28  ;;  %v8202_v49 = vrot.slane %v18516_v33, 4  ;;  %s23343_s23 = smov 68  }
 0x538   : > { %v18549_v43 = vperm.slane %v8357_v10, %v11741_v28  ;;  %v8469_v46 = vsel %vm246_vm0, %v23080_v39, %v8468_v9  ;;  %10442 = vrot.lane.b32.xlu2 %v8221_v2, %s11536_s24  ;;  %v18557_v20 = vperm.slane %v8369_v16, %v11741_v28  ;;  %v8426_v0 = vrot.slane %v18526_v1, 4  ;;  %v18565_v12 = vpop.permute.xlu0 %10266  ;;  %v23085_v9 = vld [vmem:[#allocation17_spill] sm:$0xff]  ;;  %v23086_v2 = vld [vmem:[#allocation140_spill] sm:$0xff] }
 0x539   : > { %v8480_v60 = vrot.slane %v23081_v38, 4  ;;  %v23083_v31 = vrot.slane %v23082_v45, 4  ;;  %v18568_v29 = vperm.slane %v8291_v7, %v11781_v3  ;;  %v8334_v6 = vrot.slane %v18530_v4, 4  ;;  %v23088_v16 = vld [vmem:[#allocation221_spill] sm:$0xff] }
 0x53a   : > { %v8332_v23 = vrot.slane %v18427_v27, 4  ;;  %v8345_v37 = vsel %vm246_vm0, %v23085_v9, %v8344_v14  ;;  %v10973_v40 = vsel %vm21672_vm15, %v18461_v62, %v23086_v2  ;;  %v18577_v25 = vpop.permute.xlu2 %10304  ;;  %v8556_v10 = vrot.slane %v18421_v11, 4  ;;  %v23089_v39 = vld [vmem:[#allocation117_spill] sm:$0xff]  ;;  %v23095_v2 = vld [vmem:[#allocation119_spill] sm:$0xff] }
 0x53b   : > { %v8493_v26 = vsel %vm246_vm0, %v23084_v58, %v23083_v31  ;;  %v8179_v52 = vsel %vm246_vm0, %v8178_v32, %v18540_v47  ;;  %v18583_v15 = vperm.slane %v8469_v46, %v11741_v28  ;;  %v10976_v27 = vsel %vm21672_vm15, %v10971_v61, %v23087_v50  ;;  %v23090_v46 = vld [vmem:[#allocation145_spill] sm:$0xff] }
 0x53c   : > { %v8203_v14 = vsel %vm246_vm0, %v8202_v49, %v18545_v35  ;;  %v8457_v54 = vsel %vm246_vm0, %v23088_v16, %v8456_v17  ;;  %v18592_v62 = vperm.slane %v8493_v26, %v11741_v28  ;;  %v18595_v11 = vperm.slane %v8345_v37, %v11741_v28 }
 0x53d   : > { %v8402_v7 = vrot.slane %v18549_v43, 4  ;;  %v8427_v32 = vsel %vm246_vm0, %v8426_v0, %v18557_v20  ;;  %v8481_v61 = vsel %vm246_vm0, %v23089_v39, %v8480_v60  ;;  %v10975_v49 = vsel %vm21672_vm15, %v18454_v34, %v23090_v46  ;;  %v23098_v39 = vld [vmem:[#allocation25_spill] sm:$0xff] }
 0x53e   : > { %v8335_v17 = vsel %vm246_vm0, %v8334_v6, %v18568_v29  ;;  %v8333_v38 = vsel %vm246_vm0, %v18405_v13, %v8332_v23  ;;  %v8185_v45 = vperm.slane %v8179_v52, %v11781_v3  ;;  %v8557_v0 = vsel %vm246_vm0, %v18391_v22, %v8556_v10  ;;  %v23091_v22 = vld [vmem:[#allocation184_spill] sm:$0xff] }
 0x53f   : > { %10460 = vrot.lane.b32.xlu1 %v8335_v17, %s11537_s25  ;;  %v8209_v31 = vperm.slane %v8203_v14, %v11781_v3  ;;  %v18615_v60 = vperm.slane %v8457_v54, %v11741_v28  ;;  %v8514_v34 = vrot.slane %v18583_v15, 4  ;;  %10444 = vrot.lane.b32.xlu0 %v8333_v38, %s11536_s24  ;;  %v18620_v58 = vperm.slane %v8427_v32, %v11781_v3  ;;  %v23092_v23 = vld [vmem:[#allocation20_spill] sm:$0xff]  ;;  %v18637_v52 = vpop.permute.xlu1 %10288 }
 0x540   : > { %v18623_v13 = vperm.slane %v8481_v61, %v11741_v28  ;;  %v8538_v26 = vrot.slane %v18592_v62, 4  ;;  %v8438_v6 = vrot.slane %v18387_v30, 4  ;;  %v23093_v9 = vrot.slane %v23092_v23, 4  ;;  %10448 = vrot.lane.b32.xlu2 %v8557_v0, %s11536_s24  ;;  %v23096_v14 = vld [vmem:[#allocation60_spill] sm:$0xff]  ;;  %v18643_v16 = vpop.permute.xlu0 %10272  ;;  %v23099_v61 = vld [vmem:[#allocation22_spill] sm:$0xff]  ;;  %s23357_s24 = smov 72  }
 0x541   : > { %vm21690_vm13 = vcmask 556032   ;;  %v10974_v10 = vsel %vm21672_vm15, %v18448_v56, %v23095_v2  ;;  %v8403_v50 = vsel %vm246_vm0, %v8402_v7, %v18595_v11  ;;  %v10980_v30 = vsel %vm21693_vm14, %v10975_v49, %v23096_v14  ;;  %v23103_v2 = vld [vmem:[#allocation58_spill] sm:$0xff]  ;;  %v23104_v14 = vld [vmem:[#allocation76_spill] sm:$0xff] }
 0x542   : > { %v18631_v37 = vsel %vm246_vm0, %v23093_v9, %v23091_v22  ;;  %vm21686_vm12 = vcmask 588800   ;;  %v8224_v54 = vrot.slane %v8185_v45, 4  ;;  %v18647_v32 = vsel %vm246_vm0, %v8438_v6, %v18346_v59  ;;  %v18653_v17 = vpop.permute.xlu2 %10318  ;;  %v23102_v9 = vld [vmem:[#allocation130_spill] sm:$0xff] }
 0x543   : > { %23094 = vst [vmem:[#allocation143_spill] sm:$0xff] %v18631_v37  ;;  %v10978_v56 = vsel %vm21693_vm14, %v10973_v40, %v23098_v39  ;;  %v10981_v46 = vsel %vm21693_vm14, %v10976_v27, %v23099_v61  ;;  %v8222_v7 = vrot.slane %v8209_v31, 4  ;;  %v8515_v49 = vsel %vm246_vm0, %v8514_v34, %v18615_v60  ;;  %v23100_v40 = vld [vmem:[#allocation36_spill] sm:$0xff]  ;;  %v23101_v27 = vld [vmem:[#allocation146_spill] sm:$0xff] }
 0x544   : > { %23097 = vst [vmem:[#allocation92_spill] sm:$0xff] %v18647_v32  ;;  %v18658_v38 = vperm.slane %v8403_v50, %v11781_v3  ;;  %v8446_v0 = vrot.slane %v18620_v58, 4  ;;  %v8539_v59 = vsel %vm246_vm0, %v8538_v26, %v18623_v13  ;;  %v8214_v6 = vrot.slane %v18366_v53, 4  ;;  %v23156_v32 = vld [vmem:[#allocation235_spill] sm:$0xff] }
 0x545   : > { %v10979_v22 = vsel %vm21693_vm14, %v10974_v10, %v23100_v40  ;;  %v10983_v23 = vsel %vm21690_vm13, %v10978_v56, %v23101_v27  ;;  %vm21679_vm15 = vcmask 621568   ;;  %v10985_v34 = vsel %vm21690_vm13, %v10980_v30, %v23102_v9  ;;  %v23105_v30 = vld [vmem:[#allocation16_spill] sm:$0xff]  ;;  %v23108_v27 = vld [vmem:[#allocation18_spill] sm:$0xff] }
 0x546   : > { %v10986_v50 = vsel %vm21690_vm13, %v10981_v46, %v23103_v2  ;;  %v10990_v39 = vsel %vm21686_vm12, %v10985_v34, %v23104_v14  ;;  %v8225_v26 = vsel %vm246_vm0, %v8209_v31, %v8224_v54  ;;  %v8521_v53 = vperm.slane %v8515_v49, %v11781_v3  ;;  %v23106_v54 = vld [vmem:[#allocation15_spill] sm:$0xff] }
 0x547   : > { %vm21674_vm11 = vcmask 654336   ;;  %10474 = vrot.lane.b32.xlu1 %v8225_v26, %s11538_s26  ;;  %v8223_v10 = vsel %vm246_vm0, %v8222_v7, %v8185_v45  ;;  %v8545_v56 = vperm.slane %v8539_v59, %v11781_v3  ;;  %v8428_v61 = vrot.slane %v18557_v20, 4  ;;  %v23109_v7 = vld [vmem:[#allocation153_spill] sm:$0xff]  ;;  %v18697_v9 = vpop.permute.xlu1 %10302 }
 0x548   : > { %v10984_v40 = vsel %vm21690_vm13, %v10979_v22, %v23105_v30  ;;  %10458 = vrot.lane.b32.xlu0 %v8223_v10, %s11537_s25  ;;  %v8447_v46 = vsel %vm246_vm0, %v8446_v0, %v18658_v38  ;;  %v8204_v31 = vrot.slane %v18545_v35, 4  ;;  %v18688_v49 = vsel %vm246_vm0, %v8214_v6, %v23106_v54  ;;  %v23110_v59 = vld [vmem:[#allocation141_spill] sm:$0xff]  ;;  %v18700_v35 = vpop.permute.xlu0 %10286  ;;  %v23147_v30 = vld [vmem:[#allocation28_spill] sm:$0xff] }
 0x549   : > { %23107 = vst [vmem:[#allocation197_spill] sm:$0xff] %v18688_v49  ;;  %v10988_v45 = vsel %vm21686_vm12, %v10983_v23, %v23108_v27  ;;  %v10991_v20 = vsel %vm21686_vm12, %v10986_v50, %v23109_v7  ;;  %v10995_v22 = vsel %vm21679_vm15, %v10990_v39, %v23110_v59  ;;  %10462 = vrot.lane.b32.xlu2 %v8447_v46, %s11537_s25  ;;  %v8550_v0 = vrot.slane %v18457_v24, 4  ;;  %v23113_v10 = vld [vmem:[#allocation45_spill] sm:$0xff]  ;;  %v23114_v46 = vld [vmem:[#allocation50_spill] sm:$0xff] }
 0x54a   : > { %v8560_v34 = vrot.slane %v8521_v53, 4  ;;  %v8336_v6 = vrot.slane %v18568_v29, 4  ;;  %v8404_v2 = vrot.slane %v18595_v11, 4  ;;  %v8292_v23 = vrot.slane %v18503_v5, 4  ;;  %v18705_v14 = vpop.permute.xlu2 %10332  ;;  %v23115_v54 = vld [vmem:[#allocation9_spill] sm:$0xff] }
 0x54b   : > { %23111 = vst [vmem:[#allocation173_spill] sm:$0xff] %v18705_v14  ;;  %v8558_v50 = vrot.slane %v8545_v56, 4  ;;  %v8429_v39 = vsel %vm246_vm0, %v18526_v1, %v8428_v61  ;;  %v8180_v26 = vrot.slane %v18540_v47, 4  ;;  %v18712_v24 = vsel %vm246_vm0, %v8550_v0, %v18395_v57  ;;  %v23116_v1 = vld [vmem:[#allocation149_spill] sm:$0xff]  ;;  %v23117_v61 = vld [vmem:[#allocation144_spill] sm:$0xff] }
 0x54c   : > { %23112 = vst [vmem:[#allocation10_spill] sm:$0xff] %v18712_v24  ;;  %v10989_v29 = vsel %vm21686_vm12, %v10984_v40, %v23114_v46  ;;  %v8205_v5 = vsel %vm246_vm0, %v18516_v33, %v8204_v31  ;;  %v8316_v11 = vrot.slane %v18474_v42, 4  ;;  %v10993_v27 = vsel %vm21679_vm15, %v10988_v45, %v23115_v54  ;;  %v23148_v24 = vld [vmem:[#allocation244_spill] sm:$0xff] }
 0x54d   : > { %v10996_v47 = vsel %vm21679_vm15, %v10991_v20, %v23116_v1  ;;  %v18726_v57 = vsel %vm21674_vm11, %v10995_v22, %v23117_v61  ;;  %v8540_v7 = vrot.slane %v18623_v13, 4  ;;  %v8561_v59 = vsel %vm246_vm0, %v8545_v56, %v8560_v34  ;;  %v23118_v20 = vld [vmem:[#allocation225_spill] sm:$0xff]  ;;  %v23120_v22 = vld [vmem:[#allocation151_spill] sm:$0xff] }
 0x54e   : > { %v8337_v40 = vsel %vm246_vm0, %v18530_v4, %v8336_v6  ;;  %v18733_v33 = vperm.slane %v8429_v39, %v11781_v3  ;;  %v8293_v42 = vsel %vm246_vm0, %v18471_v51, %v8292_v23  ;;  %v8559_v31 = vsel %vm246_vm0, %v8558_v50, %v8521_v53  ;;  %v23121_v53 = vld [vmem:[#allocation226_spill] sm:$0xff]  ;;  %v23122_v34 = vld [vmem:[#allocation147_spill] sm:$0xff]  ;;  %v23128_v39 = vld [vmem:[#allocation148_spill] sm:$0xff] }
 0x54f   : > { %10480 = vrot.lane.b32.xlu1 %v8561_v59, %s11538_s26  ;;  %v8405_v45 = vsel %vm246_vm0, %v18549_v43, %v8404_v2  ;;  %v8181_v13 = vsel %vm246_vm0, %v18509_v44, %v8180_v26  ;;  %v18744_v56 = vperm.slane %v8205_v5, %v11781_v3  ;;  %v8317_v4 = vsel %vm246_vm0, %v18438_v55, %v8316_v11  ;;  %v23125_v44 = vld [vmem:[#allocation14_spill] sm:$0xff]  ;;  %v23126_v2 = vld [vmem:[#allocation187_spill] sm:$0xff]  ;;  %v18768_v26 = vpop.permute.xlu1 %10316 }
 0x550   : > { %10464 = vrot.lane.b32.xlu0 %v8559_v31, %s11537_s25  ;;  %v23119_v51 = vrot.slane %v23118_v20, 4  ;;  %v23123_v43 = vrot.slane %v23122_v34, 4  ;;  %v23127_v23 = vrot.slane %v23126_v2, 4  ;;  %v10994_v55 = vsel %vm21679_vm15, %v10989_v29, %v23128_v39  ;;  %23129 = vst [vmem:[#allocation224_spill] sm:$0xff] %v18768_v26  ;;  %v18774_v54 = vpop.permute.xlu0 %10300  ;;  %v23136_v34 = vld [vmem:[#allocation37_spill] sm:$0xff] }
 0x551   : > { %10476 = vrot.lane.b32.xlu2 %v8337_v40, %s11538_s26  ;;  %v8301_v46 = vperm.slane %v8293_v42, %v11781_v3  ;;  %v8516_v5 = vrot.slane %v18615_v60, 4  ;;  %v8541_v11 = vsel %vm246_vm0, %v18592_v62, %v8540_v7  ;;  %v18777_v1 = vperm.slane %v8405_v45, %v11781_v3  ;;  %v23131_v62 = vld [vmem:[#allocation35_spill] sm:$0xff]  ;;  %v23138_v2 = vld [vmem:[#allocation157_spill] sm:$0xff] }
 0x552   : > { %v18753_v0 = vsel %vm246_vm0, %v23120_v22, %v23119_v51  ;;  %v18759_v6 = vsel %vm246_vm0, %v23123_v43, %v23121_v53  ;;  %v8603_v50 = vsel %vm246_vm0, %v23127_v23, %v23125_v44  ;;  %v8450_v61 = vrot.slane %v18733_v33, 4  ;;  %v18784_v40 = vpop.permute.xlu2 %10346  ;;  %v23135_v53 = vld [vmem:[#allocation193_spill] sm:$0xff] }
 0x553   : > { %23124 = vst [vmem:[#allocation54_spill] sm:$0xff] %v18759_v6  ;;  %v8448_v29 = vrot.slane %v18658_v38, 4  ;;  %v18782_v59 = vperm.slane %v8181_v13, %v11781_v3  ;;  %v8325_v42 = vperm.slane %v8317_v4, %v11781_v3  ;;  %v8566_v60 = vrot.slane %v18759_v6, 4  ;;  %v23160_v6 = vld [vmem:[#allocation228_spill] sm:$0xff] }
 0x554   : > { %23130 = vst [vmem:[#allocation127_spill] sm:$0xff] %v18784_v40  ;;  %v23132_v7 = vrot.slane %v23131_v62, 4  ;;  %v18793_v45 = vperm.slane %v8603_v50, %v11741_v28  ;;  %v8226_v51 = vrot.slane %v18744_v56, 4  ;;  %v18797_v38 = vperm.slane %v8541_v11, %v11781_v3  ;;  %v23139_v50 = vld [vmem:[#allocation195_spill] sm:$0xff]  ;;  %v23161_v62 = vld [vmem:[#allocation188_spill] sm:$0xff]  ;;  %v23174_v40 = vld [vmem:[#allocation238_spill] sm:$0xff] }
 0x555   : > { %v23134_v13 = vrot.slane %v23120_v22, 4  ;;  %v23137_v43 = vrot.slane %v23136_v34, 4  ;;  %v18811_v23 = vsel %vm21674_vm11, %v10994_v55, %v23138_v2  ;;  %v18815_v39 = vsel %vm21674_vm11, %v10993_v27, %v23139_v50  ;;  %v23153_v50 = vld [vmem:[#allocation88_spill] sm:$0xff] }
 0x556   : > { %v8579_v31 = vsel %vm246_vm0, %v23132_v7, %v18753_v0  ;;  %23133 = vst [vmem:[#allocation160_spill] sm:$0xff] %v18793_v45  ;;  %v8340_v11 = vrot.slane %v8301_v46, 4  ;;  %v8517_v22 = vsel %vm246_vm0, %v18583_v15, %v8516_v5  ;;  %v8451_v7 = vsel %vm246_vm0, %v8450_v61, %v18777_v1  ;;  %v23141_v61 = vld [vmem:[#allocation192_spill] sm:$0xff] }
 0x557   : > { %v18803_v4 = vsel %vm246_vm0, %v23134_v13, %v23118_v20  ;;  %v8591_v44 = vsel %vm246_vm0, %v23137_v43, %v23135_v53  ;;  %v18821_v20 = vsel %vm21674_vm11, %v10996_v47, %v18361_v63  ;;  %v8449_v13 = vsel %vm246_vm0, %v18620_v58, %v8448_v29  ;;  %10494 = vrot.lane.b32.xlu1 %v8451_v7, %s11539_s27  ;;  %v23142_v29 = vld [vmem:[#allocation53_spill] sm:$0xff]  ;;  %v23144_v7 = vld [vmem:[#allocation142_spill] sm:$0xff] }
 0x558   : > { %v18828_v55 = vperm.slane %v8579_v31, %v11741_v28  ;;  %v8338_v27 = vrot.slane %v8325_v42, 4  ;;  %v8567_v43 = vsel %vm246_vm0, %v8566_v60, %v18803_v4  ;;  %v18834_v15 = vperm.slane %v8591_v44, %v11741_v28  ;;  %10478 = vrot.lane.b32.xlu0 %v8449_v13, %s11538_s26  ;;  %v18849_v44 = vpop.permute.xlu1 %10330  ;;  %v23146_v13 = vld [vmem:[#allocation194_spill] sm:$0xff]  ;;  %s23376_s26 = smov 76  }
 0x559   : > { %v8638_v63 = vrot.slane %v18793_v45, 4  ;;  %v8227_v47 = vsel %vm246_vm0, %v8226_v51, %v18782_v59  ;;  %v18841_v58 = vperm.slane %v8517_v22, %v11781_v3  ;;  %v8562_v5 = vrot.slane %v18797_v38, 4 }
 0x55a   : > { %23140 = vst [vmem:[#allocation82_spill] sm:$0xff] %v18828_v55  ;;  %v23143_v31 = vrot.slane %v23142_v29, 4  ;;  %10490 = vrot.lane.b32.xlu2 %v8227_v47, %s11539_s27  ;;  %v8341_v2 = vsel %vm246_vm0, %v8325_v42, %v8340_v11  ;;  %v23145_v51 = vrot.slane %v23144_v7, 4  ;;  %v23149_v49 = vrot.slane %v23148_v24, 4  ;;  %v23151_v11 = vld [vmem:[#allocation30_spill] sm:$0xff] }
 0x55b   : > { %v18868_v47 = vperm.slane %v8567_v43, %v11741_v28  ;;  %v8614_v42 = vrot.slane %v18828_v55, 4  ;;  %v23157_v34 = vrot.slane %v23156_v32, 4  ;;  %vm21688_vm11 = vcmask 687104  }
 0x55c   : > { %v8939_v60 = vsel %vm246_vm0, %v23143_v31, %v23141_v61  ;;  %v18857_v22 = vsel %vm246_vm0, %v23146_v13, %v23145_v51  ;;  %v18863_v29 = vsel %vm246_vm0, %v23149_v49, %v23147_v30  ;;  %v18865_v61 = vpop.permute.xlu0 %10314  ;;  %v23152_v31 = vrot.slane %v23151_v11, 4  ;;  %v23155_v51 = vld [vmem:[#allocation234_spill] sm:$0xff]  ;;  %v18881_v49 = vpop.permute.xlu2 %10352 }
 0x55d   : > { %23150 = vst [vmem:[#allocation70_spill] sm:$0xff] %v18863_v29  ;;  %v8715_v24 = vsel %vm246_vm0, %v23157_v34, %v23155_v51  ;;  %v8339_v30 = vsel %vm246_vm0, %v8338_v27, %v8301_v46  ;;  %v8639_v43 = vsel %vm246_vm0, %v8638_v63, %v18834_v15  ;;  %v18887_v53 = vperm.slane %v8939_v60, %v11741_v28  ;;  %v23164_v51 = vld [vmem:[#allocation115_spill] sm:$0xff]  ;;  %v23166_v63 = vld [vmem:[#allocation38_spill] sm:$0xff] }
 0x55e   : > { %v18875_v37 = vsel %vm246_vm0, %v23153_v50, %v23152_v31  ;;  %23158 = vst [vmem:[#allocation128_spill] sm:$0xff] %v18881_v49  ;;  %v23162_v31 = vrot.slane %v23161_v62, 4  ;;  %v8563_v34 = vsel %vm246_vm0, %v8562_v5, %v18841_v58  ;;  %v8902_v32 = vrot.slane %v18863_v29, 4  ;;  %v23167_v49 = vld [vmem:[#allocation196_spill] sm:$0xff] }
 0x55f   : > { %23154 = vst [vmem:[#allocation204_spill] sm:$0xff] %v18875_v37  ;;  %v23165_v46 = vrot.slane %v23164_v51, 4  ;;  %v23168_v60 = vrot.slane %v23167_v49, 4  ;;  %v23169_v62 = vrot.slane %v23146_v13, 4  ;;  %v23170_v5 = vld [vmem:[#allocation232_spill] sm:$0xff]  ;;  %v18917_v51 = vperm.slane %v8715_v24, %v11741_v28  ;;  %10508 = vrot.lane.b32.xlu1 %v8341_v2, %s11540_s28 }
 0x560   : > { %23159 = vst [vmem:[#allocation21_spill] sm:$0xff] %v18887_v53  ;;  %v18893_v14 = vsel %vm246_vm0, %v23162_v31, %v23160_v6  ;;  %v23171_v31 = vrot.slane %v23170_v5, 4  ;;  %vm21687_vm15 = vcmask 719872   ;;  %v8615_v13 = vsel %vm246_vm0, %v8614_v42, %v18868_v47  ;;  %10492 = vrot.lane.b32.xlu0 %v8339_v30, %s11539_s27 }
 0x561   : > { %23163 = vst [vmem:[#allocation198_spill] sm:$0xff] %v18893_v14  ;;  %v8915_v27 = vsel %vm246_vm0, %v23165_v46, %v18857_v22  ;;  %v8927_v55 = vsel %vm246_vm0, %v23168_v60, %v23166_v63  ;;  %v18910_v6 = vsel %vm246_vm0, %v23169_v62, %v23144_v7  ;;  %v23172_v46 = vld [vmem:[#allocation230_spill] sm:$0xff]  ;;  %v18928_v7 = vperm.slane %v8639_v43, %v11781_v3 }
 0x562   : > { %v8691_v29 = vsel %vm246_vm0, %v23171_v31, %v18875_v37  ;;  %v23173_v45 = vrot.slane %v23172_v46, 4  ;;  %v8678_v60 = vrot.slane %v18893_v14, 4  ;;  %v23176_v62 = vld [vmem:[#allocation114_spill] sm:$0xff]  ;;  %v23177_v31 = vld [vmem:[#allocation237_spill] sm:$0xff]  ;;  %v18937_v5 = vperm.slane %v8915_v27, %v11741_v28  ;;  %v23182_v27 = vld [vmem:[#allocation164_spill] sm:$0xff]  ;;  %10496 = vrot.lane.b32.xlu2 %v8563_v34, %s11539_s27  ;;  %s23387_s27 = smov 80  }
 0x563   : > { %v23178_v63 = vrot.slane %v23177_v31, 4  ;;  %v8974_v42 = vrot.slane %v18887_v53, 4  ;;  %v23181_v43 = vrot.slane %v23153_v50, 4  ;;  %v18953_v2 = vperm.slane %v8691_v29, %v11741_v28  ;;  %v18961_v50 = vpop.permute.xlu1 %10336  ;;  %v23190_v37 = vld [vmem:[#allocation231_spill] sm:$0xff] }
 0x564   : > { %v18923_v49 = vsel %vm246_vm0, %v23174_v40, %v23173_v45  ;;  %23179 = vst [vmem:[#allocation72_spill] sm:$0xff] %v18937_v5  ;;  %v18940_v45 = vperm.slane %v8927_v55, %v11741_v28  ;;  %v8790_v31 = vrot.slane %v23182_v27, 4  ;;  %v23183_v55 = vld [vmem:[#allocation240_spill] sm:$0xff]  ;;  %v8750_v30 = vrot.slane %v18917_v51, 4  ;;  %v23188_v27 = vld [vmem:[#allocation241_spill] sm:$0xff] }
 0x565   : > { %23175 = vst [vmem:[#allocation124_spill] sm:$0xff] %v18923_v49  ;;  %v8703_v24 = vsel %vm246_vm0, %v23178_v63, %v23176_v62  ;;  %v18947_v14 = vsel %vm246_vm0, %v23181_v43, %v23151_v11  ;;  %v8903_v63 = vsel %vm246_vm0, %v8902_v32, %v18910_v6  ;;  %v23184_v62 = vrot.slane %v23183_v55, 4  ;;  %v23187_v43 = vld [vmem:[#allocation239_spill] sm:$0xff] }
 0x566   : > { %23180 = vst [vmem:[#allocation27_spill] sm:$0xff] %v18940_v45  ;;  %v18964_v11 = vperm.slane %v8703_v24, %v11741_v28  ;;  %v23186_v32 = vrot.slane %v23174_v40, 4  ;;  %v23189_v55 = vrot.slane %v23188_v27, 4  ;;  %v18980_v34 = vperm.slane %v8615_v13, %v11781_v3  ;;  %v23191_v40 = vld [vmem:[#allocation236_spill] sm:$0xff] }
 0x567   : > { %v8803_v53 = vsel %vm246_vm0, %v23184_v62, %v18923_v49  ;;  %23185 = vst [vmem:[#allocation83_spill] sm:$0xff] %v18961_v50  ;;  %v18977_v49 = vpop.permute.xlu0 %10320  ;;  %v8662_v24 = vrot.slane %v18928_v7, 4  ;;  %v8679_v50 = vsel %vm246_vm0, %v8678_v60, %v18947_v14  ;;  %v23192_v26 = vrot.slane %v23191_v40, 4  ;;  %v23194_v60 = vld [vmem:[#allocation32_spill] sm:$0xff] }
 0x568   : > { %v18971_v29 = vsel %vm246_vm0, %v23186_v32, %v23172_v46  ;;  %v8827_v62 = vsel %vm246_vm0, %v23189_v55, %v23187_v43  ;;  %v18991_v32 = vpop.permute.xlu2 %10366  ;;  %v18994_v27 = vperm.slane %v8903_v63, %v11741_v28  ;;  %v8950_v55 = vrot.slane %v18937_v5, 4  ;;  %v23195_v5 = vld [vmem:[#allocation242_spill] sm:$0xff] }
 0x569   : > { %v18989_v46 = vsel %vm246_vm0, %v23192_v26, %v23190_v37  ;;  %23193 = vst [vmem:[#allocation97_spill] sm:$0xff] %v18991_v32  ;;  %v8975_v13 = vsel %vm246_vm0, %v8974_v42, %v18940_v45  ;;  %v19000_v43 = vperm.slane %v8803_v53, %v11741_v28  ;;  %v11003_v40 = vsel %vm21688_vm11, %v18815_v39, %v23194_v60 }
 0x56a   : > { %v8452_v37 = vrot.slane %v18777_v1, 4  ;;  %v8791_v26 = vsel %vm246_vm0, %v8790_v31, %v18971_v29  ;;  %v19009_v63 = vperm.slane %v8827_v62, %v11741_v28  ;;  %v19012_v32 = vperm.slane %v8679_v50, %v11741_v28  ;;  %v23197_v1 = vld [vmem:[#allocation121_spill] sm:$0xff] }
 0x56b   : > { %v8726_v42 = vrot.slane %v18953_v2, 4  ;;  %v8751_v53 = vsel %vm246_vm0, %v8750_v30, %v18964_v11  ;;  %v23196_v45 = vrot.slane %v23195_v5, 4  ;;  %v11006_v31 = vsel %vm21688_vm11, %v18821_v20, %v23197_v1 }
 0x56c   : > { %v11005_v62 = vsel %vm21688_vm11, %v18726_v57, %v18418_v8  ;;  %v8663_v50 = vsel %vm246_vm0, %v8662_v24, %v18980_v34  ;;  %v19030_v60 = vperm.slane %v8975_v13, %v11781_v3  ;;  %v23198_v30 = vrot.slane %v18782_v59, 4 }
 0x56d   : > { %v8815_v39 = vsel %vm246_vm0, %v23196_v45, %v18989_v46  ;;  %10522 = vrot.lane.b32.xlu1 %v8663_v50, %s11531_s18  ;;  %v8951_v20 = vsel %vm246_vm0, %v8950_v55, %v18994_v27  ;;  %v19040_v1 = vperm.slane %v8791_v26, %v11741_v28  ;;  %v8838_v8 = vrot.slane %v19000_v43, 4  ;;  %v23199_v55 = vld [vmem:[#allocation172_spill] sm:$0xff]  ;;  %v23200_v26 = vld [vmem:[#allocation185_spill] sm:$0xff] }
 0x56e   : > { %v8229_v45 = vsel %vm246_vm0, %v18744_v56, %v23198_v30  ;;  %v8453_v57 = vsel %vm246_vm0, %v18733_v33, %v8452_v37  ;;  %v19047_v24 = vperm.slane %v8751_v53, %v11781_v3  ;;  %v19050_v59 = vperm.slane %v8815_v39, %v11741_v28  ;;  %v19059_v30 = vpop.permute.xlu1 %10350 }
 0x56f   : > { %10506 = vrot.lane.b32.xlu0 %v8229_v45, %s11540_s28  ;;  %v8862_v56 = vrot.slane %v19009_v63, 4  ;;  %vm21689_vm12 = vcmask 752640   ;;  %v11004_v13 = vsel %vm21688_vm11, %v18811_v23, %v23199_v55  ;;  %v11008_v50 = vsel %vm21687_vm15, %v11003_v40, %v23200_v26  ;;  %10510 = vrot.lane.b32.xlu2 %v8453_v57, %s11540_s28  ;;  %v19067_v39 = vpop.permute.xlu0 %10334  ;;  %v23201_v57 = vld [vmem:[#allocation186_spill] sm:$0xff] }
 0x570   : > { %v8727_v33 = vsel %vm246_vm0, %v8726_v42, %v19012_v32  ;;  %v11010_v37 = vsel %vm21687_vm15, %v11005_v62, %v18416_v48  ;;  %v11009_v53 = vsel %vm21687_vm15, %v11004_v13, %v18498_v41  ;;  %v19070_v23 = vperm.slane %v8951_v20, %v11781_v3  ;;  %v19077_v42 = vpop.permute.xlu2 %10380 }
 0x571   : > { %v8998_v40 = vrot.slane %v19030_v60, 4  ;;  %v11013_v45 = vsel %vm21689_vm12, %v11008_v50, %v18565_v12  ;;  %v11011_v55 = vsel %vm21687_vm15, %v11006_v31, %v23201_v57  ;;  %v8564_v48 = vrot.slane %v18841_v58, 4  ;;  %v23202_v58 = vld [vmem:[#allocation44_spill] sm:$0xff] }
 0x572   : > { %v8839_v41 = vsel %vm246_vm0, %v8838_v8, %v19040_v1  ;;  %v11016_v62 = vsel %vm21689_vm12, %v11011_v55, %v18643_v16  ;;  %v19085_v20 = vperm.slane %v8727_v33, %v11781_v3  ;;  %v8774_v13 = vrot.slane %v19047_v24, 4 }
 0x573   : > { %v8863_v12 = vsel %vm246_vm0, %v8862_v56, %v19050_v59  ;;  %v11014_v31 = vsel %vm21689_vm12, %v11009_v53, %v18486_v36  ;;  %vm21691_vm15 = vcmask 785408   ;;  %vm21692_vm11 = vcmask 818176   ;;  %v23203_v53 = vld [vmem:[#allocation56_spill] sm:$0xff] }
 0x574   : > { %v11015_v26 = vsel %vm21689_vm12, %v11010_v37, %v23202_v58  ;;  %v11018_v8 = vsel %vm21691_vm15, %v11013_v45, %v18554_v18  ;;  %v8999_v50 = vsel %vm246_vm0, %v8998_v40, %v19070_v23  ;;  %v8845_v33 = vperm.slane %v8839_v41, %v11781_v3  ;;  %v23205_v40 = vld [vmem:[#allocation23_spill] sm:$0xff] }
 0x575   : > { %v11020_v16 = vsel %vm21691_vm15, %v11015_v26, %v18700_v35  ;;  %v11021_v56 = vsel %vm21691_vm15, %v11016_v62, %v18637_v52  ;;  %10528 = vrot.lane.b32.xlu1 %v8999_v50, %s11531_s18  ;;  %v8565_v36 = vsel %vm246_vm0, %v18797_v38, %v8564_v48  ;;  %v8869_v37 = vperm.slane %v8863_v12, %v11781_v3 }
 0x576   : > { %v8752_v18 = vrot.slane %v18964_v11, 4  ;;  %v23204_v35 = vrot.slane %v23113_v10, 4  ;;  %vm11027_vm12 = vcmask 850944   ;;  %v8775_v52 = vsel %vm246_vm0, %v8774_v13, %v19085_v20  ;;  %v19125_v48 = vpop.permute.xlu1 %10364 }
 0x577   : > { %10512 = vrot.lane.b32.xlu0 %v8565_v36, %s11540_s28  ;;  %v8326_v57 = vrot.slane %v23205_v40, 4  ;;  %v11025_v38 = vsel %vm21692_vm11, %v11020_v16, %v18697_v9  ;;  %v11019_v11 = vsel %vm21691_vm15, %v11014_v31, %v18429_v19  ;;  %vm11032_vm13 = vcmask 883712   ;;  %10524 = vrot.lane.b32.xlu2 %v8775_v52, %s11531_s18  ;;  %v19131_v12 = vpop.permute.xlu0 %10348  ;;  %v23207_v40 = vld [vmem:[#allocation224_spill] sm:$0xff]  ;;  %s23405_s28 = smov 84  }
 0x578   : > { %v19112_v45 = vsel %vm246_vm0, %v23204_v35, %v23203_v53  ;;  %v11023_v55 = vsel %vm21692_vm11, %v11018_v8, %v18500_v21  ;;  %v11026_v41 = vsel %vm21692_vm11, %v11021_v56, %v18577_v25  ;;  %v8568_v62 = vrot.slane %v18803_v4, 4  ;;  %v10395_v31 = vpop.permute.xlu2 %10394  ;;  %v23222_v4 = vld [vmem:[#allocation49_spill] sm:$0xff] }
 0x579   : > { %v8580_v13 = vrot.slane %v18753_v0, 4  ;;  %v8888_v9 = vrot.slane %v8845_v33, 4  ;;  %v11028_v19 = vsel %vm11027_vm12, %v11023_v55, %v18865_v61  ;;  %v8886_v58 = vrot.slane %v8869_v37, 4  ;;  %v23206_v0 = vld [vmem:[#allocation65_spill] sm:$0xff]  ;;  %v23209_v55 = vld [vmem:[#allocation160_spill] sm:$0xff] }
 0x57a   : > { %v8728_v21 = vrot.slane %v19012_v32, 4  ;;  %v8753_v26 = vsel %vm246_vm0, %v18917_v51, %v8752_v18  ;;  %vm11037_vm15 = vcmask 916480   ;;  %v11030_v25 = vsel %vm11027_vm12, %v11025_v38, %v18653_v17 }
 0x57b   : > { %v8664_v8 = vrot.slane %v18980_v34, 4  ;;  %v19143_v16 = vsel %vm246_vm0, %v8326_v57, %v23206_v0  ;;  %v11024_v61 = vsel %vm21692_vm11, %v11019_v11, %v18774_v54  ;;  %v8904_v50 = vrot.slane %v18910_v6, 4 }
 0x57c   : > { %v8916_v32 = vrot.slane %v18857_v22, 4  ;;  %v8680_v56 = vrot.slane %v18947_v14, 4  ;;  %v11033_v51 = vsel %vm11032_vm13, %v11028_v19, %v18849_v44  ;;  %v8889_v17 = vsel %vm246_vm0, %v8869_v37, %v8888_v9  ;;  %v23208_v37 = vld [vmem:[#allocation127_spill] sm:$0xff] }
 0x57d   : > { %v19154_v34 = vperm.slane %v8753_v26, %v11781_v3  ;;  %v8640_v36 = vrot.slane %v18834_v15, 4  ;;  %10542 = vrot.lane.b32.xlu1 %v8889_v17, %s11541_s29  ;;  %v8887_v54 = vsel %vm246_vm0, %v8886_v58, %v8845_v33  ;;  %v8729_v18 = vsel %vm246_vm0, %v18953_v2, %v8728_v21  ;;  %v23210_v21 = vld [vmem:[#allocation82_spill] sm:$0xff]  ;;  %v23213_v17 = vld [vmem:[#allocation83_spill] sm:$0xff] }
 0x57e   : > { %v8616_v35 = vrot.slane %v18868_v47, 4  ;;  %v8864_v52 = vrot.slane %v19050_v59, 4  ;;  %v11029_v44 = vsel %vm11027_vm12, %v11024_v61, %v23207_v40  ;;  %vm11042_vm11 = vcmask 949248   ;;  %v10379_v33 = vpop.permute.xlu1 %10378 }
 0x57f   : > { %10526 = vrot.lane.b32.xlu0 %v8887_v54, %s11531_s18  ;;  %v8665_v15 = vsel %vm246_vm0, %v18928_v7, %v8664_v8  ;;  %vm11047_vm14 = vcmask 982016   ;;  %vm11052_vm10 = vcmask 1014784   ;;  %v11038_v2 = vsel %vm11037_vm15, %v11033_v51, %v23208_v37  ;;  %v10363_v38 = vpop.permute.xlu0 %10362  ;;  %v23212_v8 = vld [vmem:[#allocation173_spill] sm:$0xff]  ;;  %s19202_s18 = scalar_lea.vmem [#allocation5], %s11302_s12  ;;  %v23216_v37 = vld [vmem:[#allocation128_spill] sm:$0xff]  ;;  %s23317_s12 = smov 60  }
 0x580   : > { %10538 = vrot.lane.b32.xlu2 %v8665_v15, %s11541_s29  ;;  %v8776_v47 = vrot.slane %v19085_v20, 4  ;;  %v9000_v59 = vrot.slane %v19070_v23, 4  ;;  %v11031_v57 = vsel %vm11027_vm12, %v11026_v41, %v18977_v49  ;;  %v19176_v11 = vperm.slane %v8729_v18, %v11781_v3  ;;  %v10401_v58 = vpop.permute.xlu2 %10400  ;;  %v23211_v41 = vld [vmem:[#allocation204_spill] sm:$0xff]  ;;  %v23214_v18 = vld [vmem:[#allocation35_spill] sm:$0xff] }
 0x581   : > { %v8778_v7 = vrot.slane %v19154_v34, 4  ;;  %v8641_v9 = vsel %vm246_vm0, %v23209_v55, %v8640_v36  ;;  %v11043_v19 = vsel %vm11042_vm11, %v11038_v2, %v10363_v38  ;;  %v8617_v20 = vsel %vm246_vm0, %v23210_v21, %v8616_v35  ;;  %v23215_v15 = vld [vmem:[#allocation27_spill] sm:$0xff]  ;;  %v23218_v38 = vld [vmem:[#allocation54_spill] sm:$0xff] }
 0x582   : > { %v8840_v23 = vrot.slane %v19040_v1, 4  ;;  %v8865_v49 = vsel %vm246_vm0, %v19009_v63, %v8864_v52  ;;  %v8692_v26 = vrot.slane %v23211_v41, 4  ;;  %v19190_v0 = vsel %vm11032_vm13, %v11029_v44, %v23212_v8  ;;  %v23223_v41 = vld [vmem:[#allocation72_spill] sm:$0xff] }
 0x583   : > { %v8816_v61 = vrot.slane %v18989_v46, 4  ;;  %v11048_v51 = vsel %vm11047_vm14, %v11043_v19, %v10379_v33  ;;  %v11036_v36 = vsel %vm11032_vm13, %v11031_v57, %v23213_v17  ;;  %v8649_v1 = vperm.slane %v8641_v9, %v11781_v3  ;;  %v23217_v57 = vld [vmem:[#allocation124_spill] sm:$0xff] }
 0x584   : > { %v11053_v54 = vsel %vm11052_vm10, %v11048_v51, %v10395_v31  ;;  %v8581_v63 = vsel %vm246_vm0, %v23214_v18, %v8580_v13  ;;  %v8779_v46 = vsel %vm246_vm0, %v8778_v7, %v19176_v11  ;;  %v8625_v35 = vperm.slane %v8617_v20, %v11781_v3  ;;  %v23224_v51 = vld [vmem:[#allocation21_spill] sm:$0xff] }
 0x585   : > { %11181 = vst [vmem:[%s19202_s18] sm:$0xff] %v11053_v54  ;;  %v19209_v52 = vperm.slane %v8865_v49, %v11781_v3  ;;  %v8952_v31 = vrot.slane %v18994_v27, 4  ;;  %10556 = vrot.lane.b32.xlu1 %v8779_v46, %s11542_s30  ;;  %v8777_v13 = vsel %vm246_vm0, %v19047_v24, %v8776_v47  ;;  %v9001_v40 = vsel %vm246_vm0, %v19030_v60, %v9000_v59  ;;  %v23219_v47 = vld [vmem:[#allocation193_spill] sm:$0xff]  ;;  %v23225_v54 = vld [vmem:[#allocation167_spill] sm:$0xff]  ;;  %v23226_v46 = vld [vmem:[#allocation92_spill] sm:$0xff] }
 0x586   : > { %v8841_v44 = vsel %vm246_vm0, %v19000_v43, %v8840_v23  ;;  %v8976_v33 = vrot.slane %v23215_v15, 4  ;;  %v11041_v2 = vsel %vm11037_vm15, %v11036_v36, %v23216_v37  ;;  %v8804_v27 = vrot.slane %v23217_v57, 4  ;;  %v23221_v60 = vld [vmem:[#allocation37_spill] sm:$0xff]  ;;  %v10385_v55 = vpop.permute.xlu1 %10384 }
 0x587   : > { %10540 = vrot.lane.b32.xlu0 %v8777_v13, %s11541_s29  ;;  %v8569_v24 = vsel %vm246_vm0, %v23218_v38, %v8568_v62  ;;  %v23220_v7 = vrot.slane %v23219_v47, 4  ;;  %v11035_v43 = vsel %vm11032_vm13, %v11030_v25, %v19067_v39  ;;  %v8666_v9 = vrot.slane %v8649_v1, 4  ;;  %v10369_v62 = vpop.permute.xlu0 %10368 }
 0x588   : > { %10544 = vrot.lane.b32.xlu2 %v9001_v40, %s11541_s29  ;;  %v19236_v19 = vperm.slane %v8581_v63, %v11741_v28  ;;  %v19240_v21 = vperm.slane %v23222_v4, %v11741_v28  ;;  %v8668_v20 = vrot.slane %v8625_v35, 4  ;;  %v19243_v23 = vperm.slane %v8841_v44, %v11781_v3  ;;  %v10415_v8 = vpop.permute.xlu2 %10414  ;;  %v23227_v40 = vld [vmem:[#allocation240_spill] sm:$0xff]  ;;  %v23231_v4 = vld [vmem:[#allocation114_spill] sm:$0xff]  ;;  %s23441_s29 = smov 92  }
 0x589   : > { %v8593_v59 = vsel %vm246_vm0, %v23221_v60, %v23220_v7  ;;  %v8890_v49 = vrot.slane %v19209_v52, 4  ;;  %v8953_v39 = vsel %vm246_vm0, %v23223_v41, %v8952_v31  ;;  %v11046_v25 = vsel %vm11042_vm11, %v11041_v2, %v10369_v62  ;;  %v23234_v41 = vld [vmem:[#allocation235_spill] sm:$0xff] }
 0x58a   : > { %v8977_v17 = vsel %vm246_vm0, %v23224_v51, %v8976_v33  ;;  %v8792_v36 = vrot.slane %v18971_v29, 4  ;;  %v19254_v18 = vperm.slane %v23225_v54, %v11741_v28  ;;  %v11051_v63 = vsel %vm11047_vm14, %v11046_v25, %v10385_v55  ;;  %v23230_v55 = vld [vmem:[#allocation97_spill] sm:$0xff] }
 0x58b   : > { %v19259_v13 = vsel %vm10902_vm1, %v23226_v46, %v10415_v8  ;;  %v8805_v31 = vsel %vm246_vm0, %v23227_v40, %v8804_v27  ;;  %v8817_v44 = vsel %vm246_vm0, %v23195_v5, %v8816_v61  ;;  %v11056_v15 = vsel %vm11052_vm10, %v11051_v63, %v10401_v58 }
 0x58c   : > { %v8667_v29 = vsel %vm246_vm0, %v8666_v9, %v8625_v35  ;;  %v19268_v33 = vperm.slane %v8569_v24, %v11741_v28  ;;  %v8626_v37 = vrot.slane %v19236_v19, 4  ;;  %v11040_v2 = vsel %vm11037_vm15, %v11035_v43, %v19059_v30  ;;  %11187 = vst [vmem:[%s19202_s18 + $0x30] sm:$0xff] %v11056_v15  ;;  %v23228_v35 = vld [vmem:[#allocation232_spill] sm:$0xff] }
 0x58d   : > { %v8669_v57 = vsel %vm246_vm0, %v8649_v1, %v8668_v20  ;;  %v8961_v27 = vperm.slane %v8953_v39, %v11781_v3  ;;  %v8985_v38 = vperm.slane %v8977_v17, %v11781_v3  ;;  %v19279_v5 = vperm.slane %v8805_v31, %v11741_v28  ;;  %v23229_v24 = vld [vmem:[#allocation164_spill] sm:$0xff]  ;;  %v23232_v20 = vld [vmem:[#allocation234_spill] sm:$0xff] }
 0x58e   : > { %10570 = vrot.lane.b32.xlu1 %v8669_v57, %s11543_s2  ;;  %v19282_v58 = vperm.slane %v8817_v44, %v11741_v28  ;;  %v8874_v61 = vrot.slane %v19254_v18, 4  ;;  %v8693_v30 = vsel %vm246_vm0, %v23228_v35, %v8692_v26  ;;  %v8891_v1 = vsel %vm246_vm0, %v8890_v49, %v19243_v23  ;;  %v10399_v43 = vpop.permute.xlu1 %10398  ;;  %v23238_v35 = vld [vmem:[#allocation115_spill] sm:$0xff] }
 0x58f   : > { %10554 = vrot.lane.b32.xlu0 %v8667_v29, %s11542_s30  ;;  %v8793_v47 = vsel %vm246_vm0, %v23229_v24, %v8792_v36  ;;  %v19293_v7 = vperm.slane %v8593_v59, %v11741_v28  ;;  %v8650_v60 = vrot.slane %v19240_v21, 4  ;;  %v11045_v9 = vsel %vm11042_vm11, %v11040_v2, %v23230_v55  ;;  %v10383_v25 = vpop.permute.xlu0 %10382  ;;  %v23236_v2 = vld [vmem:[#allocation237_spill] sm:$0xff]  ;;  %v23241_v24 = vld [vmem:[#allocation196_spill] sm:$0xff] }
 0x590   : > { %10558 = vrot.lane.b32.xlu2 %v8891_v1, %s11542_s30  ;;  %v8627_v26 = vsel %vm246_vm0, %v8626_v37, %v19268_v33  ;;  %v8704_v62 = vrot.slane %v23231_v4, 4  ;;  %v23233_v49 = vrot.slane %v23232_v20, 4  ;;  %v11039_v59 = vsel %vm11037_vm15, %v19190_v0, %v19131_v12  ;;  %v10429_v54 = vpop.permute.xlu2 %10428  ;;  %v23235_v0 = vld [vmem:[#allocation198_spill] sm:$0xff] }
 0x591   : > { %v9004_v8 = vrot.slane %v8961_v27, 4  ;;  %v9002_v51 = vrot.slane %v8985_v38, 4  ;;  %v19310_v17 = vperm.slane %v8693_v30, %v11741_v28  ;;  %v11050_v36 = vsel %vm11047_vm14, %v11045_v9, %v10383_v25  ;;  %v23239_v30 = vld [vmem:[#allocation38_spill] sm:$0xff] }
 0x592   : > { %v8717_v39 = vsel %vm246_vm0, %v23234_v41, %v23233_v49  ;;  %v19314_v63 = vperm.slane %v8793_v47, %v11741_v28  ;;  %v8850_v46 = vrot.slane %v19279_v5, 4  ;;  %v8875_v40 = vsel %vm246_vm0, %v8874_v61, %v19282_v58 }
 0x593   : > { %v11055_v31 = vsel %vm11052_vm10, %v11050_v36, %v10399_v43  ;;  %v8780_v12 = vrot.slane %v19176_v11, 4  ;;  %v8681_v44 = vsel %vm246_vm0, %v23235_v0, %v8680_v56  ;;  %v19326_v15 = vperm.slane %v8717_v39, %v11741_v28  ;;  %v23237_v11 = vld [vmem:[#allocation159_spill] sm:$0xff] }
 0x594   : > { %v11044_v29 = vsel %vm11042_vm11, %v11039_v59, %v19125_v48  ;;  %11185 = vst [vmem:[%s19202_s18 + $0x20] sm:$0xff] %v11055_v31  ;;  %v8651_v37 = vsel %vm246_vm0, %v8650_v60, %v19293_v7  ;;  %v8705_v57 = vsel %vm246_vm0, %v23236_v2, %v8704_v62  ;;  %v19337_v61 = vperm.slane %v23237_v11, %v11741_v28 }
 0x595   : > { %v9005_v14 = vsel %vm246_vm0, %v8985_v38, %v9004_v8  ;;  %v19341_v56 = vperm.slane %v8875_v40, %v11781_v3  ;;  %v8917_v48 = vsel %vm246_vm0, %v23238_v35, %v8916_v32  ;;  %v23240_v1 = vrot.slane %v23239_v30, 4 }
 0x596   : > { %10576 = vrot.lane.b32.xlu1 %v9005_v14, %s11543_s2  ;;  %v9003_v60 = vsel %vm246_vm0, %v9002_v51, %v8961_v27  ;;  %v8851_v38 = vsel %vm246_vm0, %v8850_v46, %v19314_v63  ;;  %v19356_v43 = vperm.slane %v8681_v44, %v11741_v28  ;;  %v8738_v22 = vrot.slane %v19310_v17, 4  ;;  %v10413_v4 = vpop.permute.xlu1 %10412 }
 0x597   : > { %v8929_v47 = vsel %vm246_vm0, %v23241_v24, %v23240_v1  ;;  %10560 = vrot.lane.b32.xlu0 %v9003_v60, %s11542_s30  ;;  %v8781_v32 = vsel %vm246_vm0, %v19154_v34, %v8780_v12  ;;  %v19363_v55 = vperm.slane %v8651_v37, %v11781_v3  ;;  %v19366_v9 = vperm.slane %v8705_v57, %v11741_v28  ;;  %v10397_v39 = vpop.permute.xlu0 %10396  ;;  %v23245_v57 = vld [vmem:[#allocation143_spill] sm:$0xff]  ;;  %s23469_s30 = smov 100  }
 0x598   : > { %v8762_v27 = vrot.slane %v19326_v15, 4  ;;  %10572 = vrot.lane.b32.xlu2 %v8781_v32, %s11543_s2  ;;  %v11049_v62 = vsel %vm11047_vm14, %v11044_v29, %v19077_v42  ;;  %v19373_v20 = vperm.slane %v8917_v48, %v11741_v28  ;;  %v19376_v34 = vperm.slane %v8929_v47, %v11741_v28  ;;  %v23242_v42 = vld [vmem:[#allocation70_spill] sm:$0xff]  ;;  %v10443_v36 = vpop.permute.xlu2 %10442  ;;  %v23247_v48 = vld [vmem:[#allocation135_spill] sm:$0xff] }
 0x599   : > { %v8986_v49 = vrot.slane %v19337_v61, 4  ;;  %v11058_v41 = vsel %vm10902_vm1, %v19143_v16, %v10413_v4  ;;  %v19382_v59 = vperm.slane %v8851_v38, %v11781_v3  ;;  %v8894_v25 = vrot.slane %v19341_v56, 4  ;;  %v23248_v1 = vld [vmem:[#allocation47_spill] sm:$0xff]  ;;  %v23255_v4 = vld [vmem:[#allocation68_spill] sm:$0xff] }
 0x59a   : > { %v8905_v8 = vsel %vm246_vm0, %v23242_v42, %v8904_v50  ;;  %v11054_v51 = vsel %vm11052_vm10, %v11049_v62, %v10397_v39  ;;  %v8892_v46 = vrot.slane %v19243_v23, 4  ;;  %v8739_v40 = vsel %vm246_vm0, %v8738_v22, %v19356_v43  ;;  %v23251_v38 = vld [vmem:[#allocation11_spill] sm:$0xff]  ;;  %v23252_v22 = vld [vmem:[#allocation48_spill] sm:$0xff] }
 0x59b   : > { %v19394_v16 = vsel %vm10907_vm2, %v11058_v41, %v10429_v54  ;;  %v23243_v31 = vrot.slane %v23203_v53, 4  ;;  %11183 = vst [vmem:[%s19202_s18 + $0x10] sm:$0xff] %v11054_v51  ;;  %v19402_v6 = vperm.slane %v8627_v26, %v11781_v3  ;;  %v8670_v50 = vrot.slane %v19363_v55, 4  ;;  %v23256_v62 = vld [vmem:[#allocation19_spill] sm:$0xff] }
 0x59c   : > { %v8763_v23 = vsel %vm246_vm0, %v8762_v27, %v19366_v9  ;;  %v19409_v29 = vperm.slane %v8905_v8, %v11741_v28  ;;  %v8962_v54 = vrot.slane %v19373_v20, 4  ;;  %v8987_v53 = vsel %vm246_vm0, %v8986_v49, %v19376_v34 }
 0x59d   : > { %v4461_v12 = vsel %vm246_vm0, %v23113_v10, %v23243_v31  ;;  %v4465_v10 = vperm.slane %v19112_v45, %v11741_v28  ;;  %v8895_v26 = vsel %vm246_vm0, %v8894_v25, %v19382_v59  ;;  %v8745_v37 = vperm.slane %v8739_v40, %v11781_v3  ;;  %v23259_v31 = vld [vmem:[#allocation133_spill] sm:$0xff] }
 0x59e   : > { %v8652_v2 = vrot.slane %v19293_v7, 4  ;;  %v19422_v11 = vperm.slane %v23245_v57, %v11781_v3  ;;  %v4469_v14 = vperm.slane %v4461_v12, %v11741_v28  ;;  %10590 = vrot.lane.b32.xlu1 %v8895_v26, %s11544_s3  ;;  %v8893_v35 = vsel %vm246_vm0, %v19209_v52, %v8892_v46  ;;  %v10427_v39 = vpop.permute.xlu1 %10426 }
 0x59f   : > { %v8769_v45 = vperm.slane %v8763_v23, %v11781_v3  ;;  %v23249_v24 = vrot.slane %v23248_v1, 4  ;;  %10574 = vrot.lane.b32.xlu0 %v8893_v35, %s11543_s2  ;;  %v8671_v47 = vsel %vm246_vm0, %v8670_v50, %v19402_v6  ;;  %v19440_v60 = vperm.slane %v8987_v53, %v11781_v3  ;;  %v10411_v8 = vpop.permute.xlu0 %10410  ;;  %v23261_v53 = vld [vmem:[#allocation197_spill] sm:$0xff]  ;;  %s23473_s2 = smov 104  }
 0x5a0   : > { %23246 = vst [vmem:[#allocation89_spill] sm:$0xff] %v19422_v11  ;;  %v3630_v52 = vrot.slane %v23251_v38, 4  ;;  %v23253_v32 = vrot.slane %v23252_v22, 4  ;;  %v23257_v49 = vrot.slane %v23256_v62, 4  ;;  %10586 = vrot.lane.b32.xlu2 %v8671_v47, %s11544_s3  ;;  %v8963_v25 = vsel %vm246_vm0, %v8962_v54, %v19409_v29  ;;  %v10449_v57 = vpop.permute.xlu2 %10448  ;;  %v23294_v62 = vld [vmem:[#allocation41_spill] sm:$0xff]  ;;  %v23310_v11 = vld [vmem:[#allocation84_spill] sm:$0xff] }
 0x5a1   : > { %v19434_v7 = vsel %vm246_vm0, %v23247_v48, %v23249_v24  ;;  %v4494_v42 = vrot.slane %v4465_v10, 4  ;;  %v8784_v51 = vrot.slane %v8745_v37, 4  ;;  %v8628_v46 = vrot.slane %v19268_v33, 4  ;;  %v23262_v24 = vld [vmem:[#allocation139_spill] sm:$0xff] }
 0x5a2   : > { %23250 = vst [vmem:[#allocation162_spill] sm:$0xff] %v19434_v7  ;;  %v19447_v27 = vsel %vm246_vm0, %v23251_v38, %v23253_v32  ;;  %v19453_v41 = vsel %vm246_vm0, %v23257_v49, %v23255_v4  ;;  %v8653_v40 = vsel %vm246_vm0, %v19240_v21, %v8652_v2  ;;  %v23260_v12 = vrot.slane %v23259_v31, 4 }
 0x5a3   : > { %23254 = vst [vmem:[#allocation59_spill] sm:$0xff] %v19447_v27  ;;  %v4506_v23 = vrot.slane %v4469_v14, 4  ;;  %v11057_v26 = vsel %vm10902_vm1, %v23261_v53, %v10411_v8  ;;  %v8782_v35 = vrot.slane %v8769_v45, 4  ;;  %v23263_v54 = vrot.slane %v23262_v24, 4  ;;  %v23307_v27 = vld [vmem:[#allocation95_spill] sm:$0xff] }
 0x5a4   : > { %23258 = vst [vmem:[#allocation175_spill] sm:$0xff] %v19453_v41  ;;  %v4497_v50 = vsel %vm246_vm0, %v4465_v10, %v23260_v12  ;;  %v11061_v38 = vsel %vm10907_vm2, %v11057_v26, %v10427_v39  ;;  %v19471_v33 = vperm.slane %v8963_v25, %v11781_v3  ;;  %v9006_v21 = vrot.slane %v19440_v60, 4  ;;  %v23266_v12 = vld [vmem:[#allocation39_spill] sm:$0xff] }
 0x5a5   : > { %v4509_v47 = vsel %vm246_vm0, %v4469_v14, %v23263_v54  ;;  %v19477_v32 = vperm.slane %v8653_v40, %v11781_v3  ;;  %v19480_v4 = vsel %vm10912_vm3, %v11061_v38, %v10443_v36  ;;  %v19484_v14 = vsel %vm246_vm0, %v3630_v52, %v23252_v22  ;;  %v23269_v54 = vld [vmem:[#allocation10_spill] sm:$0xff] }
 0x5a6   : > { %23264 = vst [vmem:[#allocation100_spill] sm:$0xff] %v19484_v14  ;;  %v8785_v49 = vsel %vm246_vm0, %v8769_v45, %v8784_v51  ;;  %v8629_v39 = vsel %vm246_vm0, %v19236_v19, %v8628_v46  ;;  %v19491_v25 = vperm.slane %v4497_v50, %v11781_v3  ;;  %v19494_v8 = vperm.slane %v4509_v47, %v11781_v3  ;;  %v23265_v46 = vld [vmem:[#allocation51_spill] sm:$0xff] }
 0x5a7   : > { %10604 = vrot.lane.b32.xlu1 %v8785_v49, %s11545_s4  ;;  %v8783_v36 = vsel %vm246_vm0, %v8782_v35, %v8745_v37  ;;  %v8988_v52 = vrot.slane %v19376_v34, 4  ;;  %v4495_v22 = vsel %vm246_vm0, %v4494_v42, %v23259_v31  ;;  %v4507_v45 = vsel %vm246_vm0, %v4506_v23, %v23262_v24  ;;  %v10433_v37 = vpop.permute.xlu1 %10432  ;;  %v10417_v53 = vpop.permute.xlu0 %10416  ;;  %v23301_v14 = vld [vmem:[#allocation179_spill] sm:$0xff] }
 0x5a8   : > { %10588 = vrot.lane.b32.xlu0 %v8783_v36, %s11544_s3  ;;  %v9007_v19 = vsel %vm246_vm0, %v9006_v21, %v19471_v33  ;;  %v8740_v51 = vrot.slane %v19356_v43, 4  ;;  %v5354_v40 = vrot.slane %v23265_v46, 4  ;;  %v19510_v34 = vperm.slane %v8629_v39, %v11781_v3  ;;  %v23297_v39 = vld [vmem:[#allocation98_spill] sm:$0xff] }
 0x5a9   : > { %10592 = vrot.lane.b32.xlu2 %v9007_v19, %s11544_s3  ;;  %v8674_v42 = vrot.slane %v19477_v32, 4  ;;  %v8764_v31 = vrot.slane %v19366_v9, 4  ;;  %v23267_v50 = vrot.slane %v23266_v12, 4  ;;  %v8964_v43 = vrot.slane %v19409_v29, 4  ;;  %v10463_v9 = vpop.permute.xlu2 %10462  ;;  %v23271_v19 = vld [vmem:[#allocation75_spill] sm:$0xff]  ;;  %s23486_s3 = smov 108  }
 0x5aa   : > { %v8852_v26 = vrot.slane %v19314_v63, 4  ;;  %v8876_v35 = vrot.slane %v19282_v58, 4  ;;  %v19524_v24 = vperm.slane %v4495_v22, %v11781_v3  ;;  %v11060_v47 = vsel %vm10902_vm1, %v23269_v54, %v10417_v53 }
 0x5ab   : > { %v19518_v23 = vsel %vm246_vm0, %v23265_v46, %v23267_v50  ;;  %v8672_v38 = vrot.slane %v19402_v6, 4  ;;  %v8989_v21 = vsel %vm246_vm0, %v19337_v61, %v8988_v52  ;;  %v19532_v49 = vperm.slane %v4507_v45, %v11781_v3  ;;  %v23270_v45 = vld [vmem:[#allocation79_spill] sm:$0xff]  ;;  %v23274_v46 = vld [vmem:[#allocation105_spill] sm:$0xff] }
 0x5ac   : > { %23268 = vst [vmem:[#allocation91_spill] sm:$0xff] %v19524_v24  ;;  %v11064_v29 = vsel %vm10907_vm2, %v11060_v47, %v10433_v37  ;;  %v8896_v63 = vrot.slane %v19382_v59, 4  ;;  %v8741_v58 = vsel %vm246_vm0, %v19310_v17, %v8740_v51  ;;  %v8675_v36 = vsel %vm246_vm0, %v8674_v42, %v19510_v34  ;;  %v23278_v47 = vld [vmem:[#allocation170_spill] sm:$0xff] }
 0x5ad   : > { %v8765_v6 = vsel %vm246_vm0, %v19326_v15, %v8764_v31  ;;  %v19544_v61 = vsel %vm10912_vm3, %v11064_v29, %v10449_v57  ;;  %v8965_v52 = vsel %vm246_vm0, %v19373_v20, %v8964_v43  ;;  %v19549_v22 = vperm.slane %v8989_v21, %v11781_v3  ;;  %v23280_v21 = vld [vmem:[#allocation43_spill] sm:$0xff] }
 0x5ae   : > { %v8853_v17 = vsel %vm246_vm0, %v19279_v5, %v8852_v26  ;;  %v8877_v59 = vsel %vm246_vm0, %v19254_v18, %v8876_v35  ;;  %v8673_v15 = vsel %vm246_vm0, %v19363_v55, %v8672_v38  ;;  %v19559_v57 = vperm.slane %v8741_v58, %v11781_v3  ;;  %v23275_v5 = vld [vmem:[#allocation116_spill] sm:$0xff] }
 0x5af   : > { %10618 = vrot.lane.b32.xlu1 %v8675_v36, %s11546_s13  ;;  %v23272_v20 = vrot.slane %v23271_v19, 4  ;;  %v9138_v37 = vrot.slane %v23274_v46, 4  ;;  %v23276_v42 = vrot.slane %v23275_v5, 4  ;;  %v19576_v55 = vsel %vm246_vm0, %v5354_v40, %v23266_v12  ;;  %v10447_v53 = vpop.permute.xlu1 %10446  ;;  %v10431_v12 = vpop.permute.xlu0 %10430 }
 0x5b0   : > { %10602 = vrot.lane.b32.xlu0 %v8673_v15, %s11545_s4  ;;  %v8897_v31 = vsel %vm246_vm0, %v19341_v56, %v8896_v63  ;;  %v19582_v50 = vperm.slane %v8765_v6, %v11781_v3  ;;  %v19586_v43 = vperm.slane %v8965_v52, %v11781_v3  ;;  %v9008_v26 = vrot.slane %v19471_v33, 4  ;;  %v23281_v6 = vld [vmem:[#allocation99_spill] sm:$0xff]  ;;  %v23282_v15 = vld [vmem:[#allocation112_spill] sm:$0xff] }
 0x5b1   : > { %v19565_v51 = vsel %vm246_vm0, %v23272_v20, %v23270_v45  ;;  %v19572_v18 = vsel %vm246_vm0, %v19491_v25, %v23276_v42  ;;  %10606 = vrot.lane.b32.xlu2 %v8897_v31, %s11545_s4  ;;  %v8861_v35 = vperm.slane %v8853_v17, %v11781_v3  ;;  %v8885_v40 = vperm.slane %v8877_v59, %v11781_v3  ;;  %v10477_v58 = vpop.permute.xlu2 %10476  ;;  %v23283_v45 = vld [vmem:[#allocation171_spill] sm:$0xff]  ;;  %v23286_v42 = vld [vmem:[#allocation61_spill] sm:$0xff] }
 0x5b2   : > { %23273 = vst [vmem:[#allocation180_spill] sm:$0xff] %v19565_v51  ;;  %v9010_v54 = vrot.slane %v19549_v22, 4  ;;  %v8676_v56 = vrot.slane %v19510_v34, 4  ;;  %v23279_v38 = vrot.slane %v23278_v47, 4  ;;  %v9126_v63 = vrot.slane %v19565_v51, 4 }
 0x5b3   : > { %23277 = vst [vmem:[#allocation190_spill] sm:$0xff] %v19572_v18  ;;  %v11063_v33 = vsel %vm10907_vm2, %v19259_v13, %v10431_v12  ;;  %v19606_v52 = vperm.slane %v23281_v6, %v11741_v28  ;;  %v8786_v59 = vrot.slane %v19582_v50, 4  ;;  %v23284_v19 = vrot.slane %v23283_v45, 4  ;;  %v23285_v13 = vld [vmem:[#allocation31_spill] sm:$0xff]  ;;  %v23338_v18 = vld [vmem:[#allocation33_spill] sm:$0xff] }
 0x5b4   : > { %v19597_v29 = vsel %vm246_vm0, %v23280_v21, %v23279_v38  ;;  %v11067_v17 = vsel %vm10912_vm3, %v11063_v33, %v10447_v53  ;;  %v23287_v31 = vrot.slane %v23286_v42, 4  ;;  %v9009_v12 = vsel %vm246_vm0, %v19440_v60, %v9008_v26 }
 0x5b5   : > { %v9139_v36 = vsel %vm246_vm0, %v9138_v37, %v19597_v29  ;;  %v9151_v20 = vsel %vm246_vm0, %v23284_v19, %v23282_v15  ;;  %v8900_v38 = vrot.slane %v8861_v35, 4  ;;  %v8898_v6 = vrot.slane %v8885_v40, 4 }
 0x5b6   : > { %v19619_v37 = vsel %vm246_vm0, %v23287_v31, %v23285_v13  ;;  %v23288_v53 = vrot.slane %v23280_v21, 4  ;;  %v9011_v19 = vsel %vm246_vm0, %v9010_v54, %v19586_v43  ;;  %v19634_v13 = vperm.slane %v9139_v36, %v11741_v28  ;;  %v23289_v21 = vld [vmem:[#allocation227_spill] sm:$0xff]  ;;  %v23290_v54 = vld [vmem:[#allocation161_spill] sm:$0xff] }
 0x5b7   : > { %v19637_v31 = vsel %vm10917_vm4, %v11067_v17, %v10463_v9  ;;  %10624 = vrot.lane.b32.xlu1 %v9011_v19, %s11546_s13  ;;  %v19641_v60 = vperm.slane %v9151_v20, %v11741_v28  ;;  %v9198_v26 = vrot.slane %v19606_v52, 4  ;;  %v8787_v9 = vsel %vm246_vm0, %v8786_v59, %v19559_v57  ;;  %v23292_v17 = vld [vmem:[#allocation40_spill] sm:$0xff]  ;;  %v23293_v19 = vld [vmem:[#allocation166_spill] sm:$0xff]  ;;  %v10461_v44 = vpop.permute.xlu1 %10460  ;;  %v10445_v34 = vpop.permute.xlu0 %10444 }
 0x5b8   : > { %v19627_v33 = vsel %vm246_vm0, %v23288_v53, %v23278_v47  ;;  %v9014_v47 = vrot.slane %v19619_v37, 4  ;;  %v23291_v53 = vrot.slane %v23290_v54, 4  ;;  %10608 = vrot.lane.b32.xlu0 %v9009_v12, %s11545_s4  ;;  %v8677_v36 = vsel %vm246_vm0, %v19477_v32, %v8676_v56  ;;  %v23296_v59 = vld [vmem:[#allocation132_spill] sm:$0xff]  ;;  %s23496_s4 = smov 112  }
 0x5b9   : > { %v9127_v42 = vsel %vm246_vm0, %v9126_v63, %v19627_v33  ;;  %v9038_v20 = vrot.slane %v23292_v17, 4  ;;  %v23295_v10 = vrot.slane %v23294_v62, 4  ;;  %10620 = vrot.lane.b32.xlu2 %v8787_v9, %s11546_s13  ;;  %v8899_v12 = vsel %vm246_vm0, %v8898_v6, %v8861_v35  ;;  %v10491_v6 = vpop.permute.xlu2 %10490 }
 0x5ba   : > { %v9027_v63 = vsel %vm246_vm0, %v23291_v53, %v23289_v21  ;;  %v8901_v53 = vsel %vm246_vm0, %v8885_v40, %v8900_v38  ;;  %v19663_v30 = vperm.slane %v9127_v42, %v11741_v28  ;;  %v23298_v32 = vrot.slane %v23297_v39, 4  ;;  %v23303_v40 = vld [vmem:[#allocation87_spill] sm:$0xff] }
 0x5bb   : > { %v9051_v2 = vsel %vm246_vm0, %v23295_v10, %v23293_v19  ;;  %v9174_v41 = vrot.slane %v19634_v13, 4  ;;  %v23300_v10 = vld [vmem:[#allocation123_spill] sm:$0xff]  ;;  %v23302_v9 = vrot.slane %v23301_v14, 4  ;;  %v19679_v35 = vperm.slane %v9027_v63, %v11741_v28 }
 0x5bc   : > { %v19669_v56 = vsel %vm246_vm0, %v23298_v32, %v23296_v59  ;;  %v9250_v38 = vrot.slane %v23303_v40, 4  ;;  %v11066_v39 = vsel %vm10912_vm3, %v19394_v16, %v10445_v34  ;;  %v9199_v42 = vsel %vm246_vm0, %v9198_v26, %v19641_v60  ;;  %v23309_v26 = vld [vmem:[#allocation101_spill] sm:$0xff]  ;;  %v23324_v40 = vld [vmem:[#allocation106_spill] sm:$0xff] }
 0x5bd   : > { %23299 = vst [vmem:[#allocation120_spill] sm:$0xff] %v19669_v56  ;;  %v19676_v7 = vsel %vm246_vm0, %v23302_v9, %v23300_v10  ;;  %v19689_v14 = vperm.slane %v9051_v2, %v11741_v28  ;;  %v11070_v32 = vsel %vm10917_vm4, %v11066_v39, %v10461_v44  ;;  %v23304_v10 = vld [vmem:[#allocation223_spill] sm:$0xff]  ;;  %v23305_v9 = vld [vmem:[#allocation66_spill] sm:$0xff]  ;;  %v9238_v34 = vrot.slane %v19669_v56, 4  ;;  %v23312_v2 = vld [vmem:[#allocation108_spill] sm:$0xff] }
 0x5be   : > { %v9015_v59 = vsel %vm246_vm0, %v9014_v47, %v19676_v7  ;;  %v9039_v63 = vsel %vm246_vm0, %v9038_v20, %v23304_v10  ;;  %v23306_v0 = vrot.slane %v23305_v9, 4  ;;  %v23311_v48 = vrot.slane %v23310_v11, 4  ;;  %v23313_v44 = vld [vmem:[#allocation46_spill] sm:$0xff]  ;;  %v23314_v39 = vld [vmem:[#allocation111_spill] sm:$0xff] }
 0x5bf   : > { %v19707_v1 = vperm.slane %v23312_v2, %v11741_v28  ;;  %v23315_v20 = vrot.slane %v23314_v39, 4  ;;  %v19719_v56 = vperm.slane %v9199_v42, %v11781_v3  ;;  %v19722_v11 = vperm.slane %v9015_v59, %v11741_v28  ;;  %10638 = vrot.lane.b32.xlu1 %v8901_v53, %s23317_s12  ;;  %v10459_v15 = vpop.permute.xlu0 %10458 }
 0x5c0   : > { %v19698_v16 = vsel %vm246_vm0, %v23307_v27, %v23306_v0  ;;  %v9263_v47 = vsel %vm246_vm0, %v23311_v48, %v23309_v26  ;;  %v19716_v0 = vsel %vm10922_vm5, %v11070_v32, %v10477_v58  ;;  %v9062_v48 = vrot.slane %v19679_v35, 4  ;;  %10622 = vrot.lane.b32.xlu0 %v8899_v12, %s11546_s13  ;;  %v23320_v32 = vld [vmem:[#allocation169_spill] sm:$0xff]  ;;  %s23500_s13 = smov 116  }
 0x5c1   : > { %23308 = vst [vmem:[#allocation74_spill] sm:$0xff] %v19698_v16  ;;  %v19713_v51 = vsel %vm246_vm0, %v23315_v20, %v23313_v44  ;;  %v9251_v2 = vsel %vm246_vm0, %v9250_v38, %v19698_v16  ;;  %v9175_v44 = vsel %vm246_vm0, %v9174_v41, %v19663_v30  ;;  %v19731_v39 = vperm.slane %v9039_v63, %v11741_v28  ;;  %v23321_v63 = vld [vmem:[#allocation214_spill] sm:$0xff]  ;;  %v23327_v16 = vld [vmem:[#allocation168_spill] sm:$0xff] }
 0x5c2   : > { %23316 = vst [vmem:[#allocation90_spill] sm:$0xff] %v19713_v51  ;;  %v9086_v58 = vrot.slane %v19689_v14, 4  ;;  %v23318_v42 = vrot.slane %v23307_v27, 4  ;;  %v19744_v53 = vperm.slane %v9263_v47, %v11741_v28  ;;  %v9350_v41 = vrot.slane %v19713_v51, 4  ;;  %10634 = vrot.lane.b32.xlu2 %v8677_v36, %s23317_s12  ;;  %v10475_v27 = vpop.permute.xlu1 %10474  ;;  %v23325_v47 = vld [vmem:[#allocation104_spill] sm:$0xff] }
 0x5c3   : > { %v23322_v20 = vrot.slane %v23321_v63, 4  ;;  %v9310_v12 = vrot.slane %v19707_v1, 4  ;;  %v23326_v45 = vrot.slane %v23325_v47, 4  ;;  %v19762_v46 = vperm.slane %v9175_v44, %v11781_v3 }
 0x5c4   : > { %v19738_v59 = vsel %vm246_vm0, %v23318_v42, %v23305_v9  ;;  %v19753_v9 = vperm.slane %v9251_v2, %v11741_v28  ;;  %v23323_v42 = vld [vmem:[#allocation233_spill] sm:$0xff]  ;;  %v9012_v36 = vrot.slane %v19586_v43, 4  ;;  %v9063_v2 = vsel %vm246_vm0, %v9062_v48, %v19722_v11 }
 0x5c5   : > { %23319 = vst [vmem:[#allocation110_spill] sm:$0xff] %v19738_v59  ;;  %v9239_v38 = vsel %vm246_vm0, %v9238_v34, %v19738_v59  ;;  %v9363_v26 = vsel %vm246_vm0, %v23322_v20, %v23320_v32  ;;  %v9374_v34 = vrot.slane %v23323_v42, 4  ;;  %v9387_v51 = vsel %vm246_vm0, %v23326_v45, %v23324_v40  ;;  %v10497_v42 = vpop.permute.xlu2 %10496  ;;  %v23328_v45 = vld [vmem:[#allocation57_spill] sm:$0xff] }
 0x5c6   : > { %v9222_v20 = vrot.slane %v19719_v56, 4  ;;  %v11069_v63 = vsel %vm10917_vm4, %v19480_v4, %v10459_v15  ;;  %v9087_v32 = vsel %vm246_vm0, %v9086_v58, %v19731_v39  ;;  %v23329_v59 = vrot.slane %v23328_v45, 4 }
 0x5c7   : > { %v19779_v47 = vperm.slane %v9363_v26, %v11741_v28  ;;  %v11073_v43 = vsel %vm10922_vm5, %v11069_v63, %v10475_v27  ;;  %v19783_v48 = vperm.slane %v9239_v38, %v11741_v28  ;;  %v19788_v15 = vperm.slane %v9387_v51, %v11741_v28 }
 0x5c8   : > { %v19776_v44 = vsel %vm246_vm0, %v23329_v59, %v23327_v16  ;;  %v9286_v58 = vrot.slane %v19753_v9, 4  ;;  %v9311_v16 = vsel %vm246_vm0, %v9310_v12, %v19744_v53  ;;  %v23331_v59 = vld [vmem:[#allocation77_spill] sm:$0xff]  ;;  %v19796_v45 = vsel %vm10927_vm6, %v11073_v43, %v10491_v6 }
 0x5c9   : > { %23330 = vst [vmem:[#allocation102_spill] sm:$0xff] %v19776_v44  ;;  %v9351_v4 = vsel %vm246_vm0, %v9350_v41, %v19776_v44  ;;  %v9375_v26 = vsel %vm246_vm0, %v9374_v34, %v23331_v59  ;;  %v4530_v38 = vrot.slane %v19494_v8, 4  ;;  %v5361_v63 = vperm.slane %v19576_v55, %v11741_v28 }
 0x5ca   : > { %v9223_v51 = vsel %vm246_vm0, %v9222_v20, %v19762_v46  ;;  %v9069_v41 = vperm.slane %v9063_v2, %v11781_v3  ;;  %v23333_v27 = vrot.slane %v19559_v57, 4  ;;  %v9093_v6 = vperm.slane %v9087_v32, %v11781_v3  ;;  %v23334_v2 = vld [vmem:[#allocation52_spill] sm:$0xff] }
 0x5cb   : > { %10652 = vrot.lane.b32.xlu1 %v9223_v51, %s23332_s22  ;;  %v19811_v34 = vperm.slane %v9351_v4, %v11741_v28  ;;  %v9398_v43 = vrot.slane %v19779_v47, 4  ;;  %v9013_v55 = vsel %vm246_vm0, %v19549_v22, %v9012_v36  ;;  %v19818_v20 = vperm.slane %v9311_v16, %v11781_v3  ;;  %v10481_v22 = vpop.permute.xlu1 %10480 }
 0x5cc   : > { %v8789_v12 = vsel %vm246_vm0, %v19582_v50, %v23333_v27  ;;  %v19821_v57 = vperm.slane %v9375_v26, %v11741_v28  ;;  %v9422_v50 = vrot.slane %v19788_v15, 4  ;;  %v23335_v32 = vrot.slane %v23334_v2, 4  ;;  %10640 = vrot.lane.b32.xlu2 %v9013_v55, %s23317_s12 }
 0x5cd   : > { %10636 = vrot.lane.b32.xlu0 %v8789_v12, %s23317_s12  ;;  %v5365_v27 = vperm.slane %v19518_v23, %v11741_v28  ;;  %v9287_v36 = vsel %vm246_vm0, %v9286_v58, %v19783_v48  ;;  %v23336_v26 = vrot.slane %v19491_v25, 4  ;;  %v9112_v51 = vrot.slane %v9069_v41, 4  ;;  %v10511_v44 = vpop.permute.xlu2 %10510 }
 0x5ce   : > { %v19828_v4 = vsel %vm246_vm0, %v19494_v8, %v23335_v32  ;;  %v5390_v8 = vrot.slane %v5361_v63, 4  ;;  %v10465_v32 = vpop.permute.xlu0 %10464  ;;  %v23339_v59 = vrot.slane %v23338_v18, 4  ;;  %v9110_v58 = vrot.slane %v9093_v6, 4 }
 0x5cf   : > { %v19841_v12 = vsel %vm246_vm0, %v23336_v26, %v23275_v5  ;;  %v11072_v55 = vsel %vm10917_vm4, %v19544_v61, %v10465_v32  ;;  %v9399_v16 = vsel %vm246_vm0, %v9398_v43, %v19811_v34  ;;  %v19852_v5 = vperm.slane %v9287_v36, %v11781_v3 }
 0x5d0   : > { %23337 = vst [vmem:[#allocation177_spill] sm:$0xff] %v19841_v12  ;;  %v5393_v23 = vsel %vm246_vm0, %v5361_v63, %v23339_v59  ;;  %v11076_v25 = vsel %vm10922_vm5, %v11072_v55, %v10481_v22  ;;  %v9334_v26 = vrot.slane %v19818_v20, 4  ;;  %v9423_v12 = vsel %vm246_vm0, %v9422_v50, %v19821_v57  ;;  %v23341_v22 = vld [vmem:[#allocation12_spill] sm:$0xff] }
 0x5d1   : > { %v19860_v61 = vsel %vm246_vm0, %v4530_v38, %v23334_v2  ;;  %v5402_v63 = vrot.slane %v5365_v27, 4  ;;  %v19863_v32 = vsel %vm10927_vm6, %v11076_v25, %v10497_v42  ;;  %v19866_v43 = vperm.slane %v5393_v23, %v11781_v3  ;;  %v23344_v23 = vld [vmem:[#allocation62_spill] sm:$0xff] }
 0x5d2   : > { %23340 = vst [vmem:[#allocation208_spill] sm:$0xff] %v19860_v61  ;;  %v23342_v36 = vrot.slane %v23341_v22, 4  ;;  %v9113_v24 = vsel %vm246_vm0, %v9093_v6, %v9112_v51  ;;  %v9405_v50 = vperm.slane %v9399_v16, %v11781_v3  ;;  %v5391_v59 = vsel %vm246_vm0, %v5390_v8, %v23338_v18  ;;  %v23349_v51 = vld [vmem:[#allocation24_spill] sm:$0xff] }
 0x5d3   : > { %10666 = vrot.lane.b32.xlu1 %v9113_v24, %s23343_s23  ;;  %v9111_v38 = vsel %vm246_vm0, %v9110_v58, %v9069_v41  ;;  %v9429_v42 = vperm.slane %v9423_v12, %v11781_v3  ;;  %v9312_v2 = vrot.slane %v19744_v53, 4  ;;  %v23345_v25 = vrot.slane %v23344_v23, 4  ;;  %v10495_v41 = vpop.permute.xlu1 %10494  ;;  %v23346_v58 = vld [vmem:[#allocation80_spill] sm:$0xff] }
 0x5d4   : > { %v5405_v55 = vsel %vm246_vm0, %v5365_v27, %v23342_v36  ;;  %v9335_v24 = vsel %vm246_vm0, %v9334_v26, %v19852_v5  ;;  %v5403_v18 = vsel %vm246_vm0, %v5402_v63, %v23341_v22  ;;  %v9288_v16 = vrot.slane %v19783_v48, 4 }
 0x5d5   : > { %v19883_v27 = vsel %vm246_vm0, %v19532_v49, %v23345_v25  ;;  %10650 = vrot.lane.b32.xlu0 %v9111_v38, %s23332_s22  ;;  %v19893_v53 = vperm.slane %v5405_v55, %v11781_v3  ;;  %10654 = vrot.lane.b32.xlu2 %v9335_v24, %s23332_s22  ;;  %v9088_v12 = vrot.slane %v19731_v39, 4  ;;  %v19899_v8 = vperm.slane %v5391_v59, %v11781_v3  ;;  %v23347_v38 = vld [vmem:[#allocation73_spill] sm:$0xff]  ;;  %v10525_v24 = vpop.permute.xlu2 %10524 }
 0x5d6   : > { %v6250_v36 = vrot.slane %v23346_v58, 4  ;;  %v23348_v26 = vrot.slane %v23347_v38, 4  ;;  %v10479_v22 = vpop.permute.xlu0 %10478  ;;  %v9448_v55 = vrot.slane %v9405_v50, 4  ;;  %v9446_v39 = vrot.slane %v9429_v42, 4 }
 0x5d7   : > { %v11075_v48 = vsel %vm10922_vm5, %v19637_v31, %v10479_v22  ;;  %v9313_v59 = vsel %vm246_vm0, %v19707_v1, %v9312_v2  ;;  %v19914_v6 = vperm.slane %v5403_v18, %v11781_v3  ;;  %v23350_v61 = vrot.slane %v23349_v51, 4 }
 0x5d8   : > { %v19906_v63 = vsel %vm246_vm0, %v23346_v58, %v23348_v26  ;;  %v11079_v26 = vsel %vm10927_vm6, %v11075_v48, %v10495_v41  ;;  %v9224_v25 = vrot.slane %v19762_v46, 4  ;;  %v9289_v31 = vsel %vm246_vm0, %v19753_v9, %v9288_v16  ;;  %v23352_v9 = vld [vmem:[#allocation182_spill] sm:$0xff] }
 0x5d9   : > { %v19920_v58 = vsel %vm246_vm0, %v19866_v43, %v23350_v61  ;;  %v9064_v22 = vrot.slane %v19722_v11, 4  ;;  %v9089_v1 = vsel %vm246_vm0, %v19689_v14, %v9088_v12  ;;  %v19930_v2 = vsel %vm10932_vm7, %v11079_v26, %v10511_v44 }
 0x5da   : > { %23351 = vst [vmem:[#allocation205_spill] sm:$0xff] %v19920_v58  ;;  %v9449_v18 = vsel %vm246_vm0, %v9429_v42, %v9448_v55  ;;  %v19934_v61 = vperm.slane %v9313_v59, %v11781_v3  ;;  %v9176_v41 = vrot.slane %v19663_v30, 4  ;;  %v9200_v46 = vrot.slane %v19641_v60, 4 }
 0x5db   : > { %v5426_v48 = vrot.slane %v19893_v53, 4  ;;  %v23353_v16 = vrot.slane %v23352_v9, 4  ;;  %10672 = vrot.lane.b32.xlu1 %v9449_v18, %s23343_s23  ;;  %v9447_v14 = vsel %vm246_vm0, %v9446_v39, %v9405_v50  ;;  %v23354_v44 = vrot.slane %v23293_v19, 4  ;;  %v10509_v19 = vpop.permute.xlu1 %10508 }
 0x5dc   : > { %v19954_v60 = vsel %vm246_vm0, %v6250_v36, %v23347_v38  ;;  %v9225_v12 = vsel %vm246_vm0, %v19719_v56, %v9224_v25  ;;  %v19960_v55 = vperm.slane %v9089_v1, %v11781_v3  ;;  %v19964_v50 = vperm.slane %v9289_v31, %v11781_v3 }
 0x5dd   : > { %v19943_v11 = vsel %vm246_vm0, %v19893_v53, %v23353_v16  ;;  %v9053_v42 = vsel %vm246_vm0, %v23294_v62, %v23354_v44  ;;  %10656 = vrot.lane.b32.xlu0 %v9447_v14, %s23332_s22  ;;  %10668 = vrot.lane.b32.xlu2 %v9225_v12, %s23343_s23  ;;  %v9336_v62 = vrot.slane %v19852_v5, 4  ;;  %v9065_v36 = vsel %vm246_vm0, %v19679_v35, %v9064_v22  ;;  %v10539_v31 = vpop.permute.xlu2 %10538  ;;  %v23359_v12 = vld [vmem:[#allocation104_spill] sm:$0xff] }
 0x5de   : > { %v9424_v38 = vrot.slane %v19821_v57, 4  ;;  %v10493_v39 = vpop.permute.xlu0 %10492  ;;  %v9338_v59 = vrot.slane %v19934_v61, 4  ;;  %v9177_v56 = vsel %vm246_vm0, %v19634_v13, %v9176_v41  ;;  %v9201_v25 = vsel %vm246_vm0, %v19606_v52, %v9200_v46 }
 0x5df   : > { %v19976_v26 = vperm.slane %v9053_v42, %v11741_v28  ;;  %v11078_v5 = vsel %vm10927_vm6, %v19716_v0, %v10493_v39  ;;  %v9400_v35 = vrot.slane %v19811_v34, 4  ;;  %v9016_v57 = vrot.slane %v19676_v7, 4 }
 0x5e0   : > { %v23355_v22 = vrot.slane %v23289_v21, 4  ;;  %v11082_v13 = vsel %vm10932_vm7, %v11078_v5, %v10509_v19  ;;  %v19988_v52 = vperm.slane %v9065_v36, %v11781_v3  ;;  %v9114_v18 = vrot.slane %v19960_v55, 4  ;;  %v23360_v19 = vld [vmem:[#allocation110_spill] sm:$0xff] }
 0x5e1   : > { %v23356_v41 = vrot.slane %v23304_v10, 4  ;;  %v9185_v34 = vperm.slane %v9177_v56, %v11781_v3  ;;  %v9209_v7 = vperm.slane %v9201_v25, %v11781_v3  ;;  %v9425_v21 = vsel %vm246_vm0, %v19788_v15, %v9424_v38  ;;  %v23361_v36 = vld [vmem:[#allocation74_spill] sm:$0xff] }
 0x5e2   : > { %v9029_v1 = vsel %vm246_vm0, %v23290_v54, %v23355_v22  ;;  %v20000_v54 = vsel %vm10937_vm8, %v11082_v13, %v10525_v24  ;;  %v9128_v46 = vrot.slane %v19627_v33, 4  ;;  %v9339_v16 = vsel %vm246_vm0, %v9338_v59, %v19964_v50  ;;  %v23364_v22 = vld [vmem:[#allocation216_spill] sm:$0xff] }
 0x5e3   : > { %v9041_v0 = vsel %vm246_vm0, %v23292_v17, %v23356_v41  ;;  %v9337_v10 = vsel %vm246_vm0, %v19818_v20, %v9336_v62  ;;  %v20008_v17 = vperm.slane %v9029_v1, %v11741_v28  ;;  %10686 = vrot.lane.b32.xlu1 %v9339_v16, %s23357_s24  ;;  %v9401_v14 = vsel %vm246_vm0, %v19779_v47, %v9400_v35  ;;  %v23362_v35 = vld [vmem:[#allocation122_spill] sm:$0xff] }
 0x5e4   : > { %v9017_v15 = vsel %vm246_vm0, %v19619_v37, %v9016_v57  ;;  %v20016_v24 = vperm.slane %v9041_v0, %v11741_v28  ;;  %v9098_v33 = vrot.slane %v19976_v26, 4  ;;  %v9140_v44 = vrot.slane %v19597_v29, 4  ;;  %v10523_v29 = vpop.permute.xlu1 %10522  ;;  %v23365_v0 = vld [vmem:[#allocation102_spill] sm:$0xff] }
 0x5e5   : > { %10670 = vrot.lane.b32.xlu0 %v9337_v10, %s23343_s23  ;;  %v9115_v20 = vsel %vm246_vm0, %v9114_v18, %v19988_v52  ;;  %v20024_v42 = vperm.slane %v9425_v21, %v11781_v3  ;;  %v23358_v47 = vrot.slane %v23324_v40, 4  ;;  %v9240_v62 = vrot.slane %v23360_v19, 4  ;;  %v10545_v18 = vpop.permute.xlu2 %10544  ;;  %v23369_v19 = vld [vmem:[#allocation77_spill] sm:$0xff]  ;;  %s11204_s23 = sshll.u32 %s19202_s18, 4  ;;  %s11205_s23 = int_to_ptr.vmem [resolvable:$true] %s11204_s23 }
 0x5e6   : > { %v9252_v38 = vrot.slane %v23361_v36, 4  ;;  %10682 = vrot.lane.b32.xlu2 %v9115_v20, %s23357_s24  ;;  %v9228_v39 = vrot.slane %v9185_v34, 4  ;;  %v9226_v59 = vrot.slane %v9209_v7, 4  ;;  %v10507_v56 = vpop.permute.xlu0 %10506  ;;  %v20034_v25 = vperm.slane %v9401_v14, %v11781_v3  ;;  %v23371_v36 = vld [vmem:[#allocation233_spill] sm:$0xff] }
 0x5e7   : > { %v9389_v37 = vsel %vm246_vm0, %v23359_v12, %v23358_v47  ;;  %v20037_v5 = vperm.slane %v9017_v15, %v11741_v28  ;;  %v9074_v40 = vrot.slane %v20008_v17, 4  ;;  %v23363_v57 = vrot.slane %v23362_v35, 4  ;;  %v23366_v15 = vld [vmem:[#allocation169_spill] sm:$0xff]  ;;  %v23368_v47 = vld [vmem:[#allocation214_spill] sm:$0xff] }
 0x5e8   : > { %v11081_v13 = vsel %vm10932_vm7, %v19796_v45, %v10507_v56  ;;  %v9099_v41 = vsel %vm246_vm0, %v9098_v33, %v20016_v24  ;;  %v9352_v21 = vrot.slane %v23365_v0, 4  ;;  %v20050_v16 = vperm.slane %v9389_v37, %v11741_v28  ;;  %v23372_v35 = vld [vmem:[#allocation105_spill] sm:$0xff] }
 0x5e9   : > { %v9165_v1 = vsel %vm246_vm0, %v23364_v22, %v23363_v57  ;;  %v11085_v10 = vsel %vm10937_vm8, %v11081_v13, %v10523_v29  ;;  %v9450_v14 = vrot.slane %v20024_v42, 4  ;;  %v23367_v20 = vrot.slane %v23366_v15, 4  ;;  %v23373_v15 = vld [vmem:[#allocation112_spill] sm:$0xff] }
 0x5ea   : > { %v23370_v45 = vrot.slane %v23369_v19, 4  ;;  %v9229_v33 = vsel %vm246_vm0, %v9209_v7, %v9228_v39  ;;  %v9141_v37 = vsel %vm246_vm0, %v23372_v35, %v9140_v44  ;;  %v20066_v57 = vperm.slane %v9165_v1, %v11741_v28  ;;  %v23375_v7 = vld [vmem:[#allocation171_spill] sm:$0xff]  ;;  %v23377_v44 = vld [vmem:[#allocation90_spill] sm:$0xff]  ;;  %v23379_v19 = vld [vmem:[#allocation180_spill] sm:$0xff] }
 0x5eb   : > { %v9365_v12 = vsel %vm246_vm0, %v23368_v47, %v23367_v20  ;;  %v20069_v29 = vsel %vm10942_vm9, %v11085_v10, %v10539_v31  ;;  %v9227_v22 = vsel %vm246_vm0, %v9226_v59, %v9185_v34  ;;  %v9075_v13 = vsel %vm246_vm0, %v9074_v40, %v20037_v5  ;;  %10700 = vrot.lane.b32.xlu1 %v9229_v33, %s23376_s26  ;;  %v23378_v47 = vld [vmem:[#allocation87_spill] sm:$0xff] }
 0x5ec   : > { %v9377_v56 = vsel %vm246_vm0, %v23371_v36, %v23370_v45  ;;  %v20075_v0 = vperm.slane %v9099_v41, %v11781_v3  ;;  %v23374_v20 = vrot.slane %v23373_v15, 4  ;;  %v9353_v1 = vsel %vm246_vm0, %v23377_v44, %v9352_v21 }
 0x5ed   : > { %v20085_v31 = vperm.slane %v9365_v12, %v11741_v28  ;;  %v20088_v34 = vperm.slane %v9377_v56, %v11741_v28  ;;  %v9434_v59 = vrot.slane %v20050_v16, 4  ;;  %10684 = vrot.lane.b32.xlu0 %v9227_v22, %s23357_s24  ;;  %v9451_v40 = vsel %vm246_vm0, %v9450_v14, %v20034_v25  ;;  %v10529_v12 = vpop.permute.xlu1 %10528  ;;  %v23380_v14 = vld [vmem:[#allocation96_spill] sm:$0xff] }
 0x5ee   : > { %v9153_v39 = vsel %vm246_vm0, %v23375_v7, %v23374_v20  ;;  %v9116_v41 = vrot.slane %v19988_v52, 4  ;;  %v20096_v10 = vperm.slane %v9141_v37, %v11741_v28  ;;  %v9253_v21 = vsel %vm246_vm0, %v23378_v47, %v9252_v38  ;;  %10688 = vrot.lane.b32.xlu2 %v9451_v40, %s23357_s24  ;;  %v23382_v52 = vld [vmem:[#allocation81_spill] sm:$0xff]  ;;  %v10513_v37 = vpop.permute.xlu0 %10512  ;;  %v10559_v7 = vpop.permute.xlu2 %10558  ;;  %s11190_s24 = scalar_lea.sflag [#allocation4], %s11647_s5 }
 0x5ef   : > { %v9129_v45 = vsel %vm246_vm0, %v23379_v19, %v9128_v46  ;;  %v20104_v36 = vperm.slane %v9153_v39, %v11741_v28  ;;  %v9210_v56 = vrot.slane %v20066_v57, 4  ;;  %v23381_v33 = vrot.slane %v23380_v14, 4 }
 0x5f0   : > { %v20112_v22 = vperm.slane %v9075_v13, %v11781_v3  ;;  %v9118_v38 = vrot.slane %v20075_v0, 4  ;;  %v9340_v15 = vrot.slane %v19964_v50, 4  ;;  %v20117_v46 = vperm.slane %v9353_v1, %v11741_v28  ;;  %v23383_v50 = vld [vmem:[#allocation120_spill] sm:$0xff] }
 0x5f1   : > { %v9277_v35 = vsel %vm246_vm0, %v23382_v52, %v23381_v33  ;;  %v11084_v20 = vsel %vm10932_vm7, %v19863_v32, %v10513_v37  ;;  %v9410_v39 = vrot.slane %v20085_v31, 4  ;;  %v9435_v44 = vsel %vm246_vm0, %v9434_v59, %v20088_v34  ;;  %v23384_v59 = vld [vmem:[#allocation101_spill] sm:$0xff] }
 0x5f2   : > { %v20125_v40 = vperm.slane %v9253_v21, %v11741_v28  ;;  %v11088_v13 = vsel %vm10937_vm8, %v11084_v20, %v10529_v12  ;;  %v20129_v47 = vperm.slane %v9129_v45, %v11741_v28  ;;  %v9241_v1 = vsel %vm246_vm0, %v23383_v50, %v9240_v62  ;;  %v23386_v21 = vld [vmem:[#allocation84_spill] sm:$0xff] }
 0x5f3   : > { %v20134_v19 = vperm.slane %v9277_v35, %v11741_v28  ;;  %v9186_v32 = vrot.slane %v20096_v10, 4  ;;  %v9211_v14 = vsel %vm246_vm0, %v9210_v56, %v20104_v36  ;;  %v23385_v33 = vrot.slane %v23384_v59, 4 }
 0x5f4   : > { %v20144_v12 = vsel %vm10942_vm9, %v11088_v13, %v10545_v18  ;;  %v6257_v45 = vperm.slane %v19954_v60, %v11741_v28  ;;  %v6261_v62 = vperm.slane %v19906_v63, %v11741_v28  ;;  %v9119_v35 = vsel %vm246_vm0, %v9118_v38, %v20112_v22 }
 0x5f5   : > { %v9265_v52 = vsel %vm246_vm0, %v23386_v21, %v23385_v33  ;;  %v20153_v37 = vperm.slane %v9435_v44, %v11781_v3  ;;  %10714 = vrot.lane.b32.xlu1 %v9119_v35, %s23387_s27  ;;  %v9117_v56 = vsel %vm246_vm0, %v19960_v55, %v9116_v41  ;;  %v9411_v18 = vsel %vm246_vm0, %v9410_v39, %v20117_v46  ;;  %v10543_v50 = vpop.permute.xlu1 %10542 }
 0x5f6   : > { %v20161_v20 = vperm.slane %v9241_v1, %v11741_v28  ;;  %v9298_v60 = vrot.slane %v20125_v40, 4  ;;  %10698 = vrot.lane.b32.xlu0 %v9117_v56, %s23376_s26  ;;  %v9341_v63 = vsel %vm246_vm0, %v19934_v61, %v9340_v15  ;;  %v20168_v38 = vperm.slane %v9211_v14, %v11781_v3  ;;  %v23388_v1 = vld [vmem:[#allocation183_spill] sm:$0xff]  ;;  %v10527_v33 = vpop.permute.xlu0 %10526 }
 0x5f7   : > { %v20171_v44 = vperm.slane %v9265_v52, %v11741_v28  ;;  %v9322_v55 = vrot.slane %v20134_v19, 4  ;;  %v5422_v39 = vrot.slane %v19914_v6, 4  ;;  %v9722_v13 = vrot.slane %v19943_v11, 4  ;;  %10702 = vrot.lane.b32.xlu2 %v9341_v63, %s23376_s26  ;;  %v10573_v63 = vpop.permute.xlu2 %10572 }
 0x5f8   : > { %v9187_v61 = vsel %vm246_vm0, %v9186_v32, %v20129_v47  ;;  %v6298_v15 = vrot.slane %v6261_v62, 4  ;;  %v23389_v14 = vrot.slane %v23388_v1, 4  ;;  %v20184_v21 = vperm.slane %v9411_v18, %v11781_v3 }
 0x5f9   : > { %v9454_v52 = vrot.slane %v20153_v37, 4  ;;  %v6286_v35 = vrot.slane %v6257_v45, 4  ;;  %v11087_v56 = vsel %vm10937_vm8, %v19930_v2, %v10527_v33  ;;  %v9452_v41 = vrot.slane %v20034_v25, 4  ;;  %v23391_v25 = vld [vmem:[#allocation136_spill] sm:$0xff] }
 0x5fa   : > { %v6301_v59 = vsel %vm246_vm0, %v6261_v62, %v23389_v14  ;;  %v9299_v32 = vsel %vm246_vm0, %v9298_v60, %v20161_v20  ;;  %v11091_v30 = vsel %vm10942_vm9, %v11087_v56, %v10543_v50  ;;  %v20194_v62 = vperm.slane %v9187_v61, %v11781_v3 }
 0x5fb   : > { %v9230_v18 = vrot.slane %v20168_v38, 4  ;;  %v9323_v14 = vsel %vm246_vm0, %v9322_v55, %v20171_v44  ;;  %v20203_v2 = vsel %vm246_vm0, %v5426_v48, %v23352_v9  ;;  %v23392_v33 = vrot.slane %v23391_v25, 4 }
 0x5fc   : > { %23390 = vst [vmem:[#allocation103_spill] sm:$0xff] %v20203_v2  ;;  %v6309_v50 = vperm.slane %v6301_v59, %v11781_v3  ;;  %vm23393_vm1 = vcmask 326656   ;;  %v6299_v56 = vsel %vm246_vm0, %v6298_v15, %v23388_v1  ;;  %v9455_v55 = vsel %vm246_vm0, %v9454_v52, %v20184_v21  ;;  %v23394_v15 = vld [vmem:[#allocation138_spill] sm:$0xff] }
 0x5fd   : > { %v6289_v60 = vsel %vm246_vm0, %v6257_v45, %v23392_v33  ;;  %v20210_v61 = vsel %vm23393_vm1, %v11091_v30, %v10559_v7  ;;  %v9305_v53 = vperm.slane %v9299_v32, %v11781_v3  ;;  %v9076_v48 = vrot.slane %v20037_v5, 4  ;;  %10720 = vrot.lane.b32.xlu1 %v9455_v55, %s23387_s27  ;;  %vm23402_vm2 = vmmov %vm23393_vm1 }
 0x5fe   : > { %v6287_v9 = vsel %vm246_vm0, %v6286_v35, %v23391_v25  ;;  %v9453_v45 = vsel %vm246_vm0, %v20024_v42, %v9452_v41  ;;  %v9329_v30 = vperm.slane %v9323_v14, %v11781_v3  ;;  %v9212_v7 = vrot.slane %v20104_v36, 4  ;;  %v23396_v25 = vld [vmem:[#allocation55_spill] sm:$0xff]  ;;  %vm23408_vm4 = vmmov %vm23393_vm1 }
 0x5ff   : > { %v23395_v1 = vrot.slane %v23394_v15, 4  ;;  %v9710_v5 = vrot.slane %v20203_v2, 4  ;;  %v20233_v52 = vperm.slane %v6289_v60, %v11781_v3  ;;  %10704 = vrot.lane.b32.xlu0 %v9453_v45, %s23376_s26  ;;  %v9231_v42 = vsel %vm246_vm0, %v9230_v18, %v20194_v62  ;;  %v10541_v18 = vpop.permute.xlu0 %10540  ;;  %v10587_v45 = vpop.permute.xlu2 %10586  ;;  %vm23430_vm7 = vmmov %vm23393_vm1 }
 0x600   : > { %v20240_v41 = vsel %vm246_vm0, %v5422_v39, %v23394_v15  ;;  %v6305_v36 = vperm.slane %v6299_v56, %v11781_v3  ;;  %v6322_v35 = vrot.slane %v6309_v50, 4  ;;  %10716 = vrot.lane.b32.xlu2 %v9231_v42, %s23387_s27  ;;  %v9188_v32 = vrot.slane %v20129_v47, 4  ;;  %v23399_v42 = vld [vmem:[#allocation137_spill] sm:$0xff] }
 0x601   : > { %v20229_v59 = vsel %vm246_vm0, %v19914_v6, %v23395_v1  ;;  %v10557_v6 = vpop.permute.xlu1 %10556  ;;  %v20246_v14 = vperm.slane %v6287_v9, %v11781_v3  ;;  %v23397_v33 = vrot.slane %v23396_v25, 4  ;;  %v9344_v55 = vrot.slane %v9305_v53, 4  ;;  %v23437_v1 = vld [vmem:[#allocation91_spill] sm:$0xff] }
 0x602   : > { %v9077_v39 = vsel %vm246_vm0, %v20008_v17, %v9076_v48  ;;  %v11090_v56 = vsel %vm10942_vm9, %v20000_v54, %v10541_v18  ;;  %v9342_v15 = vrot.slane %v9329_v30, 4  ;;  %v9213_v47 = vsel %vm246_vm0, %v20066_v57, %v9212_v7  ;;  %v23438_v57 = vld [vmem:[#allocation100_spill] sm:$0xff] }
 0x603   : > { %v20251_v60 = vsel %vm246_vm0, %v6309_v50, %v23397_v33  ;;  %v9100_v9 = vrot.slane %v20016_v24, 4  ;;  %v23400_v50 = vrot.slane %v23399_v42, 4  ;;  %v11094_v17 = vsel %vm23402_vm2, %v11090_v56, %v10557_v6 }
 0x604   : > { %23398 = vst [vmem:[#allocation107_spill] sm:$0xff] %v20251_v60  ;;  %v9120_v48 = vrot.slane %v20112_v22, 4  ;;  %v20271_v54 = vsel %vm246_vm0, %v6322_v35, %v23396_v25  ;;  %v9189_v24 = vsel %vm246_vm0, %v20096_v10, %v9188_v32  ;;  %vm23404_vm3 = vcmask 359424   ;;  %v23406_v25 = vld [vmem:[#allocation131_spill] sm:$0xff] }
 0x605   : > { %v20265_v33 = vsel %vm246_vm0, %v20233_v52, %v23400_v50  ;;  %23403 = vst [vmem:[#allocation93_spill] sm:$0xff] %v20271_v54  ;;  %v20277_v7 = vsel %vm23404_vm3, %v11094_v17, %v10573_v63  ;;  %v9345_v18 = vsel %vm246_vm0, %v9329_v30, %v9344_v55  ;;  %v20281_v50 = vperm.slane %v9213_v47, %v11781_v3  ;;  %vm23410_vm5 = vmmov %vm23404_vm3 }
 0x606   : > { %23401 = vst [vmem:[#allocation113_spill] sm:$0xff] %v20265_v33  ;;  %v20284_v6 = vperm.slane %v9077_v39, %v11781_v3  ;;  %v9324_v22 = vrot.slane %v20171_v44, 4  ;;  %10734 = vrot.lane.b32.xlu1 %v9345_v18, %s23405_s28  ;;  %v9343_v35 = vsel %vm246_vm0, %v9342_v15, %v9305_v53  ;;  %v9101_v10 = vsel %vm246_vm0, %v19976_v26, %v9100_v9  ;;  %vm23431_vm8 = vmmov %vm23404_vm3 }
 0x607   : > { %v9412_v63 = vrot.slane %v20117_v46, 4  ;;  %v9436_v32 = vrot.slane %v20088_v34, 4  ;;  %v6318_v30 = vrot.slane %v6305_v36, 4  ;;  %v23407_v55 = vrot.slane %v23406_v25, 4  ;;  %10718 = vrot.lane.b32.xlu0 %v9343_v35, %s23387_s27  ;;  %v10555_v15 = vpop.permute.xlu0 %10554  ;;  %v20316_v18 = vpop.permute.xlu2 %10592  ;;  %vm23450_vm1 = vmmov %vm23404_vm3 }
 0x608   : > { %v9121_v44 = vsel %vm246_vm0, %v20075_v0, %v9120_v48  ;;  %v20306_v46 = vperm.slane %v9189_v24, %v11781_v3  ;;  %v9234_v47 = vrot.slane %v20281_v50, 4  ;;  %v9109_v9 = vperm.slane %v9101_v10, %v11781_v3 }
 0x609   : > { %v20296_v56 = vsel %vm246_vm0, %v6305_v36, %v23407_v55  ;;  %10730 = vrot.lane.b32.xlu2 %v9121_v44, %s23405_s28  ;;  %v10571_v34 = vpop.permute.xlu1 %10570  ;;  %v9232_v36 = vrot.slane %v20194_v62, 4  ;;  %v9300_v17 = vrot.slane %v20161_v20, 4  ;;  %v9325_v0 = vsel %vm246_vm0, %v20134_v19, %v9324_v22 }
 0x60a   : > { %v11093_v48 = vsel %vm23408_vm4, %v20069_v29, %v10555_v15  ;;  %v9124_v24 = vrot.slane %v20284_v6, 4  ;;  %v9413_v62 = vsel %vm246_vm0, %v20085_v31, %v9412_v63  ;;  %v9437_v35 = vsel %vm246_vm0, %v20050_v16, %v9436_v32  ;;  %v23411_v31 = vld [vmem:[#allocation125_spill] sm:$0xff] }
 0x60b   : > { %v20325_v10 = vsel %vm246_vm0, %v6318_v30, %v23406_v25  ;;  %v11097_v20 = vsel %vm23410_vm5, %v11093_v48, %v10571_v34  ;;  %v9456_v19 = vrot.slane %v20184_v21, 4  ;;  %v9723_v29 = vsel %vm246_vm0, %v9722_v13, %v20229_v59 }
 0x60c   : > { %23409 = vst [vmem:[#allocation174_spill] sm:$0xff] %v20325_v10  ;;  %v20334_v22 = vperm.slane %v9325_v0, %v11781_v3  ;;  %v23412_v63 = vrot.slane %v23411_v31, 4  ;;  %v23414_v32 = vrot.slane %v19866_v43, 4  ;;  %vm23416_vm6 = vcmask 392192  }
 0x60d   : > { %v20349_v21 = vsel %vm23416_vm6, %v11097_v20, %v10587_v45  ;;  %v9235_v13 = vsel %vm246_vm0, %v9234_v47, %v20306_v46  ;;  %v9301_v25 = vsel %vm246_vm0, %v20125_v40, %v9300_v17  ;;  %v9421_v55 = vperm.slane %v9413_v62, %v11781_v3  ;;  %v23421_v62 = vld [vmem:[#allocation135_spill] sm:$0xff]  ;;  %vm23449_vm9 = vmmov %vm23416_vm6 }
 0x60e   : > { %v20340_v16 = vsel %vm246_vm0, %v19899_v8, %v23412_v63  ;;  %v20346_v30 = vsel %vm246_vm0, %v23414_v32, %v23349_v51  ;;  %v9445_v44 = vperm.slane %v9437_v35, %v11781_v3  ;;  %10748 = vrot.lane.b32.xlu1 %v9235_v13, %s11553_s17  ;;  %v9233_v43 = vsel %vm246_vm0, %v20168_v38, %v9232_v36  ;;  %v23424_v63 = vld [vmem:[#allocation63_spill] sm:$0xff]  ;;  %v23426_v13 = vld [vmem:[#allocation89_spill] sm:$0xff]  ;;  %vm23455_vm2 = vmmov %vm23416_vm6 }
 0x60f   : > { %23413 = vst [vmem:[#allocation94_spill] sm:$0xff] %v20340_v16  ;;  %v9125_v51 = vsel %vm246_vm0, %v9109_v9, %v9124_v24  ;;  %v9122_v34 = vrot.slane %v9109_v9, 4  ;;  %v20362_v45 = vperm.slane %v9723_v29, %v11741_v28  ;;  %10732 = vrot.lane.b32.xlu0 %v9233_v43, %s23405_s28  ;;  %v9457_v40 = vsel %vm246_vm0, %v20153_v37, %v9456_v19  ;;  %v23420_v24 = vld [vmem:[#allocation47_spill] sm:$0xff]  ;;  %vm23462_vm4 = vmmov %vm23455_vm2 }
 0x610   : > { %23415 = vst [vmem:[#allocation64_spill] sm:$0xff] %v20346_v30  ;;  %v9686_v15 = vrot.slane %v20346_v30, 4  ;;  %v23417_v47 = vrot.slane %v19920_v58, 4  ;;  %v9711_v38 = vsel %vm246_vm0, %v9710_v5, %v20240_v41  ;;  %v20378_v9 = vperm.slane %v9301_v25, %v11781_v3  ;;  %v10561_v5 = vpop.permute.xlu0 %10560  ;;  %v23427_v43 = vld [vmem:[#allocation59_spill] sm:$0xff] }
 0x611   : > { %10736 = vrot.lane.b32.xlu2 %v9457_v40, %s23405_s28  ;;  %v10577_v36 = vpop.permute.xlu1 %10576  ;;  %v9346_v37 = vrot.slane %v20334_v22, 4  ;;  %v23418_v0 = vrot.slane %v19899_v8, 4  ;;  %v23422_v35 = vrot.slane %v23421_v62, 4  ;;  %v9460_v19 = vrot.slane %v9421_v55, 4  ;;  %v23428_v8 = vld [vmem:[#allocation69_spill] sm:$0xff]  ;;  %v23439_v30 = vld [vmem:[#allocation175_spill] sm:$0xff] }
 0x612   : > { %v9699_v17 = vsel %vm246_vm0, %v23417_v47, %v20340_v16  ;;  %v9458_v29 = vrot.slane %v9445_v44, 4  ;;  %v23425_v32 = vrot.slane %v23424_v63, 4  ;;  %v23429_v40 = vrot.slane %v23428_v8, 4 }
 0x613   : > { %v20385_v48 = vsel %vm246_vm0, %v23418_v0, %v23411_v31  ;;  %v20391_v20 = vsel %vm246_vm0, %v23422_v35, %v23420_v24  ;;  %v11096_v47 = vsel %vm23430_vm7, %v20144_v12, %v10561_v5  ;;  %v10607_v0 = vpop.permute.xlu2 %10606  ;;  %v20406_v24 = vperm.slane %v9699_v17, %v11741_v28 }
 0x614   : > { %23419 = vst [vmem:[#allocation199_spill] sm:$0xff] %v20385_v48  ;;  %v20397_v25 = vsel %vm246_vm0, %v23426_v13, %v23425_v32  ;;  %v9499_v31 = vsel %vm246_vm0, %v23429_v40, %v23427_v43  ;;  %v20409_v62 = vperm.slane %v9711_v38, %v11741_v28  ;;  %v9758_v35 = vrot.slane %v20362_v45, 4  ;;  %v23433_v38 = vld [vmem:[#allocation162_spill] sm:$0xff] }
 0x615   : > { %23423 = vst [vmem:[#allocation158_spill] sm:$0xff] %v20391_v20  ;;  %v11100_v32 = vsel %vm23431_vm8, %v11096_v47, %v10577_v36  ;;  %v9236_v53 = vrot.slane %v20306_v46, 4  ;;  %v9687_v26 = vsel %vm246_vm0, %v9686_v15, %v20385_v48  ;;  %v9462_v40 = vrot.slane %v20391_v20, 4  ;;  %v23435_v46 = vld [vmem:[#allocation176_spill] sm:$0xff] }
 0x616   : > { %v23432_v12 = vrot.slane %v23426_v13, 4  ;;  %v23434_v5 = vrot.slane %v23433_v38, 4  ;;  %v20428_v36 = vperm.slane %v9499_v31, %v11741_v28  ;;  %v23436_v47 = vrot.slane %v23435_v46, 4  ;;  %10762 = vrot.lane.b32.xlu1 %v9125_v51, %s23441_s29 }
 0x617   : > { %v9123_v13 = vsel %vm246_vm0, %v9122_v34, %v20284_v6  ;;  %v9459_v2 = vsel %vm246_vm0, %v9458_v29, %v9421_v55  ;;  %v9734_v58 = vrot.slane %v20406_v24, 4  ;;  %v9759_v6 = vsel %vm246_vm0, %v9758_v35, %v20409_v62  ;;  %v23443_v55 = vld [vmem:[#allocation190_spill] sm:$0xff] }
 0x618   : > { %v20421_v17 = vsel %vm246_vm0, %v23432_v12, %v23424_v63  ;;  %v9475_v39 = vsel %vm246_vm0, %v23434_v5, %v20397_v25  ;;  %v20434_v15 = vsel %vm246_vm0, %v23437_v1, %v23436_v47  ;;  %v9347_v63 = vsel %vm246_vm0, %v9346_v37, %v20378_v9  ;;  %10746 = vrot.lane.b32.xlu0 %v9123_v13, %s11553_s17  ;;  %v23442_v37 = vld [vmem:[#allocation177_spill] sm:$0xff] }
 0x619   : > { %v9461_v12 = vsel %vm246_vm0, %v9445_v44, %v9460_v19  ;;  %v23440_v5 = vrot.slane %v23439_v30, 4  ;;  %v20448_v47 = vperm.slane %v9687_v26, %v11741_v28  ;;  %v9463_v44 = vsel %vm246_vm0, %v9462_v40, %v20421_v17  ;;  %10750 = vrot.lane.b32.xlu2 %v9347_v63, %s11553_s17  ;;  %v10591_v29 = vpop.permute.xlu1 %10590 }
 0x61a   : > { %v20457_v34 = vperm.slane %v9475_v39, %v11741_v28  ;;  %v9574_v51 = vrot.slane %v23442_v37, 4  ;;  %v23444_v19 = vrot.slane %v23443_v55, 4  ;;  %v9534_v13 = vrot.slane %v20428_v36, 4 }
 0x61b   : > { %v9487_v31 = vsel %vm246_vm0, %v23440_v5, %v23438_v57  ;;  %v23445_v40 = vrot.slane %v23437_v1, 4  ;;  %v23446_v5 = vrot.slane %v19828_v4, 4  ;;  %v20480_v63 = vperm.slane %v9759_v6, %v11781_v3  ;;  %v10621_v6 = vpop.permute.xlu2 %10620 }
 0x61c   : > { %v9587_v26 = vsel %vm246_vm0, %v23444_v19, %v20434_v15  ;;  %v20466_v35 = vperm.slane %v9487_v31, %v11741_v28  ;;  %v10575_v19 = vpop.permute.xlu0 %10574  ;;  %v23447_v31 = vrot.slane %v19532_v49, 4  ;;  %v23448_v1 = vrot.slane %v20251_v60, 4  ;;  %v23451_v49 = vld [vmem:[#allocation34_spill] sm:$0xff] }
 0x61d   : > { %v20473_v39 = vsel %vm246_vm0, %v23445_v40, %v23435_v46  ;;  %v9611_v30 = vsel %vm246_vm0, %v23446_v5, %v19883_v27  ;;  %v20494_v40 = vsel %vm23449_vm9, %v11100_v32, %v20316_v18  ;;  %v11099_v5 = vsel %vm23450_vm1, %v20210_v61, %v10575_v19 }
 0x61e   : > { %v20486_v20 = vsel %vm246_vm0, %v23447_v31, %v23344_v23  ;;  %v9835_v46 = vsel %vm246_vm0, %v23448_v1, %v20296_v56  ;;  %v20499_v16 = vperm.slane %v9587_v26, %v11741_v28  ;;  %v23452_v48 = vrot.slane %v23451_v49, 4  ;;  %10768 = vrot.lane.b32.xlu1 %v9461_v12, %s23441_s29 }
 0x61f   : > { %v23453_v31 = vrot.slane %v20233_v52, 4  ;;  %v11103_v18 = vsel %vm23455_vm2, %v11099_v5, %v10591_v29  ;;  %v20515_v61 = vperm.slane %v9463_v44, %v11741_v28  ;;  %v9575_v32 = vsel %vm246_vm0, %v9574_v51, %v20473_v39  ;;  %v23456_v52 = vld [vmem:[#allocation208_spill] sm:$0xff] }
 0x620   : > { %v20505_v23 = vsel %vm246_vm0, %v20246_v14, %v23452_v48  ;;  %v20520_v26 = vperm.slane %v9611_v30, %v11741_v28  ;;  %v9510_v48 = vrot.slane %v20457_v34, 4  ;;  %v9535_v19 = vsel %vm246_vm0, %v9534_v13, %v20466_v35  ;;  %10752 = vrot.lane.b32.xlu0 %v9459_v2, %s11553_s17  ;;  %s23465_s17 = smov 96  }
 0x621   : > { %v20511_v1 = vsel %vm246_vm0, %v23453_v31, %v23399_v42  ;;  %v23457_v42 = vrot.slane %v23456_v52, 4  ;;  %v20530_v29 = vperm.slane %v9835_v46, %v11741_v28  ;;  %v23458_v51 = vrot.slane %v20265_v33, 4 }
 0x622   : > { %23454 = vst [vmem:[#allocation206_spill] sm:$0xff] %v20511_v1  ;;  %v9798_v44 = vrot.slane %v20511_v1, 4  ;;  %v23459_v5 = vrot.slane %v20271_v54, 4  ;;  %vm23460_vm3 = vcmask 424960   ;;  %v9735_v46 = vsel %vm246_vm0, %v9734_v58, %v20448_v47 }
 0x623   : > { %v9599_v31 = vsel %vm246_vm0, %v23457_v42, %v20486_v20  ;;  %v9811_v30 = vsel %vm246_vm0, %v23458_v51, %v20505_v23  ;;  %v20542_v60 = vsel %vm23460_vm3, %v11103_v18, %v10607_v0  ;;  %v20548_v42 = vperm.slane %v9575_v32, %v11741_v28  ;;  %v10605_v32 = vpop.permute.xlu1 %10604  ;;  %vm23463_vm5 = vmmov %vm23460_vm3 }
 0x624   : > { %v9823_v13 = vsel %vm246_vm0, %v23459_v5, %v20325_v10  ;;  %v9622_v1 = vrot.slane %v20499_v16, 4  ;;  %v23461_v51 = vrot.slane %v20246_v14, 4  ;;  %v9237_v0 = vsel %vm246_vm0, %v20281_v50, %v9236_v53  ;;  %v10589_v53 = vpop.permute.xlu0 %10588  ;;  %vm23466_vm7 = vmmov %vm23460_vm3 }
 0x625   : > { %v20561_v12 = vperm.slane %v9535_v19, %v11781_v3  ;;  %v20564_v58 = vperm.slane %v9599_v31, %v11741_v28  ;;  %v9646_v18 = vrot.slane %v20520_v26, 4  ;;  %10764 = vrot.lane.b32.xlu2 %v9237_v0, %s23441_s29  ;;  %v9511_v14 = vsel %vm246_vm0, %v9510_v48, %v20515_v61  ;;  %v10635_v48 = vpop.permute.xlu2 %10634  ;;  %vm23470_vm1 = vmmov %vm23460_vm3 }
 0x626   : > { %v20555_v54 = vsel %vm246_vm0, %v23461_v51, %v23451_v49  ;;  %v20571_v49 = vperm.slane %v9811_v30, %v11741_v28  ;;  %v9829_v2 = vperm.slane %v9823_v13, %v11741_v28  ;;  %v9870_v50 = vrot.slane %v20530_v29, 4 }
 0x627   : > { %v20576_v19 = vperm.slane %v9735_v46, %v11781_v3  ;;  %v9782_v31 = vrot.slane %v20480_v63, 4  ;;  %v9799_v5 = vsel %vm246_vm0, %v9798_v44, %v20555_v54  ;;  %v11102_v51 = vsel %vm23462_vm4, %v20277_v7, %v10589_v53 }
 0x628   : > { %v9348_v30 = vrot.slane %v20378_v9, 4  ;;  %v9623_v13 = vsel %vm246_vm0, %v9622_v1, %v20548_v42  ;;  %v11106_v0 = vsel %vm23463_vm5, %v11102_v51, %v10605_v32  ;;  %v20588_v10 = vperm.slane %v9511_v14, %v11781_v3 }
 0x629   : > { %v9558_v46 = vrot.slane %v20561_v12, 4  ;;  %v9647_v33 = vsel %vm246_vm0, %v9646_v18, %v20564_v58  ;;  %v9805_v44 = vperm.slane %v9799_v5, %v11741_v28  ;;  %v9846_v7 = vrot.slane %v20571_v49, 4 }
 0x62a   : > { %v9871_v53 = vsel %vm246_vm0, %v9870_v50, %v9829_v2  ;;  %vm23464_vm6 = vcmask 457728   ;;  %v9783_v1 = vsel %vm246_vm0, %v9782_v31, %v20576_v19  ;;  %v9629_v32 = vperm.slane %v9623_v13, %v11781_v3 }
 0x62b   : > { %v20597_v9 = vsel %vm23464_vm6, %v11106_v0, %v10621_v6  ;;  %10782 = vrot.lane.b32.xlu1 %v9783_v1, %s23465_s17  ;;  %v9349_v14 = vsel %vm246_vm0, %v20334_v22, %v9348_v30  ;;  %v9653_v18 = vperm.slane %v9647_v33, %v11781_v3  ;;  %v9536_v5 = vrot.slane %v20466_v35, 4  ;;  %v10619_v31 = vpop.permute.xlu1 %10618  ;;  %vm23467_vm8 = vmmov %vm23464_vm6 }
 0x62c   : > { %10766 = vrot.lane.b32.xlu0 %v9349_v14, %s23441_s29  ;;  %v9559_v6 = vsel %vm246_vm0, %v9558_v46, %v20588_v10  ;;  %v20611_v50 = vperm.slane %v9871_v53, %v11781_v3  ;;  %v9847_v51 = vsel %vm246_vm0, %v9846_v7, %v9805_v44  ;;  %v10603_v13 = vpop.permute.xlu0 %10602  ;;  %v9672_v0 = vrot.slane %v9629_v32, 4  ;;  %vm23471_vm2 = vmmov %vm23464_vm6 }
 0x62d   : > { %10778 = vrot.lane.b32.xlu2 %v9559_v6, %s23465_s17  ;;  %v11105_v33 = vsel %vm23466_vm7, %v20349_v21, %v10603_v13  ;;  %v10641_v22 = vpop.permute.xlu2 %10640  ;;  %v9670_v35 = vrot.slane %v9653_v18, 4  ;;  %v9512_v30 = vrot.slane %v20515_v61, 4  ;;  %v9537_v46 = vsel %vm246_vm0, %v20428_v36, %v9536_v5  ;;  %vm23474_vm4 = vmmov %vm23471_vm2 }
 0x62e   : > { %v11109_v53 = vsel %vm23467_vm8, %v11105_v33, %v10619_v31  ;;  %v20622_v1 = vperm.slane %v9847_v51, %v11781_v3  ;;  %v9894_v14 = vrot.slane %v20611_v50, 4  ;;  %vm23468_vm9 = vcmask 490496  }
 0x62f   : > { %v20626_v7 = vsel %vm23468_vm9, %v11109_v53, %v10635_v48  ;;  %v9673_v6 = vsel %vm246_vm0, %v9653_v18, %v9672_v0  ;;  %v20630_v21 = vperm.slane %v9537_v46, %v11781_v3  ;;  %v9671_v61 = vsel %vm246_vm0, %v9670_v35, %v9629_v32  ;;  %vm23472_vm3 = vmmov %vm23468_vm9 }
 0x630   : > { %v9513_v36 = vsel %vm246_vm0, %v20457_v34, %v9512_v30  ;;  %v9872_v5 = vrot.slane %v9829_v2, 4  ;;  %v9895_v31 = vsel %vm246_vm0, %v9894_v14, %v20622_v1  ;;  %v9648_v18 = vrot.slane %v20564_v58, 4  ;;  %vm23475_vm5 = vmmov %vm23472_vm3 }
 0x631   : > { %v9612_v51 = vrot.slane %v19883_v27, 4  ;;  %v20643_v0 = vperm.slane %v9513_v36, %v11781_v3  ;;  %v9562_v32 = vrot.slane %v20630_v21, 4  ;;  %v9560_v33 = vrot.slane %v20588_v10, 4  ;;  %vm23479_vm7 = vmmov %vm23472_vm3 }
 0x632   : > { %v9848_v35 = vrot.slane %v9805_v44, 4  ;;  %v9873_v30 = vsel %vm246_vm0, %v20530_v29, %v9872_v5  ;;  %v9784_v27 = vrot.slane %v20576_v19, 4  ;;  %v9500_v46 = vrot.slane %v23427_v43, 4 }
 0x633   : > { %10796 = vrot.lane.b32.xlu1 %v9673_v6, %s23469_s30  ;;  %v10625_v48 = vpop.permute.xlu1 %10624  ;;  %v9624_v53 = vrot.slane %v20548_v42, 4  ;;  %v9649_v14 = vsel %vm246_vm0, %v20520_v26, %v9648_v18  ;;  %v9563_v10 = vsel %vm246_vm0, %v9562_v32, %v20643_v0  ;;  %v20663_v44 = vperm.slane %v9873_v30, %v11781_v3 }
 0x634   : > { %10780 = vrot.lane.b32.xlu0 %v9671_v61, %s23465_s17  ;;  %v10609_v13 = vpop.permute.xlu0 %10608  ;;  %v9736_v29 = vrot.slane %v20448_v47, 4  ;;  %v9760_v19 = vrot.slane %v20409_v62, 4  ;;  %v9613_v43 = vsel %vm246_vm0, %v19828_v4, %v9612_v51  ;;  %v9561_v26 = vsel %vm246_vm0, %v20561_v12, %v9560_v33 }
 0x635   : > { %10784 = vrot.lane.b32.xlu2 %v9895_v31, %s23465_s17  ;;  %v11108_v34 = vsel %vm23470_vm1, %v20494_v40, %v10609_v13  ;;  %v10655_v2 = vpop.permute.xlu2 %10654  ;;  %v9849_v42 = vsel %vm246_vm0, %v20571_v49, %v9848_v35  ;;  %v9724_v6 = vrot.slane %v20229_v59, 4  ;;  %v9600_v61 = vrot.slane %v20486_v20, 4  ;;  %s11463_s17 = scalar_lea.hbm %s21056_s1, 128 }
 0x636   : > { %v11112_v58 = vsel %vm23471_vm2, %v11108_v34, %v10625_v48  ;;  %v9785_v62 = vsel %vm246_vm0, %v20480_v63, %v9784_v27  ;;  %v20681_v4 = vperm.slane %v9649_v14, %v11781_v3  ;;  %v9712_v47 = vrot.slane %v20240_v41, 4  ;;  %v23478_v14 = vld [vmem:[#allocation94_spill] sm:$0xff] }
 0x637   : > { %v20658_v40 = vsel %vm23472_vm3, %v11112_v58, %v10641_v22  ;;  %v9588_v22 = vrot.slane %v20434_v15, 4  ;;  %v9476_v12 = vrot.slane %v20397_v25, 4  ;;  %v9896_v15 = vrot.slane %v20622_v1, 4 }
 0x638   : > { %v9625_v59 = vsel %vm246_vm0, %v20499_v16, %v9624_v53  ;;  %v20690_v36 = vperm.slane %v9849_v42, %v11781_v3  ;;  %v9898_v63 = vrot.slane %v20663_v44, 4  ;;  %v9737_v5 = vsel %vm246_vm0, %v20406_v24, %v9736_v29  ;;  %v23477_v53 = vld [vmem:[#allocation199_spill] sm:$0xff] }
 0x639   : > { %v9761_v25 = vsel %vm246_vm0, %v20362_v45, %v9760_v19  ;;  %v9576_v1 = vrot.slane %v20473_v39, 4  ;;  %v9589_v16 = vsel %vm246_vm0, %v23443_v55, %v9588_v22  ;;  %v20703_v18 = vperm.slane %v9613_v43, %v11741_v28 }
 0x63a   : > { %v20707_v13 = vperm.slane %v9625_v59, %v11781_v3  ;;  %v9674_v24 = vrot.slane %v20681_v4, 4  ;;  %v9601_v45 = vsel %vm246_vm0, %v23456_v52, %v9600_v61  ;;  %v9836_v39 = vrot.slane %v20296_v56, 4 }
 0x63b   : > { %10810 = vrot.lane.b32.xlu1 %v9563_v10, %s23473_s2  ;;  %v10639_v49 = vpop.permute.xlu1 %10638  ;;  %v9745_v55 = vperm.slane %v9737_v5, %v11781_v3  ;;  %vm23476_vm6 = vcmask 523264   ;;  %v9464_v34 = vrot.slane %v20421_v17, 4  ;;  %v9899_v33 = vsel %vm246_vm0, %v9898_v63, %v20690_v36 }
 0x63c   : > { %10794 = vrot.lane.b32.xlu0 %v9561_v26, %s23469_s30  ;;  %v10623_v20 = vpop.permute.xlu0 %10622  ;;  %v9769_v35 = vperm.slane %v9761_v25, %v11781_v3  ;;  %v20724_v30 = vperm.slane %v9589_v16, %v11741_v28  ;;  %v9577_v56 = vsel %vm246_vm0, %v23442_v37, %v9576_v1  ;;  %v20732_v52 = vperm.slane %v9601_v45, %v11741_v28  ;;  %vm23480_vm8 = vmmov %vm23476_vm6  ;;  %v23485_v16 = vld [vmem:[#allocation103_spill] sm:$0xff] }
 0x63d   : > { %10798 = vrot.lane.b32.xlu2 %v9785_v62, %s23469_s30  ;;  %v11111_v31 = vsel %vm23474_vm4, %v20542_v60, %v10623_v20  ;;  %v10669_v48 = vpop.permute.xlu2 %10668  ;;  %v9725_v60 = vsel %vm246_vm0, %v19943_v11, %v9724_v6  ;;  %v9897_v11 = vsel %vm246_vm0, %v20611_v50, %v9896_v15  ;;  %v9658_v17 = vrot.slane %v20703_v18, 4  ;;  %v23482_v15 = vld [vmem:[#allocation175_spill] sm:$0xff]  ;;  %v23483_v20 = vld [vmem:[#allocation205_spill] sm:$0xff]  ;;  %vm23491_vm1 = vmmov %vm23476_vm6 }
 0x63e   : > { %v11115_v51 = vsel %vm23475_vm5, %v11111_v31, %v10639_v49  ;;  %v9477_v58 = vsel %vm246_vm0, %v23433_v38, %v9476_v12  ;;  %v9488_v27 = vrot.slane %v23438_v57, 4  ;;  %v9501_v50 = vsel %vm246_vm0, %v23428_v8, %v9500_v46  ;;  %v23481_v12 = vld [vmem:[#allocation158_spill] sm:$0xff]  ;;  %vm23497_vm4 = vmmov %vm23491_vm1 }
 0x63f   : > { %v20717_v32 = vsel %vm23476_vm6, %v11115_v51, %v10655_v2  ;;  %v9675_v2 = vsel %vm246_vm0, %v9674_v24, %v20707_v13  ;;  %v9688_v37 = vrot.slane %v23477_v53, 4  ;;  %v9700_v10 = vrot.slane %v23478_v14, 4 }
 0x640   : > { %v9800_v29 = vrot.slane %v20555_v54, 4  ;;  %v9788_v43 = vrot.slane %v9745_v55, 4  ;;  %v9812_v26 = vrot.slane %v20505_v23, 4  ;;  %v9786_v22 = vrot.slane %v9769_v35, 4 }
 0x641   : > { %v20749_v38 = vperm.slane %v9577_v56, %v11741_v28  ;;  %v9634_v57 = vrot.slane %v20724_v30, 4  ;;  %v9659_v54 = vsel %vm246_vm0, %v9658_v17, %v20732_v52  ;;  %v20757_v6 = vperm.slane %v9477_v58, %v11741_v28 }
 0x642   : > { %v20760_v61 = vperm.slane %v9501_v50, %v11741_v28  ;;  %v9564_v62 = vrot.slane %v20643_v0, 4  ;;  %v9465_v49 = vsel %vm246_vm0, %v23481_v12, %v9464_v34  ;;  %v9789_v59 = vsel %vm246_vm0, %v9769_v35, %v9788_v43 }
 0x643   : > { %10816 = vrot.lane.b32.xlu1 %v9899_v33, %s23473_s2  ;;  %v10653_v19 = vpop.permute.xlu1 %10652  ;;  %v9701_v63 = vsel %vm246_vm0, %v23483_v20, %v9700_v10  ;;  %v20772_v5 = vperm.slane %v9725_v60, %v11741_v28  ;;  %vm23484_vm9 = vcmask 556032   ;;  %v9787_v31 = vsel %vm246_vm0, %v9786_v22, %v9745_v55  ;;  %v23487_v55 = vld [vmem:[#allocation64_spill] sm:$0xff]  ;;  %v23488_v33 = vld [vmem:[#allocation113_spill] sm:$0xff] }
 0x644   : > { %10800 = vrot.lane.b32.xlu0 %v9897_v11, %s23469_s30  ;;  %v10637_v42 = vpop.permute.xlu0 %10636  ;;  %v9635_v0 = vsel %vm246_vm0, %v9634_v57, %v20749_v38  ;;  %v20781_v1 = vperm.slane %v9659_v54, %v11781_v3  ;;  %v9713_v51 = vsel %vm246_vm0, %v23485_v16, %v9712_v47  ;;  %v20789_v24 = vperm.slane %v9465_v49, %v11741_v28  ;;  %vm23492_vm2 = vmmov %vm23484_vm9 }
 0x645   : > { %10812 = vrot.lane.b32.xlu2 %v9675_v2, %s23473_s2  ;;  %v11114_v8 = vsel %vm23479_vm7, %v20597_v9, %v10637_v42  ;;  %v10683_v46 = vpop.permute.xlu2 %10682  ;;  %v9489_v9 = vsel %vm246_vm0, %v23482_v15, %v9488_v27  ;;  %v9522_v45 = vrot.slane %v20757_v6, 4  ;;  %v9546_v60 = vrot.slane %v20760_v61, 4  ;;  %v23489_v2 = vld [vmem:[#allocation174_spill] sm:$0xff]  ;;  %vm23498_vm5 = vmmov %vm23492_vm2 }
 0x646   : > { %v11118_v23 = vsel %vm23480_vm8, %v11114_v8, %v10653_v19  ;;  %v9565_v41 = vsel %vm246_vm0, %v20630_v21, %v9564_v62  ;;  %v9689_v47 = vsel %vm246_vm0, %v23487_v55, %v9688_v37  ;;  %v20802_v34 = vperm.slane %v9701_v63, %v11741_v28  ;;  %v23490_v21 = vld [vmem:[#allocation107_spill] sm:$0xff]  ;;  %vm23501_vm7 = vmmov %vm23492_vm2 }
 0x647   : > { %v20775_v25 = vsel %vm23484_vm9, %v11118_v23, %v10669_v48  ;;  %v20792_v48 = vperm.slane %v9489_v9, %v11741_v28  ;;  %v9813_v35 = vsel %vm246_vm0, %v23488_v33, %v9812_v26  ;;  %v20808_v56 = vperm.slane %v9713_v51, %v11741_v28  ;;  %v23494_v23 = vld [vmem:[#allocation93_spill] sm:$0xff] }
 0x648   : > { %v9770_v17 = vrot.slane %v20772_v5, 4  ;;  %v9824_v58 = vrot.slane %v23489_v2, 4  ;;  %v9837_v27 = vsel %vm246_vm0, %v23490_v21, %v9836_v39  ;;  %v20815_v53 = vperm.slane %v9635_v0, %v11781_v3 }
 0x649   : > { %v9678_v37 = vrot.slane %v20781_v1, 4  ;;  %v9676_v14 = vrot.slane %v20707_v13, 4  ;;  %v9900_v10 = vrot.slane %v20690_v36, 4  ;;  %v9523_v26 = vsel %vm246_vm0, %v9522_v45, %v20789_v24  ;;  %v23493_v13 = vld [vmem:[#allocation206_spill] sm:$0xff] }
 0x64a   : > { %v9547_v39 = vsel %vm246_vm0, %v9546_v60, %v20792_v48  ;;  %v20827_v42 = vperm.slane %v9813_v35, %v11741_v28  ;;  %v9697_v57 = vperm.slane %v9689_v47, %v11741_v28  ;;  %v9801_v36 = vsel %vm246_vm0, %v23493_v13, %v9800_v29 }
 0x64b   : > { %10830 = vrot.lane.b32.xlu1 %v9789_v59, %s23486_s3  ;;  %v10667_v11 = vpop.permute.xlu1 %10666  ;;  %v20834_v8 = vperm.slane %v9837_v27, %v11741_v28  ;;  %v9771_v54 = vsel %vm246_vm0, %v9770_v17, %v20808_v56  ;;  %v9825_v62 = vsel %vm246_vm0, %v23494_v23, %v9824_v58  ;;  %vm23495_vm3 = vcmask 588800  }
 0x64c   : > { %10814 = vrot.lane.b32.xlu0 %v9787_v31, %s23473_s2  ;;  %v10651_v50 = vpop.permute.xlu0 %10650  ;;  %v9679_v49 = vsel %vm246_vm0, %v9678_v37, %v20815_v53  ;;  %v9529_v15 = vperm.slane %v9523_v26, %v11781_v3  ;;  %v9677_v29 = vsel %vm246_vm0, %v20681_v4, %v9676_v14  ;;  %v9553_v9 = vperm.slane %v9547_v39, %v11781_v3  ;;  %vm23499_vm6 = vmmov %vm23495_vm3 }
 0x64d   : > { %10826 = vrot.lane.b32.xlu2 %v9565_v41, %s23486_s3  ;;  %v11117_v19 = vsel %vm23491_vm1, %v20626_v7, %v10651_v50  ;;  %v10689_v43 = vpop.permute.xlu2 %10688  ;;  %v9746_v7 = vrot.slane %v20802_v34, 4  ;;  %v20852_v59 = vperm.slane %v9801_v36, %v11741_v28  ;;  %v9858_v20 = vrot.slane %v20827_v42, 4  ;;  %vm23502_vm8 = vmmov %vm23495_vm3 }
 0x64e   : > { %v11121_v22 = vsel %vm23492_vm2, %v11117_v19, %v10667_v11  ;;  %v20859_v63 = vperm.slane %v9771_v54, %v11781_v3  ;;  %v20862_v31 = vperm.slane %v9825_v62, %v11741_v28  ;;  %v9882_v4 = vrot.slane %v20834_v8, 4  ;;  %vm23504_vm1 = vmmov %vm23495_vm3 }
 0x64f   : > { %v20842_v12 = vsel %vm23495_vm3, %v11121_v22, %v10683_v46  ;;  %v9901_v46 = vsel %vm246_vm0, %v20663_v44, %v9900_v10  ;;  %v9747_v16 = vsel %vm246_vm0, %v9746_v7, %v9697_v57  ;;  %v9568_v45 = vrot.slane %v9529_v15, 4 }
 0x650   : > { %v9566_v44 = vrot.slane %v9553_v9, 4  ;;  %v9859_v55 = vsel %vm246_vm0, %v9858_v20, %v20852_v59  ;;  %v9753_v47 = vperm.slane %v9747_v16, %v11781_v3  ;;  %v9790_v33 = vrot.slane %v20859_v63, 4 }
 0x651   : > { %v9883_v35 = vsel %vm246_vm0, %v9882_v4, %v20862_v31  ;;  %v9569_v17 = vsel %vm246_vm0, %v9553_v9, %v9568_v45  ;;  %v9772_v21 = vrot.slane %v20808_v56, 4  ;;  %v9548_v37 = vrot.slane %v20792_v48, 4 }
 0x652   : > { %v9567_v2 = vsel %vm246_vm0, %v9566_v44, %v9529_v15  ;;  %v9889_v58 = vperm.slane %v9883_v35, %v11781_v3  ;;  %v9791_v27 = vsel %vm246_vm0, %v9790_v33, %v9753_v47  ;;  %v9748_v39 = vrot.slane %v9697_v57, 4 }
 0x653   : > { %10844 = vrot.lane.b32.xlu1 %v9679_v49, %s23496_s4  ;;  %v10673_v0 = vpop.permute.xlu1 %10672  ;;  %v9773_v56 = vsel %vm246_vm0, %v20772_v5, %v9772_v21  ;;  %v9680_v13 = vrot.slane %v20815_v53, 4  ;;  %v9524_v36 = vrot.slane %v20789_v24, 4  ;;  %v9549_v48 = vsel %vm246_vm0, %v20760_v61, %v9548_v37 }
 0x654   : > { %10828 = vrot.lane.b32.xlu0 %v9677_v29, %s23486_s3  ;;  %v10657_v51 = vpop.permute.xlu0 %10656  ;;  %v9902_v26 = vrot.slane %v9889_v58, 4  ;;  %vm23503_vm9 = vcmask 621568   ;;  %v20903_v54 = vperm.slane %v9773_v56, %v11781_v3  ;;  %v9749_v53 = vsel %vm246_vm0, %v20802_v34, %v9748_v39 }
 0x655   : > { %10832 = vrot.lane.b32.xlu2 %v9901_v46, %s23486_s3  ;;  %v11120_v60 = vsel %vm23497_vm4, %v20658_v40, %v10657_v51  ;;  %v10703_v41 = vpop.permute.xlu2 %10702  ;;  %v9865_v40 = vperm.slane %v9859_v55, %v11781_v3  ;;  %v9636_v24 = vrot.slane %v20749_v38, 4  ;;  %v9681_v61 = vsel %vm246_vm0, %v20781_v1, %v9680_v13  ;;  %vm23505_vm2 = vmmov %vm23503_vm9 }
 0x656   : > { %v11124_v28 = vsel %vm23498_vm5, %v11120_v60, %v10673_v0  ;;  %v9557_v57 = vperm.slane %v9549_v48, %v11781_v3  ;;  %v9660_v23 = vrot.slane %v20732_v52, 4  ;;  %v9525_v49 = vsel %vm246_vm0, %v20757_v6, %v9524_v36  ;;  %vm23507_vm4 = vmmov %vm23505_vm2 }
 0x657   : > { %v20877_v11 = vsel %vm23499_vm6, %v11124_v28, %v10689_v43  ;;  %v9904_v10 = vrot.slane %v9865_v40, 4  ;;  %v9903_v5 = vsel %vm246_vm0, %v9902_v26, %v9865_v40  ;;  %v9884_v15 = vrot.slane %v20862_v31, 4 }
 0x658   : > { %v9757_v38 = vperm.slane %v9749_v53, %v11781_v3  ;;  %v9794_v29 = vrot.slane %v20903_v54, 4  ;;  %v9792_v20 = vrot.slane %v9753_v47, 4  ;;  %v9637_v52 = vsel %vm246_vm0, %v20724_v30, %v9636_v24 }
 0x659   : > { %v9533_v4 = vperm.slane %v9525_v49, %v11781_v3  ;;  %v9570_v6 = vrot.slane %v9557_v57, 4  ;;  %v9661_v31 = vsel %vm246_vm0, %v20703_v18, %v9660_v23  ;;  %v9860_v0 = vrot.slane %v20852_v59, 4 }
 0x65a   : > { %v9885_v16 = vsel %vm246_vm0, %v20834_v8, %v9884_v15  ;;  %vm23506_vm3 = vcmask 654336   ;;  %v9795_v51 = vsel %vm246_vm0, %v9794_v29, %v9757_v38  ;;  %v9645_v45 = vperm.slane %v9637_v52, %v11781_v3 }
 0x65b   : > { %10858 = vrot.lane.b32.xlu1 %v9569_v17, %s23500_s13  ;;  %v10687_v50 = vpop.permute.xlu1 %10686  ;;  %v9793_v30 = vsel %vm246_vm0, %v20859_v63, %v9792_v20  ;;  %v9669_v60 = vperm.slane %v9661_v31, %v11781_v3  ;;  %v9571_v18 = vsel %vm246_vm0, %v9570_v6, %v9533_v4  ;;  %v9893_v59 = vperm.slane %v9885_v16, %v11781_v3  ;;  %vm23508_vm5 = vmmov %vm23506_vm3 }
 0x65c   : > { %10842 = vrot.lane.b32.xlu0 %v9567_v2, %s23496_s4  ;;  %v10671_v14 = vpop.permute.xlu0 %10670  ;;  %v9684_v55 = vrot.slane %v9645_v45, 4  ;;  %vm23509_vm6 = vcmask 687104  }
 0x65d   : > { %10846 = vrot.lane.b32.xlu2 %v9791_v27, %s23496_s4  ;;  %v11123_v19 = vsel %vm23501_vm7, %v20717_v32, %v10671_v14  ;;  %v10717_v43 = vpop.permute.xlu2 %10716  ;;  %v9905_v32 = vsel %vm246_vm0, %v9889_v58, %v9904_v10  ;;  %v9682_v47 = vrot.slane %v9669_v60, 4  ;;  %v9906_v17 = vrot.slane %v9893_v59, 4  ;;  %vm23510_vm7 = vmmov %vm23505_vm2 }
 0x65e   : > { %v11127_v22 = vsel %vm23502_vm8, %v11123_v19, %v10687_v50  ;;  %v9685_v2 = vsel %vm246_vm0, %v9669_v60, %v9684_v55  ;;  %v9572_v50 = vrot.slane %v9533_v4, 4  ;;  %vm23511_vm8 = vmmov %vm23506_vm3  ;;  %v9796_v14 = vrot.slane %v9757_v38, 4 }
 0x65f   : > { %v20899_v7 = vsel %vm23503_vm9, %v11127_v22, %v10703_v41  ;;  %v9861_v41 = vsel %vm246_vm0, %v20827_v42, %v9860_v0  ;;  %v9683_v42 = vsel %vm246_vm0, %v9682_v47, %v9645_v45  ;;  %vm23512_vm9 = vmmov %vm23509_vm6 }
 0x660   : > { %v9869_v35 = vperm.slane %v9861_v41, %v11781_v3  ;;  %v9573_v19 = vsel %vm246_vm0, %v9557_v57, %v9572_v50 }
 0x662   : > { %v9907_v58 = vsel %vm246_vm0, %v9906_v17, %v9869_v35  ;;  %v9908_v22 = vrot.slane %v9869_v35, 4 }
 0x663   : > { %10864 = vrot.lane.b32.xlu1 %v9905_v32, %s23500_s13  ;;  %v10701_v62 = vpop.permute.xlu1 %10700 }
 0x664   : > { %10848 = vrot.lane.b32.xlu0 %v9903_v5, %s23496_s4  ;;  %v10685_v34 = vpop.permute.xlu0 %10684  ;;  %v9909_v48 = vsel %vm246_vm0, %v9893_v59, %v9908_v22 }
 0x665   : > { %10860 = vrot.lane.b32.xlu2 %v9681_v61, %s23500_s13  ;;  %v11126_v1 = vsel %vm23504_vm1, %v20775_v25, %v10685_v34  ;;  %v10731_v9 = vpop.permute.xlu2 %10730  ;;  %vm23513_vm1 = vmmov %vm23506_vm3 }
 0x666   : > { %v11130_v46 = vsel %vm23505_vm2, %v11126_v1, %v10701_v62  ;;  %vm23514_vm2 = vmmov %vm23509_vm6 }
 0x667   : > { %v11134_v25 = vsel %vm23506_vm3, %v11130_v46, %v10717_v43  ;;  %v9797_v43 = vsel %vm246_vm0, %v20903_v54, %v9796_v14  ;;  %vm23515_vm3 = vcmask 719872  }
 0x668   : > { %vm23522_vm0 = vmmov %vm23515_vm3 }
 0x66b   : > { %10878 = vrot.lane.b32.xlu1 %v9795_v51, %s11560_s16  ;;  %v10715_v8 = vpop.permute.xlu1 %10714 }
 0x66c   : > { %10862 = vrot.lane.b32.xlu0 %v9793_v30, %s23500_s13  ;;  %v10699_v44 = vpop.permute.xlu0 %10698 }
 0x66d   : > { %10874 = vrot.lane.b32.xlu2 %v9571_v18, %s11560_s16  ;;  %v11129_v28 = vsel %vm23507_vm4, %v20842_v12, %v10699_v44  ;;  %v10737_v63 = vpop.permute.xlu2 %10736  ;;  %vm23516_vm4 = vmmov %vm23514_vm2 }
 0x66e   : > { %v11133_v33 = vsel %vm23508_vm5, %v11129_v28, %v10715_v8  ;;  %vm23517_vm5 = vmmov %vm23515_vm3 }
 0x66f   : > { %v11137_v40 = vsel %vm23509_vm6, %v11133_v33, %v10731_v9  ;;  %vm23518_vm6 = vcmask 752640  }
 0x673   : > { %10892 = vrot.lane.b32.xlu1 %v9685_v2, %s11561_s15  ;;  %v10721_v12 = vpop.permute.xlu1 %10720 }
 0x674   : > { %10876 = vrot.lane.b32.xlu0 %v9683_v42, %s11560_s16  ;;  %v10705_v21 = vpop.permute.xlu0 %10704 }
 0x675   : > { %10880 = vrot.lane.b32.xlu2 %v9907_v58, %s11560_s16  ;;  %v11132_v3 = vsel %vm23510_vm7, %v20877_v11, %v10705_v21  ;;  %v10751_v27 = vpop.permute.xlu2 %10750  ;;  %vm23519_vm7 = vmmov %vm23515_vm3  ;;  %s11310_s16 = sshll.u32 %s11517_s9, 6 }
 0x676   : > { %v11136_v37 = vsel %vm23511_vm8, %v11132_v3, %v10721_v12  ;;  %vm23520_vm8 = vmmov %vm23518_vm6  ;;  %s11203_s22 = scalar_lea.hbm %s21056_s1, %s11310_s16 }
 0x677   : > { %v11140_v10 = vsel %vm23512_vm9, %v11136_v37, %v10737_v63  ;;  %vm23521_vm9 = vcmask 785408   ;;  %s11206_s9 = sshll.u32 %s11203_s22, 4  ;;  %s11207_s9 = int_to_ptr.hbm [resolvable:$true] %s11206_s9 }
 0x678   : > { %s11457_s26 = sshra.s32 %s11207_s9, 4  ;;  %s11458_s26 = int_to_ptr.hbm [resolvable:$true] %s11457_s26 }
 0x679   : > { %s11459_s27 = scalar_lea.hbm %s11458_s26, 64  ;;  %p11464_p7 = scmp.lt.s32.totalorder %s11458_s26, %s21056_s1 }
 0x67a   : > { %p11460_p4 = scmp.ne.s32.totalorder %s11458_s26, %s11459_s27  ;;  %p11465_p8 = scmp.lt.s32.totalorder %s11463_s17, %s11459_s27 }
 0x67b   : > { %v10735_v26 = vpop.permute.xlu1 %10734 }
 0x67c   : > { %10890 = vrot.lane.b32.xlu0 %v9573_v19, %s11561_s15  ;;  %v10719_v39 = vpop.permute.xlu0 %10718  ;;  %p11461_p5 = pnand %p11460_p4, %p11624_p9  ;;  %p11466_p10 = por %p11465_p8, %p11464_p7 }
 0x67d   : > { %10894 = vrot.lane.b32.xlu2 %v9797_v43, %s11561_s15  ;;  %v11135_v11 = vsel %vm23513_vm1, %v20899_v7, %v10719_v39  ;;  %vm23523_vm1 = vmmov %vm23518_vm6 }
 0x67e   : > { %v11139_v13 = vsel %vm23514_vm2, %v11135_v11, %v10735_v26  ;;  %vm23524_vm2 = vmmov %vm23521_vm9  ;;  %p11462_p6 = pneg %p11461_p5 }
 0x67f   : > { %v10765_v56 = vpop.permute.xlu2 %10764  ;;  %v11143_v36 = vsel %vm23515_vm3, %v11139_v13, %v10751_v27  ;;  %vm23525_vm3 = vmmov %vm23523_vm1 }
 0x680   : > { %p11467_p13 = pnand %p11466_p10, %p11462_p6 }
 0x683   : > { %v10749_v32 = vpop.permute.xlu1 %10748 }
 0x684   : > { %10896 = vrot.lane.b32.xlu0 %v9909_v48, %s11561_s15  ;;  %v10733_v5 = vpop.permute.xlu0 %10732 }
 0x685   : > { %v11138_v54 = vsel %vm23516_vm4, %v11134_v25, %v10733_v5  ;;  %vm23526_vm4 = vmmov %vm23524_vm2 }
 0x686   : > { %v11142_v24 = vsel %vm23517_vm5, %v11138_v54, %v10749_v32  ;;  %vm23527_vm5 = vcmask 818176  }
 0x687   : > { %v10779_v53 = vpop.permute.xlu2 %10778  ;;  %v11146_v61 = vsel %vm23518_vm6, %v11142_v24, %v10765_v56  ;;  %vm23528_vm6 = vmmov %vm23524_vm2 }
 0x68b   : > { %v10763_v7 = vpop.permute.xlu1 %10762 }
 0x68c   : > { %v10747_v57 = vpop.permute.xlu0 %10746 }
 0x68d   : > { %v11141_v23 = vsel %vm23519_vm7, %v11137_v40, %v10747_v57  ;;  %vm23529_vm7 = vmmov %vm23527_vm5 }
 0x68e   : > { %v11145_v49 = vsel %vm23520_vm8, %v11141_v23, %v10763_v7  ;;  %vm23530_vm8 = vmmov %vm23527_vm5 }
 0x68f   : > { %v10785_v62 = vpop.permute.xlu2 %10784  ;;  %v11149_v15 = vsel %vm23521_vm9, %v11145_v49, %v10779_v53  ;;  %vm23531_vm9 = vmmov %vm23527_vm5 }
 0x693   : > { %v10769_v34 = vpop.permute.xlu1 %10768 }
 0x694   : > { %v10753_v38 = vpop.permute.xlu0 %10752 }
 0x695   : > { %v11144_v29 = vsel %vm23522_vm0, %v11140_v10, %v10753_v38 }
 0x696   : > { %v11148_v9 = vsel %vm23523_vm1, %v11144_v29, %v10769_v34 }
 0x697   : > { %v10799_v1 = vpop.permute.xlu2 %10798  ;;  %v11152_v20 = vsel %vm23524_vm2, %v11148_v9, %v10785_v62 }
 0x69d   : > { %v10783_v52 = vpop.permute.xlu1 %10782 }
 0x69e   : > { %v10767_v46 = vpop.permute.xlu0 %10766 }
 0x69f   : > { %v10813_v4 = vpop.permute.xlu2 %10812  ;;  %v11147_v47 = vsel %vm23525_vm3, %v11143_v36, %v10767_v46 }
 0x6a0   : > { %v11151_v33 = vsel %vm23526_vm4, %v11147_v47, %v10783_v52 }
 0x6a1   : > { %v11155_v2 = vsel %vm23527_vm5, %v11151_v33, %v10799_v1 }
 0x6a5   : > { %v10797_v6 = vpop.permute.xlu1 %10796 }
 0x6a6   : > { %v10781_v31 = vpop.permute.xlu0 %10780 }
 0x6a7   : > { %v10827_v0 = vpop.permute.xlu2 %10826  ;;  %v11150_v58 = vsel %vm23528_vm6, %v11146_v61, %v10781_v31 }
 0x6a8   : > { %v11154_v21 = vsel %vm23529_vm7, %v11150_v58, %v10797_v6 }
 0x6a9   : > { %v11158_v37 = vsel %vm11027_vm12, %v11154_v21, %v10813_v4 }
 0x6ad   : > { %v10811_v16 = vpop.permute.xlu1 %10810 }
 0x6ae   : > { %v10795_v25 = vpop.permute.xlu0 %10794 }
 0x6af   : > { %v10833_v51 = vpop.permute.xlu2 %10832  ;;  %v11153_v26 = vsel %vm23530_vm8, %v11149_v15, %v10795_v25 }
 0x6b0   : > { %v11157_v56 = vsel %vm11027_vm12, %v11153_v26, %v10811_v16 }
 0x6b1   : > { %v11161_v36 = vsel %vm11032_vm13, %v11157_v56, %v10827_v0 }
 0x6b5   : > { %v10817_v45 = vpop.permute.xlu1 %10816 }
 0x6b6   : > { %v10801_v30 = vpop.permute.xlu0 %10800 }
 0x6b7   : > { %v10847_v60 = vpop.permute.xlu2 %10846  ;;  %v11156_v53 = vsel %vm23531_vm9, %v11152_v20, %v10801_v30 }
 0x6b8   : > { %v11160_v61 = vsel %vm11027_vm12, %v11156_v53, %v10817_v45 }
 0x6b9   : > { %v11164_v23 = vsel %vm11032_vm13, %v11160_v61, %v10833_v51 }
 0x6bd   : > { %v10831_v18 = vpop.permute.xlu1 %10830 }
 0x6be   : > { %v10815_v59 = vpop.permute.xlu0 %10814 }
 0x6bf   : > { %v10861_v8 = vpop.permute.xlu2 %10860  ;;  %v11159_v42 = vsel %vm11027_vm12, %v11155_v2, %v10815_v59 }
 0x6c0   : > { %v11163_v12 = vsel %vm11032_vm13, %v11159_v42, %v10831_v18 }
 0x6c1   : > { %v11167_v50 = vsel %vm11037_vm15, %v11163_v12, %v10847_v60 }
 0x6c5   : > { %v10845_v41 = vpop.permute.xlu1 %10844 }
 0x6c6   : > { %v10829_v44 = vpop.permute.xlu0 %10828 }
 0x6c7   : > { %v10875_v55 = vpop.permute.xlu2 %10874  ;;  %v11162_v10 = vsel %vm11032_vm13, %v11158_v37, %v10829_v44 }
 0x6c8   : > { %v11166_v11 = vsel %vm11037_vm15, %v11162_v10, %v10845_v41 }
 0x6c9   : > { %v11170_v13 = vsel %vm11042_vm11, %v11166_v11, %v10861_v8 }
 0x6cd   : > { %v10859_v28 = vpop.permute.xlu1 %10858 }
 0x6ce   : > { %v10843_v63 = vpop.permute.xlu0 %10842 }
 0x6cf   : > { %v10881_v17 = vpop.permute.xlu2 %10880  ;;  %v11165_v5 = vsel %vm11037_vm15, %v11161_v36, %v10843_v63 }
 0x6d0   : > { %v11169_v24 = vsel %vm11042_vm11, %v11165_v5, %v10859_v28 }
 0x6d1   : > { %v11173_v57 = vsel %vm11047_vm14, %v11169_v24, %v10875_v55 }
 0x6d5   : > { %v10865_v35 = vpop.permute.xlu1 %10864 }
 0x6d6   : > { %v10849_v40 = vpop.permute.xlu0 %10848 }
 0x6d7   : > { %v10895_v19 = vpop.permute.xlu2 %10894  ;;  %v11168_v49 = vsel %vm11037_vm15, %v11164_v23, %v10849_v40 }
 0x6d8   : > { %v11172_v15 = vsel %vm11042_vm11, %v11168_v49, %v10865_v35 }
 0x6d9   : > { %v11176_v38 = vsel %vm11047_vm14, %v11172_v15, %v10881_v17 }
 0x6dd   : > { %v10879_v3 = vpop.permute.xlu1 %10878 }
 0x6de   : > { %v10863_v27 = vpop.permute.xlu0 %10862 }
 0x6df   : > { %v11171_v14 = vsel %vm11042_vm11, %v11167_v50, %v10863_v27 }
 0x6e0   : > { %v11175_v43 = vsel %vm11047_vm14, %v11171_v14, %v10879_v3 }
 0x6e1   : > { %v11179_v39 = vsel %vm11052_vm10, %v11175_v43, %v10895_v19 }
 0x6e2   : > { %11186 = vst [vmem:[%s19202_s18 + $0x28] sm:$0xff] %v11179_v39 }
 0x6e5   : > { %v10893_v48 = vpop.permute.xlu1 %10892 }
 0x6e6   : > { %v10877_v22 = vpop.permute.xlu0 %10876 }
 0x6e7   : > { %v11174_v32 = vsel %vm11047_vm14, %v11170_v13, %v10877_v22 }
 0x6e8   : > { %v11178_v54 = vsel %vm11052_vm10, %v11174_v32, %v10893_v48 }
 0x6e9   : > { %11184 = vst [vmem:[%s19202_s18 + $0x18] sm:$0xff] %v11178_v54 }
 0x6ee   : > { %v10891_v7 = vpop.permute.xlu0 %10890 }
 0x6ef   : > { %v11177_v62 = vsel %vm11052_vm10, %v11173_v57, %v10891_v7 }
 0x6f0   : > { %11182 = vst [vmem:[%s19202_s18 + $0x8] sm:$0xff] %v11177_v62 }
 0x6f6   : > { %v10897_v34 = vpop.permute.xlu0 %10896 }
 0x6f7   : > { %v11180_v29 = vsel %vm11052_vm10, %v11176_v38, %v10897_v34 }
 0x6f8   : > { %11188 = vst [vmem:[%s19202_s18 + $0x38] sm:$0xff] %v11180_v29 }
 0x6f9   : > { %11470 = shalt.err (!%p11467_p13)
}
 0x6fa   : > { %s11562_s5 = smov 256  }
 0x6fb   : > { %11313 = dma.vmem_to_hbm [thread:$0]  (%p11624_p9), %s11205_s23, 1024, %s11207_s9, %s11190_s24, %s11562_s5, %s11562_s5, %s11537_s25  }
 0x6fc PF: > { %s11221_s18 = sand.u32 1, %s11505_s6   ;;  %p11320_p0 = pnand %p11297_p12, %p11631_p11 }
 0x6fd   : > { %s11222_s3 = scalar_lea.sflag [#allocation4], %s11221_s18 }
 0x6fe   : > { %p11321_p1 = pneg %p11320_p0 }
 0x700   : > { %11500 = dma.done.wait (%p11321_p1), %s11222_s3, 1024  }
 0x701   : > { %11502 = vsyncadd (%p11321_p1), %s11222_s3, 4294966272  ;;  %s17_s11 = sadd.s32 1, %s11525_s11   ;;  %s23532_s6 = smov %s11509_s7 }
 0x702   : > { %p14_p2 = scmp.ge.s32.totalorder %s17_s11, 4   ;;  %s23533_s7 = smov %s11513_s8 }
 0x703   : > { %s23534_s8 = smov %s11629_s20  ;;  %s23535_s9 = smov %s11521_s10 }
 0x704   : > { %s23536_s10 = smov %s23538_s14  ;;  %16 = sbr.rel (!%p14_p2) target bundleno = 6 (0x6), region = 69 }
 0x709   :  { %11228 = vsyncpa [#allocation3], 1 }
 0x70a   :  { %11230 = vsyncpa [#allocation3 + $0x1], 1 }
 0x70b   :  { %11231 = vsyncpa [#allocation4], 1 }
 0x70c   :  { %11233 = vsyncpa [#allocation4 + $0x1], 1 }

// kernel: tpu_custom_call.1
= control target key start
LH: loop header
LB: loop body
LE: loop exit
PB: predicated region body
PF: predicated region fallthrough
CT: control target
= control target key end

     0   :  { %6 = vsyncpa [#allocation3], 0  ;;  %s674_s0 = inlined_call_operand.vmem [shape: f32[2,256,32], index: 0, kind: input, shape index: {}]   ;;  %s675_s1 = inlined_call_operand.hbm [shape: f32[2,32,256], index: 1, kind: output, shape index: {}]  }
   0x1   :  { %8 = vsyncpa [#allocation3 + $0x1], 0  ;;  %s543_s6 = smov 0   ;;  %s545_s7 = smov 0  }
   0x2   :  { %s547_s8 = smov 0   ;;  %s549_s9 = smov 0  }
   0x3   :  { %s551_s10 = smov 0   ;;  %s553_s11 = smov 0  }
   0x4 LB: > { %s379_s12 = sadd.s32 4294967295, %s529_s11   ;;  %s380_s13 = sadd.s32 4294967294, %s529_s11   ;;  %s529_s11 = sphi %s553_s11, %s14_s11   ;;  %s525_s10 = sphi %s551_s10, %s682_s10   ;;  %s521_s9 = sphi %s549_s9, %s681_s9   ;;  %s517_s8 = sphi %s547_s8, %s680_s8   ;;  %s513_s7 = sphi %s545_s7, %s679_s7   ;;  %s509_s6 = sphi %s543_s6, %s678_s6  }
   0x5   : > { %s33_s14 = sadd.s32 1, %s525_s10  ;;  %s74_s15 = sadd.s32 1, %s517_s8 }
   0x6   : > { %p35_p0 = scmp.ge.s32.totalorder %s33_s14, 2  ;;  %p84_p1 = scmp.ne.s32.totalorder %s517_s8, %s513_s7 }
   0x7   : > { %p85_p2 = scmp.eq.s32.totalorder %s379_s12, 1  ;;  %p90_p3 = scmp.ne.s32.totalorder %s513_s7, %s509_s6 }
   0x8   : > { %s684_s14 = smov (%p35_p0, %s33_s14), 0  ;;  %p91_p5 = scmp.eq.s32.totalorder %s380_s13, 1 }
   0x9   : > { %p583_p4 = por %p85_p2, %p84_p1  ;;  %s67_s17 = ssub.s32 %s525_s10, %s684_s14 }
   0xa   : > { %p383_p6 = scmp.ge.s32.totalorder %s529_s11, 1  ;;  %p72_p7 = scmp.eq.s32.totalorder %s67_s17, 0 }
   0xb   : > { %p590_p8 = por %p91_p5, %p90_p3  ;;  %p125_p9 = scmp.lt.s32.totalorder %s529_s11, 3 }
   0xc   : > { %s596_s19 = scalar_select %p72_p7, %s517_s8, %s74_s15  }
   0xd   : > { %p126_p10 = pnand %p383_p6, %p125_p9 }
   0xe   : > { %p153_p11 = scmp.lt.s32.totalorder (!%p126_p10), %s521_s9, 1  ;;  %s149_s25 = sand.u32 (!%p126_p10), 1, %s513_s7  }
   0xf   : > { %129 = sbr.rel (%p126_p10) target bundleno = 219 (0xdb), region = 24  ;;  %s384_s26 = sshll.u32 (!%p126_p10), %s149_s25, 6 }
  0x10   : > { %s151_s27 = scalar_lea.vmem (!%p126_p10), [#allocation2], %s384_s26  ;;  %s393_s28 = sshll.u32 (!%p126_p10), %s521_s9, 6 }
  0x11   : > { %s288_s2 = scalar_lea.hbm (!%p126_p10), %s675_s1, %s393_s28  ;;  %s289_s3 = sshll.u32 (!%p126_p10), %s151_s27, 4  ;;  %s290_s3 = int_to_ptr.vmem [resolvable:$true] %s289_s3 }
  0x12   : > { %s291_s4 = sshll.u32 (!%p126_p10), %s288_s2, 4  ;;  %s272_s5 = scalar_lea.sflag (!%p126_p10), [#allocation3], %s149_s25  ;;  %s292_s4 = int_to_ptr.hbm [resolvable:$true] %s291_s4 }
  0x13   : > { %s465_s12 = sshra.s32 (!%p126_p10), %s292_s4, 4  ;;  %s471_s17 = scalar_lea.hbm (!%p126_p10), %s675_s1, 128  ;;  %s466_s12 = int_to_ptr.hbm [resolvable:$true] %s465_s12 }
  0x14   : > { %s154_s20 = scalar_select %p153_p11, %s521_s9, 1 }
  0x15   : > { %s467_s9 = scalar_lea.hbm %s466_s12, 64  ;;  %p472_p1 = scmp.lt.s32.totalorder %s466_s12, %s675_s1 }
  0x16   : > { %s392_s21 = sshll.u32 %s154_s20, 8  ;;  %p468_p12 = scmp.ne.s32.totalorder %s466_s12, %s467_s9 }
  0x17   : > { %s603_s24 = scalar_lea.vmem %s674_s0, %s392_s21  ;;  %p473_p2 = scmp.lt.s32.totalorder %s471_s17, %s467_s9 }
  0x18   : > { %v183_v0 = vld [vmem:[%s603_s24 + $0x80] sm:$0xff]  ;;  %v184_v2 = vld [vmem:[%s603_s24 + $0x88] sm:$0xff]  ;;  %v185_v4 = vld [vmem:[%s603_s24 + $0x90] sm:$0xff]  ;;  %p469_p13 = pnand %p468_p12, %p583_p4 }
  0x19   : > { %v167_v1 = vld [vmem:[%s603_s24] sm:$0xff]  ;;  %231 = vxpose.xlu1.b32.start [1/16] (narrow) %v183_v0, 32  ;;  %v168_v3 = vld [vmem:[%s603_s24 + $0x8] sm:$0xff]  ;;  %v169_v5 = vld [vmem:[%s603_s24 + $0x10] sm:$0xff]  ;;  %p474_p3 = por %p473_p2, %p472_p1 }
  0x1a   : > { %199 = vxpose.xlu0.b32.start [1/16] (narrow) %v167_v1, 32  ;;  %v186_v6 = vld [vmem:[%s603_s24 + $0x98] sm:$0xff]  ;;  %v187_v8 = vld [vmem:[%s603_s24 + $0xa0] sm:$0xff]  ;;  %v188_v10 = vld [vmem:[%s603_s24 + $0xa8] sm:$0xff]  ;;  %p470_p0 = pneg %p469_p13 }
  0x1b   : > { %v170_v7 = vld [vmem:[%s603_s24 + $0x18] sm:$0xff]  ;;  %v171_v9 = vld [vmem:[%s603_s24 + $0x20] sm:$0xff]  ;;  %v172_v11 = vld [vmem:[%s603_s24 + $0x28] sm:$0xff] }
  0x1c   : > { %v189_v12 = vld [vmem:[%s603_s24 + $0xb0] sm:$0xff]  ;;  %v190_v14 = vld [vmem:[%s603_s24 + $0xb8] sm:$0xff]  ;;  %v191_v16 = vld [vmem:[%s603_s24 + $0xc0] sm:$0xff]  ;;  %p475_p5 = pnand %p474_p3, %p470_p0 }
  0x1d   : > { %v173_v13 = vld [vmem:[%s603_s24 + $0x30] sm:$0xff]  ;;  %v174_v15 = vld [vmem:[%s603_s24 + $0x38] sm:$0xff]  ;;  %v175_v17 = vld [vmem:[%s603_s24 + $0x40] sm:$0xff] }
  0x1e   : > { %v192_v18 = vld [vmem:[%s603_s24 + $0xc8] sm:$0xff]  ;;  %v193_v20 = vld [vmem:[%s603_s24 + $0xd0] sm:$0xff]  ;;  %v194_v22 = vld [vmem:[%s603_s24 + $0xd8] sm:$0xff] }
  0x1f   : > { %v176_v19 = vld [vmem:[%s603_s24 + $0x48] sm:$0xff]  ;;  %v177_v21 = vld [vmem:[%s603_s24 + $0x50] sm:$0xff]  ;;  %v178_v23 = vld [vmem:[%s603_s24 + $0x58] sm:$0xff] }
  0x20   : > { %v195_v24 = vld [vmem:[%s603_s24 + $0xe0] sm:$0xff]  ;;  %v196_v26 = vld [vmem:[%s603_s24 + $0xe8] sm:$0xff]  ;;  %v197_v28 = vld [vmem:[%s603_s24 + $0xf0] sm:$0xff] }
  0x21   : > { %232 = vxpose.xlu1.b32.cont [2/16] (narrow) %v184_v2, 32  ;;  %v179_v25 = vld [vmem:[%s603_s24 + $0x60] sm:$0xff]  ;;  %v180_v27 = vld [vmem:[%s603_s24 + $0x68] sm:$0xff]  ;;  %v181_v29 = vld [vmem:[%s603_s24 + $0x70] sm:$0xff] }
  0x22   : > { %200 = vxpose.xlu0.b32.cont [2/16] (narrow) %v168_v3, 32  ;;  %v198_v30 = vld [vmem:[%s603_s24 + $0xf8] sm:$0xff] }
  0x23   : > { %v182_v31 = vld [vmem:[%s603_s24 + $0x78] sm:$0xff] }
  0x29   : > { %233 = vxpose.xlu1.b32.cont [3/16] (narrow) %v185_v4, 32 }
  0x2a   : > { %201 = vxpose.xlu0.b32.cont [3/16] (narrow) %v169_v5, 32 }
  0x31   : > { %234 = vxpose.xlu1.b32.cont [4/16] (narrow) %v186_v6, 32 }
  0x32   : > { %202 = vxpose.xlu0.b32.cont [4/16] (narrow) %v170_v7, 32 }
  0x39   : > { %235 = vxpose.xlu1.b32.cont [5/16] (narrow) %v187_v8, 32 }
  0x3a   : > { %203 = vxpose.xlu0.b32.cont [5/16] (narrow) %v171_v9, 32 }
  0x41   : > { %236 = vxpose.xlu1.b32.cont [6/16] (narrow) %v188_v10, 32 }
  0x42   : > { %204 = vxpose.xlu0.b32.cont [6/16] (narrow) %v172_v11, 32 }
  0x49   : > { %237 = vxpose.xlu1.b32.cont [7/16] (narrow) %v189_v12, 32 }
  0x4a   : > { %205 = vxpose.xlu0.b32.cont [7/16] (narrow) %v173_v13, 32 }
  0x51   : > { %238 = vxpose.xlu1.b32.cont [8/16] (narrow) %v190_v14, 32 }
  0x52   : > { %206 = vxpose.xlu0.b32.cont [8/16] (narrow) %v174_v15, 32 }
  0x59   : > { %239 = vxpose.xlu1.b32.cont [9/16] (narrow) %v191_v16, 32 }
  0x5a   : > { %207 = vxpose.xlu0.b32.cont [9/16] (narrow) %v175_v17, 32 }
  0x61   : > { %240 = vxpose.xlu1.b32.cont [10/16] (narrow) %v192_v18, 32 }
  0x62   : > { %208 = vxpose.xlu0.b32.cont [10/16] (narrow) %v176_v19, 32 }
  0x69   : > { %241 = vxpose.xlu1.b32.cont [11/16] (narrow) %v193_v20, 32 }
  0x6a   : > { %209 = vxpose.xlu0.b32.cont [11/16] (narrow) %v177_v21, 32 }
  0x71   : > { %242 = vxpose.xlu1.b32.cont [12/16] (narrow) %v194_v22, 32 }
  0x72   : > { %210 = vxpose.xlu0.b32.cont [12/16] (narrow) %v178_v23, 32 }
  0x79   : > { %243 = vxpose.xlu1.b32.cont [13/16] (narrow) %v195_v24, 32 }
  0x7a   : > { %211 = vxpose.xlu0.b32.cont [13/16] (narrow) %v179_v25, 32 }
  0x81   : > { %244 = vxpose.xlu1.b32.cont [14/16] (narrow) %v196_v26, 32 }
  0x82   : > { %212 = vxpose.xlu0.b32.cont [14/16] (narrow) %v180_v27, 32 }
  0x89   : > { %245 = vxpose.xlu1.b32.cont [15/16] (narrow) %v197_v28, 32 }
  0x8a   : > { %213 = vxpose.xlu0.b32.cont [15/16] (narrow) %v181_v29, 32 }
  0x91   : > { %246 = vxpose.xlu1.b32.end [16/16] (narrow) %v198_v30, 32 }
  0x92   : > { %214 = vxpose.xlu0.b32.end [16/16] (narrow) %v182_v31, 32 }
  0xbd   : > { %v247_v32 = vpop.trf.xlu1 }
  0xbe   : > { %v215_v33 = vpop.trf.xlu0  ;;  %264 = vst [vmem:[%s151_s27 + $0x8] sm:$0xff] %v247_v32 }
  0xbf   : > { %263 = vst [vmem:[%s151_s27] sm:$0xff] %v215_v33 }
  0xc5   : > { %v248_v34 = vpop.trf.xlu1 }
  0xc6   : > { %v216_v35 = vpop.trf.xlu0  ;;  %266 = vst [vmem:[%s151_s27 + $0x18] sm:$0xff] %v248_v34 }
  0xc7   : > { %265 = vst [vmem:[%s151_s27 + $0x10] sm:$0xff] %v216_v35 }
  0xcd   : > { %v249_v36 = vpop.trf.xlu1 }
  0xce   : > { %v217_v37 = vpop.trf.xlu0  ;;  %268 = vst [vmem:[%s151_s27 + $0x28] sm:$0xff] %v249_v36 }
  0xcf   : > { %267 = vst [vmem:[%s151_s27 + $0x20] sm:$0xff] %v217_v37 }
  0xd5   : > { %v250_v38 = vpop.trf.xlu1 }
  0xd6   : > { %v218_v39 = vpop.trf.xlu0  ;;  %270 = vst [vmem:[%s151_s27 + $0x38] sm:$0xff] %v250_v38 }
  0xd7   : > { %269 = vst [vmem:[%s151_s27 + $0x30] sm:$0xff] %v218_v39 }
  0xd8   : > { %478 = shalt.err (!%p475_p5)
}
  0xd9   : > { %s531_s22 = smov 256   ;;  %s532_s23 = smov 16  }
  0xda   : > { %394 = dma.vmem_to_hbm [thread:$0]  (%p583_p4), %s290_s3, 1024, %s292_s4, %s272_s5, %s531_s22, %s531_s22, %s532_s23  }
  0xdb PF: > { %p400_p6 = scmp.ge.s32.totalorder %s529_s11, 2  ;;  %s306_s24 = sand.u32 1, %s509_s6  }
  0xdc   : > { %s307_s25 = scalar_lea.sflag [#allocation3], %s306_s24 }
  0xdd   : > { %p397_p7 = pnand %p400_p6, %p590_p8 }
  0xdf   : > { %p398_p9 = pneg %p397_p7 }
  0xe1   : > { %504 = dma.done.wait (%p398_p9), %s307_s25, 1024  }
  0xe2   : > { %506 = vsyncadd (%p398_p9), %s307_s25, 4294966272  ;;  %s14_s11 = sadd.s32 1, %s529_s11   ;;  %s678_s6 = smov %s513_s7 }
  0xe3   : > { %p11_p10 = scmp.ge.s32.totalorder %s14_s11, 4   ;;  %s679_s7 = smov %s517_s8 }
  0xe4   : > { %s680_s8 = smov %s596_s19  ;;  %s681_s9 = smov %s525_s10 }
  0xe5   : > { %s682_s10 = smov %s684_s14  ;;  %13 = sbr.rel (!%p11_p10) target bundleno = 4 (0x4), region = 59 }
  0xea   :  { %313 = vsyncpa [#allocation3], 1 }
  0xeb   :  { %315 = vsyncpa [#allocation3 + $0x1], 1 }

</bundles_post_ra>
